<compile_context>
chip_gen: v7x
topology: tpu7x:2x2x1
jax: 0.10.0
libtpu: 0.0.40
codegen_flags: <defaults>
</compile_context>

<pallas_src>
import functools

import numpy as np
import jax
import jax.numpy as jnp
from jax import lax
from jax.experimental import pallas as pl
from jax.experimental.pallas import tpu as pltpu


def _round_up(x, m):
    return (x + m - 1) // m * m


# ----------------------------------------------------------------------------
# Pallas kernel 1: fused 3x3 conv (+bias +activation), no HBM im2col
# ----------------------------------------------------------------------------
def _conv3x3_kernel(x0_ref, x1_ref, x2_ref, w_ref, b_ref, o_ref, *, th, act):
    # x{dw}_ref : (1, H+2, W, Cin)  bf16, width-pre-shifted, row-padded, resident
    # w_ref     : (3, 3, Cin, Cout) bf16, resident
    # b_ref     : (1, Cout)         f32
    # o_ref     : (1, th, W, Cout)  f32
    row0 = pl.program_id(1) * th
    _, _, wd, cin = x0_ref.shape
    cout = o_ref.shape[-1]
    xs = (x0_ref, x1_ref, x2_ref)

    acc = jnp.zeros((th * wd, cout), jnp.float32)
    for dh in range(3):
        for dw in range(3):
            # Dynamic slice only along the (untiled) row axis -> cheap load.
            tile = xs[dw][0, pl.ds(row0 + dh, th), :, :]          # (th, W, Cin)
            tile = tile.reshape(th * wd, cin)
            acc = acc + jnp.dot(tile, w_ref[dh, dw],
                                preferred_element_type=jnp.float32)
    acc = acc + b_ref[...]
    if act == "relu":
        acc = jnp.maximum(acc, 0.0)
    else:  # leaky relu, slope 0.2
        acc = jnp.where(acc >= 0.0, acc, 0.2 * acc)
    o_ref[0] = acc.reshape(th, wd, cout).astype(o_ref.dtype)


def _pick_row_tile(h, wd):
    # Largest divisor of h such that the output row-tile is ~512 rows of lanes.
    target = max(1, 512 // max(wd, 1))
    best = 1
    for cand in range(1, h + 1):
        if h % cand == 0 and cand <= target:
            best = cand
    return best


def conv3x3_fused(x, w_hwio, b, act):
    n, h, wd, cin = x.shape
    cout = w_hwio.shape[-1]
    th = _pick_row_tile(h, wd)
    xp = jnp.pad(x, ((0, 0), (1, 1), (1, 1), (0, 0))).astype(jnp.bfloat16)
    # Three width-shifted views (3x HBM instead of 9x im2col); row shifts are
    # handled inside the kernel with pl.ds on the untiled row axis.
    shifts = [xp[:, :, dw:dw + wd, :] for dw in range(3)]
    out = pl.pallas_call(
        functools.partial(_conv3x3_kernel, th=th, act=act),
        out_shape=jax.ShapeDtypeStruct((n, h, wd, cout), jnp.float32),
        grid=(n, h // th),
        in_specs=[pl.BlockSpec((1, h + 2, wd, cin), lambda bb, i: (bb, 0, 0, 0))] * 3
        + [pl.BlockSpec((3, 3, cin, cout), lambda bb, i: (0, 0, 0, 0)),
           pl.BlockSpec((1, cout), lambda bb, i: (0, 0))],
        out_specs=pl.BlockSpec((1, th, wd, cout), lambda bb, i: (bb, i, 0, 0)),
        compiler_params=pltpu.CompilerParams(
            dimension_semantics=("parallel", "arbitrary"),
            vmem_limit_bytes=32 * 1024 * 1024),
    )(shifts[0], shifts[1], shifts[2],
      w_hwio.astype(jnp.bfloat16), b.reshape(1, cout).astype(jnp.float32))
    return out


# ----------------------------------------------------------------------------
# Pallas kernel 2: tiled fused matmul + bias + activation (1x1 conv / fallback)
# ----------------------------------------------------------------------------
def _matmul_bias_act_kernel(a_ref, b_ref, bias_ref, o_ref, *, act):
    acc = jnp.dot(a_ref[...], b_ref[...], preferred_element_type=jnp.float32)
    acc = acc + bias_ref[...]
    if act == "relu":
        acc = jnp.maximum(acc, 0.0)
    elif act == "leaky":
        acc = jnp.where(acc >= 0.0, acc, 0.2 * acc)
    o_ref[...] = acc.astype(o_ref.dtype)


def matmul_bias_act(a, b, bias, act):
    """a: (M, K) @ b: (K, N) + bias (1, N), activation.  bf16 MXU, f32 accum."""
    m, k = a.shape
    n_out = b.shape[1]
    tm = min(512, _round_up(m, 8))          # M-tile: pipelined, v7x-VMEM safe
    m_pad = _round_up(m, tm)
    if m_pad != m:
        a = jnp.pad(a, ((0, m_pad - m), (0, 0)))
    out = pl.pallas_call(
        functools.partial(_matmul_bias_act_kernel, act=act),
        out_shape=jax.ShapeDtypeStruct((m_pad, n_out), jnp.float32),
        grid=(m_pad // tm,),
        in_specs=[
            pl.BlockSpec((tm, k), lambda i: (i, 0)),
            pl.BlockSpec((k, n_out), lambda i: (0, 0)),     # resident weights
            pl.BlockSpec((1, n_out), lambda i: (0, 0)),
        ],
        out_specs=pl.BlockSpec((tm, n_out), lambda i: (i, 0)),
        compiler_params=pltpu.CompilerParams(
            dimension_semantics=("parallel",),
            vmem_limit_bytes=32 * 1024 * 1024),
    )(a.astype(jnp.bfloat16), b.astype(jnp.bfloat16), bias.astype(jnp.float32))
    return out[:m]


# ----------------------------------------------------------------------------
# Pallas kernel 3: streaming patch matching (bmm + running max / argmax)
# ----------------------------------------------------------------------------
def _match_kernel(w_ref, q_ref, val_ref, idx_ref, *, hw_k, tk):
    kt = pl.program_id(1)

    @pl.when(kt == 0)
    def _():
        val_ref[...] = jnp.full(val_ref.shape, -jnp.inf, jnp.float32)
        idx_ref[...] = jnp.zeros(idx_ref.shape, jnp.int32)

    w = w_ref[0]                                   # (TK, D)   normalized key
    q = q_ref[0]                                   # (D, HWq)  normalized query
    sim = jnp.dot(w, q, preferred_element_type=jnp.float32)   # (TK, HWq)

    row = lax.broadcasted_iota(jnp.int32, sim.shape, 0) + kt * tk
    sim = jnp.where(row < hw_k, sim, -jnp.inf)     # mask padded key rows

    tile_max = jnp.max(sim, axis=0, keepdims=True)                 # (1, HWq)
    cand = jnp.where(sim == tile_max, row, jnp.int32(2 ** 30))
    tile_arg = jnp.min(cand, axis=0, keepdims=True)                # (1, HWq)

    prev_val = val_ref[0]
    prev_idx = idx_ref[0]
    better = tile_max > prev_val                   # strict > keeps first index
    val_ref[0] = jnp.where(better, tile_max, prev_val)
    idx_ref[0] = jnp.where(better, tile_arg, prev_idx)


def match_argmax(w_feat, q_feat_t, hw_k, tk):
    """w_feat: (N, HWk_pad, D), q_feat_t: (N, D, HWq_pad) -> (max, argmax)."""
    n, hwk_pad, d = w_feat.shape
    hwq_pad = q_feat_t.shape[2]
    n_kt = hwk_pad // tk
    val, idx = pl.pallas_call(
        functools.partial(_match_kernel, hw_k=hw_k, tk=tk),
        out_shape=(jax.ShapeDtypeStruct((n, 1, hwq_pad), jnp.float32),
                   jax.ShapeDtypeStruct((n, 1, hwq_pad), jnp.int32)),
        grid=(n, n_kt),
        in_specs=[
            pl.BlockSpec((1, tk, d), lambda b, kt: (b, kt, 0)),
            pl.BlockSpec((1, d, hwq_pad), lambda b, kt: (b, 0, 0)),
        ],
        out_specs=(pl.BlockSpec((1, 1, hwq_pad), lambda b, kt: (b, 0, 0)),
                   pl.BlockSpec((1, 1, hwq_pad), lambda b, kt: (b, 0, 0))),
        compiler_params=pltpu.CompilerParams(
            dimension_semantics=("parallel", "arbitrary"),
            vmem_limit_bytes=32 * 1024 * 1024),
    )(w_feat, q_feat_t)
    return val, idx


# ----------------------------------------------------------------------------
# NHWC conv / pooling / interpolation glue
# ----------------------------------------------------------------------------
def conv3x3(x, w_hwio, b, act):
    # x: (N,H,W,Cin); w_hwio: (3,3,Cin,Cout) — zero 'same' padding (nn.Conv2d).
    n, h, wd, cin = x.shape
    cout = w_hwio.shape[-1]
    # The fused kernel keeps three bf16 width-shifted copies resident in VMEM.
    fused_bytes = 3 * (h + 2) * wd * cin * 2
    if fused_bytes <= 6 * 1024 * 1024:
        return conv3x3_fused(x, w_hwio, b, act)
    # TODO(synk): very large images fall back to HBM im2col; a halo-tiled fused
    # conv kernel would remove the 9x patch materialization there too.
    xp = jnp.pad(x, ((0, 0), (1, 1), (1, 1), (0, 0)))
    cols = [xp[:, dh:dh + h, dw:dw + wd, :] for dh in range(3) for dw in range(3)]
    patches = jnp.concatenate(cols, axis=-1).reshape(n * h * wd, 9 * cin)
    out = matmul_bias_act(patches, w_hwio.reshape(9 * cin, cout),
                          b.reshape(1, cout), act)
    return out.reshape(n, h, wd, cout)


def conv1x1(x, w, b, act):
    n, h, wd, cin = x.shape
    out = matmul_bias_act(x.reshape(-1, cin), w, b.reshape(1, -1), act)
    return out.reshape(n, h, wd, -1)


def maxpool2x2(x):
    n, h, w, c = x.shape
    return x.reshape(n, h // 2, 2, w // 2, 2, c).max(axis=(2, 4))


def avgpool(x, s):
    n, h, w, c = x.shape
    return x.reshape(n, h // s, s, w // s, s, c).mean(axis=(2, 4))


def _cubic_kernel(t, a=-0.75):
    at = abs(float(t))
    if at <= 1.0:
        return (a + 2.0) * at ** 3 - (a + 3.0) * at ** 2 + 1.0
    if at < 2.0:
        return a * at ** 3 - 5.0 * a * at ** 2 + 8.0 * a * at - 4.0 * a
    return 0.0


def _bicubic_matrix(in_size, out_size):
    # F.interpolate(mode='bicubic', align_corners=True) weights (a = -0.75).
    m = np.zeros((out_size, in_size), np.float32)
    scale = 0.0 if out_size == 1 else (in_size - 1) / (out_size - 1)
    for o in range(out_size):
        x = o * scale
        x0 = int(np.floor(x))
        t = x - x0
        for k in range(-1, 3):
            idx = min(max(x0 + k, 0), in_size - 1)
            m[o, idx] += _cubic_kernel(k - t)
    return jnp.asarray(m)


def bicubic_upsample(x, scale):
    n, h, w, c = x.shape
    wh = _bicubic_matrix(h, h * scale)
    ww = _bicubic_matrix(w, w * scale)
    t = jnp.einsum('oh,nhwc->nowc', wh, x)
    return jnp.einsum('pw,nowc->nopc', ww, t)


VGG_MEAN = jnp.array([0.485, 0.456, 0.406], jnp.float32)
VGG_STD = jnp.array([0.229, 0.224, 0.225], jnp.float32)


def sub_mean(x):   # MeanShift(1, vgg_mean, vgg_std, sign=-1)
    return (x - VGG_MEAN.reshape(1, 1, 1, 3)) / VGG_STD.reshape(1, 1, 1, 3)


def extract_patches_3x3(x):
    # extract_image_patches(ksize=3, stride=1, 'same') uses ReflectionPad2d.
    # Patch-vector ordering is (kh, kw, c) vs torch's (c, kh, kw); the inner
    # products / norms below are invariant to this consistent permutation.
    n, h, w, c = x.shape
    xp = jnp.pad(x, ((0, 0), (1, 1), (1, 1), (0, 0)), mode='reflect')
    cols = [xp[:, dh:dh + h, dw:dw + w, :] for dh in range(3) for dw in range(3)]
    return jnp.concatenate(cols, axis=-1)          # (N, H, W, 9*C)


def _l2_normalize(x, axis):
    norm = jnp.sqrt(jnp.sum(x * x, axis=axis, keepdims=True))
    return x / jnp.maximum(norm, 1e-12)


# ----------------------------------------------------------------------------
# Feature extractor (VGG19 layers 0..6 + 1x1 'match0' head), random weights
# ----------------------------------------------------------------------------
def init_params(key):
    def conv_p(k, kh, kw, cin, cout):
        kw_, kb_ = jax.random.split(k)
        scale = (2.0 / (kh * kw * cin)) ** 0.5
        w = jax.random.normal(kw_, (kh, kw, cin, cout), jnp.float32) * scale
        b = jax.random.normal(kb_, (cout,), jnp.float32) * 0.01
        return w, b
    keys = jax.random.split(key, 4)
    return {
        'conv1_1': conv_p(keys[0], 3, 3, 3, 64),
        'conv1_2': conv_p(keys[1], 3, 3, 64, 64),
        'conv2_1': conv_p(keys[2], 3, 3, 64, 128),
        'map':     conv_p(keys[3], 1, 1, 128, 16),
    }


def feature_extract(x, params):
    w, b = params['conv1_1']
    x = conv3x3(x, w, b, 'relu')
    w, b = params['conv1_2']
    x = conv3x3(x, w, b, 'relu')
    x = maxpool2x2(x)
    w, b = params['conv2_1']
    x = conv3x3(x, w, b, 'relu')
    w, b = params['map']
    x = conv1x1(x, w.reshape(w.shape[2], w.shape[3]), b, 'leaky')
    return x


# ----------------------------------------------------------------------------
# FeatureMatching.forward
# ----------------------------------------------------------------------------
def feature_matching_forward(query, key, params, flag_8k=False, scale=2):
    # NCHW (PyTorch convention) -> NHWC (channels on lanes).
    q = jnp.transpose(query, (0, 2, 3, 1))
    k = jnp.transpose(key, (0, 2, 3, 1))

    q = sub_mean(q)
    if not flag_8k:
        q = bicubic_upsample(q, scale)
    qf = feature_extract(q, params)                    # (N, Hq, Wq, 16)

    k = avgpool(k, scale)
    k = sub_mean(k)
    if not flag_8k:
        k = bicubic_upsample(k, scale)
    kf = feature_extract(k, params)                    # (N, Hk, Wk, 16)

    n, hq, wq, c = qf.shape
    _, hk, wk, _ = kf.shape
    d = 9 * c
    hwq, hwk = hq * wq, hk * wk

    q_patch = extract_patches_3x3(qf).reshape(n, hwq, d)
    k_patch = extract_patches_3x3(kf).reshape(n, hwk, d)

    qn = _l2_normalize(q_patch, axis=-1)               # F.normalize(query, dim=1)
    kn = _l2_normalize(k_patch, axis=-1)               # F.normalize(w, dim=2)

    # Lane-dense layouts for the streaming matching kernel.
    hwq_pad = _round_up(hwq, 128)
    qt = jnp.transpose(qn, (0, 2, 1))                  # (N, D, HWq)
    qt = jnp.pad(qt, ((0, 0), (0, 0), (0, hwq_pad - hwq)))

    tk = min(256, _round_up(hwk, 8))
    hwk_pad = _round_up(hwk, tk)
    kn = jnp.pad(kn, ((0, 0), (0, hwk_pad - hwk), (0, 0)))

    val, idx = match_argmax(kn, qt, hw_k=hwk, tk=tk)

    relevance_maps = val[:, 0, :hwq].reshape(n, 1, hq, wq)
    hard_indices = idx[:, 0, :hwq]                     # int32 (torch uses int64)
    return relevance_maps, hard_indices


if __name__ == "__main__":
    key = jax.random.PRNGKey(0)
    kp, kq, kk = jax.random.split(key, 3)
    params = init_params(kp)
    query = jax.random.uniform(kq, (2, 3, 16, 16), jnp.float32)
    key_img = jax.random.uniform(kk, (2, 3, 16, 16), jnp.float32)

    fwd = jax.jit(functools.partial(
        feature_matching_forward, params=params, flag_8k=False, scale=2))
    rel, idx = fwd(query, key_img)
    jax.block_until_ready((rel, idx))

    assert rel.shape == (2, 1, 16, 16)
    assert idx.shape == (2, 256)
    assert bool(jnp.all(jnp.isfinite(rel)))
    assert bool(jnp.all((idx >= 0) & (idx < 64)))
    print("KERNEL_OK")
</pallas_src>

<mosaic_0001>
module attributes {stable_mosaic.version = 11 : i64} {
  func.func @_conv3x3_kernel(%arg0: i32, %arg1: i32, %arg2: memref<1x34x32x3xbf16, #tpu.memory_space<vmem>>, %arg3: memref<1x34x32x3xbf16, #tpu.memory_space<vmem>>, %arg4: memref<1x34x32x3xbf16, #tpu.memory_space<vmem>>, %arg5: memref<3x3x3x64xbf16, #tpu.memory_space<vmem>>, %arg6: memref<1x64xf32, #tpu.memory_space<vmem>>, %arg7: memref<1x16x32x64xf32, #tpu.memory_space<vmem>>) attributes {dimension_semantics = [#tpu.dimension_semantics<parallel>, #tpu.dimension_semantics<arbitrary>], iteration_bounds = array<i64: 2, 2>, scalar_prefetch = 0 : i64, scratch_operands = 0 : i64, tpu.core_type = #tpu.core_type<tc>, window_params = [{transform_indices = @transform_0, window_bounds = array<i64: 1, 34, 32, 3>}, {transform_indices = @transform_1, window_bounds = array<i64: 1, 34, 32, 3>}, {transform_indices = @transform_2, window_bounds = array<i64: 1, 34, 32, 3>}, {pipeline_mode = #tpu.pipeline_mode<synchronous>, transform_indices = @transform_3, window_bounds = array<i64: 3, 3, 3, 64>}, {pipeline_mode = #tpu.pipeline_mode<synchronous>, transform_indices = @transform_4, window_bounds = array<i64: 1, 64>}, {transform_indices = @transform_5, window_bounds = array<i64: 1, 16, 32, 64>}]} {
    %c16_i32 = arith.constant 16 : i32
    %0 = arith.muli %arg1, %c16_i32 : i32
    %cst = arith.constant 0.000000e+00 : f32
    %1 = vector.broadcast %cst : f32 to vector<512x64xf32>
    %c0_i32 = arith.constant 0 : i32
    %2 = arith.addi %0, %c0_i32 : i32
    %c0 = arith.constant 0 : index
    %3 = arith.index_cast %2 : i32 to index
    %c0_0 = arith.constant 0 : index
    %c0_1 = arith.constant 0 : index
    %4 = vector.load %arg2[%c0, %3, %c0_0, %c0_1] : memref<1x34x32x3xbf16, #tpu.memory_space<vmem>>, vector<1x16x32x3xbf16>
    %5 = vector.shape_cast %4 : vector<1x16x32x3xbf16> to vector<16x32x3xbf16>
    %6 = vector.shape_cast %5 : vector<16x32x3xbf16> to vector<512x3xbf16>
    %c0_2 = arith.constant 0 : index
    %c0_3 = arith.constant 0 : index
    %c0_4 = arith.constant 0 : index
    %c0_5 = arith.constant 0 : index
    %7 = vector.load %arg5[%c0_2, %c0_3, %c0_4, %c0_5] : memref<3x3x3x64xbf16, #tpu.memory_space<vmem>>, vector<1x1x3x64xbf16>
    %8 = vector.shape_cast %7 : vector<1x1x3x64xbf16> to vector<3x64xbf16>
    %cst_6 = arith.constant dense<0.000000e+00> : vector<512x64xf32>
    %9 = tpu.matmul %6, %8, %cst_6 {dimension_numbers = #tpu.dot_dimension_numbers<[1], [0], [0], [1], [0, 0, 1, 1], [], []>} : vector<512x3xbf16>, vector<3x64xbf16>, vector<512x64xf32> -> vector<512x64xf32>
    %10 = arith.addf %1, %9 : vector<512x64xf32>
    %c0_i32_7 = arith.constant 0 : i32
    %11 = arith.addi %0, %c0_i32_7 : i32
    %c0_8 = arith.constant 0 : index
    %12 = arith.index_cast %11 : i32 to index
    %c0_9 = arith.constant 0 : index
    %c0_10 = arith.constant 0 : index
    %13 = vector.load %arg3[%c0_8, %12, %c0_9, %c0_10] : memref<1x34x32x3xbf16, #tpu.memory_space<vmem>>, vector<1x16x32x3xbf16>
    %14 = vector.shape_cast %13 : vector<1x16x32x3xbf16> to vector<16x32x3xbf16>
    %15 = vector.shape_cast %14 : vector<16x32x3xbf16> to vector<512x3xbf16>
    %c0_11 = arith.constant 0 : index
    %c1 = arith.constant 1 : index
    %c0_12 = arith.constant 0 : index
    %c0_13 = arith.constant 0 : index
    %16 = vector.load %arg5[%c0_11, %c1, %c0_12, %c0_13] : memref<3x3x3x64xbf16, #tpu.memory_space<vmem>>, vector<1x1x3x64xbf16>
    %17 = vector.shape_cast %16 : vector<1x1x3x64xbf16> to vector<3x64xbf16>
    %cst_14 = arith.constant dense<0.000000e+00> : vector<512x64xf32>
    %18 = tpu.matmul %15, %17, %cst_14 {dimension_numbers = #tpu.dot_dimension_numbers<[1], [0], [0], [1], [0, 0, 1, 1], [], []>} : vector<512x3xbf16>, vector<3x64xbf16>, vector<512x64xf32> -> vector<512x64xf32>
    %19 = arith.addf %10, %18 : vector<512x64xf32>
    %c0_i32_15 = arith.constant 0 : i32
    %20 = arith.addi %0, %c0_i32_15 : i32
    %c0_16 = arith.constant 0 : index
    %21 = arith.index_cast %20 : i32 to index
    %c0_17 = arith.constant 0 : index
    %c0_18 = arith.constant 0 : index
    %22 = vector.load %arg4[%c0_16, %21, %c0_17, %c0_18] : memref<1x34x32x3xbf16, #tpu.memory_space<vmem>>, vector<1x16x32x3xbf16>
    %23 = vector.shape_cast %22 : vector<1x16x32x3xbf16> to vector<16x32x3xbf16>
    %24 = vector.shape_cast %23 : vector<16x32x3xbf16> to vector<512x3xbf16>
    %c0_19 = arith.constant 0 : index
    %c2 = arith.constant 2 : index
    %c0_20 = arith.constant 0 : index
    %c0_21 = arith.constant 0 : index
    %25 = vector.load %arg5[%c0_19, %c2, %c0_20, %c0_21] : memref<3x3x3x64xbf16, #tpu.memory_space<vmem>>, vector<1x1x3x64xbf16>
    %26 = vector.shape_cast %25 : vector<1x1x3x64xbf16> to vector<3x64xbf16>
    %cst_22 = arith.constant dense<0.000000e+00> : vector<512x64xf32>
    %27 = tpu.matmul %24, %26, %cst_22 {dimension_numbers = #tpu.dot_dimension_numbers<[1], [0], [0], [1], [0, 0, 1, 1], [], []>} : vector<512x3xbf16>, vector<3x64xbf16>, vector<512x64xf32> -> vector<512x64xf32>
    %28 = arith.addf %19, %27 : vector<512x64xf32>
    %c1_i32 = arith.constant 1 : i32
    %29 = arith.addi %0, %c1_i32 : i32
    %c0_23 = arith.constant 0 : index
    %30 = arith.index_cast %29 : i32 to index
    %c0_24 = arith.constant 0 : index
    %c0_25 = arith.constant 0 : index
    %31 = vector.load %arg2[%c0_23, %30, %c0_24, %c0_25] : memref<1x34x32x3xbf16, #tpu.memory_space<vmem>>, vector<1x16x32x3xbf16>
    %32 = vector.shape_cast %31 : vector<1x16x32x3xbf16> to vector<16x32x3xbf16>
    %33 = vector.shape_cast %32 : vector<16x32x3xbf16> to vector<512x3xbf16>
    %c1_26 = arith.constant 1 : index
    %c0_27 = arith.constant 0 : index
    %c0_28 = arith.constant 0 : index
    %c0_29 = arith.constant 0 : index
    %34 = vector.load %arg5[%c1_26, %c0_27, %c0_28, %c0_29] : memref<3x3x3x64xbf16, #tpu.memory_space<vmem>>, vector<1x1x3x64xbf16>
    %35 = vector.shape_cast %34 : vector<1x1x3x64xbf16> to vector<3x64xbf16>
    %cst_30 = arith.constant dense<0.000000e+00> : vector<512x64xf32>
    %36 = tpu.matmul %33, %35, %cst_30 {dimension_numbers = #tpu.dot_dimension_numbers<[1], [0], [0], [1], [0, 0, 1, 1], [], []>} : vector<512x3xbf16>, vector<3x64xbf16>, vector<512x64xf32> -> vector<512x64xf32>
    %37 = arith.addf %28, %36 : vector<512x64xf32>
    %c1_i32_31 = arith.constant 1 : i32
    %38 = arith.addi %0, %c1_i32_31 : i32
    %c0_32 = arith.constant 0 : index
    %39 = arith.index_cast %38 : i32 to index
    %c0_33 = arith.constant 0 : index
    %c0_34 = arith.constant 0 : index
    %40 = vector.load %arg3[%c0_32, %39, %c0_33, %c0_34] : memref<1x34x32x3xbf16, #tpu.memory_space<vmem>>, vector<1x16x32x3xbf16>
    %41 = vector.shape_cast %40 : vector<1x16x32x3xbf16> to vector<16x32x3xbf16>
    %42 = vector.shape_cast %41 : vector<16x32x3xbf16> to vector<512x3xbf16>
    %c1_35 = arith.constant 1 : index
    %c1_36 = arith.constant 1 : index
    %c0_37 = arith.constant 0 : index
    %c0_38 = arith.constant 0 : index
    %43 = vector.load %arg5[%c1_35, %c1_36, %c0_37, %c0_38] : memref<3x3x3x64xbf16, #tpu.memory_space<vmem>>, vector<1x1x3x64xbf16>
    %44 = vector.shape_cast %43 : vector<1x1x3x64xbf16> to vector<3x64xbf16>
    %cst_39 = arith.constant dense<0.000000e+00> : vector<512x64xf32>
    %45 = tpu.matmul %42, %44, %cst_39 {dimension_numbers = #tpu.dot_dimension_numbers<[1], [0], [0], [1], [0, 0, 1, 1], [], []>} : vector<512x3xbf16>, vector<3x64xbf16>, vector<512x64xf32> -> vector<512x64xf32>
    %46 = arith.addf %37, %45 : vector<512x64xf32>
    %c1_i32_40 = arith.constant 1 : i32
    %47 = arith.addi %0, %c1_i32_40 : i32
    %c0_41 = arith.constant 0 : index
    %48 = arith.index_cast %47 : i32 to index
    %c0_42 = arith.constant 0 : index
    %c0_43 = arith.constant 0 : index
    %49 = vector.load %arg4[%c0_41, %48, %c0_42, %c0_43] : memref<1x34x32x3xbf16, #tpu.memory_space<vmem>>, vector<1x16x32x3xbf16>
    %50 = vector.shape_cast %49 : vector<1x16x32x3xbf16> to vector<16x32x3xbf16>
    %51 = vector.shape_cast %50 : vector<16x32x3xbf16> to vector<512x3xbf16>
    %c1_44 = arith.constant 1 : index
    %c2_45 = arith.constant 2 : index
    %c0_46 = arith.constant 0 : index
    %c0_47 = arith.constant 0 : index
    %52 = vector.load %arg5[%c1_44, %c2_45, %c0_46, %c0_47] : memref<3x3x3x64xbf16, #tpu.memory_space<vmem>>, vector<1x1x3x64xbf16>
    %53 = vector.shape_cast %52 : vector<1x1x3x64xbf16> to vector<3x64xbf16>
    %cst_48 = arith.constant dense<0.000000e+00> : vector<512x64xf32>
    %54 = tpu.matmul %51, %53, %cst_48 {dimension_numbers = #tpu.dot_dimension_numbers<[1], [0], [0], [1], [0, 0, 1, 1], [], []>} : vector<512x3xbf16>, vector<3x64xbf16>, vector<512x64xf32> -> vector<512x64xf32>
    %55 = arith.addf %46, %54 : vector<512x64xf32>
    %c2_i32 = arith.constant 2 : i32
    %56 = arith.addi %0, %c2_i32 : i32
    %c0_49 = arith.constant 0 : index
    %57 = arith.index_cast %56 : i32 to index
    %c0_50 = arith.constant 0 : index
    %c0_51 = arith.constant 0 : index
    %58 = vector.load %arg2[%c0_49, %57, %c0_50, %c0_51] : memref<1x34x32x3xbf16, #tpu.memory_space<vmem>>, vector<1x16x32x3xbf16>
    %59 = vector.shape_cast %58 : vector<1x16x32x3xbf16> to vector<16x32x3xbf16>
    %60 = vector.shape_cast %59 : vector<16x32x3xbf16> to vector<512x3xbf16>
    %c2_52 = arith.constant 2 : index
    %c0_53 = arith.constant 0 : index
    %c0_54 = arith.constant 0 : index
    %c0_55 = arith.constant 0 : index
    %61 = vector.load %arg5[%c2_52, %c0_53, %c0_54, %c0_55] : memref<3x3x3x64xbf16, #tpu.memory_space<vmem>>, vector<1x1x3x64xbf16>
    %62 = vector.shape_cast %61 : vector<1x1x3x64xbf16> to vector<3x64xbf16>
    %cst_56 = arith.constant dense<0.000000e+00> : vector<512x64xf32>
    %63 = tpu.matmul %60, %62, %cst_56 {dimension_numbers = #tpu.dot_dimension_numbers<[1], [0], [0], [1], [0, 0, 1, 1], [], []>} : vector<512x3xbf16>, vector<3x64xbf16>, vector<512x64xf32> -> vector<512x64xf32>
    %64 = arith.addf %55, %63 : vector<512x64xf32>
    %c2_i32_57 = arith.constant 2 : i32
    %65 = arith.addi %0, %c2_i32_57 : i32
    %c0_58 = arith.constant 0 : index
    %66 = arith.index_cast %65 : i32 to index
    %c0_59 = arith.constant 0 : index
    %c0_60 = arith.constant 0 : index
    %67 = vector.load %arg3[%c0_58, %66, %c0_59, %c0_60] : memref<1x34x32x3xbf16, #tpu.memory_space<vmem>>, vector<1x16x32x3xbf16>
    %68 = vector.shape_cast %67 : vector<1x16x32x3xbf16> to vector<16x32x3xbf16>
    %69 = vector.shape_cast %68 : vector<16x32x3xbf16> to vector<512x3xbf16>
    %c2_61 = arith.constant 2 : index
    %c1_62 = arith.constant 1 : index
    %c0_63 = arith.constant 0 : index
    %c0_64 = arith.constant 0 : index
    %70 = vector.load %arg5[%c2_61, %c1_62, %c0_63, %c0_64] : memref<3x3x3x64xbf16, #tpu.memory_space<vmem>>, vector<1x1x3x64xbf16>
    %71 = vector.shape_cast %70 : vector<1x1x3x64xbf16> to vector<3x64xbf16>
    %cst_65 = arith.constant dense<0.000000e+00> : vector<512x64xf32>
    %72 = tpu.matmul %69, %71, %cst_65 {dimension_numbers = #tpu.dot_dimension_numbers<[1], [0], [0], [1], [0, 0, 1, 1], [], []>} : vector<512x3xbf16>, vector<3x64xbf16>, vector<512x64xf32> -> vector<512x64xf32>
    %73 = arith.addf %64, %72 : vector<512x64xf32>
    %c2_i32_66 = arith.constant 2 : i32
    %74 = arith.addi %0, %c2_i32_66 : i32
    %c0_67 = arith.constant 0 : index
    %75 = arith.index_cast %74 : i32 to index
    %c0_68 = arith.constant 0 : index
    %c0_69 = arith.constant 0 : index
    %76 = vector.load %arg4[%c0_67, %75, %c0_68, %c0_69] : memref<1x34x32x3xbf16, #tpu.memory_space<vmem>>, vector<1x16x32x3xbf16>
    %77 = vector.shape_cast %76 : vector<1x16x32x3xbf16> to vector<16x32x3xbf16>
    %78 = vector.shape_cast %77 : vector<16x32x3xbf16> to vector<512x3xbf16>
    %c2_70 = arith.constant 2 : index
    %c2_71 = arith.constant 2 : index
    %c0_72 = arith.constant 0 : index
    %c0_73 = arith.constant 0 : index
    %79 = vector.load %arg5[%c2_70, %c2_71, %c0_72, %c0_73] : memref<3x3x3x64xbf16, #tpu.memory_space<vmem>>, vector<1x1x3x64xbf16>
    %80 = vector.shape_cast %79 : vector<1x1x3x64xbf16> to vector<3x64xbf16>
    %cst_74 = arith.constant dense<0.000000e+00> : vector<512x64xf32>
    %81 = tpu.matmul %78, %80, %cst_74 {dimension_numbers = #tpu.dot_dimension_numbers<[1], [0], [0], [1], [0, 0, 1, 1], [], []>} : vector<512x3xbf16>, vector<3x64xbf16>, vector<512x64xf32> -> vector<512x64xf32>
    %82 = arith.addf %73, %81 : vector<512x64xf32>
    %c0_75 = arith.constant 0 : index
    %c0_76 = arith.constant 0 : index
    %83 = vector.load %arg6[%c0_75, %c0_76] : memref<1x64xf32, #tpu.memory_space<vmem>>, vector<1x64xf32>
    %84 = vector.broadcast %83 : vector<1x64xf32> to vector<512x64xf32>
    %85 = arith.addf %82, %84 : vector<512x64xf32>
    %cst_77 = arith.constant 0.000000e+00 : f32
    %86 = vector.broadcast %cst_77 : f32 to vector<512x64xf32>
    %87 = arith.maximumf %85, %86 : vector<512x64xf32>
    %88 = vector.shape_cast %87 : vector<512x64xf32> to vector<16x32x64xf32>
    %c0_78 = arith.constant 0 : index
    %c0_79 = arith.constant 0 : index
    %c0_80 = arith.constant 0 : index
    %c0_81 = arith.constant 0 : index
    %89 = vector.load %arg7[%c0_78, %c0_79, %c0_80, %c0_81] : memref<1x16x32x64xf32, #tpu.memory_space<vmem>>, vector<1x16x32x64xf32>
    %90 = vector.shape_cast %89 : vector<1x16x32x64xf32> to vector<16x32x64xf32>
    %91 = vector.shape_cast %88 : vector<16x32x64xf32> to vector<1x16x32x64xf32>
    tpu.vector_store %arg7[%c0_78, %c0_79, %c0_80, %c0_81], %91 {strides = array<i32>} : memref<1x16x32x64xf32, #tpu.memory_space<vmem>>, vector<1x16x32x64xf32>,
    return
  }
  func.func @transform_0(%arg0: i32, %arg1: i32) -> (i32, i32, i32, i32) {
    %c0_i32 = arith.constant 0 : i32
    %c0_i32_0 = arith.constant 0 : i32
    %c0_i32_1 = arith.constant 0 : i32
    %c0_i32_2 = arith.constant 0 : i32
    return %arg0, %c0_i32, %c0_i32_0, %c0_i32_1 : i32, i32, i32, i32
  }
  func.func @transform_1(%arg0: i32, %arg1: i32) -> (i32, i32, i32, i32) {
    %c0_i32 = arith.constant 0 : i32
    %c0_i32_0 = arith.constant 0 : i32
    %c0_i32_1 = arith.constant 0 : i32
    %c0_i32_2 = arith.constant 0 : i32
    return %arg0, %c0_i32, %c0_i32_0, %c0_i32_1 : i32, i32, i32, i32
  }
  func.func @transform_2(%arg0: i32, %arg1: i32) -> (i32, i32, i32, i32) {
    %c0_i32 = arith.constant 0 : i32
    %c0_i32_0 = arith.constant 0 : i32
    %c0_i32_1 = arith.constant 0 : i32
    %c0_i32_2 = arith.constant 0 : i32
    return %arg0, %c0_i32, %c0_i32_0, %c0_i32_1 : i32, i32, i32, i32
  }
  func.func @transform_3(%arg0: i32, %arg1: i32) -> (i32, i32, i32, i32) {
    %c0_i32 = arith.constant 0 : i32
    %c0_i32_0 = arith.constant 0 : i32
    %c0_i32_1 = arith.constant 0 : i32
    %c0_i32_2 = arith.constant 0 : i32
    %c0_i32_3 = arith.constant 0 : i32
    return %c0_i32, %c0_i32_0, %c0_i32_1, %c0_i32_2 : i32, i32, i32, i32
  }
  func.func @transform_4(%arg0: i32, %arg1: i32) -> (i32, i32) {
    %c0_i32 = arith.constant 0 : i32
    %c0_i32_0 = arith.constant 0 : i32
    %c0_i32_1 = arith.constant 0 : i32
    return %c0_i32, %c0_i32_0 : i32, i32
  }
  func.func @transform_5(%arg0: i32, %arg1: i32) -> (i32, i32, i32, i32) {
    %c0_i32 = arith.constant 0 : i32
    %c0_i32_0 = arith.constant 0 : i32
    %c0_i32_1 = arith.constant 0 : i32
    return %arg0, %arg1, %c0_i32, %c0_i32_0 : i32, i32, i32, i32
  }
}

module attributes {stable_mosaic.version = 11 : i64} {
  func.func @_conv3x3_kernel(%arg0: i32, %arg1: i32, %arg2: memref<1x34x32x64xbf16, #tpu.memory_space<vmem>>, %arg3: memref<1x34x32x64xbf16, #tpu.memory_space<vmem>>, %arg4: memref<1x34x32x64xbf16, #tpu.memory_space<vmem>>, %arg5: memref<3x3x64x64xbf16, #tpu.memory_space<vmem>>, %arg6: memref<1x64xf32, #tpu.memory_space<vmem>>, %arg7: memref<1x16x32x64xf32, #tpu.memory_space<vmem>>) attributes {dimension_semantics = [#tpu.dimension_semantics<parallel>, #tpu.dimension_semantics<arbitrary>], iteration_bounds = array<i64: 2, 2>, scalar_prefetch = 0 : i64, scratch_operands = 0 : i64, tpu.core_type = #tpu.core_type<tc>, window_params = [{transform_indices = @transform_0, window_bounds = array<i64: 1, 34, 32, 64>}, {transform_indices = @transform_1, window_bounds = array<i64: 1, 34, 32, 64>}, {transform_indices = @transform_2, window_bounds = array<i64: 1, 34, 32, 64>}, {pipeline_mode = #tpu.pipeline_mode<synchronous>, transform_indices = @transform_3, window_bounds = array<i64: 3, 3, 64, 64>}, {pipeline_mode = #tpu.pipeline_mode<synchronous>, transform_indices = @transform_4, window_bounds = array<i64: 1, 64>}, {transform_indices = @transform_5, window_bounds = array<i64: 1, 16, 32, 64>}]} {
    %c16_i32 = arith.constant 16 : i32
    %0 = arith.muli %arg1, %c16_i32 : i32
    %cst = arith.constant 0.000000e+00 : f32
    %1 = vector.broadcast %cst : f32 to vector<512x64xf32>
    %c0_i32 = arith.constant 0 : i32
    %2 = arith.addi %0, %c0_i32 : i32
    %c0 = arith.constant 0 : index
    %3 = arith.index_cast %2 : i32 to index
    %c0_0 = arith.constant 0 : index
    %c0_1 = arith.constant 0 : index
    %4 = vector.load %arg2[%c0, %3, %c0_0, %c0_1] : memref<1x34x32x64xbf16, #tpu.memory_space<vmem>>, vector<1x16x32x64xbf16>
    %5 = vector.shape_cast %4 : vector<1x16x32x64xbf16> to vector<16x32x64xbf16>
    %6 = vector.shape_cast %5 : vector<16x32x64xbf16> to vector<512x64xbf16>
    %c0_2 = arith.constant 0 : index
    %c0_3 = arith.constant 0 : index
    %c0_4 = arith.constant 0 : index
    %c0_5 = arith.constant 0 : index
    %7 = vector.load %arg5[%c0_2, %c0_3, %c0_4, %c0_5] : memref<3x3x64x64xbf16, #tpu.memory_space<vmem>>, vector<1x1x64x64xbf16>
    %8 = vector.shape_cast %7 : vector<1x1x64x64xbf16> to vector<64x64xbf16>
    %cst_6 = arith.constant dense<0.000000e+00> : vector<512x64xf32>
    %9 = tpu.matmul %6, %8, %cst_6 {dimension_numbers = #tpu.dot_dimension_numbers<[1], [0], [0], [1], [0, 0, 1, 1], [], []>} : vector<512x64xbf16>, vector<64x64xbf16>, vector<512x64xf32> -> vector<512x64xf32>
    %10 = arith.addf %1, %9 : vector<512x64xf32>
    %c0_i32_7 = arith.constant 0 : i32
    %11 = arith.addi %0, %c0_i32_7 : i32
    %c0_8 = arith.constant 0 : index
    %12 = arith.index_cast %11 : i32 to index
    %c0_9 = arith.constant 0 : index
    %c0_10 = arith.constant 0 : index
    %13 = vector.load %arg3[%c0_8, %12, %c0_9, %c0_10] : memref<1x34x32x64xbf16, #tpu.memory_space<vmem>>, vector<1x16x32x64xbf16>
    %14 = vector.shape_cast %13 : vector<1x16x32x64xbf16> to vector<16x32x64xbf16>
    %15 = vector.shape_cast %14 : vector<16x32x64xbf16> to vector<512x64xbf16>
    %c0_11 = arith.constant 0 : index
    %c1 = arith.constant 1 : index
    %c0_12 = arith.constant 0 : index
    %c0_13 = arith.constant 0 : index
    %16 = vector.load %arg5[%c0_11, %c1, %c0_12, %c0_13] : memref<3x3x64x64xbf16, #tpu.memory_space<vmem>>, vector<1x1x64x64xbf16>
    %17 = vector.shape_cast %16 : vector<1x1x64x64xbf16> to vector<64x64xbf16>
    %cst_14 = arith.constant dense<0.000000e+00> : vector<512x64xf32>
    %18 = tpu.matmul %15, %17, %cst_14 {dimension_numbers = #tpu.dot_dimension_numbers<[1], [0], [0], [1], [0, 0, 1, 1], [], []>} : vector<512x64xbf16>, vector<64x64xbf16>, vector<512x64xf32> -> vector<512x64xf32>
    %19 = arith.addf %10, %18 : vector<512x64xf32>
    %c0_i32_15 = arith.constant 0 : i32
    %20 = arith.addi %0, %c0_i32_15 : i32
    %c0_16 = arith.constant 0 : index
    %21 = arith.index_cast %20 : i32 to index
    %c0_17 = arith.constant 0 : index
    %c0_18 = arith.constant 0 : index
    %22 = vector.load %arg4[%c0_16, %21, %c0_17, %c0_18] : memref<1x34x32x64xbf16, #tpu.memory_space<vmem>>, vector<1x16x32x64xbf16>
    %23 = vector.shape_cast %22 : vector<1x16x32x64xbf16> to vector<16x32x64xbf16>
    %24 = vector.shape_cast %23 : vector<16x32x64xbf16> to vector<512x64xbf16>
    %c0_19 = arith.constant 0 : index
    %c2 = arith.constant 2 : index
    %c0_20 = arith.constant 0 : index
    %c0_21 = arith.constant 0 : index
    %25 = vector.load %arg5[%c0_19, %c2, %c0_20, %c0_21] : memref<3x3x64x64xbf16, #tpu.memory_space<vmem>>, vector<1x1x64x64xbf16>
    %26 = vector.shape_cast %25 : vector<1x1x64x64xbf16> to vector<64x64xbf16>
    %cst_22 = arith.constant dense<0.000000e+00> : vector<512x64xf32>
    %27 = tpu.matmul %24, %26, %cst_22 {dimension_numbers = #tpu.dot_dimension_numbers<[1], [0], [0], [1], [0, 0, 1, 1], [], []>} : vector<512x64xbf16>, vector<64x64xbf16>, vector<512x64xf32> -> vector<512x64xf32>
    %28 = arith.addf %19, %27 : vector<512x64xf32>
    %c1_i32 = arith.constant 1 : i32
    %29 = arith.addi %0, %c1_i32 : i32
    %c0_23 = arith.constant 0 : index
    %30 = arith.index_cast %29 : i32 to index
    %c0_24 = arith.constant 0 : index
    %c0_25 = arith.constant 0 : index
    %31 = vector.load %arg2[%c0_23, %30, %c0_24, %c0_25] : memref<1x34x32x64xbf16, #tpu.memory_space<vmem>>, vector<1x16x32x64xbf16>
    %32 = vector.shape_cast %31 : vector<1x16x32x64xbf16> to vector<16x32x64xbf16>
    %33 = vector.shape_cast %32 : vector<16x32x64xbf16> to vector<512x64xbf16>
    %c1_26 = arith.constant 1 : index
    %c0_27 = arith.constant 0 : index
    %c0_28 = arith.constant 0 : index
    %c0_29 = arith.constant 0 : index
    %34 = vector.load %arg5[%c1_26, %c0_27, %c0_28, %c0_29] : memref<3x3x64x64xbf16, #tpu.memory_space<vmem>>, vector<1x1x64x64xbf16>
    %35 = vector.shape_cast %34 : vector<1x1x64x64xbf16> to vector<64x64xbf16>
    %cst_30 = arith.constant dense<0.000000e+00> : vector<512x64xf32>
    %36 = tpu.matmul %33, %35, %cst_30 {dimension_numbers = #tpu.dot_dimension_numbers<[1], [0], [0], [1], [0, 0, 1, 1], [], []>} : vector<512x64xbf16>, vector<64x64xbf16>, vector<512x64xf32> -> vector<512x64xf32>
    %37 = arith.addf %28, %36 : vector<512x64xf32>
    %c1_i32_31 = arith.constant 1 : i32
    %38 = arith.addi %0, %c1_i32_31 : i32
    %c0_32 = arith.constant 0 : index
    %39 = arith.index_cast %38 : i32 to index
    %c0_33 = arith.constant 0 : index
    %c0_34 = arith.constant 0 : index
    %40 = vector.load %arg3[%c0_32, %39, %c0_33, %c0_34] : memref<1x34x32x64xbf16, #tpu.memory_space<vmem>>, vector<1x16x32x64xbf16>
    %41 = vector.shape_cast %40 : vector<1x16x32x64xbf16> to vector<16x32x64xbf16>
    %42 = vector.shape_cast %41 : vector<16x32x64xbf16> to vector<512x64xbf16>
    %c1_35 = arith.constant 1 : index
    %c1_36 = arith.constant 1 : index
    %c0_37 = arith.constant 0 : index
    %c0_38 = arith.constant 0 : index
    %43 = vector.load %arg5[%c1_35, %c1_36, %c0_37, %c0_38] : memref<3x3x64x64xbf16, #tpu.memory_space<vmem>>, vector<1x1x64x64xbf16>
    %44 = vector.shape_cast %43 : vector<1x1x64x64xbf16> to vector<64x64xbf16>
    %cst_39 = arith.constant dense<0.000000e+00> : vector<512x64xf32>
    %45 = tpu.matmul %42, %44, %cst_39 {dimension_numbers = #tpu.dot_dimension_numbers<[1], [0], [0], [1], [0, 0, 1, 1], [], []>} : vector<512x64xbf16>, vector<64x64xbf16>, vector<512x64xf32> -> vector<512x64xf32>
    %46 = arith.addf %37, %45 : vector<512x64xf32>
    %c1_i32_40 = arith.constant 1 : i32
    %47 = arith.addi %0, %c1_i32_40 : i32
    %c0_41 = arith.constant 0 : index
    %48 = arith.index_cast %47 : i32 to index
    %c0_42 = arith.constant 0 : index
    %c0_43 = arith.constant 0 : index
    %49 = vector.load %arg4[%c0_41, %48, %c0_42, %c0_43] : memref<1x34x32x64xbf16, #tpu.memory_space<vmem>>, vector<1x16x32x64xbf16>
    %50 = vector.shape_cast %49 : vector<1x16x32x64xbf16> to vector<16x32x64xbf16>
    %51 = vector.shape_cast %50 : vector<16x32x64xbf16> to vector<512x64xbf16>
    %c1_44 = arith.constant 1 : index
    %c2_45 = arith.constant 2 : index
    %c0_46 = arith.constant 0 : index
    %c0_47 = arith.constant 0 : index
    %52 = vector.load %arg5[%c1_44, %c2_45, %c0_46, %c0_47] : memref<3x3x64x64xbf16, #tpu.memory_space<vmem>>, vector<1x1x64x64xbf16>
    %53 = vector.shape_cast %52 : vector<1x1x64x64xbf16> to vector<64x64xbf16>
    %cst_48 = arith.constant dense<0.000000e+00> : vector<512x64xf32>
    %54 = tpu.matmul %51, %53, %cst_48 {dimension_numbers = #tpu.dot_dimension_numbers<[1], [0], [0], [1], [0, 0, 1, 1], [], []>} : vector<512x64xbf16>, vector<64x64xbf16>, vector<512x64xf32> -> vector<512x64xf32>
    %55 = arith.addf %46, %54 : vector<512x64xf32>
    %c2_i32 = arith.constant 2 : i32
    %56 = arith.addi %0, %c2_i32 : i32
    %c0_49 = arith.constant 0 : index
    %57 = arith.index_cast %56 : i32 to index
    %c0_50 = arith.constant 0 : index
    %c0_51 = arith.constant 0 : index
    %58 = vector.load %arg2[%c0_49, %57, %c0_50, %c0_51] : memref<1x34x32x64xbf16, #tpu.memory_space<vmem>>, vector<1x16x32x64xbf16>
    %59 = vector.shape_cast %58 : vector<1x16x32x64xbf16> to vector<16x32x64xbf16>
    %60 = vector.shape_cast %59 : vector<16x32x64xbf16> to vector<512x64xbf16>
    %c2_52 = arith.constant 2 : index
    %c0_53 = arith.constant 0 : index
    %c0_54 = arith.constant 0 : index
    %c0_55 = arith.constant 0 : index
    %61 = vector.load %arg5[%c2_52, %c0_53, %c0_54, %c0_55] : memref<3x3x64x64xbf16, #tpu.memory_space<vmem>>, vector<1x1x64x64xbf16>
    %62 = vector.shape_cast %61 : vector<1x1x64x64xbf16> to vector<64x64xbf16>
    %cst_56 = arith.constant dense<0.000000e+00> : vector<512x64xf32>
    %63 = tpu.matmul %60, %62, %cst_56 {dimension_numbers = #tpu.dot_dimension_numbers<[1], [0], [0], [1], [0, 0, 1, 1], [], []>} : vector<512x64xbf16>, vector<64x64xbf16>, vector<512x64xf32> -> vector<512x64xf32>
    %64 = arith.addf %55, %63 : vector<512x64xf32>
    %c2_i32_57 = arith.constant 2 : i32
    %65 = arith.addi %0, %c2_i32_57 : i32
    %c0_58 = arith.constant 0 : index
    %66 = arith.index_cast %65 : i32 to index
    %c0_59 = arith.constant 0 : index
    %c0_60 = arith.constant 0 : index
    %67 = vector.load %arg3[%c0_58, %66, %c0_59, %c0_60] : memref<1x34x32x64xbf16, #tpu.memory_space<vmem>>, vector<1x16x32x64xbf16>
    %68 = vector.shape_cast %67 : vector<1x16x32x64xbf16> to vector<16x32x64xbf16>
    %69 = vector.shape_cast %68 : vector<16x32x64xbf16> to vector<512x64xbf16>
    %c2_61 = arith.constant 2 : index
    %c1_62 = arith.constant 1 : index
    %c0_63 = arith.constant 0 : index
    %c0_64 = arith.constant 0 : index
    %70 = vector.load %arg5[%c2_61, %c1_62, %c0_63, %c0_64] : memref<3x3x64x64xbf16, #tpu.memory_space<vmem>>, vector<1x1x64x64xbf16>
    %71 = vector.shape_cast %70 : vector<1x1x64x64xbf16> to vector<64x64xbf16>
    %cst_65 = arith.constant dense<0.000000e+00> : vector<512x64xf32>
    %72 = tpu.matmul %69, %71, %cst_65 {dimension_numbers = #tpu.dot_dimension_numbers<[1], [0], [0], [1], [0, 0, 1, 1], [], []>} : vector<512x64xbf16>, vector<64x64xbf16>, vector<512x64xf32> -> vector<512x64xf32>
    %73 = arith.addf %64, %72 : vector<512x64xf32>
    %c2_i32_66 = arith.constant 2 : i32
    %74 = arith.addi %0, %c2_i32_66 : i32
    %c0_67 = arith.constant 0 : index
    %75 = arith.index_cast %74 : i32 to index
    %c0_68 = arith.constant 0 : index
    %c0_69 = arith.constant 0 : index
    %76 = vector.load %arg4[%c0_67, %75, %c0_68, %c0_69] : memref<1x34x32x64xbf16, #tpu.memory_space<vmem>>, vector<1x16x32x64xbf16>
    %77 = vector.shape_cast %76 : vector<1x16x32x64xbf16> to vector<16x32x64xbf16>
    %78 = vector.shape_cast %77 : vector<16x32x64xbf16> to vector<512x64xbf16>
    %c2_70 = arith.constant 2 : index
    %c2_71 = arith.constant 2 : index
    %c0_72 = arith.constant 0 : index
    %c0_73 = arith.constant 0 : index
    %79 = vector.load %arg5[%c2_70, %c2_71, %c0_72, %c0_73] : memref<3x3x64x64xbf16, #tpu.memory_space<vmem>>, vector<1x1x64x64xbf16>
    %80 = vector.shape_cast %79 : vector<1x1x64x64xbf16> to vector<64x64xbf16>
    %cst_74 = arith.constant dense<0.000000e+00> : vector<512x64xf32>
    %81 = tpu.matmul %78, %80, %cst_74 {dimension_numbers = #tpu.dot_dimension_numbers<[1], [0], [0], [1], [0, 0, 1, 1], [], []>} : vector<512x64xbf16>, vector<64x64xbf16>, vector<512x64xf32> -> vector<512x64xf32>
    %82 = arith.addf %73, %81 : vector<512x64xf32>
    %c0_75 = arith.constant 0 : index
    %c0_76 = arith.constant 0 : index
    %83 = vector.load %arg6[%c0_75, %c0_76] : memref<1x64xf32, #tpu.memory_space<vmem>>, vector<1x64xf32>
    %84 = vector.broadcast %83 : vector<1x64xf32> to vector<512x64xf32>
    %85 = arith.addf %82, %84 : vector<512x64xf32>
    %cst_77 = arith.constant 0.000000e+00 : f32
    %86 = vector.broadcast %cst_77 : f32 to vector<512x64xf32>
    %87 = arith.maximumf %85, %86 : vector<512x64xf32>
    %88 = vector.shape_cast %87 : vector<512x64xf32> to vector<16x32x64xf32>
    %c0_78 = arith.constant 0 : index
    %c0_79 = arith.constant 0 : index
    %c0_80 = arith.constant 0 : index
    %c0_81 = arith.constant 0 : index
    %89 = vector.load %arg7[%c0_78, %c0_79, %c0_80, %c0_81] : memref<1x16x32x64xf32, #tpu.memory_space<vmem>>, vector<1x16x32x64xf32>
    %90 = vector.shape_cast %89 : vector<1x16x32x64xf32> to vector<16x32x64xf32>
    %91 = vector.shape_cast %88 : vector<16x32x64xf32> to vector<1x16x32x64xf32>
    tpu.vector_store %arg7[%c0_78, %c0_79, %c0_80, %c0_81], %91 {strides = array<i32>} : memref<1x16x32x64xf32, #tpu.memory_space<vmem>>, vector<1x16x32x64xf32>,
    return
  }
  func.func @transform_0(%arg0: i32, %arg1: i32) -> (i32, i32, i32, i32) {
    %c0_i32 = arith.constant 0 : i32
    %c0_i32_0 = arith.constant 0 : i32
    %c0_i32_1 = arith.constant 0 : i32
    %c0_i32_2 = arith.constant 0 : i32
    return %arg0, %c0_i32, %c0_i32_0, %c0_i32_1 : i32, i32, i32, i32
  }
  func.func @transform_1(%arg0: i32, %arg1: i32) -> (i32, i32, i32, i32) {
    %c0_i32 = arith.constant 0 : i32
    %c0_i32_0 = arith.constant 0 : i32
    %c0_i32_1 = arith.constant 0 : i32
    %c0_i32_2 = arith.constant 0 : i32
    return %arg0, %c0_i32, %c0_i32_0, %c0_i32_1 : i32, i32, i32, i32
  }
  func.func @transform_2(%arg0: i32, %arg1: i32) -> (i32, i32, i32, i32) {
    %c0_i32 = arith.constant 0 : i32
    %c0_i32_0 = arith.constant 0 : i32
    %c0_i32_1 = arith.constant 0 : i32
    %c0_i32_2 = arith.constant 0 : i32
    return %arg0, %c0_i32, %c0_i32_0, %c0_i32_1 : i32, i32, i32, i32
  }
  func.func @transform_3(%arg0: i32, %arg1: i32) -> (i32, i32, i32, i32) {
    %c0_i32 = arith.constant 0 : i32
    %c0_i32_0 = arith.constant 0 : i32
    %c0_i32_1 = arith.constant 0 : i32
    %c0_i32_2 = arith.constant 0 : i32
    %c0_i32_3 = arith.constant 0 : i32
    return %c0_i32, %c0_i32_0, %c0_i32_1, %c0_i32_2 : i32, i32, i32, i32
  }
  func.func @transform_4(%arg0: i32, %arg1: i32) -> (i32, i32) {
    %c0_i32 = arith.constant 0 : i32
    %c0_i32_0 = arith.constant 0 : i32
    %c0_i32_1 = arith.constant 0 : i32
    return %c0_i32, %c0_i32_0 : i32, i32
  }
  func.func @transform_5(%arg0: i32, %arg1: i32) -> (i32, i32, i32, i32) {
    %c0_i32 = arith.constant 0 : i32
    %c0_i32_0 = arith.constant 0 : i32
    %c0_i32_1 = arith.constant 0 : i32
    return %arg0, %arg1, %c0_i32, %c0_i32_0 : i32, i32, i32, i32
  }
}

module attributes {stable_mosaic.version = 11 : i64} {
  func.func @_conv3x3_kernel(%arg0: i32, %arg1: i32, %arg2: memref<1x18x16x64xbf16, #tpu.memory_space<vmem>>, %arg3: memref<1x18x16x64xbf16, #tpu.memory_space<vmem>>, %arg4: memref<1x18x16x64xbf16, #tpu.memory_space<vmem>>, %arg5: memref<3x3x64x128xbf16, #tpu.memory_space<vmem>>, %arg6: memref<1x128xf32, #tpu.memory_space<vmem>>, %arg7: memref<1x16x16x128xf32, #tpu.memory_space<vmem>>) attributes {dimension_semantics = [#tpu.dimension_semantics<parallel>, #tpu.dimension_semantics<arbitrary>], iteration_bounds = array<i64: 2, 1>, scalar_prefetch = 0 : i64, scratch_operands = 0 : i64, tpu.core_type = #tpu.core_type<tc>, window_params = [{transform_indices = @transform_0, window_bounds = array<i64: 1, 18, 16, 64>}, {transform_indices = @transform_1, window_bounds = array<i64: 1, 18, 16, 64>}, {transform_indices = @transform_2, window_bounds = array<i64: 1, 18, 16, 64>}, {pipeline_mode = #tpu.pipeline_mode<synchronous>, transform_indices = @transform_3, window_bounds = array<i64: 3, 3, 64, 128>}, {pipeline_mode = #tpu.pipeline_mode<synchronous>, transform_indices = @transform_4, window_bounds = array<i64: 1, 128>}, {transform_indices = @transform_5, window_bounds = array<i64: 1, 16, 16, 128>}]} {
    %c16_i32 = arith.constant 16 : i32
    %0 = arith.muli %arg1, %c16_i32 : i32
    %cst = arith.constant 0.000000e+00 : f32
    %1 = vector.broadcast %cst : f32 to vector<256x128xf32>
    %c0_i32 = arith.constant 0 : i32
    %2 = arith.addi %0, %c0_i32 : i32
    %c0 = arith.constant 0 : index
    %3 = arith.index_cast %2 : i32 to index
    %c0_0 = arith.constant 0 : index
    %c0_1 = arith.constant 0 : index
    %4 = vector.load %arg2[%c0, %3, %c0_0, %c0_1] : memref<1x18x16x64xbf16, #tpu.memory_space<vmem>>, vector<1x16x16x64xbf16>
    %5 = vector.shape_cast %4 : vector<1x16x16x64xbf16> to vector<16x16x64xbf16>
    %6 = vector.shape_cast %5 : vector<16x16x64xbf16> to vector<256x64xbf16>
    %c0_2 = arith.constant 0 : index
    %c0_3 = arith.constant 0 : index
    %c0_4 = arith.constant 0 : index
    %c0_5 = arith.constant 0 : index
    %7 = vector.load %arg5[%c0_2, %c0_3, %c0_4, %c0_5] : memref<3x3x64x128xbf16, #tpu.memory_space<vmem>>, vector<1x1x64x128xbf16>
    %8 = vector.shape_cast %7 : vector<1x1x64x128xbf16> to vector<64x128xbf16>
    %cst_6 = arith.constant dense<0.000000e+00> : vector<256x128xf32>
    %9 = tpu.matmul %6, %8, %cst_6 {dimension_numbers = #tpu.dot_dimension_numbers<[1], [0], [0], [1], [0, 0, 1, 1], [], []>} : vector<256x64xbf16>, vector<64x128xbf16>, vector<256x128xf32> -> vector<256x128xf32>
    %10 = arith.addf %1, %9 : vector<256x128xf32>
    %c0_i32_7 = arith.constant 0 : i32
    %11 = arith.addi %0, %c0_i32_7 : i32
    %c0_8 = arith.constant 0 : index
    %12 = arith.index_cast %11 : i32 to index
    %c0_9 = arith.constant 0 : index
    %c0_10 = arith.constant 0 : index
    %13 = vector.load %arg3[%c0_8, %12, %c0_9, %c0_10] : memref<1x18x16x64xbf16, #tpu.memory_space<vmem>>, vector<1x16x16x64xbf16>
    %14 = vector.shape_cast %13 : vector<1x16x16x64xbf16> to vector<16x16x64xbf16>
    %15 = vector.shape_cast %14 : vector<16x16x64xbf16> to vector<256x64xbf16>
    %c0_11 = arith.constant 0 : index
    %c1 = arith.constant 1 : index
    %c0_12 = arith.constant 0 : index
    %c0_13 = arith.constant 0 : index
    %16 = vector.load %arg5[%c0_11, %c1, %c0_12, %c0_13] : memref<3x3x64x128xbf16, #tpu.memory_space<vmem>>, vector<1x1x64x128xbf16>
    %17 = vector.shape_cast %16 : vector<1x1x64x128xbf16> to vector<64x128xbf16>
    %cst_14 = arith.constant dense<0.000000e+00> : vector<256x128xf32>
    %18 = tpu.matmul %15, %17, %cst_14 {dimension_numbers = #tpu.dot_dimension_numbers<[1], [0], [0], [1], [0, 0, 1, 1], [], []>} : vector<256x64xbf16>, vector<64x128xbf16>, vector<256x128xf32> -> vector<256x128xf32>
    %19 = arith.addf %10, %18 : vector<256x128xf32>
    %c0_i32_15 = arith.constant 0 : i32
    %20 = arith.addi %0, %c0_i32_15 : i32
    %c0_16 = arith.constant 0 : index
    %21 = arith.index_cast %20 : i32 to index
    %c0_17 = arith.constant 0 : index
    %c0_18 = arith.constant 0 : index
    %22 = vector.load %arg4[%c0_16, %21, %c0_17, %c0_18] : memref<1x18x16x64xbf16, #tpu.memory_space<vmem>>, vector<1x16x16x64xbf16>
    %23 = vector.shape_cast %22 : vector<1x16x16x64xbf16> to vector<16x16x64xbf16>
    %24 = vector.shape_cast %23 : vector<16x16x64xbf16> to vector<256x64xbf16>
    %c0_19 = arith.constant 0 : index
    %c2 = arith.constant 2 : index
    %c0_20 = arith.constant 0 : index
    %c0_21 = arith.constant 0 : index
    %25 = vector.load %arg5[%c0_19, %c2, %c0_20, %c0_21] : memref<3x3x64x128xbf16, #tpu.memory_space<vmem>>, vector<1x1x64x128xbf16>
    %26 = vector.shape_cast %25 : vector<1x1x64x128xbf16> to vector<64x128xbf16>
    %cst_22 = arith.constant dense<0.000000e+00> : vector<256x128xf32>
    %27 = tpu.matmul %24, %26, %cst_22 {dimension_numbers = #tpu.dot_dimension_numbers<[1], [0], [0], [1], [0, 0, 1, 1], [], []>} : vector<256x64xbf16>, vector<64x128xbf16>, vector<256x128xf32> -> vector<256x128xf32>
    %28 = arith.addf %19, %27 : vector<256x128xf32>
    %c1_i32 = arith.constant 1 : i32
    %29 = arith.addi %0, %c1_i32 : i32
    %c0_23 = arith.constant 0 : index
    %30 = arith.index_cast %29 : i32 to index
    %c0_24 = arith.constant 0 : index
    %c0_25 = arith.constant 0 : index
    %31 = vector.load %arg2[%c0_23, %30, %c0_24, %c0_25] : memref<1x18x16x64xbf16, #tpu.memory_space<vmem>>, vector<1x16x16x64xbf16>
    %32 = vector.shape_cast %31 : vector<1x16x16x64xbf16> to vector<16x16x64xbf16>
    %33 = vector.shape_cast %32 : vector<16x16x64xbf16> to vector<256x64xbf16>
    %c1_26 = arith.constant 1 : index
    %c0_27 = arith.constant 0 : index
    %c0_28 = arith.constant 0 : index
    %c0_29 = arith.constant 0 : index
    %34 = vector.load %arg5[%c1_26, %c0_27, %c0_28, %c0_29] : memref<3x3x64x128xbf16, #tpu.memory_space<vmem>>, vector<1x1x64x128xbf16>
    %35 = vector.shape_cast %34 : vector<1x1x64x128xbf16> to vector<64x128xbf16>
    %cst_30 = arith.constant dense<0.000000e+00> : vector<256x128xf32>
    %36 = tpu.matmul %33, %35, %cst_30 {dimension_numbers = #tpu.dot_dimension_numbers<[1], [0], [0], [1], [0, 0, 1, 1], [], []>} : vector<256x64xbf16>, vector<64x128xbf16>, vector<256x128xf32> -> vector<256x128xf32>
    %37 = arith.addf %28, %36 : vector<256x128xf32>
    %c1_i32_31 = arith.constant 1 : i32
    %38 = arith.addi %0, %c1_i32_31 : i32
    %c0_32 = arith.constant 0 : index
    %39 = arith.index_cast %38 : i32 to index
    %c0_33 = arith.constant 0 : index
    %c0_34 = arith.constant 0 : index
    %40 = vector.load %arg3[%c0_32, %39, %c0_33, %c0_34] : memref<1x18x16x64xbf16, #tpu.memory_space<vmem>>, vector<1x16x16x64xbf16>
    %41 = vector.shape_cast %40 : vector<1x16x16x64xbf16> to vector<16x16x64xbf16>
    %42 = vector.shape_cast %41 : vector<16x16x64xbf16> to vector<256x64xbf16>
    %c1_35 = arith.constant 1 : index
    %c1_36 = arith.constant 1 : index
    %c0_37 = arith.constant 0 : index
    %c0_38 = arith.constant 0 : index
    %43 = vector.load %arg5[%c1_35, %c1_36, %c0_37, %c0_38] : memref<3x3x64x128xbf16, #tpu.memory_space<vmem>>, vector<1x1x64x128xbf16>
    %44 = vector.shape_cast %43 : vector<1x1x64x128xbf16> to vector<64x128xbf16>
    %cst_39 = arith.constant dense<0.000000e+00> : vector<256x128xf32>
    %45 = tpu.matmul %42, %44, %cst_39 {dimension_numbers = #tpu.dot_dimension_numbers<[1], [0], [0], [1], [0, 0, 1, 1], [], []>} : vector<256x64xbf16>, vector<64x128xbf16>, vector<256x128xf32> -> vector<256x128xf32>
    %46 = arith.addf %37, %45 : vector<256x128xf32>
    %c1_i32_40 = arith.constant 1 : i32
    %47 = arith.addi %0, %c1_i32_40 : i32
    %c0_41 = arith.constant 0 : index
    %48 = arith.index_cast %47 : i32 to index
    %c0_42 = arith.constant 0 : index
    %c0_43 = arith.constant 0 : index
    %49 = vector.load %arg4[%c0_41, %48, %c0_42, %c0_43] : memref<1x18x16x64xbf16, #tpu.memory_space<vmem>>, vector<1x16x16x64xbf16>
    %50 = vector.shape_cast %49 : vector<1x16x16x64xbf16> to vector<16x16x64xbf16>
    %51 = vector.shape_cast %50 : vector<16x16x64xbf16> to vector<256x64xbf16>
    %c1_44 = arith.constant 1 : index
    %c2_45 = arith.constant 2 : index
    %c0_46 = arith.constant 0 : index
    %c0_47 = arith.constant 0 : index
    %52 = vector.load %arg5[%c1_44, %c2_45, %c0_46, %c0_47] : memref<3x3x64x128xbf16, #tpu.memory_space<vmem>>, vector<1x1x64x128xbf16>
    %53 = vector.shape_cast %52 : vector<1x1x64x128xbf16> to vector<64x128xbf16>
    %cst_48 = arith.constant dense<0.000000e+00> : vector<256x128xf32>
    %54 = tpu.matmul %51, %53, %cst_48 {dimension_numbers = #tpu.dot_dimension_numbers<[1], [0], [0], [1], [0, 0, 1, 1], [], []>} : vector<256x64xbf16>, vector<64x128xbf16>, vector<256x128xf32> -> vector<256x128xf32>
    %55 = arith.addf %46, %54 : vector<256x128xf32>
    %c2_i32 = arith.constant 2 : i32
    %56 = arith.addi %0, %c2_i32 : i32
    %c0_49 = arith.constant 0 : index
    %57 = arith.index_cast %56 : i32 to index
    %c0_50 = arith.constant 0 : index
    %c0_51 = arith.constant 0 : index
    %58 = vector.load %arg2[%c0_49, %57, %c0_50, %c0_51] : memref<1x18x16x64xbf16, #tpu.memory_space<vmem>>, vector<1x16x16x64xbf16>
    %59 = vector.shape_cast %58 : vector<1x16x16x64xbf16> to vector<16x16x64xbf16>
    %60 = vector.shape_cast %59 : vector<16x16x64xbf16> to vector<256x64xbf16>
    %c2_52 = arith.constant 2 : index
    %c0_53 = arith.constant 0 : index
    %c0_54 = arith.constant 0 : index
    %c0_55 = arith.constant 0 : index
    %61 = vector.load %arg5[%c2_52, %c0_53, %c0_54, %c0_55] : memref<3x3x64x128xbf16, #tpu.memory_space<vmem>>, vector<1x1x64x128xbf16>
    %62 = vector.shape_cast %61 : vector<1x1x64x128xbf16> to vector<64x128xbf16>
    %cst_56 = arith.constant dense<0.000000e+00> : vector<256x128xf32>
    %63 = tpu.matmul %60, %62, %cst_56 {dimension_numbers = #tpu.dot_dimension_numbers<[1], [0], [0], [1], [0, 0, 1, 1], [], []>} : vector<256x64xbf16>, vector<64x128xbf16>, vector<256x128xf32> -> vector<256x128xf32>
    %64 = arith.addf %55, %63 : vector<256x128xf32>
    %c2_i32_57 = arith.constant 2 : i32
    %65 = arith.addi %0, %c2_i32_57 : i32
    %c0_58 = arith.constant 0 : index
    %66 = arith.index_cast %65 : i32 to index
    %c0_59 = arith.constant 0 : index
    %c0_60 = arith.constant 0 : index
    %67 = vector.load %arg3[%c0_58, %66, %c0_59, %c0_60] : memref<1x18x16x64xbf16, #tpu.memory_space<vmem>>, vector<1x16x16x64xbf16>
    %68 = vector.shape_cast %67 : vector<1x16x16x64xbf16> to vector<16x16x64xbf16>
    %69 = vector.shape_cast %68 : vector<16x16x64xbf16> to vector<256x64xbf16>
    %c2_61 = arith.constant 2 : index
    %c1_62 = arith.constant 1 : index
    %c0_63 = arith.constant 0 : index
    %c0_64 = arith.constant 0 : index
    %70 = vector.load %arg5[%c2_61, %c1_62, %c0_63, %c0_64] : memref<3x3x64x128xbf16, #tpu.memory_space<vmem>>, vector<1x1x64x128xbf16>
    %71 = vector.shape_cast %70 : vector<1x1x64x128xbf16> to vector<64x128xbf16>
    %cst_65 = arith.constant dense<0.000000e+00> : vector<256x128xf32>
    %72 = tpu.matmul %69, %71, %cst_65 {dimension_numbers = #tpu.dot_dimension_numbers<[1], [0], [0], [1], [0, 0, 1, 1], [], []>} : vector<256x64xbf16>, vector<64x128xbf16>, vector<256x128xf32> -> vector<256x128xf32>
    %73 = arith.addf %64, %72 : vector<256x128xf32>
    %c2_i32_66 = arith.constant 2 : i32
    %74 = arith.addi %0, %c2_i32_66 : i32
    %c0_67 = arith.constant 0 : index
    %75 = arith.index_cast %74 : i32 to index
    %c0_68 = arith.constant 0 : index
    %c0_69 = arith.constant 0 : index
    %76 = vector.load %arg4[%c0_67, %75, %c0_68, %c0_69] : memref<1x18x16x64xbf16, #tpu.memory_space<vmem>>, vector<1x16x16x64xbf16>
    %77 = vector.shape_cast %76 : vector<1x16x16x64xbf16> to vector<16x16x64xbf16>
    %78 = vector.shape_cast %77 : vector<16x16x64xbf16> to vector<256x64xbf16>
    %c2_70 = arith.constant 2 : index
    %c2_71 = arith.constant 2 : index
    %c0_72 = arith.constant 0 : index
    %c0_73 = arith.constant 0 : index
    %79 = vector.load %arg5[%c2_70, %c2_71, %c0_72, %c0_73] : memref<3x3x64x128xbf16, #tpu.memory_space<vmem>>, vector<1x1x64x128xbf16>
    %80 = vector.shape_cast %79 : vector<1x1x64x128xbf16> to vector<64x128xbf16>
    %cst_74 = arith.constant dense<0.000000e+00> : vector<256x128xf32>
    %81 = tpu.matmul %78, %80, %cst_74 {dimension_numbers = #tpu.dot_dimension_numbers<[1], [0], [0], [1], [0, 0, 1, 1], [], []>} : vector<256x64xbf16>, vector<64x128xbf16>, vector<256x128xf32> -> vector<256x128xf32>
    %82 = arith.addf %73, %81 : vector<256x128xf32>
    %c0_75 = arith.constant 0 : index
    %c0_76 = arith.constant 0 : index
    %83 = vector.load %arg6[%c0_75, %c0_76] : memref<1x128xf32, #tpu.memory_space<vmem>>, vector<1x128xf32>
    %84 = vector.broadcast %83 : vector<1x128xf32> to vector<256x128xf32>
    %85 = arith.addf %82, %84 : vector<256x128xf32>
    %cst_77 = arith.constant 0.000000e+00 : f32
    %86 = vector.broadcast %cst_77 : f32 to vector<256x128xf32>
    %87 = arith.maximumf %85, %86 : vector<256x128xf32>
    %88 = vector.shape_cast %87 : vector<256x128xf32> to vector<16x16x128xf32>
    %c0_78 = arith.constant 0 : index
    %c0_79 = arith.constant 0 : index
    %c0_80 = arith.constant 0 : index
    %c0_81 = arith.constant 0 : index
    %89 = vector.load %arg7[%c0_78, %c0_79, %c0_80, %c0_81] : memref<1x16x16x128xf32, #tpu.memory_space<vmem>>, vector<1x16x16x128xf32>
    %90 = vector.shape_cast %89 : vector<1x16x16x128xf32> to vector<16x16x128xf32>
    %91 = vector.shape_cast %88 : vector<16x16x128xf32> to vector<1x16x16x128xf32>
    tpu.vector_store %arg7[%c0_78, %c0_79, %c0_80, %c0_81], %91 {strides = array<i32>} : memref<1x16x16x128xf32, #tpu.memory_space<vmem>>, vector<1x16x16x128xf32>,
    return
  }
  func.func @transform_0(%arg0: i32, %arg1: i32) -> (i32, i32, i32, i32) {
    %c0_i32 = arith.constant 0 : i32
    %c0_i32_0 = arith.constant 0 : i32
    %c0_i32_1 = arith.constant 0 : i32
    %c0_i32_2 = arith.constant 0 : i32
    return %arg0, %c0_i32, %c0_i32_0, %c0_i32_1 : i32, i32, i32, i32
  }
  func.func @transform_1(%arg0: i32, %arg1: i32) -> (i32, i32, i32, i32) {
    %c0_i32 = arith.constant 0 : i32
    %c0_i32_0 = arith.constant 0 : i32
    %c0_i32_1 = arith.constant 0 : i32
    %c0_i32_2 = arith.constant 0 : i32
    return %arg0, %c0_i32, %c0_i32_0, %c0_i32_1 : i32, i32, i32, i32
  }
  func.func @transform_2(%arg0: i32, %arg1: i32) -> (i32, i32, i32, i32) {
    %c0_i32 = arith.constant 0 : i32
    %c0_i32_0 = arith.constant 0 : i32
    %c0_i32_1 = arith.constant 0 : i32
    %c0_i32_2 = arith.constant 0 : i32
    return %arg0, %c0_i32, %c0_i32_0, %c0_i32_1 : i32, i32, i32, i32
  }
  func.func @transform_3(%arg0: i32, %arg1: i32) -> (i32, i32, i32, i32) {
    %c0_i32 = arith.constant 0 : i32
    %c0_i32_0 = arith.constant 0 : i32
    %c0_i32_1 = arith.constant 0 : i32
    %c0_i32_2 = arith.constant 0 : i32
    %c0_i32_3 = arith.constant 0 : i32
    return %c0_i32, %c0_i32_0, %c0_i32_1, %c0_i32_2 : i32, i32, i32, i32
  }
  func.func @transform_4(%arg0: i32, %arg1: i32) -> (i32, i32) {
    %c0_i32 = arith.constant 0 : i32
    %c0_i32_0 = arith.constant 0 : i32
    %c0_i32_1 = arith.constant 0 : i32
    return %c0_i32, %c0_i32_0 : i32, i32
  }
  func.func @transform_5(%arg0: i32, %arg1: i32) -> (i32, i32, i32, i32) {
    %c0_i32 = arith.constant 0 : i32
    %c0_i32_0 = arith.constant 0 : i32
    %c0_i32_1 = arith.constant 0 : i32
    return %arg0, %arg1, %c0_i32, %c0_i32_0 : i32, i32, i32, i32
  }
}

module attributes {stable_mosaic.version = 11 : i64} {
  func.func @_matmul_bias_act_kernel(%arg0: i32, %arg1: memref<512x128xbf16, #tpu.memory_space<vmem>>, %arg2: memref<128x16xbf16, #tpu.memory_space<vmem>>, %arg3: memref<1x16xf32, #tpu.memory_space<vmem>>, %arg4: memref<512x16xf32, #tpu.memory_space<vmem>>) attributes {dimension_semantics = [#tpu.dimension_semantics<parallel>], iteration_bounds = array<i64: 1>, scalar_prefetch = 0 : i64, scratch_operands = 0 : i64, tpu.core_type = #tpu.core_type<tc>, window_params = [{transform_indices = @transform_0, window_bounds = array<i64: 512, 128>}, {pipeline_mode = #tpu.pipeline_mode<synchronous>, transform_indices = @transform_1, window_bounds = array<i64: 128, 16>}, {pipeline_mode = #tpu.pipeline_mode<synchronous>, transform_indices = @transform_2, window_bounds = array<i64: 1, 16>}, {transform_indices = @transform_3, window_bounds = array<i64: 512, 16>}]} {
    %c0 = arith.constant 0 : index
    %c0_0 = arith.constant 0 : index
    %0 = vector.load %arg1[%c0, %c0_0] : memref<512x128xbf16, #tpu.memory_space<vmem>>, vector<512x128xbf16>
    %c0_1 = arith.constant 0 : index
    %c0_2 = arith.constant 0 : index
    %1 = vector.load %arg2[%c0_1, %c0_2] : memref<128x16xbf16, #tpu.memory_space<vmem>>, vector<128x16xbf16>
    %cst = arith.constant dense<0.000000e+00> : vector<512x16xf32>
    %2 = tpu.matmul %0, %1, %cst {dimension_numbers = #tpu.dot_dimension_numbers<[1], [0], [0], [1], [0, 0, 1, 1], [], []>} : vector<512x128xbf16>, vector<128x16xbf16>, vector<512x16xf32> -> vector<512x16xf32>
    %c0_3 = arith.constant 0 : index
    %c0_4 = arith.constant 0 : index
    %3 = vector.load %arg3[%c0_3, %c0_4] : memref<1x16xf32, #tpu.memory_space<vmem>>, vector<1x16xf32>
    %4 = vector.broadcast %3 : vector<1x16xf32> to vector<512x16xf32>
    %5 = arith.addf %2, %4 : vector<512x16xf32>
    %cst_5 = arith.constant 0.000000e+00 : f32
    %6 = vector.broadcast %cst_5 : f32 to vector<512x16xf32>
    %7 = arith.cmpf oge, %5, %6 : vector<512x16xf32>
    %cst_6 = arith.constant 2.000000e-01 : f32
    %8 = vector.broadcast %cst_6 : f32 to vector<512x16xf32>
    %9 = arith.mulf %8, %5 : vector<512x16xf32>
    %10 = arith.select %7, %5, %9 : vector<512x16xi1>, vector<512x16xf32>
    %c0_7 = arith.constant 0 : index
    %c0_8 = arith.constant 0 : index
    %11 = vector.load %arg4[%c0_7, %c0_8] : memref<512x16xf32, #tpu.memory_space<vmem>>, vector<512x16xf32>
    tpu.vector_store %arg4[%c0_7, %c0_8], %10 {strides = array<i32>} : memref<512x16xf32, #tpu.memory_space<vmem>>, vector<512x16xf32>,
    return
  }
  func.func @transform_0(%arg0: i32) -> (i32, i32) {
    %c0_i32 = arith.constant 0 : i32
    %c0_i32_0 = arith.constant 0 : i32
    return %arg0, %c0_i32 : i32, i32
  }
  func.func @transform_1(%arg0: i32) -> (i32, i32) {
    %c0_i32 = arith.constant 0 : i32
    %c0_i32_0 = arith.constant 0 : i32
    %c0_i32_1 = arith.constant 0 : i32
    return %c0_i32, %c0_i32_0 : i32, i32
  }
  func.func @transform_2(%arg0: i32) -> (i32, i32) {
    %c0_i32 = arith.constant 0 : i32
    %c0_i32_0 = arith.constant 0 : i32
    %c0_i32_1 = arith.constant 0 : i32
    return %c0_i32, %c0_i32_0 : i32, i32
  }
  func.func @transform_3(%arg0: i32) -> (i32, i32) {
    %c0_i32 = arith.constant 0 : i32
    %c0_i32_0 = arith.constant 0 : i32
    return %arg0, %c0_i32 : i32, i32
  }
}

module attributes {stable_mosaic.version = 11 : i64} {
  func.func @_conv3x3_kernel(%arg0: i32, %arg1: i32, %arg2: memref<1x18x16x3xbf16, #tpu.memory_space<vmem>>, %arg3: memref<1x18x16x3xbf16, #tpu.memory_space<vmem>>, %arg4: memref<1x18x16x3xbf16, #tpu.memory_space<vmem>>, %arg5: memref<3x3x3x64xbf16, #tpu.memory_space<vmem>>, %arg6: memref<1x64xf32, #tpu.memory_space<vmem>>, %arg7: memref<1x16x16x64xf32, #tpu.memory_space<vmem>>) attributes {dimension_semantics = [#tpu.dimension_semantics<parallel>, #tpu.dimension_semantics<arbitrary>], iteration_bounds = array<i64: 2, 1>, scalar_prefetch = 0 : i64, scratch_operands = 0 : i64, tpu.core_type = #tpu.core_type<tc>, window_params = [{transform_indices = @transform_0, window_bounds = array<i64: 1, 18, 16, 3>}, {transform_indices = @transform_1, window_bounds = array<i64: 1, 18, 16, 3>}, {transform_indices = @transform_2, window_bounds = array<i64: 1, 18, 16, 3>}, {pipeline_mode = #tpu.pipeline_mode<synchronous>, transform_indices = @transform_3, window_bounds = array<i64: 3, 3, 3, 64>}, {pipeline_mode = #tpu.pipeline_mode<synchronous>, transform_indices = @transform_4, window_bounds = array<i64: 1, 64>}, {transform_indices = @transform_5, window_bounds = array<i64: 1, 16, 16, 64>}]} {
    %c16_i32 = arith.constant 16 : i32
    %0 = arith.muli %arg1, %c16_i32 : i32
    %cst = arith.constant 0.000000e+00 : f32
    %1 = vector.broadcast %cst : f32 to vector<256x64xf32>
    %c0_i32 = arith.constant 0 : i32
    %2 = arith.addi %0, %c0_i32 : i32
    %c0 = arith.constant 0 : index
    %3 = arith.index_cast %2 : i32 to index
    %c0_0 = arith.constant 0 : index
    %c0_1 = arith.constant 0 : index
    %4 = vector.load %arg2[%c0, %3, %c0_0, %c0_1] : memref<1x18x16x3xbf16, #tpu.memory_space<vmem>>, vector<1x16x16x3xbf16>
    %5 = vector.shape_cast %4 : vector<1x16x16x3xbf16> to vector<16x16x3xbf16>
    %6 = vector.shape_cast %5 : vector<16x16x3xbf16> to vector<256x3xbf16>
    %c0_2 = arith.constant 0 : index
    %c0_3 = arith.constant 0 : index
    %c0_4 = arith.constant 0 : index
    %c0_5 = arith.constant 0 : index
    %7 = vector.load %arg5[%c0_2, %c0_3, %c0_4, %c0_5] : memref<3x3x3x64xbf16, #tpu.memory_space<vmem>>, vector<1x1x3x64xbf16>
    %8 = vector.shape_cast %7 : vector<1x1x3x64xbf16> to vector<3x64xbf16>
    %cst_6 = arith.constant dense<0.000000e+00> : vector<256x64xf32>
    %9 = tpu.matmul %6, %8, %cst_6 {dimension_numbers = #tpu.dot_dimension_numbers<[1], [0], [0], [1], [0, 0, 1, 1], [], []>} : vector<256x3xbf16>, vector<3x64xbf16>, vector<256x64xf32> -> vector<256x64xf32>
    %10 = arith.addf %1, %9 : vector<256x64xf32>
    %c0_i32_7 = arith.constant 0 : i32
    %11 = arith.addi %0, %c0_i32_7 : i32
    %c0_8 = arith.constant 0 : index
    %12 = arith.index_cast %11 : i32 to index
    %c0_9 = arith.constant 0 : index
    %c0_10 = arith.constant 0 : index
    %13 = vector.load %arg3[%c0_8, %12, %c0_9, %c0_10] : memref<1x18x16x3xbf16, #tpu.memory_space<vmem>>, vector<1x16x16x3xbf16>
    %14 = vector.shape_cast %13 : vector<1x16x16x3xbf16> to vector<16x16x3xbf16>
    %15 = vector.shape_cast %14 : vector<16x16x3xbf16> to vector<256x3xbf16>
    %c0_11 = arith.constant 0 : index
    %c1 = arith.constant 1 : index
    %c0_12 = arith.constant 0 : index
    %c0_13 = arith.constant 0 : index
    %16 = vector.load %arg5[%c0_11, %c1, %c0_12, %c0_13] : memref<3x3x3x64xbf16, #tpu.memory_space<vmem>>, vector<1x1x3x64xbf16>
    %17 = vector.shape_cast %16 : vector<1x1x3x64xbf16> to vector<3x64xbf16>
    %cst_14 = arith.constant dense<0.000000e+00> : vector<256x64xf32>
    %18 = tpu.matmul %15, %17, %cst_14 {dimension_numbers = #tpu.dot_dimension_numbers<[1], [0], [0], [1], [0, 0, 1, 1], [], []>} : vector<256x3xbf16>, vector<3x64xbf16>, vector<256x64xf32> -> vector<256x64xf32>
    %19 = arith.addf %10, %18 : vector<256x64xf32>
    %c0_i32_15 = arith.constant 0 : i32
    %20 = arith.addi %0, %c0_i32_15 : i32
    %c0_16 = arith.constant 0 : index
    %21 = arith.index_cast %20 : i32 to index
    %c0_17 = arith.constant 0 : index
    %c0_18 = arith.constant 0 : index
    %22 = vector.load %arg4[%c0_16, %21, %c0_17, %c0_18] : memref<1x18x16x3xbf16, #tpu.memory_space<vmem>>, vector<1x16x16x3xbf16>
    %23 = vector.shape_cast %22 : vector<1x16x16x3xbf16> to vector<16x16x3xbf16>
    %24 = vector.shape_cast %23 : vector<16x16x3xbf16> to vector<256x3xbf16>
    %c0_19 = arith.constant 0 : index
    %c2 = arith.constant 2 : index
    %c0_20 = arith.constant 0 : index
    %c0_21 = arith.constant 0 : index
    %25 = vector.load %arg5[%c0_19, %c2, %c0_20, %c0_21] : memref<3x3x3x64xbf16, #tpu.memory_space<vmem>>, vector<1x1x3x64xbf16>
    %26 = vector.shape_cast %25 : vector<1x1x3x64xbf16> to vector<3x64xbf16>
    %cst_22 = arith.constant dense<0.000000e+00> : vector<256x64xf32>
    %27 = tpu.matmul %24, %26, %cst_22 {dimension_numbers = #tpu.dot_dimension_numbers<[1], [0], [0], [1], [0, 0, 1, 1], [], []>} : vector<256x3xbf16>, vector<3x64xbf16>, vector<256x64xf32> -> vector<256x64xf32>
    %28 = arith.addf %19, %27 : vector<256x64xf32>
    %c1_i32 = arith.constant 1 : i32
    %29 = arith.addi %0, %c1_i32 : i32
    %c0_23 = arith.constant 0 : index
    %30 = arith.index_cast %29 : i32 to index
    %c0_24 = arith.constant 0 : index
    %c0_25 = arith.constant 0 : index
    %31 = vector.load %arg2[%c0_23, %30, %c0_24, %c0_25] : memref<1x18x16x3xbf16, #tpu.memory_space<vmem>>, vector<1x16x16x3xbf16>
    %32 = vector.shape_cast %31 : vector<1x16x16x3xbf16> to vector<16x16x3xbf16>
    %33 = vector.shape_cast %32 : vector<16x16x3xbf16> to vector<256x3xbf16>
    %c1_26 = arith.constant 1 : index
    %c0_27 = arith.constant 0 : index
    %c0_28 = arith.constant 0 : index
    %c0_29 = arith.constant 0 : index
    %34 = vector.load %arg5[%c1_26, %c0_27, %c0_28, %c0_29] : memref<3x3x3x64xbf16, #tpu.memory_space<vmem>>, vector<1x1x3x64xbf16>
    %35 = vector.shape_cast %34 : vector<1x1x3x64xbf16> to vector<3x64xbf16>
    %cst_30 = arith.constant dense<0.000000e+00> : vector<256x64xf32>
    %36 = tpu.matmul %33, %35, %cst_30 {dimension_numbers = #tpu.dot_dimension_numbers<[1], [0], [0], [1], [0, 0, 1, 1], [], []>} : vector<256x3xbf16>, vector<3x64xbf16>, vector<256x64xf32> -> vector<256x64xf32>
    %37 = arith.addf %28, %36 : vector<256x64xf32>
    %c1_i32_31 = arith.constant 1 : i32
    %38 = arith.addi %0, %c1_i32_31 : i32
    %c0_32 = arith.constant 0 : index
    %39 = arith.index_cast %38 : i32 to index
    %c0_33 = arith.constant 0 : index
    %c0_34 = arith.constant 0 : index
    %40 = vector.load %arg3[%c0_32, %39, %c0_33, %c0_34] : memref<1x18x16x3xbf16, #tpu.memory_space<vmem>>, vector<1x16x16x3xbf16>
    %41 = vector.shape_cast %40 : vector<1x16x16x3xbf16> to vector<16x16x3xbf16>
    %42 = vector.shape_cast %41 : vector<16x16x3xbf16> to vector<256x3xbf16>
    %c1_35 = arith.constant 1 : index
    %c1_36 = arith.constant 1 : index
    %c0_37 = arith.constant 0 : index
    %c0_38 = arith.constant 0 : index
    %43 = vector.load %arg5[%c1_35, %c1_36, %c0_37, %c0_38] : memref<3x3x3x64xbf16, #tpu.memory_space<vmem>>, vector<1x1x3x64xbf16>
    %44 = vector.shape_cast %43 : vector<1x1x3x64xbf16> to vector<3x64xbf16>
    %cst_39 = arith.constant dense<0.000000e+00> : vector<256x64xf32>
    %45 = tpu.matmul %42, %44, %cst_39 {dimension_numbers = #tpu.dot_dimension_numbers<[1], [0], [0], [1], [0, 0, 1, 1], [], []>} : vector<256x3xbf16>, vector<3x64xbf16>, vector<256x64xf32> -> vector<256x64xf32>
    %46 = arith.addf %37, %45 : vector<256x64xf32>
    %c1_i32_40 = arith.constant 1 : i32
    %47 = arith.addi %0, %c1_i32_40 : i32
    %c0_41 = arith.constant 0 : index
    %48 = arith.index_cast %47 : i32 to index
    %c0_42 = arith.constant 0 : index
    %c0_43 = arith.constant 0 : index
    %49 = vector.load %arg4[%c0_41, %48, %c0_42, %c0_43] : memref<1x18x16x3xbf16, #tpu.memory_space<vmem>>, vector<1x16x16x3xbf16>
    %50 = vector.shape_cast %49 : vector<1x16x16x3xbf16> to vector<16x16x3xbf16>
    %51 = vector.shape_cast %50 : vector<16x16x3xbf16> to vector<256x3xbf16>
    %c1_44 = arith.constant 1 : index
    %c2_45 = arith.constant 2 : index
    %c0_46 = arith.constant 0 : index
    %c0_47 = arith.constant 0 : index
    %52 = vector.load %arg5[%c1_44, %c2_45, %c0_46, %c0_47] : memref<3x3x3x64xbf16, #tpu.memory_space<vmem>>, vector<1x1x3x64xbf16>
    %53 = vector.shape_cast %52 : vector<1x1x3x64xbf16> to vector<3x64xbf16>
    %cst_48 = arith.constant dense<0.000000e+00> : vector<256x64xf32>
    %54 = tpu.matmul %51, %53, %cst_48 {dimension_numbers = #tpu.dot_dimension_numbers<[1], [0], [0], [1], [0, 0, 1, 1], [], []>} : vector<256x3xbf16>, vector<3x64xbf16>, vector<256x64xf32> -> vector<256x64xf32>
    %55 = arith.addf %46, %54 : vector<256x64xf32>
    %c2_i32 = arith.constant 2 : i32
    %56 = arith.addi %0, %c2_i32 : i32
    %c0_49 = arith.constant 0 : index
    %57 = arith.index_cast %56 : i32 to index
    %c0_50 = arith.constant 0 : index
    %c0_51 = arith.constant 0 : index
    %58 = vector.load %arg2[%c0_49, %57, %c0_50, %c0_51] : memref<1x18x16x3xbf16, #tpu.memory_space<vmem>>, vector<1x16x16x3xbf16>
    %59 = vector.shape_cast %58 : vector<1x16x16x3xbf16> to vector<16x16x3xbf16>
    %60 = vector.shape_cast %59 : vector<16x16x3xbf16> to vector<256x3xbf16>
    %c2_52 = arith.constant 2 : index
    %c0_53 = arith.constant 0 : index
    %c0_54 = arith.constant 0 : index
    %c0_55 = arith.constant 0 : index
    %61 = vector.load %arg5[%c2_52, %c0_53, %c0_54, %c0_55] : memref<3x3x3x64xbf16, #tpu.memory_space<vmem>>, vector<1x1x3x64xbf16>
    %62 = vector.shape_cast %61 : vector<1x1x3x64xbf16> to vector<3x64xbf16>
    %cst_56 = arith.constant dense<0.000000e+00> : vector<256x64xf32>
    %63 = tpu.matmul %60, %62, %cst_56 {dimension_numbers = #tpu.dot_dimension_numbers<[1], [0], [0], [1], [0, 0, 1, 1], [], []>} : vector<256x3xbf16>, vector<3x64xbf16>, vector<256x64xf32> -> vector<256x64xf32>
    %64 = arith.addf %55, %63 : vector<256x64xf32>
    %c2_i32_57 = arith.constant 2 : i32
    %65 = arith.addi %0, %c2_i32_57 : i32
    %c0_58 = arith.constant 0 : index
    %66 = arith.index_cast %65 : i32 to index
    %c0_59 = arith.constant 0 : index
    %c0_60 = arith.constant 0 : index
    %67 = vector.load %arg3[%c0_58, %66, %c0_59, %c0_60] : memref<1x18x16x3xbf16, #tpu.memory_space<vmem>>, vector<1x16x16x3xbf16>
    %68 = vector.shape_cast %67 : vector<1x16x16x3xbf16> to vector<16x16x3xbf16>
    %69 = vector.shape_cast %68 : vector<16x16x3xbf16> to vector<256x3xbf16>
    %c2_61 = arith.constant 2 : index
    %c1_62 = arith.constant 1 : index
    %c0_63 = arith.constant 0 : index
    %c0_64 = arith.constant 0 : index
    %70 = vector.load %arg5[%c2_61, %c1_62, %c0_63, %c0_64] : memref<3x3x3x64xbf16, #tpu.memory_space<vmem>>, vector<1x1x3x64xbf16>
    %71 = vector.shape_cast %70 : vector<1x1x3x64xbf16> to vector<3x64xbf16>
    %cst_65 = arith.constant dense<0.000000e+00> : vector<256x64xf32>
    %72 = tpu.matmul %69, %71, %cst_65 {dimension_numbers = #tpu.dot_dimension_numbers<[1], [0], [0], [1], [0, 0, 1, 1], [], []>} : vector<256x3xbf16>, vector<3x64xbf16>, vector<256x64xf32> -> vector<256x64xf32>
    %73 = arith.addf %64, %72 : vector<256x64xf32>
    %c2_i32_66 = arith.constant 2 : i32
    %74 = arith.addi %0, %c2_i32_66 : i32
    %c0_67 = arith.constant 0 : index
    %75 = arith.index_cast %74 : i32 to index
    %c0_68 = arith.constant 0 : index
    %c0_69 = arith.constant 0 : index
    %76 = vector.load %arg4[%c0_67, %75, %c0_68, %c0_69] : memref<1x18x16x3xbf16, #tpu.memory_space<vmem>>, vector<1x16x16x3xbf16>
    %77 = vector.shape_cast %76 : vector<1x16x16x3xbf16> to vector<16x16x3xbf16>
    %78 = vector.shape_cast %77 : vector<16x16x3xbf16> to vector<256x3xbf16>
    %c2_70 = arith.constant 2 : index
    %c2_71 = arith.constant 2 : index
    %c0_72 = arith.constant 0 : index
    %c0_73 = arith.constant 0 : index
    %79 = vector.load %arg5[%c2_70, %c2_71, %c0_72, %c0_73] : memref<3x3x3x64xbf16, #tpu.memory_space<vmem>>, vector<1x1x3x64xbf16>
    %80 = vector.shape_cast %79 : vector<1x1x3x64xbf16> to vector<3x64xbf16>
    %cst_74 = arith.constant dense<0.000000e+00> : vector<256x64xf32>
    %81 = tpu.matmul %78, %80, %cst_74 {dimension_numbers = #tpu.dot_dimension_numbers<[1], [0], [0], [1], [0, 0, 1, 1], [], []>} : vector<256x3xbf16>, vector<3x64xbf16>, vector<256x64xf32> -> vector<256x64xf32>
    %82 = arith.addf %73, %81 : vector<256x64xf32>
    %c0_75 = arith.constant 0 : index
    %c0_76 = arith.constant 0 : index
    %83 = vector.load %arg6[%c0_75, %c0_76] : memref<1x64xf32, #tpu.memory_space<vmem>>, vector<1x64xf32>
    %84 = vector.broadcast %83 : vector<1x64xf32> to vector<256x64xf32>
    %85 = arith.addf %82, %84 : vector<256x64xf32>
    %cst_77 = arith.constant 0.000000e+00 : f32
    %86 = vector.broadcast %cst_77 : f32 to vector<256x64xf32>
    %87 = arith.maximumf %85, %86 : vector<256x64xf32>
    %88 = vector.shape_cast %87 : vector<256x64xf32> to vector<16x16x64xf32>
    %c0_78 = arith.constant 0 : index
    %c0_79 = arith.constant 0 : index
    %c0_80 = arith.constant 0 : index
    %c0_81 = arith.constant 0 : index
    %89 = vector.load %arg7[%c0_78, %c0_79, %c0_80, %c0_81] : memref<1x16x16x64xf32, #tpu.memory_space<vmem>>, vector<1x16x16x64xf32>
    %90 = vector.shape_cast %89 : vector<1x16x16x64xf32> to vector<16x16x64xf32>
    %91 = vector.shape_cast %88 : vector<16x16x64xf32> to vector<1x16x16x64xf32>
    tpu.vector_store %arg7[%c0_78, %c0_79, %c0_80, %c0_81], %91 {strides = array<i32>} : memref<1x16x16x64xf32, #tpu.memory_space<vmem>>, vector<1x16x16x64xf32>,
    return
  }
  func.func @transform_0(%arg0: i32, %arg1: i32) -> (i32, i32, i32, i32) {
    %c0_i32 = arith.constant 0 : i32
    %c0_i32_0 = arith.constant 0 : i32
    %c0_i32_1 = arith.constant 0 : i32
    %c0_i32_2 = arith.constant 0 : i32
    return %arg0, %c0_i32, %c0_i32_0, %c0_i32_1 : i32, i32, i32, i32
  }
  func.func @transform_1(%arg0: i32, %arg1: i32) -> (i32, i32, i32, i32) {
    %c0_i32 = arith.constant 0 : i32
    %c0_i32_0 = arith.constant 0 : i32
    %c0_i32_1 = arith.constant 0 : i32
    %c0_i32_2 = arith.constant 0 : i32
    return %arg0, %c0_i32, %c0_i32_0, %c0_i32_1 : i32, i32, i32, i32
  }
  func.func @transform_2(%arg0: i32, %arg1: i32) -> (i32, i32, i32, i32) {
    %c0_i32 = arith.constant 0 : i32
    %c0_i32_0 = arith.constant 0 : i32
    %c0_i32_1 = arith.constant 0 : i32
    %c0_i32_2 = arith.constant 0 : i32
    return %arg0, %c0_i32, %c0_i32_0, %c0_i32_1 : i32, i32, i32, i32
  }
  func.func @transform_3(%arg0: i32, %arg1: i32) -> (i32, i32, i32, i32) {
    %c0_i32 = arith.constant 0 : i32
    %c0_i32_0 = arith.constant 0 : i32
    %c0_i32_1 = arith.constant 0 : i32
    %c0_i32_2 = arith.constant 0 : i32
    %c0_i32_3 = arith.constant 0 : i32
    return %c0_i32, %c0_i32_0, %c0_i32_1, %c0_i32_2 : i32, i32, i32, i32
  }
  func.func @transform_4(%arg0: i32, %arg1: i32) -> (i32, i32) {
    %c0_i32 = arith.constant 0 : i32
    %c0_i32_0 = arith.constant 0 : i32
    %c0_i32_1 = arith.constant 0 : i32
    return %c0_i32, %c0_i32_0 : i32, i32
  }
  func.func @transform_5(%arg0: i32, %arg1: i32) -> (i32, i32, i32, i32) {
    %c0_i32 = arith.constant 0 : i32
    %c0_i32_0 = arith.constant 0 : i32
    %c0_i32_1 = arith.constant 0 : i32
    return %arg0, %arg1, %c0_i32, %c0_i32_0 : i32, i32, i32, i32
  }
}

module attributes {stable_mosaic.version = 11 : i64} {
  func.func @_conv3x3_kernel(%arg0: i32, %arg1: i32, %arg2: memref<1x18x16x64xbf16, #tpu.memory_space<vmem>>, %arg3: memref<1x18x16x64xbf16, #tpu.memory_space<vmem>>, %arg4: memref<1x18x16x64xbf16, #tpu.memory_space<vmem>>, %arg5: memref<3x3x64x64xbf16, #tpu.memory_space<vmem>>, %arg6: memref<1x64xf32, #tpu.memory_space<vmem>>, %arg7: memref<1x16x16x64xf32, #tpu.memory_space<vmem>>) attributes {dimension_semantics = [#tpu.dimension_semantics<parallel>, #tpu.dimension_semantics<arbitrary>], iteration_bounds = array<i64: 2, 1>, scalar_prefetch = 0 : i64, scratch_operands = 0 : i64, tpu.core_type = #tpu.core_type<tc>, window_params = [{transform_indices = @transform_0, window_bounds = array<i64: 1, 18, 16, 64>}, {transform_indices = @transform_1, window_bounds = array<i64: 1, 18, 16, 64>}, {transform_indices = @transform_2, window_bounds = array<i64: 1, 18, 16, 64>}, {pipeline_mode = #tpu.pipeline_mode<synchronous>, transform_indices = @transform_3, window_bounds = array<i64: 3, 3, 64, 64>}, {pipeline_mode = #tpu.pipeline_mode<synchronous>, transform_indices = @transform_4, window_bounds = array<i64: 1, 64>}, {transform_indices = @transform_5, window_bounds = array<i64: 1, 16, 16, 64>}]} {
    %c16_i32 = arith.constant 16 : i32
    %0 = arith.muli %arg1, %c16_i32 : i32
    %cst = arith.constant 0.000000e+00 : f32
    %1 = vector.broadcast %cst : f32 to vector<256x64xf32>
    %c0_i32 = arith.constant 0 : i32
    %2 = arith.addi %0, %c0_i32 : i32
    %c0 = arith.constant 0 : index
    %3 = arith.index_cast %2 : i32 to index
    %c0_0 = arith.constant 0 : index
    %c0_1 = arith.constant 0 : index
    %4 = vector.load %arg2[%c0, %3, %c0_0, %c0_1] : memref<1x18x16x64xbf16, #tpu.memory_space<vmem>>, vector<1x16x16x64xbf16>
    %5 = vector.shape_cast %4 : vector<1x16x16x64xbf16> to vector<16x16x64xbf16>
    %6 = vector.shape_cast %5 : vector<16x16x64xbf16> to vector<256x64xbf16>
    %c0_2 = arith.constant 0 : index
    %c0_3 = arith.constant 0 : index
    %c0_4 = arith.constant 0 : index
    %c0_5 = arith.constant 0 : index
    %7 = vector.load %arg5[%c0_2, %c0_3, %c0_4, %c0_5] : memref<3x3x64x64xbf16, #tpu.memory_space<vmem>>, vector<1x1x64x64xbf16>
    %8 = vector.shape_cast %7 : vector<1x1x64x64xbf16> to vector<64x64xbf16>
    %cst_6 = arith.constant dense<0.000000e+00> : vector<256x64xf32>
    %9 = tpu.matmul %6, %8, %cst_6 {dimension_numbers = #tpu.dot_dimension_numbers<[1], [0], [0], [1], [0, 0, 1, 1], [], []>} : vector<256x64xbf16>, vector<64x64xbf16>, vector<256x64xf32> -> vector<256x64xf32>
    %10 = arith.addf %1, %9 : vector<256x64xf32>
    %c0_i32_7 = arith.constant 0 : i32
    %11 = arith.addi %0, %c0_i32_7 : i32
    %c0_8 = arith.constant 0 : index
    %12 = arith.index_cast %11 : i32 to index
    %c0_9 = arith.constant 0 : index
    %c0_10 = arith.constant 0 : index
    %13 = vector.load %arg3[%c0_8, %12, %c0_9, %c0_10] : memref<1x18x16x64xbf16, #tpu.memory_space<vmem>>, vector<1x16x16x64xbf16>
    %14 = vector.shape_cast %13 : vector<1x16x16x64xbf16> to vector<16x16x64xbf16>
    %15 = vector.shape_cast %14 : vector<16x16x64xbf16> to vector<256x64xbf16>
    %c0_11 = arith.constant 0 : index
    %c1 = arith.constant 1 : index
    %c0_12 = arith.constant 0 : index
    %c0_13 = arith.constant 0 : index
    %16 = vector.load %arg5[%c0_11, %c1, %c0_12, %c0_13] : memref<3x3x64x64xbf16, #tpu.memory_space<vmem>>, vector<1x1x64x64xbf16>
    %17 = vector.shape_cast %16 : vector<1x1x64x64xbf16> to vector<64x64xbf16>
    %cst_14 = arith.constant dense<0.000000e+00> : vector<256x64xf32>
    %18 = tpu.matmul %15, %17, %cst_14 {dimension_numbers = #tpu.dot_dimension_numbers<[1], [0], [0], [1], [0, 0, 1, 1], [], []>} : vector<256x64xbf16>, vector<64x64xbf16>, vector<256x64xf32> -> vector<256x64xf32>
    %19 = arith.addf %10, %18 : vector<256x64xf32>
    %c0_i32_15 = arith.constant 0 : i32
    %20 = arith.addi %0, %c0_i32_15 : i32
    %c0_16 = arith.constant 0 : index
    %21 = arith.index_cast %20 : i32 to index
    %c0_17 = arith.constant 0 : index
    %c0_18 = arith.constant 0 : index
    %22 = vector.load %arg4[%c0_16, %21, %c0_17, %c0_18] : memref<1x18x16x64xbf16, #tpu.memory_space<vmem>>, vector<1x16x16x64xbf16>
    %23 = vector.shape_cast %22 : vector<1x16x16x64xbf16> to vector<16x16x64xbf16>
    %24 = vector.shape_cast %23 : vector<16x16x64xbf16> to vector<256x64xbf16>
    %c0_19 = arith.constant 0 : index
    %c2 = arith.constant 2 : index
    %c0_20 = arith.constant 0 : index
    %c0_21 = arith.constant 0 : index
    %25 = vector.load %arg5[%c0_19, %c2, %c0_20, %c0_21] : memref<3x3x64x64xbf16, #tpu.memory_space<vmem>>, vector<1x1x64x64xbf16>
    %26 = vector.shape_cast %25 : vector<1x1x64x64xbf16> to vector<64x64xbf16>
    %cst_22 = arith.constant dense<0.000000e+00> : vector<256x64xf32>
    %27 = tpu.matmul %24, %26, %cst_22 {dimension_numbers = #tpu.dot_dimension_numbers<[1], [0], [0], [1], [0, 0, 1, 1], [], []>} : vector<256x64xbf16>, vector<64x64xbf16>, vector<256x64xf32> -> vector<256x64xf32>
    %28 = arith.addf %19, %27 : vector<256x64xf32>
    %c1_i32 = arith.constant 1 : i32
    %29 = arith.addi %0, %c1_i32 : i32
    %c0_23 = arith.constant 0 : index
    %30 = arith.index_cast %29 : i32 to index
    %c0_24 = arith.constant 0 : index
    %c0_25 = arith.constant 0 : index
    %31 = vector.load %arg2[%c0_23, %30, %c0_24, %c0_25] : memref<1x18x16x64xbf16, #tpu.memory_space<vmem>>, vector<1x16x16x64xbf16>
    %32 = vector.shape_cast %31 : vector<1x16x16x64xbf16> to vector<16x16x64xbf16>
    %33 = vector.shape_cast %32 : vector<16x16x64xbf16> to vector<256x64xbf16>
    %c1_26 = arith.constant 1 : index
    %c0_27 = arith.constant 0 : index
    %c0_28 = arith.constant 0 : index
    %c0_29 = arith.constant 0 : index
    %34 = vector.load %arg5[%c1_26, %c0_27, %c0_28, %c0_29] : memref<3x3x64x64xbf16, #tpu.memory_space<vmem>>, vector<1x1x64x64xbf16>
    %35 = vector.shape_cast %34 : vector<1x1x64x64xbf16> to vector<64x64xbf16>
    %cst_30 = arith.constant dense<0.000000e+00> : vector<256x64xf32>
    %36 = tpu.matmul %33, %35, %cst_30 {dimension_numbers = #tpu.dot_dimension_numbers<[1], [0], [0], [1], [0, 0, 1, 1], [], []>} : vector<256x64xbf16>, vector<64x64xbf16>, vector<256x64xf32> -> vector<256x64xf32>
    %37 = arith.addf %28, %36 : vector<256x64xf32>
    %c1_i32_31 = arith.constant 1 : i32
    %38 = arith.addi %0, %c1_i32_31 : i32
    %c0_32 = arith.constant 0 : index
    %39 = arith.index_cast %38 : i32 to index
    %c0_33 = arith.constant 0 : index
    %c0_34 = arith.constant 0 : index
    %40 = vector.load %arg3[%c0_32, %39, %c0_33, %c0_34] : memref<1x18x16x64xbf16, #tpu.memory_space<vmem>>, vector<1x16x16x64xbf16>
    %41 = vector.shape_cast %40 : vector<1x16x16x64xbf16> to vector<16x16x64xbf16>
    %42 = vector.shape_cast %41 : vector<16x16x64xbf16> to vector<256x64xbf16>
    %c1_35 = arith.constant 1 : index
    %c1_36 = arith.constant 1 : index
    %c0_37 = arith.constant 0 : index
    %c0_38 = arith.constant 0 : index
    %43 = vector.load %arg5[%c1_35, %c1_36, %c0_37, %c0_38] : memref<3x3x64x64xbf16, #tpu.memory_space<vmem>>, vector<1x1x64x64xbf16>
    %44 = vector.shape_cast %43 : vector<1x1x64x64xbf16> to vector<64x64xbf16>
    %cst_39 = arith.constant dense<0.000000e+00> : vector<256x64xf32>
    %45 = tpu.matmul %42, %44, %cst_39 {dimension_numbers = #tpu.dot_dimension_numbers<[1], [0], [0], [1], [0, 0, 1, 1], [], []>} : vector<256x64xbf16>, vector<64x64xbf16>, vector<256x64xf32> -> vector<256x64xf32>
    %46 = arith.addf %37, %45 : vector<256x64xf32>
    %c1_i32_40 = arith.constant 1 : i32
    %47 = arith.addi %0, %c1_i32_40 : i32
    %c0_41 = arith.constant 0 : index
    %48 = arith.index_cast %47 : i32 to index
    %c0_42 = arith.constant 0 : index
    %c0_43 = arith.constant 0 : index
    %49 = vector.load %arg4[%c0_41, %48, %c0_42, %c0_43] : memref<1x18x16x64xbf16, #tpu.memory_space<vmem>>, vector<1x16x16x64xbf16>
    %50 = vector.shape_cast %49 : vector<1x16x16x64xbf16> to vector<16x16x64xbf16>
    %51 = vector.shape_cast %50 : vector<16x16x64xbf16> to vector<256x64xbf16>
    %c1_44 = arith.constant 1 : index
    %c2_45 = arith.constant 2 : index
    %c0_46 = arith.constant 0 : index
    %c0_47 = arith.constant 0 : index
    %52 = vector.load %arg5[%c1_44, %c2_45, %c0_46, %c0_47] : memref<3x3x64x64xbf16, #tpu.memory_space<vmem>>, vector<1x1x64x64xbf16>
    %53 = vector.shape_cast %52 : vector<1x1x64x64xbf16> to vector<64x64xbf16>
    %cst_48 = arith.constant dense<0.000000e+00> : vector<256x64xf32>
    %54 = tpu.matmul %51, %53, %cst_48 {dimension_numbers = #tpu.dot_dimension_numbers<[1], [0], [0], [1], [0, 0, 1, 1], [], []>} : vector<256x64xbf16>, vector<64x64xbf16>, vector<256x64xf32> -> vector<256x64xf32>
    %55 = arith.addf %46, %54 : vector<256x64xf32>
    %c2_i32 = arith.constant 2 : i32
    %56 = arith.addi %0, %c2_i32 : i32
    %c0_49 = arith.constant 0 : index
    %57 = arith.index_cast %56 : i32 to index
    %c0_50 = arith.constant 0 : index
    %c0_51 = arith.constant 0 : index
    %58 = vector.load %arg2[%c0_49, %57, %c0_50, %c0_51] : memref<1x18x16x64xbf16, #tpu.memory_space<vmem>>, vector<1x16x16x64xbf16>
    %59 = vector.shape_cast %58 : vector<1x16x16x64xbf16> to vector<16x16x64xbf16>
    %60 = vector.shape_cast %59 : vector<16x16x64xbf16> to vector<256x64xbf16>
    %c2_52 = arith.constant 2 : index
    %c0_53 = arith.constant 0 : index
    %c0_54 = arith.constant 0 : index
    %c0_55 = arith.constant 0 : index
    %61 = vector.load %arg5[%c2_52, %c0_53, %c0_54, %c0_55] : memref<3x3x64x64xbf16, #tpu.memory_space<vmem>>, vector<1x1x64x64xbf16>
    %62 = vector.shape_cast %61 : vector<1x1x64x64xbf16> to vector<64x64xbf16>
    %cst_56 = arith.constant dense<0.000000e+00> : vector<256x64xf32>
    %63 = tpu.matmul %60, %62, %cst_56 {dimension_numbers = #tpu.dot_dimension_numbers<[1], [0], [0], [1], [0, 0, 1, 1], [], []>} : vector<256x64xbf16>, vector<64x64xbf16>, vector<256x64xf32> -> vector<256x64xf32>
    %64 = arith.addf %55, %63 : vector<256x64xf32>
    %c2_i32_57 = arith.constant 2 : i32
    %65 = arith.addi %0, %c2_i32_57 : i32
    %c0_58 = arith.constant 0 : index
    %66 = arith.index_cast %65 : i32 to index
    %c0_59 = arith.constant 0 : index
    %c0_60 = arith.constant 0 : index
    %67 = vector.load %arg3[%c0_58, %66, %c0_59, %c0_60] : memref<1x18x16x64xbf16, #tpu.memory_space<vmem>>, vector<1x16x16x64xbf16>
    %68 = vector.shape_cast %67 : vector<1x16x16x64xbf16> to vector<16x16x64xbf16>
    %69 = vector.shape_cast %68 : vector<16x16x64xbf16> to vector<256x64xbf16>
    %c2_61 = arith.constant 2 : index
    %c1_62 = arith.constant 1 : index
    %c0_63 = arith.constant 0 : index
    %c0_64 = arith.constant 0 : index
    %70 = vector.load %arg5[%c2_61, %c1_62, %c0_63, %c0_64] : memref<3x3x64x64xbf16, #tpu.memory_space<vmem>>, vector<1x1x64x64xbf16>
    %71 = vector.shape_cast %70 : vector<1x1x64x64xbf16> to vector<64x64xbf16>
    %cst_65 = arith.constant dense<0.000000e+00> : vector<256x64xf32>
    %72 = tpu.matmul %69, %71, %cst_65 {dimension_numbers = #tpu.dot_dimension_numbers<[1], [0], [0], [1], [0, 0, 1, 1], [], []>} : vector<256x64xbf16>, vector<64x64xbf16>, vector<256x64xf32> -> vector<256x64xf32>
    %73 = arith.addf %64, %72 : vector<256x64xf32>
    %c2_i32_66 = arith.constant 2 : i32
    %74 = arith.addi %0, %c2_i32_66 : i32
    %c0_67 = arith.constant 0 : index
    %75 = arith.index_cast %74 : i32 to index
    %c0_68 = arith.constant 0 : index
    %c0_69 = arith.constant 0 : index
    %76 = vector.load %arg4[%c0_67, %75, %c0_68, %c0_69] : memref<1x18x16x64xbf16, #tpu.memory_space<vmem>>, vector<1x16x16x64xbf16>
    %77 = vector.shape_cast %76 : vector<1x16x16x64xbf16> to vector<16x16x64xbf16>
    %78 = vector.shape_cast %77 : vector<16x16x64xbf16> to vector<256x64xbf16>
    %c2_70 = arith.constant 2 : index
    %c2_71 = arith.constant 2 : index
    %c0_72 = arith.constant 0 : index
    %c0_73 = arith.constant 0 : index
    %79 = vector.load %arg5[%c2_70, %c2_71, %c0_72, %c0_73] : memref<3x3x64x64xbf16, #tpu.memory_space<vmem>>, vector<1x1x64x64xbf16>
    %80 = vector.shape_cast %79 : vector<1x1x64x64xbf16> to vector<64x64xbf16>
    %cst_74 = arith.constant dense<0.000000e+00> : vector<256x64xf32>
    %81 = tpu.matmul %78, %80, %cst_74 {dimension_numbers = #tpu.dot_dimension_numbers<[1], [0], [0], [1], [0, 0, 1, 1], [], []>} : vector<256x64xbf16>, vector<64x64xbf16>, vector<256x64xf32> -> vector<256x64xf32>
    %82 = arith.addf %73, %81 : vector<256x64xf32>
    %c0_75 = arith.constant 0 : index
    %c0_76 = arith.constant 0 : index
    %83 = vector.load %arg6[%c0_75, %c0_76] : memref<1x64xf32, #tpu.memory_space<vmem>>, vector<1x64xf32>
    %84 = vector.broadcast %83 : vector<1x64xf32> to vector<256x64xf32>
    %85 = arith.addf %82, %84 : vector<256x64xf32>
    %cst_77 = arith.constant 0.000000e+00 : f32
    %86 = vector.broadcast %cst_77 : f32 to vector<256x64xf32>
    %87 = arith.maximumf %85, %86 : vector<256x64xf32>
    %88 = vector.shape_cast %87 : vector<256x64xf32> to vector<16x16x64xf32>
    %c0_78 = arith.constant 0 : index
    %c0_79 = arith.constant 0 : index
    %c0_80 = arith.constant 0 : index
    %c0_81 = arith.constant 0 : index
    %89 = vector.load %arg7[%c0_78, %c0_79, %c0_80, %c0_81] : memref<1x16x16x64xf32, #tpu.memory_space<vmem>>, vector<1x16x16x64xf32>
    %90 = vector.shape_cast %89 : vector<1x16x16x64xf32> to vector<16x16x64xf32>
    %91 = vector.shape_cast %88 : vector<16x16x64xf32> to vector<1x16x16x64xf32>
    tpu.vector_store %arg7[%c0_78, %c0_79, %c0_80, %c0_81], %91 {strides = array<i32>} : memref<1x16x16x64xf32, #tpu.memory_space<vmem>>, vector<1x16x16x64xf32>,
    return
  }
  func.func @transform_0(%arg0: i32, %arg1: i32) -> (i32, i32, i32, i32) {
    %c0_i32 = arith.constant 0 : i32
    %c0_i32_0 = arith.constant 0 : i32
    %c0_i32_1 = arith.constant 0 : i32
    %c0_i32_2 = arith.constant 0 : i32
    return %arg0, %c0_i32, %c0_i32_0, %c0_i32_1 : i32, i32, i32, i32
  }
  func.func @transform_1(%arg0: i32, %arg1: i32) -> (i32, i32, i32, i32) {
    %c0_i32 = arith.constant 0 : i32
    %c0_i32_0 = arith.constant 0 : i32
    %c0_i32_1 = arith.constant 0 : i32
    %c0_i32_2 = arith.constant 0 : i32
    return %arg0, %c0_i32, %c0_i32_0, %c0_i32_1 : i32, i32, i32, i32
  }
  func.func @transform_2(%arg0: i32, %arg1: i32) -> (i32, i32, i32, i32) {
    %c0_i32 = arith.constant 0 : i32
    %c0_i32_0 = arith.constant 0 : i32
    %c0_i32_1 = arith.constant 0 : i32
    %c0_i32_2 = arith.constant 0 : i32
    return %arg0, %c0_i32, %c0_i32_0, %c0_i32_1 : i32, i32, i32, i32
  }
  func.func @transform_3(%arg0: i32, %arg1: i32) -> (i32, i32, i32, i32) {
    %c0_i32 = arith.constant 0 : i32
    %c0_i32_0 = arith.constant 0 : i32
    %c0_i32_1 = arith.constant 0 : i32
    %c0_i32_2 = arith.constant 0 : i32
    %c0_i32_3 = arith.constant 0 : i32
    return %c0_i32, %c0_i32_0, %c0_i32_1, %c0_i32_2 : i32, i32, i32, i32
  }
  func.func @transform_4(%arg0: i32, %arg1: i32) -> (i32, i32) {
    %c0_i32 = arith.constant 0 : i32
    %c0_i32_0 = arith.constant 0 : i32
    %c0_i32_1 = arith.constant 0 : i32
    return %c0_i32, %c0_i32_0 : i32, i32
  }
  func.func @transform_5(%arg0: i32, %arg1: i32) -> (i32, i32, i32, i32) {
    %c0_i32 = arith.constant 0 : i32
    %c0_i32_0 = arith.constant 0 : i32
    %c0_i32_1 = arith.constant 0 : i32
    return %arg0, %arg1, %c0_i32, %c0_i32_0 : i32, i32, i32, i32
  }
}

module attributes {stable_mosaic.version = 11 : i64} {
  func.func @_conv3x3_kernel(%arg0: i32, %arg1: i32, %arg2: memref<1x10x8x64xbf16, #tpu.memory_space<vmem>>, %arg3: memref<1x10x8x64xbf16, #tpu.memory_space<vmem>>, %arg4: memref<1x10x8x64xbf16, #tpu.memory_space<vmem>>, %arg5: memref<3x3x64x128xbf16, #tpu.memory_space<vmem>>, %arg6: memref<1x128xf32, #tpu.memory_space<vmem>>, %arg7: memref<1x8x8x128xf32, #tpu.memory_space<vmem>>) attributes {dimension_semantics = [#tpu.dimension_semantics<parallel>, #tpu.dimension_semantics<arbitrary>], iteration_bounds = array<i64: 2, 1>, scalar_prefetch = 0 : i64, scratch_operands = 0 : i64, tpu.core_type = #tpu.core_type<tc>, window_params = [{transform_indices = @transform_0, window_bounds = array<i64: 1, 10, 8, 64>}, {transform_indices = @transform_1, window_bounds = array<i64: 1, 10, 8, 64>}, {transform_indices = @transform_2, window_bounds = array<i64: 1, 10, 8, 64>}, {pipeline_mode = #tpu.pipeline_mode<synchronous>, transform_indices = @transform_3, window_bounds = array<i64: 3, 3, 64, 128>}, {pipeline_mode = #tpu.pipeline_mode<synchronous>, transform_indices = @transform_4, window_bounds = array<i64: 1, 128>}, {transform_indices = @transform_5, window_bounds = array<i64: 1, 8, 8, 128>}]} {
    %c8_i32 = arith.constant 8 : i32
    %0 = arith.muli %arg1, %c8_i32 : i32
    %cst = arith.constant 0.000000e+00 : f32
    %1 = vector.broadcast %cst : f32 to vector<64x128xf32>
    %c0_i32 = arith.constant 0 : i32
    %2 = arith.addi %0, %c0_i32 : i32
    %c0 = arith.constant 0 : index
    %3 = arith.index_cast %2 : i32 to index
    %c0_0 = arith.constant 0 : index
    %c0_1 = arith.constant 0 : index
    %4 = vector.load %arg2[%c0, %3, %c0_0, %c0_1] : memref<1x10x8x64xbf16, #tpu.memory_space<vmem>>, vector<1x8x8x64xbf16>
    %5 = vector.shape_cast %4 : vector<1x8x8x64xbf16> to vector<8x8x64xbf16>
    %6 = vector.shape_cast %5 : vector<8x8x64xbf16> to vector<64x64xbf16>
    %c0_2 = arith.constant 0 : index
    %c0_3 = arith.constant 0 : index
    %c0_4 = arith.constant 0 : index
    %c0_5 = arith.constant 0 : index
    %7 = vector.load %arg5[%c0_2, %c0_3, %c0_4, %c0_5] : memref<3x3x64x128xbf16, #tpu.memory_space<vmem>>, vector<1x1x64x128xbf16>
    %8 = vector.shape_cast %7 : vector<1x1x64x128xbf16> to vector<64x128xbf16>
    %cst_6 = arith.constant dense<0.000000e+00> : vector<64x128xf32>
    %9 = tpu.matmul %6, %8, %cst_6 {dimension_numbers = #tpu.dot_dimension_numbers<[1], [0], [0], [1], [0, 0, 1, 1], [], []>} : vector<64x64xbf16>, vector<64x128xbf16>, vector<64x128xf32> -> vector<64x128xf32>
    %10 = arith.addf %1, %9 : vector<64x128xf32>
    %c0_i32_7 = arith.constant 0 : i32
    %11 = arith.addi %0, %c0_i32_7 : i32
    %c0_8 = arith.constant 0 : index
    %12 = arith.index_cast %11 : i32 to index
    %c0_9 = arith.constant 0 : index
    %c0_10 = arith.constant 0 : index
    %13 = vector.load %arg3[%c0_8, %12, %c0_9, %c0_10] : memref<1x10x8x64xbf16, #tpu.memory_space<vmem>>, vector<1x8x8x64xbf16>
    %14 = vector.shape_cast %13 : vector<1x8x8x64xbf16> to vector<8x8x64xbf16>
    %15 = vector.shape_cast %14 : vector<8x8x64xbf16> to vector<64x64xbf16>
    %c0_11 = arith.constant 0 : index
    %c1 = arith.constant 1 : index
    %c0_12 = arith.constant 0 : index
    %c0_13 = arith.constant 0 : index
    %16 = vector.load %arg5[%c0_11, %c1, %c0_12, %c0_13] : memref<3x3x64x128xbf16, #tpu.memory_space<vmem>>, vector<1x1x64x128xbf16>
    %17 = vector.shape_cast %16 : vector<1x1x64x128xbf16> to vector<64x128xbf16>
    %cst_14 = arith.constant dense<0.000000e+00> : vector<64x128xf32>
    %18 = tpu.matmul %15, %17, %cst_14 {dimension_numbers = #tpu.dot_dimension_numbers<[1], [0], [0], [1], [0, 0, 1, 1], [], []>} : vector<64x64xbf16>, vector<64x128xbf16>, vector<64x128xf32> -> vector<64x128xf32>
    %19 = arith.addf %10, %18 : vector<64x128xf32>
    %c0_i32_15 = arith.constant 0 : i32
    %20 = arith.addi %0, %c0_i32_15 : i32
    %c0_16 = arith.constant 0 : index
    %21 = arith.index_cast %20 : i32 to index
    %c0_17 = arith.constant 0 : index
    %c0_18 = arith.constant 0 : index
    %22 = vector.load %arg4[%c0_16, %21, %c0_17, %c0_18] : memref<1x10x8x64xbf16, #tpu.memory_space<vmem>>, vector<1x8x8x64xbf16>
    %23 = vector.shape_cast %22 : vector<1x8x8x64xbf16> to vector<8x8x64xbf16>
    %24 = vector.shape_cast %23 : vector<8x8x64xbf16> to vector<64x64xbf16>
    %c0_19 = arith.constant 0 : index
    %c2 = arith.constant 2 : index
    %c0_20 = arith.constant 0 : index
    %c0_21 = arith.constant 0 : index
    %25 = vector.load %arg5[%c0_19, %c2, %c0_20, %c0_21] : memref<3x3x64x128xbf16, #tpu.memory_space<vmem>>, vector<1x1x64x128xbf16>
    %26 = vector.shape_cast %25 : vector<1x1x64x128xbf16> to vector<64x128xbf16>
    %cst_22 = arith.constant dense<0.000000e+00> : vector<64x128xf32>
    %27 = tpu.matmul %24, %26, %cst_22 {dimension_numbers = #tpu.dot_dimension_numbers<[1], [0], [0], [1], [0, 0, 1, 1], [], []>} : vector<64x64xbf16>, vector<64x128xbf16>, vector<64x128xf32> -> vector<64x128xf32>
    %28 = arith.addf %19, %27 : vector<64x128xf32>
    %c1_i32 = arith.constant 1 : i32
    %29 = arith.addi %0, %c1_i32 : i32
    %c0_23 = arith.constant 0 : index
    %30 = arith.index_cast %29 : i32 to index
    %c0_24 = arith.constant 0 : index
    %c0_25 = arith.constant 0 : index
    %31 = vector.load %arg2[%c0_23, %30, %c0_24, %c0_25] : memref<1x10x8x64xbf16, #tpu.memory_space<vmem>>, vector<1x8x8x64xbf16>
    %32 = vector.shape_cast %31 : vector<1x8x8x64xbf16> to vector<8x8x64xbf16>
    %33 = vector.shape_cast %32 : vector<8x8x64xbf16> to vector<64x64xbf16>
    %c1_26 = arith.constant 1 : index
    %c0_27 = arith.constant 0 : index
    %c0_28 = arith.constant 0 : index
    %c0_29 = arith.constant 0 : index
    %34 = vector.load %arg5[%c1_26, %c0_27, %c0_28, %c0_29] : memref<3x3x64x128xbf16, #tpu.memory_space<vmem>>, vector<1x1x64x128xbf16>
    %35 = vector.shape_cast %34 : vector<1x1x64x128xbf16> to vector<64x128xbf16>
    %cst_30 = arith.constant dense<0.000000e+00> : vector<64x128xf32>
    %36 = tpu.matmul %33, %35, %cst_30 {dimension_numbers = #tpu.dot_dimension_numbers<[1], [0], [0], [1], [0, 0, 1, 1], [], []>} : vector<64x64xbf16>, vector<64x128xbf16>, vector<64x128xf32> -> vector<64x128xf32>
    %37 = arith.addf %28, %36 : vector<64x128xf32>
    %c1_i32_31 = arith.constant 1 : i32
    %38 = arith.addi %0, %c1_i32_31 : i32
    %c0_32 = arith.constant 0 : index
    %39 = arith.index_cast %38 : i32 to index
    %c0_33 = arith.constant 0 : index
    %c0_34 = arith.constant 0 : index
    %40 = vector.load %arg3[%c0_32, %39, %c0_33, %c0_34] : memref<1x10x8x64xbf16, #tpu.memory_space<vmem>>, vector<1x8x8x64xbf16>
    %41 = vector.shape_cast %40 : vector<1x8x8x64xbf16> to vector<8x8x64xbf16>
    %42 = vector.shape_cast %41 : vector<8x8x64xbf16> to vector<64x64xbf16>
    %c1_35 = arith.constant 1 : index
    %c1_36 = arith.constant 1 : index
    %c0_37 = arith.constant 0 : index
    %c0_38 = arith.constant 0 : index
    %43 = vector.load %arg5[%c1_35, %c1_36, %c0_37, %c0_38] : memref<3x3x64x128xbf16, #tpu.memory_space<vmem>>, vector<1x1x64x128xbf16>
    %44 = vector.shape_cast %43 : vector<1x1x64x128xbf16> to vector<64x128xbf16>
    %cst_39 = arith.constant dense<0.000000e+00> : vector<64x128xf32>
    %45 = tpu.matmul %42, %44, %cst_39 {dimension_numbers = #tpu.dot_dimension_numbers<[1], [0], [0], [1], [0, 0, 1, 1], [], []>} : vector<64x64xbf16>, vector<64x128xbf16>, vector<64x128xf32> -> vector<64x128xf32>
    %46 = arith.addf %37, %45 : vector<64x128xf32>
    %c1_i32_40 = arith.constant 1 : i32
    %47 = arith.addi %0, %c1_i32_40 : i32
    %c0_41 = arith.constant 0 : index
    %48 = arith.index_cast %47 : i32 to index
    %c0_42 = arith.constant 0 : index
    %c0_43 = arith.constant 0 : index
    %49 = vector.load %arg4[%c0_41, %48, %c0_42, %c0_43] : memref<1x10x8x64xbf16, #tpu.memory_space<vmem>>, vector<1x8x8x64xbf16>
    %50 = vector.shape_cast %49 : vector<1x8x8x64xbf16> to vector<8x8x64xbf16>
    %51 = vector.shape_cast %50 : vector<8x8x64xbf16> to vector<64x64xbf16>
    %c1_44 = arith.constant 1 : index
    %c2_45 = arith.constant 2 : index
    %c0_46 = arith.constant 0 : index
    %c0_47 = arith.constant 0 : index
    %52 = vector.load %arg5[%c1_44, %c2_45, %c0_46, %c0_47] : memref<3x3x64x128xbf16, #tpu.memory_space<vmem>>, vector<1x1x64x128xbf16>
    %53 = vector.shape_cast %52 : vector<1x1x64x128xbf16> to vector<64x128xbf16>
    %cst_48 = arith.constant dense<0.000000e+00> : vector<64x128xf32>
    %54 = tpu.matmul %51, %53, %cst_48 {dimension_numbers = #tpu.dot_dimension_numbers<[1], [0], [0], [1], [0, 0, 1, 1], [], []>} : vector<64x64xbf16>, vector<64x128xbf16>, vector<64x128xf32> -> vector<64x128xf32>
    %55 = arith.addf %46, %54 : vector<64x128xf32>
    %c2_i32 = arith.constant 2 : i32
    %56 = arith.addi %0, %c2_i32 : i32
    %c0_49 = arith.constant 0 : index
    %57 = arith.index_cast %56 : i32 to index
    %c0_50 = arith.constant 0 : index
    %c0_51 = arith.constant 0 : index
    %58 = vector.load %arg2[%c0_49, %57, %c0_50, %c0_51] : memref<1x10x8x64xbf16, #tpu.memory_space<vmem>>, vector<1x8x8x64xbf16>
    %59 = vector.shape_cast %58 : vector<1x8x8x64xbf16> to vector<8x8x64xbf16>
    %60 = vector.shape_cast %59 : vector<8x8x64xbf16> to vector<64x64xbf16>
    %c2_52 = arith.constant 2 : index
    %c0_53 = arith.constant 0 : index
    %c0_54 = arith.constant 0 : index
    %c0_55 = arith.constant 0 : index
    %61 = vector.load %arg5[%c2_52, %c0_53, %c0_54, %c0_55] : memref<3x3x64x128xbf16, #tpu.memory_space<vmem>>, vector<1x1x64x128xbf16>
    %62 = vector.shape_cast %61 : vector<1x1x64x128xbf16> to vector<64x128xbf16>
    %cst_56 = arith.constant dense<0.000000e+00> : vector<64x128xf32>
    %63 = tpu.matmul %60, %62, %cst_56 {dimension_numbers = #tpu.dot_dimension_numbers<[1], [0], [0], [1], [0, 0, 1, 1], [], []>} : vector<64x64xbf16>, vector<64x128xbf16>, vector<64x128xf32> -> vector<64x128xf32>
    %64 = arith.addf %55, %63 : vector<64x128xf32>
    %c2_i32_57 = arith.constant 2 : i32
    %65 = arith.addi %0, %c2_i32_57 : i32
    %c0_58 = arith.constant 0 : index
    %66 = arith.index_cast %65 : i32 to index
    %c0_59 = arith.constant 0 : index
    %c0_60 = arith.constant 0 : index
    %67 = vector.load %arg3[%c0_58, %66, %c0_59, %c0_60] : memref<1x10x8x64xbf16, #tpu.memory_space<vmem>>, vector<1x8x8x64xbf16>
    %68 = vector.shape_cast %67 : vector<1x8x8x64xbf16> to vector<8x8x64xbf16>
    %69 = vector.shape_cast %68 : vector<8x8x64xbf16> to vector<64x64xbf16>
    %c2_61 = arith.constant 2 : index
    %c1_62 = arith.constant 1 : index
    %c0_63 = arith.constant 0 : index
    %c0_64 = arith.constant 0 : index
    %70 = vector.load %arg5[%c2_61, %c1_62, %c0_63, %c0_64] : memref<3x3x64x128xbf16, #tpu.memory_space<vmem>>, vector<1x1x64x128xbf16>
    %71 = vector.shape_cast %70 : vector<1x1x64x128xbf16> to vector<64x128xbf16>
    %cst_65 = arith.constant dense<0.000000e+00> : vector<64x128xf32>
    %72 = tpu.matmul %69, %71, %cst_65 {dimension_numbers = #tpu.dot_dimension_numbers<[1], [0], [0], [1], [0, 0, 1, 1], [], []>} : vector<64x64xbf16>, vector<64x128xbf16>, vector<64x128xf32> -> vector<64x128xf32>
    %73 = arith.addf %64, %72 : vector<64x128xf32>
    %c2_i32_66 = arith.constant 2 : i32
    %74 = arith.addi %0, %c2_i32_66 : i32
    %c0_67 = arith.constant 0 : index
    %75 = arith.index_cast %74 : i32 to index
    %c0_68 = arith.constant 0 : index
    %c0_69 = arith.constant 0 : index
    %76 = vector.load %arg4[%c0_67, %75, %c0_68, %c0_69] : memref<1x10x8x64xbf16, #tpu.memory_space<vmem>>, vector<1x8x8x64xbf16>
    %77 = vector.shape_cast %76 : vector<1x8x8x64xbf16> to vector<8x8x64xbf16>
    %78 = vector.shape_cast %77 : vector<8x8x64xbf16> to vector<64x64xbf16>
    %c2_70 = arith.constant 2 : index
    %c2_71 = arith.constant 2 : index
    %c0_72 = arith.constant 0 : index
    %c0_73 = arith.constant 0 : index
    %79 = vector.load %arg5[%c2_70, %c2_71, %c0_72, %c0_73] : memref<3x3x64x128xbf16, #tpu.memory_space<vmem>>, vector<1x1x64x128xbf16>
    %80 = vector.shape_cast %79 : vector<1x1x64x128xbf16> to vector<64x128xbf16>
    %cst_74 = arith.constant dense<0.000000e+00> : vector<64x128xf32>
    %81 = tpu.matmul %78, %80, %cst_74 {dimension_numbers = #tpu.dot_dimension_numbers<[1], [0], [0], [1], [0, 0, 1, 1], [], []>} : vector<64x64xbf16>, vector<64x128xbf16>, vector<64x128xf32> -> vector<64x128xf32>
    %82 = arith.addf %73, %81 : vector<64x128xf32>
    %c0_75 = arith.constant 0 : index
    %c0_76 = arith.constant 0 : index
    %83 = vector.load %arg6[%c0_75, %c0_76] : memref<1x128xf32, #tpu.memory_space<vmem>>, vector<1x128xf32>
    %84 = vector.broadcast %83 : vector<1x128xf32> to vector<64x128xf32>
    %85 = arith.addf %82, %84 : vector<64x128xf32>
    %cst_77 = arith.constant 0.000000e+00 : f32
    %86 = vector.broadcast %cst_77 : f32 to vector<64x128xf32>
    %87 = arith.maximumf %85, %86 : vector<64x128xf32>
    %88 = vector.shape_cast %87 : vector<64x128xf32> to vector<8x8x128xf32>
    %c0_78 = arith.constant 0 : index
    %c0_79 = arith.constant 0 : index
    %c0_80 = arith.constant 0 : index
    %c0_81 = arith.constant 0 : index
    %89 = vector.load %arg7[%c0_78, %c0_79, %c0_80, %c0_81] : memref<1x8x8x128xf32, #tpu.memory_space<vmem>>, vector<1x8x8x128xf32>
    %90 = vector.shape_cast %89 : vector<1x8x8x128xf32> to vector<8x8x128xf32>
    %91 = vector.shape_cast %88 : vector<8x8x128xf32> to vector<1x8x8x128xf32>
    tpu.vector_store %arg7[%c0_78, %c0_79, %c0_80, %c0_81], %91 {strides = array<i32>} : memref<1x8x8x128xf32, #tpu.memory_space<vmem>>, vector<1x8x8x128xf32>,
    return
  }
  func.func @transform_0(%arg0: i32, %arg1: i32) -> (i32, i32, i32, i32) {
    %c0_i32 = arith.constant 0 : i32
    %c0_i32_0 = arith.constant 0 : i32
    %c0_i32_1 = arith.constant 0 : i32
    %c0_i32_2 = arith.constant 0 : i32
    return %arg0, %c0_i32, %c0_i32_0, %c0_i32_1 : i32, i32, i32, i32
  }
  func.func @transform_1(%arg0: i32, %arg1: i32) -> (i32, i32, i32, i32) {
    %c0_i32 = arith.constant 0 : i32
    %c0_i32_0 = arith.constant 0 : i32
    %c0_i32_1 = arith.constant 0 : i32
    %c0_i32_2 = arith.constant 0 : i32
    return %arg0, %c0_i32, %c0_i32_0, %c0_i32_1 : i32, i32, i32, i32
  }
  func.func @transform_2(%arg0: i32, %arg1: i32) -> (i32, i32, i32, i32) {
    %c0_i32 = arith.constant 0 : i32
    %c0_i32_0 = arith.constant 0 : i32
    %c0_i32_1 = arith.constant 0 : i32
    %c0_i32_2 = arith.constant 0 : i32
    return %arg0, %c0_i32, %c0_i32_0, %c0_i32_1 : i32, i32, i32, i32
  }
  func.func @transform_3(%arg0: i32, %arg1: i32) -> (i32, i32, i32, i32) {
    %c0_i32 = arith.constant 0 : i32
    %c0_i32_0 = arith.constant 0 : i32
    %c0_i32_1 = arith.constant 0 : i32
    %c0_i32_2 = arith.constant 0 : i32
    %c0_i32_3 = arith.constant 0 : i32
    return %c0_i32, %c0_i32_0, %c0_i32_1, %c0_i32_2 : i32, i32, i32, i32
  }
  func.func @transform_4(%arg0: i32, %arg1: i32) -> (i32, i32) {
    %c0_i32 = arith.constant 0 : i32
    %c0_i32_0 = arith.constant 0 : i32
    %c0_i32_1 = arith.constant 0 : i32
    return %c0_i32, %c0_i32_0 : i32, i32
  }
  func.func @transform_5(%arg0: i32, %arg1: i32) -> (i32, i32, i32, i32) {
    %c0_i32 = arith.constant 0 : i32
    %c0_i32_0 = arith.constant 0 : i32
    %c0_i32_1 = arith.constant 0 : i32
    return %arg0, %arg1, %c0_i32, %c0_i32_0 : i32, i32, i32, i32
  }
}

module attributes {stable_mosaic.version = 11 : i64} {
  func.func @_matmul_bias_act_kernel(%arg0: i32, %arg1: memref<128x128xbf16, #tpu.memory_space<vmem>>, %arg2: memref<128x16xbf16, #tpu.memory_space<vmem>>, %arg3: memref<1x16xf32, #tpu.memory_space<vmem>>, %arg4: memref<128x16xf32, #tpu.memory_space<vmem>>) attributes {dimension_semantics = [#tpu.dimension_semantics<parallel>], iteration_bounds = array<i64: 1>, scalar_prefetch = 0 : i64, scratch_operands = 0 : i64, tpu.core_type = #tpu.core_type<tc>, window_params = [{transform_indices = @transform_0, window_bounds = array<i64: 128, 128>}, {pipeline_mode = #tpu.pipeline_mode<synchronous>, transform_indices = @transform_1, window_bounds = array<i64: 128, 16>}, {pipeline_mode = #tpu.pipeline_mode<synchronous>, transform_indices = @transform_2, window_bounds = array<i64: 1, 16>}, {transform_indices = @transform_3, window_bounds = array<i64: 128, 16>}]} {
    %c0 = arith.constant 0 : index
    %c0_0 = arith.constant 0 : index
    %0 = vector.load %arg1[%c0, %c0_0] : memref<128x128xbf16, #tpu.memory_space<vmem>>, vector<128x128xbf16>
    %c0_1 = arith.constant 0 : index
    %c0_2 = arith.constant 0 : index
    %1 = vector.load %arg2[%c0_1, %c0_2] : memref<128x16xbf16, #tpu.memory_space<vmem>>, vector<128x16xbf16>
    %cst = arith.constant dense<0.000000e+00> : vector<128x16xf32>
    %2 = tpu.matmul %0, %1, %cst {dimension_numbers = #tpu.dot_dimension_numbers<[1], [0], [0], [1], [0, 0, 1, 1], [], []>} : vector<128x128xbf16>, vector<128x16xbf16>, vector<128x16xf32> -> vector<128x16xf32>
    %c0_3 = arith.constant 0 : index
    %c0_4 = arith.constant 0 : index
    %3 = vector.load %arg3[%c0_3, %c0_4] : memref<1x16xf32, #tpu.memory_space<vmem>>, vector<1x16xf32>
    %4 = vector.broadcast %3 : vector<1x16xf32> to vector<128x16xf32>
    %5 = arith.addf %2, %4 : vector<128x16xf32>
    %cst_5 = arith.constant 0.000000e+00 : f32
    %6 = vector.broadcast %cst_5 : f32 to vector<128x16xf32>
    %7 = arith.cmpf oge, %5, %6 : vector<128x16xf32>
    %cst_6 = arith.constant 2.000000e-01 : f32
    %8 = vector.broadcast %cst_6 : f32 to vector<128x16xf32>
    %9 = arith.mulf %8, %5 : vector<128x16xf32>
    %10 = arith.select %7, %5, %9 : vector<128x16xi1>, vector<128x16xf32>
    %c0_7 = arith.constant 0 : index
    %c0_8 = arith.constant 0 : index
    %11 = vector.load %arg4[%c0_7, %c0_8] : memref<128x16xf32, #tpu.memory_space<vmem>>, vector<128x16xf32>
    tpu.vector_store %arg4[%c0_7, %c0_8], %10 {strides = array<i32>} : memref<128x16xf32, #tpu.memory_space<vmem>>, vector<128x16xf32>,
    return
  }
  func.func @transform_0(%arg0: i32) -> (i32, i32) {
    %c0_i32 = arith.constant 0 : i32
    %c0_i32_0 = arith.constant 0 : i32
    return %arg0, %c0_i32 : i32, i32
  }
  func.func @transform_1(%arg0: i32) -> (i32, i32) {
    %c0_i32 = arith.constant 0 : i32
    %c0_i32_0 = arith.constant 0 : i32
    %c0_i32_1 = arith.constant 0 : i32
    return %c0_i32, %c0_i32_0 : i32, i32
  }
  func.func @transform_2(%arg0: i32) -> (i32, i32) {
    %c0_i32 = arith.constant 0 : i32
    %c0_i32_0 = arith.constant 0 : i32
    %c0_i32_1 = arith.constant 0 : i32
    return %c0_i32, %c0_i32_0 : i32, i32
  }
  func.func @transform_3(%arg0: i32) -> (i32, i32) {
    %c0_i32 = arith.constant 0 : i32
    %c0_i32_0 = arith.constant 0 : i32
    return %arg0, %c0_i32 : i32, i32
  }
}

module attributes {stable_mosaic.version = 11 : i64} {
  func.func @_match_kernel(%arg0: i32, %arg1: i32, %arg2: memref<1x64x144xf32, #tpu.memory_space<vmem>>, %arg3: memref<1x144x256xf32, #tpu.memory_space<vmem>>, %arg4: memref<1x1x256xf32, #tpu.memory_space<vmem>>, %arg5: memref<1x1x256xi32, #tpu.memory_space<vmem>>) attributes {dimension_semantics = [#tpu.dimension_semantics<parallel>, #tpu.dimension_semantics<arbitrary>], iteration_bounds = array<i64: 2, 1>, scalar_prefetch = 0 : i64, scratch_operands = 0 : i64, tpu.core_type = #tpu.core_type<tc>, window_params = [{transform_indices = @transform_0, window_bounds = array<i64: 1, 64, 144>}, {transform_indices = @transform_1, window_bounds = array<i64: 1, 144, 256>}, {transform_indices = @transform_2, window_bounds = array<i64: 1, 1, 256>}, {transform_indices = @transform_3, window_bounds = array<i64: 1, 1, 256>}]} {
    %c0_i32 = arith.constant 0 : i32
    %0 = arith.cmpi eq, %arg1, %c0_i32 : i32
    %1 = arith.extui %0 : i1 to i32
    %c0_i32_0 = arith.constant 0 : i32
    %2 = arith.cmpi ne, %1, %c0_i32_0 : i32
    scf.if %2 {
      %cst_22 = arith.constant 0xFF800000 : f32
      %37 = vector.broadcast %cst_22 : f32 to vector<1x1x256xf32>
      %c0_23 = arith.constant 0 : index
      %c0_24 = arith.constant 0 : index
      %c0_25 = arith.constant 0 : index
      %38 = vector.load %arg4[%c0_23, %c0_24, %c0_25] : memref<1x1x256xf32, #tpu.memory_space<vmem>>, vector<1x1x256xf32>
      tpu.vector_store %arg4[%c0_23, %c0_24, %c0_25], %37 {strides = array<i32>} : memref<1x1x256xf32, #tpu.memory_space<vmem>>, vector<1x1x256xf32>,
      %c0_i32_26 = arith.constant 0 : i32
      %39 = vector.broadcast %c0_i32_26 : i32 to vector<1x1x256xi32>
      %c0_27 = arith.constant 0 : index
      %c0_28 = arith.constant 0 : index
      %c0_29 = arith.constant 0 : index
      %40 = vector.load %arg5[%c0_27, %c0_28, %c0_29] : memref<1x1x256xi32, #tpu.memory_space<vmem>>, vector<1x1x256xi32>
      tpu.vector_store %arg5[%c0_27, %c0_28, %c0_29], %39 {strides = array<i32>} : memref<1x1x256xi32, #tpu.memory_space<vmem>>, vector<1x1x256xi32>,
    } else {
    }
    %c0 = arith.constant 0 : index
    %c0_1 = arith.constant 0 : index
    %c0_2 = arith.constant 0 : index
    %3 = vector.load %arg2[%c0, %c0_1, %c0_2] : memref<1x64x144xf32, #tpu.memory_space<vmem>>, vector<1x64x144xf32>
    %4 = vector.shape_cast %3 : vector<1x64x144xf32> to vector<64x144xf32>
    %c0_3 = arith.constant 0 : index
    %c0_4 = arith.constant 0 : index
    %c0_5 = arith.constant 0 : index
    %5 = vector.load %arg3[%c0_3, %c0_4, %c0_5] : memref<1x144x256xf32, #tpu.memory_space<vmem>>, vector<1x144x256xf32>
    %6 = vector.shape_cast %5 : vector<1x144x256xf32> to vector<144x256xf32>
    %cst = arith.constant dense<0.000000e+00> : vector<64x256xf32>
    %7 = tpu.matmul %4, %6, %cst {dimension_numbers = #tpu.dot_dimension_numbers<[1], [0], [0], [1], [0, 0, 1, 1], [], []>} : vector<64x144xf32>, vector<144x256xf32>, vector<64x256xf32> -> vector<64x256xf32>
    %8 = tpu.iota {dimensions = array<i32: 0>} : vector<64x256xi32>
    %c64_i32 = arith.constant 64 : i32
    %9 = arith.muli %arg1, %c64_i32 : i32
    %10 = vector.broadcast %9 : i32 to vector<64x256xi32>
    %11 = arith.addi %8, %10 : vector<64x256xi32>
    %c64_i32_6 = arith.constant 64 : i32
    %12 = vector.broadcast %c64_i32_6 : i32 to vector<64x256xi32>
    %13 = arith.cmpi slt, %11, %12 : vector<64x256xi32>
    %cst_7 = arith.constant 0xFF800000 : f32
    %14 = vector.broadcast %cst_7 : f32 to vector<64x256xf32>
    %15 = arith.select %13, %7, %14 : vector<64x256xi1>, vector<64x256xf32>
    %cst_8 = arith.constant dense<0xFF800000> : vector<256xf32>
    %16 = vector.multi_reduction <maximumf>, %15, %cst_8 [0] : vector<64x256xf32> to vector<256xf32>
    %17 = vector.shape_cast %16 : vector<256xf32> to vector<1x256xf32>
    %18 = vector.broadcast %17 : vector<1x256xf32> to vector<64x256xf32>
    %19 = arith.cmpf oeq, %15, %18 : vector<64x256xf32>
    %c1073741824_i32 = arith.constant 1073741824 : i32
    %20 = vector.broadcast %c1073741824_i32 : i32 to vector<64x256xi32>
    %21 = arith.select %19, %11, %20 : vector<64x256xi1>, vector<64x256xi32>
    %cst_9 = arith.constant dense<2147483647> : vector<256xi32>
    %22 = vector.multi_reduction <minsi>, %21, %cst_9 [0] : vector<64x256xi32> to vector<256xi32>
    %23 = vector.shape_cast %22 : vector<256xi32> to vector<1x256xi32>
    %c0_10 = arith.constant 0 : index
    %c0_11 = arith.constant 0 : index
    %c0_12 = arith.constant 0 : index
    %24 = vector.load %arg4[%c0_10, %c0_11, %c0_12] : memref<1x1x256xf32, #tpu.memory_space<vmem>>, vector<1x1x256xf32>
    %25 = vector.shape_cast %24 : vector<1x1x256xf32> to vector<1x256xf32>
    %c0_13 = arith.constant 0 : index
    %c0_14 = arith.constant 0 : index
    %c0_15 = arith.constant 0 : index
    %26 = vector.load %arg5[%c0_13, %c0_14, %c0_15] : memref<1x1x256xi32, #tpu.memory_space<vmem>>, vector<1x1x256xi32>
    %27 = vector.shape_cast %26 : vector<1x1x256xi32> to vector<1x256xi32>
    %28 = arith.cmpf ogt, %17, %25 : vector<1x256xf32>
    %29 = arith.select %28, %17, %25 : vector<1x256xi1>, vector<1x256xf32>
    %c0_16 = arith.constant 0 : index
    %c0_17 = arith.constant 0 : index
    %c0_18 = arith.constant 0 : index
    %30 = vector.load %arg4[%c0_16, %c0_17, %c0_18] : memref<1x1x256xf32, #tpu.memory_space<vmem>>, vector<1x1x256xf32>
    %31 = vector.shape_cast %30 : vector<1x1x256xf32> to vector<1x256xf32>
    %32 = vector.shape_cast %29 : vector<1x256xf32> to vector<1x1x256xf32>
    tpu.vector_store %arg4[%c0_16, %c0_17, %c0_18], %32 {strides = array<i32>} : memref<1x1x256xf32, #tpu.memory_space<vmem>>, vector<1x1x256xf32>,
    %33 = arith.select %28, %23, %27 : vector<1x256xi1>, vector<1x256xi32>
    %c0_19 = arith.constant 0 : index
    %c0_20 = arith.constant 0 : index
    %c0_21 = arith.constant 0 : index
    %34 = vector.load %arg5[%c0_19, %c0_20, %c0_21] : memref<1x1x256xi32, #tpu.memory_space<vmem>>, vector<1x1x256xi32>
    %35 = vector.shape_cast %34 : vector<1x1x256xi32> to vector<1x256xi32>
    %36 = vector.shape_cast %33 : vector<1x256xi32> to vector<1x1x256xi32>
    tpu.vector_store %arg5[%c0_19, %c0_20, %c0_21], %36 {strides = array<i32>} : memref<1x1x256xi32, #tpu.memory_space<vmem>>, vector<1x1x256xi32>,
    return
  }
  func.func @transform_0(%arg0: i32, %arg1: i32) -> (i32, i32, i32) {
    %c0_i32 = arith.constant 0 : i32
    %c0_i32_0 = arith.constant 0 : i32
    return %arg0, %arg1, %c0_i32 : i32, i32, i32
  }
  func.func @transform_1(%arg0: i32, %arg1: i32) -> (i32, i32, i32) {
    %c0_i32 = arith.constant 0 : i32
    %c0_i32_0 = arith.constant 0 : i32
    %c0_i32_1 = arith.constant 0 : i32
    return %arg0, %c0_i32, %c0_i32_0 : i32, i32, i32
  }
  func.func @transform_2(%arg0: i32, %arg1: i32) -> (i32, i32, i32) {
    %c0_i32 = arith.constant 0 : i32
    %c0_i32_0 = arith.constant 0 : i32
    %c0_i32_1 = arith.constant 0 : i32
    return %arg0, %c0_i32, %c0_i32_0 : i32, i32, i32
  }
  func.func @transform_3(%arg0: i32, %arg1: i32) -> (i32, i32, i32) {
    %c0_i32 = arith.constant 0 : i32
    %c0_i32_0 = arith.constant 0 : i32
    %c0_i32_1 = arith.constant 0 : i32
    return %arg0, %c0_i32, %c0_i32_0 : i32, i32, i32
  }
}

</mosaic_0001>

<bundles_post_ra>
// kernel: feature_matching_forward.9
= control target key start
LH: loop header
LB: loop body
LE: loop exit
PB: predicated region body
PF: predicated region fallthrough
CT: control target
= control target key end

     0   :  { %s9453_s18 = smov 0   ;;  %s9455_s19 = smov 0   ;;  %s10448_s0 = inlined_call_operand.vmem [shape: bf16[2,34,32,3], index: 0, kind: input, shape index: {}]   ;;  %s10449_s1 = inlined_call_operand.vmem [shape: bf16[2,34,32,3], index: 1, kind: input, shape index: {}]   ;;  %s10450_s2 = inlined_call_operand.vmem [shape: bf16[2,34,32,3], index: 2, kind: input, shape index: {}]   ;;  %s10451_s3 = inlined_call_operand.vmem [shape: bf16[3,3,3,64], index: 3, kind: input, shape index: {}]   ;;  %s10452_s4 = inlined_call_operand.vmem [shape: f32[1,64], index: 4, kind: input, shape index: {}]   ;;  %s10453_s5 = inlined_call_operand.vmem [shape: f32[2,32,32,64], index: 5, kind: output, shape index: {}]  }
   0x1   :  { %s9457_s20 = smov 0   ;;  %s9459_s21 = smov 0  }
   0x2   :  { %s9461_s22 = smov 0  }
   0x3 LB: > { %s24_s23 = sadd.s32 1, %s9412_s20  ;;  %s27_s24 = sadd.s32 1, %s9416_s21  ;;  %s9420_s22 = sphi %s9461_s22, %s15_s22   ;;  %s9416_s21 = sphi %s9459_s21, %s10457_s21   ;;  %s9412_s20 = sphi %s9457_s20, %s10456_s20   ;;  %s9408_s19 = sphi %s9455_s19, %s10455_s19   ;;  %s9404_s18 = sphi %s9453_s18, %s10454_s18  }
   0x4   : > { %p25_p0 = scmp.ge.s32.totalorder %s24_s23, 2  ;;  %p6641_p1 = scmp.ge.s32.totalorder %s9420_s22, 1 }
   0x5   : > { %p221_p2 = scmp.lt.s32.totalorder %s9420_s22, 5 }
   0x6   : > { %s10459_s23 = smov (%p25_p0, %s24_s23), 0  ;;  %s10461_s24 = smov (!%p25_p0, %s27_s24), %s9416_s21 }
   0x7   : > { %p222_p3 = pnand %p6641_p1, %p221_p2  ;;  %p29_p4 = scmp.ge.s32.totalorder %s10461_s24, 2 }
   0x8   : > { %v6653_v0 = vld [vmem:[%s10451_s3 + $0x2] sm:$0x3] (!%p222_p3)  ;;  %vm685_vm0 = vcmask (!%p222_p3), 1040384   ;;  %vm686_vm1 = vcmask (!%p222_p3), 1041408   ;;  %p264_p5 = scmp.lt.s32.totalorder (!%p222_p3), %s9408_s19, 1  ;;  %v9422_v1 = vmov (!%p222_p3), 65535  }
   0x9   : > { %s10463_s24 = smov (%p29_p4, %s10461_s24), 0  ;;  %225 = sbr.rel (%p222_p3) target bundleno = 813 (0x32d), region = 40 }
   0xa   : > { %v687_v2 = vsel (!%p222_p3), %vm685_vm0, 4294967295, %v9422_v1  ;;  %v7045_v3 = vld [vmem:[%s10451_s3 + $0x8] sm:$0x3] (!%p222_p3)  ;;  %v359_v5 = vld [vmem:[%s10451_s3] sm:$0x3] (!%p222_p3)  ;;  %s9512_s9 = sshll.u32 (!%p222_p3), %s9404_s18, 8 }
   0xb   : > { %v9491_v4 = vsel (!%p222_p3), %vm686_vm1, %v687_v2, 0  ;;  %v7176_v6 = vld [vmem:[%s10451_s3 + $0xa] sm:$0x3] (!%p222_p3)  ;;  %vm588_vm2 = vcmask (!%p222_p3), 23552   ;;  %v7307_v11 = vld [vmem:[%s10451_s3 + $0xc] sm:$0x3] (!%p222_p3) }
   0xc   : > { %v690_v7 = vand.u32 (!%p222_p3), %v6653_v0, %v9491_v4  ;;  %v9503_v8 = vand.u32 (!%p222_p3), %v7045_v3, %v9491_v4  ;;  %v1238_v9 = vand.u32 (!%p222_p3), %v9491_v4, %v359_v5  ;;  %v3896_v10 = vand.u32 (!%p222_p3), %v7176_v6, %v9491_v4  ;;  %v6783_v12 = vld [vmem:[%s10451_s3 + $0x4] sm:$0x3] (!%p222_p3)  ;;  %v7438_v5 = vld [vmem:[%s10451_s3 + $0xe] sm:$0x3] (!%p222_p3)  ;;  %s6645_s14 = sshll.u32 (!%p222_p3), %s9404_s18, 4 }
   0xd   : > { %v9542_v17 = vand.u32 (!%p222_p3), %v7307_v11, %v9491_v4  ;;  %v9547_v19 = vand.u32 (!%p222_p3), %v6783_v12, %v9491_v4  ;;  %p282_p6 = scmp.lt.s32.totalorder (!%p222_p3), %s6645_s14, 31  ;;  %vm6428_vm3 = vcmask (!%p222_p3), 523264  }
   0xe   : > { %7944 = vmatprep.subr.bf16.mxu1 (!%p222_p3), %v690_v7  ;;  %8208 = vmatprep.subr.bf16.mxu0 (!%p222_p3), %v9503_v8 }
   0xf   : > { %7945 = vmatpush3.bf16.msra.mxu1 (!%p222_p3), %v690_v7  ;;  %8209 = vmatpush3.bf16.msra.mxu0 (!%p222_p3), %v9503_v8  ;;  %v9659_v7 = vand.u32 (!%p222_p3), %v7438_v5, %v9491_v4 }
  0x10   : > { %s10465_s19 = smov (!%p264_p5, %s9408_s19), 1  ;;  %8010 = vmatprep.subr.bf16.mxu1 %v1238_v9  ;;  %8274 = vmatprep.subr.bf16.mxu0 %v3896_v10  ;;  %s10467_s14 = smov (!%p282_p6, %s6645_s14), 31 }
  0x11   : > { %s9508_s8 = smul.u32 544, %s10465_s19 }
  0x13   : > { %s268_s12 = scalar_lea.vmem %s10448_s0, %s9508_s8  ;;  %s273_s15 = scalar_lea.vmem %s10449_s1, %s9508_s8 }
  0x14   : > { %s9524_s16 = scalar_lea.vmem %s268_s12, %s9512_s9  ;;  %s9530_s26 = scalar_lea.vmem %s273_s15, %s9512_s9 }
  0x15   : > { %v9094_v13 = vld [vmem:[%s9530_s26] sm:$0xff]   ;;  %v9095_v14 = vld [vmem:[%s9530_s26 + $0x10] sm:$0xff]   ;;  %v9096_v15 = vld [vmem:[%s9530_s26 + $0x8] sm:$0xff]   ;;  %s278_s6 = scalar_lea.vmem %s10450_s2, %s9508_s8  ;;  %s6646_s15 = sshll.u32 %s10467_s14, 2 }
  0x16   : > { %7946 = vmatprep.mubr.msk.bf16.mxu1 %vm588_vm2, %v9094_v13  ;;  %8210 = vmatprep.mubr.msk.bf16.mxu0 %vm588_vm2, %v9095_v14  ;;  %v9097_v16 = vld [vmem:[%s9530_s26 + $0x18] sm:$0xff]   ;;  %v9098_v18 = vld [vmem:[%s9530_s26 + $0x10] sm:$0xff]   ;;  %v9099_v20 = vld [vmem:[%s9530_s26 + $0x20] sm:$0xff]   ;;  %s9585_s7 = scalar_lea.vmem %s278_s6, %s9512_s9 }
  0x17   : > { %7947 = vmatmul.mubr.msk.bf16.vlgmr.msra.gmra.mrb[0].mxu1 %vm588_vm2, %v9096_v15  ;;  %8211 = vmatmul.mubr.msk.bf16.vlgmr.msra.gmra.mrb[0].mxu0 %vm588_vm2, %v9097_v16  ;;  %v9100_v21 = vld [vmem:[%s9530_s26 + $0x18] sm:$0xff]   ;;  %v9101_v22 = vld [vmem:[%s9530_s26 + $0x28] sm:$0xff]   ;;  %v9102_v23 = vld [vmem:[%s9530_s26 + $0x20] sm:$0xff]  }
  0x18   : > { %8011 = vmatpush3.bf16.msra.mxu1 %v1238_v9  ;;  %8275 = vmatpush3.bf16.msra.mxu0 %v3896_v10  ;;  %v9103_v24 = vld [vmem:[%s9530_s26 + $0x30] sm:$0xff]   ;;  %v9104_v25 = vld [vmem:[%s9530_s26 + $0x28] sm:$0xff]   ;;  %v9105_v26 = vld [vmem:[%s9530_s26 + $0x38] sm:$0xff]  }
  0x19   : > { %7950 = vmatprep.mubr.msk.bf16.mxu1 %vm588_vm2, %v9098_v18  ;;  %8214 = vmatprep.mubr.msk.bf16.mxu0 %vm588_vm2, %v9099_v20  ;;  %v9106_v27 = vld [vmem:[%s9530_s26 + $0x30] sm:$0xff]   ;;  %v9107_v28 = vld [vmem:[%s9530_s26 + $0x40] sm:$0xff]   ;;  %v9108_v29 = vld [vmem:[%s9530_s26 + $0x38] sm:$0xff]  }
  0x1a   : > { %8340 = vmatprep.subr.bf16.mxu0 %v9542_v17  ;;  %8076 = vmatprep.subr.bf16.mxu1 %v9547_v19  ;;  %v9109_v30 = vld [vmem:[%s9530_s26 + $0x48] sm:$0xff]   ;;  %v9110_v31 = vld [vmem:[%s9530_s26 + $0x40] sm:$0xff]   ;;  %v9111_v32 = vld [vmem:[%s9530_s26 + $0x50] sm:$0xff]  }
  0x1b   : > { %v9112_v33 = vld [vmem:[%s9530_s26 + $0x48] sm:$0xff]   ;;  %v9113_v34 = vld [vmem:[%s9530_s26 + $0x58] sm:$0xff]   ;;  %v9114_v35 = vld [vmem:[%s9530_s26 + $0x50] sm:$0xff]  }
  0x1c   : > { %v9115_v36 = vld [vmem:[%s9530_s26 + $0x60] sm:$0xff]   ;;  %v9116_v37 = vld [vmem:[%s9530_s26 + $0x58] sm:$0xff]   ;;  %v9117_v38 = vld [vmem:[%s9530_s26 + $0x68] sm:$0xff]  }
  0x1d   : > { %v9118_v39 = vld [vmem:[%s9530_s26 + $0x60] sm:$0xff]   ;;  %v9119_v40 = vld [vmem:[%s9530_s26 + $0x70] sm:$0xff]   ;;  %v9120_v41 = vld [vmem:[%s9530_s26 + $0x68] sm:$0xff]  }
  0x1e   : > { %v9121_v42 = vld [vmem:[%s9530_s26 + $0x78] sm:$0xff]   ;;  %v9122_v43 = vld [vmem:[%s9530_s26 + $0x70] sm:$0xff]   ;;  %v9123_v44 = vld [vmem:[%s9530_s26 + $0x80] sm:$0xff]  }
  0x1f   : > { %7951 = vmatmul.mubr.msk.bf16.gmra.mrb[4].mxu1 %vm588_vm2, %v9100_v21  ;;  %8215 = vmatmul.mubr.msk.bf16.gmra.mrb[4].mxu0 %vm588_vm2, %v9101_v22  ;;  %v9124_v45 = vld [vmem:[%s9530_s26 + $0x78] sm:$0xff]   ;;  %v9125_v46 = vld [vmem:[%s9530_s26 + $0x88] sm:$0xff]   ;;  %v9126_v47 = vld [vmem:[%s9530_s26 + $0x80] sm:$0xff]  }
  0x20   : > { %7954 = vmatprep.mubr.msk.bf16.mxu1 %vm588_vm2, %v9102_v23  ;;  %8218 = vmatprep.mubr.msk.bf16.mxu0 %vm588_vm2, %v9103_v24  ;;  %v9127_v48 = vld [vmem:[%s9585_s7 + $0x10] sm:$0xff]   ;;  %v9128_v49 = vld [vmem:[%s9530_s26 + $0x88] sm:$0xff]   ;;  %v9129_v50 = vld [vmem:[%s9585_s7 + $0x18] sm:$0xff]  }
  0x21   : > { %v9130_v51 = vld [vmem:[%s9530_s26 + $0x90] sm:$0xff]   ;;  %v9131_v52 = vld [vmem:[%s9585_s7 + $0x20] sm:$0xff]   ;;  %v9132_v53 = vld [vmem:[%s9530_s26 + $0x98] sm:$0xff]  }
  0x22   : > { %v9133_v54 = vld [vmem:[%s9585_s7 + $0x28] sm:$0xff]   ;;  %v9134_v55 = vld [vmem:[%s9530_s26 + $0xa0] sm:$0xff]   ;;  %v9135_v56 = vld [vmem:[%s9585_s7 + $0x30] sm:$0xff]  }
  0x23   : > { %v9136_v57 = vld [vmem:[%s9530_s26 + $0xa8] sm:$0xff]   ;;  %v9137_v58 = vld [vmem:[%s9585_s7 + $0x38] sm:$0xff]   ;;  %v9138_v59 = vld [vmem:[%s9530_s26 + $0xb0] sm:$0xff]  }
  0x24   : > { %v9139_v60 = vld [vmem:[%s9585_s7 + $0x40] sm:$0xff]   ;;  %v9140_v61 = vld [vmem:[%s9530_s26 + $0xb8] sm:$0xff]   ;;  %v9141_v62 = vld [vmem:[%s9585_s7 + $0x48] sm:$0xff]  }
  0x25   : > { %v9142_v63 = vld [vmem:[%s9530_s26 + $0xc0] sm:$0xff]   ;;  %v9143_v0 = vld [vmem:[%s9585_s7 + $0x50] sm:$0xff]   ;;  %v9144_v1 = vld [vmem:[%s9530_s26 + $0xc8] sm:$0xff]  }
  0x26   : > { %v9145_v2 = vld [vmem:[%s9585_s7 + $0x58] sm:$0xff]   ;;  %v9146_v3 = vld [vmem:[%s9530_s26 + $0xd0] sm:$0xff]   ;;  %v9147_v6 = vld [vmem:[%s9585_s7 + $0x60] sm:$0xff]  }
  0x27   : > { %7955 = vmatmul.mubr.msk.bf16.gmra.mrb[8].mxu1 %vm588_vm2, %v9104_v25  ;;  %8219 = vmatmul.mubr.msk.bf16.gmra.mrb[8].mxu0 %vm588_vm2, %v9105_v26  ;;  %v9148_v9 = vld [vmem:[%s9530_s26 + $0xd8] sm:$0xff]   ;;  %v9149_v10 = vld [vmem:[%s9585_s7 + $0x68] sm:$0xff]   ;;  %v9150_v11 = vld [vmem:[%s9530_s26 + $0xe0] sm:$0xff]  }
  0x28   : > { %7958 = vmatprep.mubr.msk.bf16.mxu1 %vm588_vm2, %v9106_v27  ;;  %8222 = vmatprep.mubr.msk.bf16.mxu0 %vm588_vm2, %v9107_v28  ;;  %v9151_v12 = vld [vmem:[%s9585_s7 + $0x70] sm:$0xff]   ;;  %v9152_v13 = vld [vmem:[%s9530_s26 + $0xe8] sm:$0xff]   ;;  %v9153_v14 = vld [vmem:[%s9585_s7 + $0x78] sm:$0xff]  }
  0x29   : > { %v9154_v15 = vld [vmem:[%s9530_s26 + $0xf0] sm:$0xff]   ;;  %v9155_v16 = vld [vmem:[%s9585_s7 + $0x80] sm:$0xff]   ;;  %v9156_v18 = vld [vmem:[%s9530_s26 + $0xf8] sm:$0xff]  }
  0x2a   : > { %v9157_v20 = vld [vmem:[%s9585_s7 + $0x88] sm:$0xff]   ;;  %v9159_v21 = vld [vmem:[%s9585_s7 + $0x90] sm:$0xff]   ;;  %v9161_v23 = vld [vmem:[%s9585_s7 + $0x98] sm:$0xff]  }
  0x2b   : > { %v9160_v22 = vld [vmem:[%s9524_s16 + $0x8] sm:$0xff]   ;;  %v6914_v24 = vld [vmem:[%s10451_s3 + $0x6] sm:$0x3]  ;;  %v9162_v25 = vld [vmem:[%s9524_s16 + $0x10] sm:$0xff]  }
  0x2c   : > { %v9163_v26 = vld [vmem:[%s9585_s7 + $0xa0] sm:$0xff]   ;;  %v9698_v27 = vand.u32 %v6914_v24, %v9491_v4  ;;  %v9164_v28 = vld [vmem:[%s9524_s16 + $0x18] sm:$0xff]  }
  0x2d   : > { %v9204_v5 = vld [vmem:[%s9524_s16 + $0xb8] sm:$0xff]  }
  0x2e   : > { %v9221_v24 = vld [vmem:[%s9524_s16 + $0x98] sm:$0xff]  }
  0x2f   : > { %7959 = vmatmul.mubr.msk.bf16.gmra.mrb[12].mxu1 %vm588_vm2, %v9108_v29  ;;  %8223 = vmatmul.mubr.msk.bf16.gmra.mrb[12].mxu0 %vm588_vm2, %v9109_v30  ;;  %v9165_v29 = vld [vmem:[%s9585_s7 + $0xa8] sm:$0xff]   ;;  %v9166_v30 = vld [vmem:[%s9524_s16 + $0x20] sm:$0xff]  }
  0x30   : > { %7962 = vmatprep.mubr.msk.bf16.mxu1 %vm588_vm2, %v9110_v31  ;;  %8226 = vmatprep.mubr.msk.bf16.mxu0 %vm588_vm2, %v9111_v32  ;;  %v9167_v31 = vld [vmem:[%s9585_s7 + $0xb0] sm:$0xff]   ;;  %v9169_v32 = vld [vmem:[%s9585_s7 + $0xb8] sm:$0xff]  }
  0x37   : > { %7963 = vmatmul.mubr.msk.bf16.gmra.mrb[16].mxu1 %vm588_vm2, %v9112_v33  ;;  %8227 = vmatmul.mubr.msk.bf16.gmra.mrb[16].mxu0 %vm588_vm2, %v9113_v34  ;;  %v9170_v33 = vld [vmem:[%s9524_s16 + $0x30] sm:$0xff]   ;;  %v9171_v34 = vld [vmem:[%s9585_s7 + $0xc0] sm:$0xff]  }
  0x38   : > { %7966 = vmatprep.mubr.msk.bf16.mxu1 %vm588_vm2, %v9114_v35  ;;  %8230 = vmatprep.mubr.msk.bf16.mxu0 %vm588_vm2, %v9115_v36  ;;  %v9172_v35 = vld [vmem:[%s9524_s16 + $0x38] sm:$0xff]   ;;  %v9173_v36 = vld [vmem:[%s9585_s7 + $0xc8] sm:$0xff]  }
  0x3f   : > { %7967 = vmatmul.mubr.msk.bf16.gmra.mrb[20].mxu1 %vm588_vm2, %v9116_v37  ;;  %8231 = vmatmul.mubr.msk.bf16.gmra.mrb[20].mxu0 %vm588_vm2, %v9117_v38  ;;  %v9174_v37 = vld [vmem:[%s9524_s16 + $0x40] sm:$0xff]   ;;  %v9175_v38 = vld [vmem:[%s9585_s7 + $0xd0] sm:$0xff]  }
  0x40   : > { %7970 = vmatprep.mubr.msk.bf16.mxu1 %vm588_vm2, %v9118_v39  ;;  %8234 = vmatprep.mubr.msk.bf16.mxu0 %vm588_vm2, %v9119_v40  ;;  %v9176_v39 = vld [vmem:[%s9524_s16 + $0x48] sm:$0xff]   ;;  %v9177_v40 = vld [vmem:[%s9585_s7 + $0xd8] sm:$0xff]  }
  0x47   : > { %7971 = vmatmul.mubr.msk.bf16.gmra.mrb[24].mxu1 %vm588_vm2, %v9120_v41  ;;  %8235 = vmatmul.mubr.msk.bf16.gmra.mrb[24].mxu0 %vm588_vm2, %v9121_v42  ;;  %v9178_v41 = vld [vmem:[%s9524_s16 + $0x50] sm:$0xff]   ;;  %v9179_v42 = vld [vmem:[%s9585_s7 + $0xe0] sm:$0xff]  }
  0x48   : > { %7974 = vmatprep.mubr.msk.bf16.mxu1 %vm588_vm2, %v9122_v43  ;;  %8238 = vmatprep.mubr.msk.bf16.mxu0 %vm588_vm2, %v9123_v44  ;;  %v9180_v43 = vld [vmem:[%s9524_s16 + $0x58] sm:$0xff]   ;;  %v9181_v44 = vld [vmem:[%s9585_s7 + $0xe8] sm:$0xff]  }
  0x4f   : > { %7975 = vmatmul.mubr.msk.bf16.gmra.mrb[28].mxu1 %vm588_vm2, %v9124_v45  ;;  %8239 = vmatmul.mubr.msk.bf16.gmra.mrb[28].mxu0 %vm588_vm2, %v9125_v46  ;;  %v9182_v45 = vld [vmem:[%s9524_s16 + $0x60] sm:$0xff]   ;;  %v9183_v46 = vld [vmem:[%s9585_s7 + $0xf0] sm:$0xff]  }
  0x50   : > { %7978 = vmatprep.mubr.msk.bf16.mxu1 %vm588_vm2, %v9126_v47  ;;  %8276 = vmatprep.mubr.msk.bf16.mxu0 %vm588_vm2, %v9127_v48  ;;  %v9184_v47 = vld [vmem:[%s9524_s16 + $0x68] sm:$0xff]   ;;  %v9185_v48 = vld [vmem:[%s9585_s7 + $0xf8] sm:$0xff]  }
  0x57   : > { %7979 = vmatmul.mubr.msk.bf16.gmra.mrb[32].mxu1 %vm588_vm2, %v9128_v49  ;;  %8277 = vmatmul.mubr.msk.bf16.vlgmr.msra.gmra.mrb[0].mxu0 %vm588_vm2, %v9129_v50  ;;  %v9186_v49 = vld [vmem:[%s9524_s16 + $0x70] sm:$0xff]   ;;  %v9187_v50 = vld [vmem:[%s9585_s7 + $0x100] sm:$0xff]  }
  0x58   : > { %7982 = vmatprep.mubr.msk.bf16.mxu1 %vm588_vm2, %v9130_v51  ;;  %8341 = vmatpush3.bf16.msra.mxu0 %v9542_v17  ;;  %v9158_v17 = vld [vmem:[%s9524_s16] sm:$0xff]   ;;  %v9188_v51 = vld [vmem:[%s9524_s16 + $0x78] sm:$0xff]  }
  0x59   : > { %8280 = vmatprep.mubr.msk.bf16.mxu0 %vm588_vm2, %v9131_v52  ;;  %8406 = vmatprep.subr.bf16.mxu0 %v9659_v7  ;;  %v9189_v52 = vld [vmem:[%s9585_s7 + $0x108] sm:$0xff]  }
  0x5f   : > { %7983 = vmatmul.mubr.msk.bf16.gmra.mrb[36].mxu1 %vm588_vm2, %v9132_v53  ;;  %8281 = vmatmul.mubr.msk.bf16.gmra.mrb[4].mxu0 %vm588_vm2, %v9133_v54  ;;  %v9190_v53 = vld [vmem:[%s9524_s16 + $0x80] sm:$0xff]  }
  0x60   : > { %7986 = vmatprep.mubr.msk.bf16.mxu1 %vm588_vm2, %v9134_v55  ;;  %8284 = vmatprep.mubr.msk.bf16.mxu0 %vm588_vm2, %v9135_v56  ;;  %v9191_v54 = vld [vmem:[%s9524_s16 + $0x20] sm:$0xff]   ;;  %v9192_v55 = vld [vmem:[%s9524_s16 + $0x88] sm:$0xff]   ;;  %v7569_v56 = vld [vmem:[%s10451_s3 + $0x10] sm:$0x3] }
  0x67   : > { %7987 = vmatmul.mubr.msk.bf16.gmra.mrb[40].mxu1 %vm588_vm2, %v9136_v57  ;;  %8285 = vmatmul.mubr.msk.bf16.gmra.mrb[8].mxu0 %vm588_vm2, %v9137_v58  ;;  %v9193_v57 = vld [vmem:[%s9524_s16 + $0x28] sm:$0xff]   ;;  %v9194_v58 = vld [vmem:[%s9524_s16 + $0x90] sm:$0xff]  }
  0x68   : > { %7990 = vmatprep.mubr.msk.bf16.mxu1 %vm588_vm2, %v9138_v59  ;;  %8288 = vmatprep.mubr.msk.bf16.mxu0 %vm588_vm2, %v9139_v60  ;;  %v9195_v59 = vld [vmem:[%s9524_s16 + $0x30] sm:$0xff]   ;;  %v9770_v60 = vand.u32 %v7569_v56, %v9491_v4  ;;  %v9199_v4 = vld [vmem:[%s9524_s16 + $0x40] sm:$0xff]  }
  0x69   : > { %v9254_v56 = vld [vmem:[%s9585_s7 + $0x80] sm:$0xff]  }
  0x6f   : > { %7991 = vmatmul.mubr.msk.bf16.gmra.mrb[44].mxu1 %vm588_vm2, %v9140_v61  ;;  %8289 = vmatmul.mubr.msk.bf16.gmra.mrb[12].mxu0 %vm588_vm2, %v9141_v62  ;;  %v9196_v61 = vld [vmem:[%s9524_s16 + $0x98] sm:$0xff]  }
  0x70   : > { %7994 = vmatprep.mubr.msk.bf16.mxu1 %vm588_vm2, %v9142_v63  ;;  %8292 = vmatprep.mubr.msk.bf16.mxu0 %vm588_vm2, %v9143_v0  ;;  %v9197_v62 = vld [vmem:[%s9524_s16 + $0x38] sm:$0xff]   ;;  %v9198_v63 = vld [vmem:[%s9524_s16 + $0xa0] sm:$0xff]   ;;  %v9200_v0 = vld [vmem:[%s9524_s16 + $0xa8] sm:$0xff]  }
  0x77   : > { %7995 = vmatmul.mubr.msk.bf16.gmra.mrb[48].mxu1 %vm588_vm2, %v9144_v1  ;;  %8293 = vmatmul.mubr.msk.bf16.gmra.mrb[16].mxu0 %vm588_vm2, %v9145_v2  ;;  %v9201_v1 = vld [vmem:[%s9524_s16 + $0x48] sm:$0xff]   ;;  %v9202_v2 = vld [vmem:[%s9524_s16 + $0xb0] sm:$0xff]  }
  0x78   : > { %7998 = vmatprep.mubr.msk.bf16.mxu1 %vm588_vm2, %v9146_v3  ;;  %8296 = vmatprep.mubr.msk.bf16.mxu0 %vm588_vm2, %v9147_v6  ;;  %v9203_v3 = vld [vmem:[%s9524_s16 + $0x50] sm:$0xff]   ;;  %v9205_v6 = vld [vmem:[%s9524_s16 + $0x58] sm:$0xff]  }
  0x7f   : > { %7999 = vmatmul.mubr.msk.bf16.gmra.mrb[52].mxu1 %vm588_vm2, %v9148_v9  ;;  %8297 = vmatmul.mubr.msk.bf16.gmra.mrb[20].mxu0 %vm588_vm2, %v9149_v10  ;;  %v9207_v9 = vld [vmem:[%s9524_s16 + $0x60] sm:$0xff]   ;;  %v9208_v10 = vld [vmem:[%s9524_s16 + $0xc8] sm:$0xff]  }
  0x80   : > { %8002 = vmatprep.mubr.msk.bf16.mxu1 %vm588_vm2, %v9150_v11  ;;  %8300 = vmatprep.mubr.msk.bf16.mxu0 %vm588_vm2, %v9151_v12  ;;  %v9209_v11 = vld [vmem:[%s9524_s16 + $0x68] sm:$0xff]   ;;  %v9210_v12 = vld [vmem:[%s9524_s16 + $0xd0] sm:$0xff]  }
  0x87   : > { %8003 = vmatmul.mubr.msk.bf16.gmra.mrb[56].mxu1 %vm588_vm2, %v9152_v13  ;;  %8301 = vmatmul.mubr.msk.bf16.gmra.mrb[24].mxu0 %vm588_vm2, %v9153_v14  ;;  %v9211_v13 = vld [vmem:[%s9524_s16 + $0x70] sm:$0xff]   ;;  %v9212_v14 = vld [vmem:[%s9524_s16 + $0xd8] sm:$0xff]  }
  0x88   : > { %8006 = vmatprep.mubr.msk.bf16.mxu1 %vm588_vm2, %v9154_v15  ;;  %8304 = vmatprep.mubr.msk.bf16.mxu0 %vm588_vm2, %v9155_v16  ;;  %v9213_v15 = vld [vmem:[%s9524_s16 + $0x78] sm:$0xff]   ;;  %v9214_v16 = vld [vmem:[%s9524_s16 + $0xe0] sm:$0xff]  }
  0x8f   : > { %8007 = vmatmul.mubr.msk.bf16.gmra.mrb[60].mxu1 %vm588_vm2, %v9156_v18  ;;  %8305 = vmatmul.mubr.msk.bf16.gmra.mrb[28].mxu0 %vm588_vm2, %v9157_v20  ;;  %v9216_v18 = vld [vmem:[%s9524_s16 + $0xe8] sm:$0xff]  }
  0x90   : > { %8012 = vmatprep.mubr.msk.bf16.mxu1 %vm588_vm2, %v9158_v17  ;;  %8308 = vmatprep.mubr.msk.bf16.mxu0 %vm588_vm2, %v9159_v21  ;;  %v9215_v17 = vld [vmem:[%s9524_s16 + $0x80] sm:$0xff]   ;;  %v9217_v20 = vld [vmem:[%s9524_s16 + $0x88] sm:$0xff]   ;;  %v9218_v21 = vld [vmem:[%s9524_s16 + $0xf0] sm:$0xff]  }
  0x97   : > { %8013 = vmatmul.mubr.msk.bf16.vlgmr.msra.gmra.mrb[0].mxu1 %vm588_vm2, %v9160_v22  ;;  %8309 = vmatmul.mubr.msk.bf16.gmra.mrb[32].mxu0 %vm588_vm2, %v9161_v23  ;;  %v9219_v22 = vld [vmem:[%s9524_s16 + $0x90] sm:$0xff]   ;;  %v9220_v23 = vld [vmem:[%s9524_s16 + $0xf8] sm:$0xff]  }
  0x98   : > { %8077 = vmatpush3.bf16.msra.mxu1 %v9547_v19  ;;  %8016 = vmatprep.mubr.msk.bf16.mxu1 %vm588_vm2, %v9162_v25  ;;  %v9168_v19 = vld [vmem:[%s9524_s16 + $0x28] sm:$0xff]   ;;  %v9222_v25 = vld [vmem:[%s9585_s7] sm:$0xff]  }
  0x99   : > { %8312 = vmatprep.mubr.msk.bf16.mxu0 %vm588_vm2, %v9163_v26  ;;  %8142 = vmatprep.subr.bf16.mxu1 %v9698_v27  ;;  %v9223_v26 = vld [vmem:[%s9524_s16 + $0xa0] sm:$0xff]  }
  0x9f   : > { %8017 = vmatmul.mubr.msk.bf16.gmra.mrb[4].mxu1 %vm588_vm2, %v9164_v28  ;;  %8313 = vmatmul.mubr.msk.bf16.gmra.mrb[36].mxu0 %vm588_vm2, %v9165_v29  ;;  %v9224_v28 = vld [vmem:[%s9585_s7 + $0x8] sm:$0xff]  }
  0xa0   : > { %8020 = vmatprep.mubr.msk.bf16.mxu1 %vm588_vm2, %v9166_v30  ;;  %8316 = vmatprep.mubr.msk.bf16.mxu0 %vm588_vm2, %v9167_v31  ;;  %v9225_v29 = vld [vmem:[%s9524_s16 + $0xa8] sm:$0xff]   ;;  %v9226_v30 = vld [vmem:[%s9585_s7 + $0x10] sm:$0xff]  }
  0xa1   : > { %v9227_v31 = vld [vmem:[%s9524_s16 + $0xb0] sm:$0xff]  }
  0xa7   : > { %8021 = vmatmul.mubr.msk.bf16.gmra.mrb[8].mxu1 %vm588_vm2, %v9168_v19  ;;  %8317 = vmatmul.mubr.msk.bf16.gmra.mrb[40].mxu0 %vm588_vm2, %v9169_v32  ;;  %v9228_v19 = vld [vmem:[%s9585_s7 + $0x18] sm:$0xff]  }
  0xa8   : > { %8024 = vmatprep.mubr.msk.bf16.mxu1 %vm588_vm2, %v9170_v33  ;;  %8320 = vmatprep.mubr.msk.bf16.mxu0 %vm588_vm2, %v9171_v34  ;;  %v9229_v32 = vld [vmem:[%s9524_s16 + $0xb8] sm:$0xff]   ;;  %v9230_v33 = vld [vmem:[%s9585_s7 + $0x20] sm:$0xff]  }
  0xa9   : > { %v9231_v34 = vld [vmem:[%s9524_s16 + $0xc0] sm:$0xff]  }
  0xaf   : > { %8025 = vmatmul.mubr.msk.bf16.gmra.mrb[12].mxu1 %vm588_vm2, %v9172_v35  ;;  %8321 = vmatmul.mubr.msk.bf16.gmra.mrb[44].mxu0 %vm588_vm2, %v9173_v36  ;;  %v9233_v35 = vld [vmem:[%s9524_s16 + $0xc8] sm:$0xff]   ;;  %v9234_v36 = vld [vmem:[%s9585_s7 + $0x30] sm:$0xff]  }
  0xb0   : > { %8028 = vmatprep.mubr.msk.bf16.mxu1 %vm588_vm2, %v9174_v37  ;;  %8324 = vmatprep.mubr.msk.bf16.mxu0 %vm588_vm2, %v9175_v38  ;;  %v9235_v37 = vld [vmem:[%s9524_s16 + $0xd0] sm:$0xff]   ;;  %v9236_v38 = vld [vmem:[%s9585_s7 + $0x38] sm:$0xff]  }
  0xb7   : > { %8029 = vmatmul.mubr.msk.bf16.gmra.mrb[16].mxu1 %vm588_vm2, %v9176_v39  ;;  %8325 = vmatmul.mubr.msk.bf16.gmra.mrb[48].mxu0 %vm588_vm2, %v9177_v40  ;;  %v9237_v39 = vld [vmem:[%s9524_s16 + $0xd8] sm:$0xff]   ;;  %v9238_v40 = vld [vmem:[%s9585_s7 + $0x40] sm:$0xff]  }
  0xb8   : > { %8032 = vmatprep.mubr.msk.bf16.mxu1 %vm588_vm2, %v9178_v41  ;;  %8328 = vmatprep.mubr.msk.bf16.mxu0 %vm588_vm2, %v9179_v42  ;;  %v9239_v41 = vld [vmem:[%s9524_s16 + $0xe0] sm:$0xff]   ;;  %v9240_v42 = vld [vmem:[%s9585_s7 + $0x48] sm:$0xff]  }
  0xbf   : > { %8033 = vmatmul.mubr.msk.bf16.gmra.mrb[20].mxu1 %vm588_vm2, %v9180_v43  ;;  %8329 = vmatmul.mubr.msk.bf16.gmra.mrb[52].mxu0 %vm588_vm2, %v9181_v44  ;;  %v9241_v43 = vld [vmem:[%s9524_s16 + $0xe8] sm:$0xff]   ;;  %v9242_v44 = vld [vmem:[%s9585_s7 + $0x50] sm:$0xff]  }
  0xc0   : > { %8036 = vmatprep.mubr.msk.bf16.mxu1 %vm588_vm2, %v9182_v45  ;;  %8332 = vmatprep.mubr.msk.bf16.mxu0 %vm588_vm2, %v9183_v46  ;;  %v9243_v45 = vld [vmem:[%s9524_s16 + $0xf0] sm:$0xff]   ;;  %v9244_v46 = vld [vmem:[%s9585_s7 + $0x58] sm:$0xff]  }
  0xc7   : > { %8037 = vmatmul.mubr.msk.bf16.gmra.mrb[24].mxu1 %vm588_vm2, %v9184_v47  ;;  %8333 = vmatmul.mubr.msk.bf16.gmra.mrb[56].mxu0 %vm588_vm2, %v9185_v48  ;;  %v9245_v47 = vld [vmem:[%s9524_s16 + $0xf8] sm:$0xff]   ;;  %v9246_v48 = vld [vmem:[%s9585_s7 + $0x60] sm:$0xff]  }
  0xc8   : > { %8040 = vmatprep.mubr.msk.bf16.mxu1 %vm588_vm2, %v9186_v49  ;;  %8336 = vmatprep.mubr.msk.bf16.mxu0 %vm588_vm2, %v9187_v50  ;;  %v9247_v49 = vld [vmem:[%s9524_s16 + $0x100] sm:$0xff]   ;;  %v9248_v50 = vld [vmem:[%s9585_s7 + $0x68] sm:$0xff]  }
  0xcf   : > { %8041 = vmatmul.mubr.msk.bf16.gmra.mrb[28].mxu1 %vm588_vm2, %v9188_v51  ;;  %8337 = vmatmul.mubr.msk.bf16.gmra.mrb[60].mxu0 %vm588_vm2, %v9189_v52  ;;  %v9249_v51 = vld [vmem:[%s9524_s16 + $0x108] sm:$0xff]   ;;  %v9250_v52 = vld [vmem:[%s9585_s7 + $0x70] sm:$0xff]  }
  0xd0   : > { %8044 = vmatprep.mubr.msk.bf16.mxu1 %vm588_vm2, %v9190_v53  ;;  %8342 = vmatprep.mubr.msk.bf16.mxu0 %vm588_vm2, %v9191_v54  ;;  %v9251_v53 = vld [vmem:[%s9524_s16 + $0x110] sm:$0xff]   ;;  %v9252_v54 = vld [vmem:[%s9585_s7 + $0x78] sm:$0xff]  }
  0xd7   : > { %8045 = vmatmul.mubr.msk.bf16.gmra.mrb[32].mxu1 %vm588_vm2, %v9192_v55  ;;  %8343 = vmatmul.mubr.msk.bf16.vlgmr.msra.gmra.mrb[0].mxu0 %vm588_vm2, %v9193_v57  ;;  %v9253_v55 = vld [vmem:[%s9524_s16 + $0x118] sm:$0xff]   ;;  %v9255_v57 = vld [vmem:[%s9530_s26 + $0x20] sm:$0xff]  }
  0xd8   : > { %8048 = vmatprep.mubr.msk.bf16.mxu1 %vm588_vm2, %v9194_v58  ;;  %8407 = vmatpush3.bf16.msra.mxu0 %v9659_v7  ;;  %v9206_v7 = vld [vmem:[%s9524_s16 + $0xc0] sm:$0xff]   ;;  %v9256_v58 = vld [vmem:[%s9585_s7 + $0x88] sm:$0xff]  }
  0xd9   : > { %8346 = vmatprep.mubr.msk.bf16.mxu0 %vm588_vm2, %v9195_v59  ;;  %8472 = vmatprep.subr.bf16.mxu0 %v9770_v60  ;;  %v9257_v59 = vld [vmem:[%s9530_s26 + $0x28] sm:$0xff]  }
  0xdf   : > { %8049 = vmatmul.mubr.msk.bf16.gmra.mrb[36].mxu1 %vm588_vm2, %v9196_v61  ;;  %8347 = vmatmul.mubr.msk.bf16.gmra.mrb[4].mxu0 %vm588_vm2, %v9197_v62  ;;  %v9258_v61 = vld [vmem:[%s9585_s7 + $0x90] sm:$0xff]  }
  0xe0   : > { %8052 = vmatprep.mubr.msk.bf16.mxu1 %vm588_vm2, %v9198_v63  ;;  %8350 = vmatprep.mubr.msk.bf16.mxu0 %vm588_vm2, %v9199_v4  ;;  %v9259_v62 = vld [vmem:[%s9530_s26 + $0x30] sm:$0xff]   ;;  %v9260_v63 = vld [vmem:[%s9585_s7 + $0x98] sm:$0xff]  }
  0xe1   : > { %v9261_v4 = vld [vmem:[%s9530_s26 + $0x38] sm:$0xff]  }
  0xe7   : > { %8053 = vmatmul.mubr.msk.bf16.gmra.mrb[40].mxu1 %vm588_vm2, %v9200_v0  ;;  %8351 = vmatmul.mubr.msk.bf16.gmra.mrb[8].mxu0 %vm588_vm2, %v9201_v1  ;;  %v9262_v0 = vld [vmem:[%s9585_s7 + $0xa0] sm:$0xff]  }
  0xe8   : > { %8056 = vmatprep.mubr.msk.bf16.mxu1 %vm588_vm2, %v9202_v2  ;;  %8354 = vmatprep.mubr.msk.bf16.mxu0 %vm588_vm2, %v9203_v3  ;;  %v9263_v1 = vld [vmem:[%s9530_s26 + $0x40] sm:$0xff]   ;;  %v9264_v2 = vld [vmem:[%s9585_s7 + $0xa8] sm:$0xff]   ;;  %v9266_v3 = vld [vmem:[%s9585_s7 + $0xb0] sm:$0xff]  }
  0xef   : > { %8057 = vmatmul.mubr.msk.bf16.gmra.mrb[44].mxu1 %vm588_vm2, %v9204_v5  ;;  %8355 = vmatmul.mubr.msk.bf16.gmra.mrb[12].mxu0 %vm588_vm2, %v9205_v6  ;;  %v9267_v5 = vld [vmem:[%s9530_s26 + $0x50] sm:$0xff]   ;;  %v9268_v6 = vld [vmem:[%s9585_s7 + $0xb8] sm:$0xff]  }
  0xf0   : > { %8060 = vmatprep.mubr.msk.bf16.mxu1 %vm588_vm2, %v9206_v7  ;;  %8358 = vmatprep.mubr.msk.bf16.mxu0 %vm588_vm2, %v9207_v9  ;;  %v9269_v7 = vld [vmem:[%s9530_s26 + $0x58] sm:$0xff]   ;;  %v9270_v9 = vld [vmem:[%s9585_s7 + $0xc0] sm:$0xff]  }
  0xf7   : > { %8061 = vmatmul.mubr.msk.bf16.gmra.mrb[48].mxu1 %vm588_vm2, %v9208_v10  ;;  %8359 = vmatmul.mubr.msk.bf16.gmra.mrb[16].mxu0 %vm588_vm2, %v9209_v11  ;;  %v9271_v10 = vld [vmem:[%s9530_s26 + $0x60] sm:$0xff]   ;;  %v9272_v11 = vld [vmem:[%s9585_s7 + $0xc8] sm:$0xff]  }
  0xf8   : > { %8064 = vmatprep.mubr.msk.bf16.mxu1 %vm588_vm2, %v9210_v12  ;;  %8362 = vmatprep.mubr.msk.bf16.mxu0 %vm588_vm2, %v9211_v13  ;;  %v9273_v12 = vld [vmem:[%s9530_s26 + $0x68] sm:$0xff]   ;;  %v9274_v13 = vld [vmem:[%s9585_s7 + $0xd0] sm:$0xff]  }
  0xff   : > { %8065 = vmatmul.mubr.msk.bf16.gmra.mrb[52].mxu1 %vm588_vm2, %v9212_v14  ;;  %8363 = vmatmul.mubr.msk.bf16.gmra.mrb[20].mxu0 %vm588_vm2, %v9213_v15  ;;  %v9275_v14 = vld [vmem:[%s9530_s26 + $0x70] sm:$0xff]   ;;  %v9276_v15 = vld [vmem:[%s9585_s7 + $0xd8] sm:$0xff]  }
 0x100   : > { %8068 = vmatprep.mubr.msk.bf16.mxu1 %vm588_vm2, %v9214_v16  ;;  %8366 = vmatprep.mubr.msk.bf16.mxu0 %vm588_vm2, %v9215_v17  ;;  %v9277_v16 = vld [vmem:[%s9530_s26 + $0x78] sm:$0xff]   ;;  %v9278_v17 = vld [vmem:[%s9585_s7 + $0xe0] sm:$0xff]  }
 0x107   : > { %8069 = vmatmul.mubr.msk.bf16.gmra.mrb[56].mxu1 %vm588_vm2, %v9216_v18  ;;  %8367 = vmatmul.mubr.msk.bf16.gmra.mrb[24].mxu0 %vm588_vm2, %v9217_v20  ;;  %v9279_v18 = vld [vmem:[%s9530_s26 + $0x80] sm:$0xff]   ;;  %v9280_v20 = vld [vmem:[%s9585_s7 + $0xe8] sm:$0xff]  }
 0x108   : > { %8072 = vmatprep.mubr.msk.bf16.mxu1 %vm588_vm2, %v9218_v21  ;;  %8370 = vmatprep.mubr.msk.bf16.mxu0 %vm588_vm2, %v9219_v22  ;;  %v9281_v21 = vld [vmem:[%s9530_s26 + $0x88] sm:$0xff]   ;;  %v9282_v22 = vld [vmem:[%s9585_s7 + $0xf0] sm:$0xff]  }
 0x10f   : > { %8073 = vmatmul.mubr.msk.bf16.gmra.mrb[60].mxu1 %vm588_vm2, %v9220_v23  ;;  %8371 = vmatmul.mubr.msk.bf16.gmra.mrb[28].mxu0 %vm588_vm2, %v9221_v24  ;;  %v9283_v23 = vld [vmem:[%s9530_s26 + $0x90] sm:$0xff]   ;;  %v9284_v24 = vld [vmem:[%s9585_s7 + $0xf8] sm:$0xff]  }
 0x110   : > { %8078 = vmatprep.mubr.msk.bf16.mxu1 %vm588_vm2, %v9222_v25  ;;  %8374 = vmatprep.mubr.msk.bf16.mxu0 %vm588_vm2, %v9223_v26  ;;  %v9285_v25 = vld [vmem:[%s9530_s26 + $0x98] sm:$0xff]   ;;  %v9286_v26 = vld [vmem:[%s9524_s16 + $0x10] sm:$0xff]  }
 0x117   : > { %8079 = vmatmul.mubr.msk.bf16.vlgmr.msra.gmra.mrb[0].mxu1 %vm588_vm2, %v9224_v28  ;;  %8375 = vmatmul.mubr.msk.bf16.gmra.mrb[32].mxu0 %vm588_vm2, %v9225_v29  ;;  %v9287_v28 = vld [vmem:[%s9530_s26 + $0xa0] sm:$0xff]   ;;  %v9288_v29 = vld [vmem:[%s9524_s16 + $0x18] sm:$0xff]  }
 0x118   : > { %8143 = vmatpush3.bf16.msra.mxu1 %v9698_v27  ;;  %8082 = vmatprep.mubr.msk.bf16.mxu1 %vm588_vm2, %v9226_v30  ;;  %v9232_v27 = vld [vmem:[%s9585_s7 + $0x28] sm:$0xff]  }
 0x119   : > { %8378 = vmatprep.mubr.msk.bf16.mxu0 %vm588_vm2, %v9227_v31  ;;  %8538 = vmatprep.subr.bf16.mxu1 %v9503_v8  ;;  %v9289_v30 = vld [vmem:[%s9530_s26 + $0xa8] sm:$0xff]   ;;  %v9290_v31 = vld [vmem:[%s9524_s16 + $0x20] sm:$0xff]  }
 0x11f   : > { %8083 = vmatmul.mubr.msk.bf16.gmra.mrb[4].mxu1 %vm588_vm2, %v9228_v19  ;;  %8379 = vmatmul.mubr.msk.bf16.gmra.mrb[36].mxu0 %vm588_vm2, %v9229_v32  ;;  %v9291_v19 = vld [vmem:[%s9530_s26 + $0xb0] sm:$0xff]   ;;  %v9292_v32 = vld [vmem:[%s9524_s16 + $0x28] sm:$0xff]  }
 0x120   : > { %8086 = vmatprep.mubr.msk.bf16.mxu1 %vm588_vm2, %v9230_v33  ;;  %8382 = vmatprep.mubr.msk.bf16.mxu0 %vm588_vm2, %v9231_v34  ;;  %v9293_v33 = vld [vmem:[%s9530_s26 + $0xb8] sm:$0xff]   ;;  %v9294_v34 = vld [vmem:[%s9524_s16 + $0x30] sm:$0xff]  }
 0x127   : > { %8087 = vmatmul.mubr.msk.bf16.gmra.mrb[8].mxu1 %vm588_vm2, %v9232_v27  ;;  %8383 = vmatmul.mubr.msk.bf16.gmra.mrb[40].mxu0 %vm588_vm2, %v9233_v35  ;;  %v9295_v27 = vld [vmem:[%s9530_s26 + $0xc0] sm:$0xff]   ;;  %v9297_v35 = vld [vmem:[%s9530_s26 + $0xc8] sm:$0xff]  }
 0x128   : > { %8090 = vmatprep.mubr.msk.bf16.mxu1 %vm588_vm2, %v9234_v36  ;;  %8386 = vmatprep.mubr.msk.bf16.mxu0 %vm588_vm2, %v9235_v37  ;;  %v9298_v36 = vld [vmem:[%s9524_s16 + $0x40] sm:$0xff]   ;;  %v9299_v37 = vld [vmem:[%s9530_s26 + $0xd0] sm:$0xff]  }
 0x12f   : > { %8091 = vmatmul.mubr.msk.bf16.gmra.mrb[12].mxu1 %vm588_vm2, %v9236_v38  ;;  %8387 = vmatmul.mubr.msk.bf16.gmra.mrb[44].mxu0 %vm588_vm2, %v9237_v39  ;;  %v9300_v38 = vld [vmem:[%s9524_s16 + $0x48] sm:$0xff]   ;;  %v9301_v39 = vld [vmem:[%s9530_s26 + $0xd8] sm:$0xff]  }
 0x130   : > { %8094 = vmatprep.mubr.msk.bf16.mxu1 %vm588_vm2, %v9238_v40  ;;  %8390 = vmatprep.mubr.msk.bf16.mxu0 %vm588_vm2, %v9239_v41  ;;  %v9302_v40 = vld [vmem:[%s9524_s16 + $0x50] sm:$0xff]   ;;  %v9303_v41 = vld [vmem:[%s9530_s26 + $0xe0] sm:$0xff]  }
 0x137   : > { %8095 = vmatmul.mubr.msk.bf16.gmra.mrb[16].mxu1 %vm588_vm2, %v9240_v42  ;;  %8391 = vmatmul.mubr.msk.bf16.gmra.mrb[48].mxu0 %vm588_vm2, %v9241_v43  ;;  %v9304_v42 = vld [vmem:[%s9524_s16 + $0x58] sm:$0xff]   ;;  %v9305_v43 = vld [vmem:[%s9530_s26 + $0xe8] sm:$0xff]  }
 0x138   : > { %8098 = vmatprep.mubr.msk.bf16.mxu1 %vm588_vm2, %v9242_v44  ;;  %8394 = vmatprep.mubr.msk.bf16.mxu0 %vm588_vm2, %v9243_v45  ;;  %v9306_v44 = vld [vmem:[%s9524_s16 + $0x60] sm:$0xff]   ;;  %v9307_v45 = vld [vmem:[%s9530_s26 + $0xf0] sm:$0xff]  }
 0x13f   : > { %8099 = vmatmul.mubr.msk.bf16.gmra.mrb[20].mxu1 %vm588_vm2, %v9244_v46  ;;  %8395 = vmatmul.mubr.msk.bf16.gmra.mrb[52].mxu0 %vm588_vm2, %v9245_v47  ;;  %v9308_v46 = vld [vmem:[%s9524_s16 + $0x68] sm:$0xff]   ;;  %v9309_v47 = vld [vmem:[%s9530_s26 + $0xf8] sm:$0xff]  }
 0x140   : > { %8102 = vmatprep.mubr.msk.bf16.mxu1 %vm588_vm2, %v9246_v48  ;;  %8398 = vmatprep.mubr.msk.bf16.mxu0 %vm588_vm2, %v9247_v49  ;;  %v9310_v48 = vld [vmem:[%s9524_s16 + $0x70] sm:$0xff]   ;;  %v9311_v49 = vld [vmem:[%s9530_s26 + $0x100] sm:$0xff]  }
 0x147   : > { %8103 = vmatmul.mubr.msk.bf16.gmra.mrb[24].mxu1 %vm588_vm2, %v9248_v50  ;;  %8399 = vmatmul.mubr.msk.bf16.gmra.mrb[56].mxu0 %vm588_vm2, %v9249_v51  ;;  %v9312_v50 = vld [vmem:[%s9524_s16 + $0x78] sm:$0xff]   ;;  %v9313_v51 = vld [vmem:[%s9530_s26 + $0x108] sm:$0xff]  }
 0x148   : > { %8106 = vmatprep.mubr.msk.bf16.mxu1 %vm588_vm2, %v9250_v52  ;;  %8402 = vmatprep.mubr.msk.bf16.mxu0 %vm588_vm2, %v9251_v53  ;;  %v9314_v52 = vld [vmem:[%s9524_s16 + $0x80] sm:$0xff]   ;;  %v9315_v53 = vld [vmem:[%s9530_s26 + $0x110] sm:$0xff]  }
 0x14f   : > { %8107 = vmatmul.mubr.msk.bf16.gmra.mrb[28].mxu1 %vm588_vm2, %v9252_v54  ;;  %8403 = vmatmul.mubr.msk.bf16.gmra.mrb[60].mxu0 %vm588_vm2, %v9253_v55  ;;  %v9316_v54 = vld [vmem:[%s9524_s16 + $0x88] sm:$0xff]   ;;  %v9317_v55 = vld [vmem:[%s9530_s26 + $0x118] sm:$0xff]  }
 0x150   : > { %8110 = vmatprep.mubr.msk.bf16.mxu1 %vm588_vm2, %v9254_v56  ;;  %8408 = vmatprep.mubr.msk.bf16.mxu0 %vm588_vm2, %v9255_v57  ;;  %v9318_v56 = vld [vmem:[%s9524_s16 + $0x90] sm:$0xff]   ;;  %v9319_v57 = vld [vmem:[%s9585_s7 + $0x20] sm:$0xff]  }
 0x157   : > { %8111 = vmatmul.mubr.msk.bf16.gmra.mrb[32].mxu1 %vm588_vm2, %v9256_v58  ;;  %8409 = vmatmul.mubr.msk.bf16.vlgmr.msra.gmra.mrb[0].mxu0 %vm588_vm2, %v9257_v59  ;;  %v9320_v58 = vld [vmem:[%s9524_s16 + $0x98] sm:$0xff]   ;;  %v9321_v59 = vld [vmem:[%s9585_s7 + $0x28] sm:$0xff]  }
 0x158   : > { %8114 = vmatprep.mubr.msk.bf16.mxu1 %vm588_vm2, %v9258_v61  ;;  %8473 = vmatpush3.bf16.msra.mxu0 %v9770_v60  ;;  %v9265_v60 = vld [vmem:[%s9530_s26 + $0x48] sm:$0xff]   ;;  %v9322_v61 = vld [vmem:[%s9524_s16 + $0xa0] sm:$0xff]  }
 0x159   : > { %8412 = vmatprep.mubr.msk.bf16.mxu0 %vm588_vm2, %v9259_v62  ;;  %v9323_v62 = vld [vmem:[%s9585_s7 + $0x30] sm:$0xff]  }
 0x15f   : > { %8115 = vmatmul.mubr.msk.bf16.gmra.mrb[36].mxu1 %vm588_vm2, %v9260_v63  ;;  %8413 = vmatmul.mubr.msk.bf16.gmra.mrb[4].mxu0 %vm588_vm2, %v9261_v4  ;;  %v9324_v63 = vld [vmem:[%s9524_s16 + $0xa8] sm:$0xff]   ;;  %v9325_v4 = vld [vmem:[%s9585_s7 + $0x38] sm:$0xff]  }
 0x160   : > { %8118 = vmatprep.mubr.msk.bf16.mxu1 %vm588_vm2, %v9262_v0  ;;  %8416 = vmatprep.mubr.msk.bf16.mxu0 %vm588_vm2, %v9263_v1  ;;  %v9326_v0 = vld [vmem:[%s9524_s16 + $0xb0] sm:$0xff]   ;;  %v9327_v1 = vld [vmem:[%s9585_s7 + $0x40] sm:$0xff]  }
 0x167   : > { %8119 = vmatmul.mubr.msk.bf16.gmra.mrb[40].mxu1 %vm588_vm2, %v9264_v2  ;;  %8417 = vmatmul.mubr.msk.bf16.gmra.mrb[8].mxu0 %vm588_vm2, %v9265_v60  ;;  %v9328_v2 = vld [vmem:[%s9524_s16 + $0xb8] sm:$0xff]   ;;  %v9329_v60 = vld [vmem:[%s9585_s7 + $0x48] sm:$0xff]  }
 0x168   : > { %8122 = vmatprep.mubr.msk.bf16.mxu1 %vm588_vm2, %v9266_v3  ;;  %8420 = vmatprep.mubr.msk.bf16.mxu0 %vm588_vm2, %v9267_v5  ;;  %v9330_v3 = vld [vmem:[%s9524_s16 + $0xc0] sm:$0xff]   ;;  %v9331_v5 = vld [vmem:[%s9585_s7 + $0x50] sm:$0xff]  }
 0x16f   : > { %8123 = vmatmul.mubr.msk.bf16.gmra.mrb[44].mxu1 %vm588_vm2, %v9268_v6  ;;  %8421 = vmatmul.mubr.msk.bf16.gmra.mrb[12].mxu0 %vm588_vm2, %v9269_v7  ;;  %v9332_v6 = vld [vmem:[%s9524_s16 + $0xc8] sm:$0xff]   ;;  %v9333_v7 = vld [vmem:[%s9585_s7 + $0x58] sm:$0xff]  }
 0x170   : > { %8126 = vmatprep.mubr.msk.bf16.mxu1 %vm588_vm2, %v9270_v9  ;;  %8424 = vmatprep.mubr.msk.bf16.mxu0 %vm588_vm2, %v9271_v10  ;;  %v9334_v9 = vld [vmem:[%s9524_s16 + $0xd0] sm:$0xff]   ;;  %v9335_v10 = vld [vmem:[%s9585_s7 + $0x60] sm:$0xff]  }
 0x177   : > { %8127 = vmatmul.mubr.msk.bf16.gmra.mrb[48].mxu1 %vm588_vm2, %v9272_v11  ;;  %8425 = vmatmul.mubr.msk.bf16.gmra.mrb[16].mxu0 %vm588_vm2, %v9273_v12  ;;  %v9336_v11 = vld [vmem:[%s9524_s16 + $0xd8] sm:$0xff]   ;;  %v9337_v12 = vld [vmem:[%s9585_s7 + $0x68] sm:$0xff]  }
 0x178   : > { %8130 = vmatprep.mubr.msk.bf16.mxu1 %vm588_vm2, %v9274_v13  ;;  %8428 = vmatprep.mubr.msk.bf16.mxu0 %vm588_vm2, %v9275_v14  ;;  %v9338_v13 = vld [vmem:[%s9524_s16 + $0xe0] sm:$0xff]   ;;  %v9339_v14 = vld [vmem:[%s9585_s7 + $0x70] sm:$0xff]  }
 0x17f   : > { %8131 = vmatmul.mubr.msk.bf16.gmra.mrb[52].mxu1 %vm588_vm2, %v9276_v15  ;;  %8429 = vmatmul.mubr.msk.bf16.gmra.mrb[20].mxu0 %vm588_vm2, %v9277_v16  ;;  %v9340_v15 = vld [vmem:[%s9524_s16 + $0xe8] sm:$0xff]   ;;  %v9341_v16 = vld [vmem:[%s9585_s7 + $0x78] sm:$0xff]  }
 0x180   : > { %8134 = vmatprep.mubr.msk.bf16.mxu1 %vm588_vm2, %v9278_v17  ;;  %8432 = vmatprep.mubr.msk.bf16.mxu0 %vm588_vm2, %v9279_v18  ;;  %v9342_v17 = vld [vmem:[%s9524_s16 + $0xf0] sm:$0xff]   ;;  %v9343_v18 = vld [vmem:[%s9585_s7 + $0x80] sm:$0xff]  }
 0x187   : > { %8135 = vmatmul.mubr.msk.bf16.gmra.mrb[56].mxu1 %vm588_vm2, %v9280_v20  ;;  %8433 = vmatmul.mubr.msk.bf16.gmra.mrb[24].mxu0 %vm588_vm2, %v9281_v21  ;;  %v9344_v20 = vld [vmem:[%s9524_s16 + $0xf8] sm:$0xff]   ;;  %v9345_v21 = vld [vmem:[%s9585_s7 + $0x88] sm:$0xff]  }
 0x188   : > { %8138 = vmatprep.mubr.msk.bf16.mxu1 %vm588_vm2, %v9282_v22  ;;  %8436 = vmatprep.mubr.msk.bf16.mxu0 %vm588_vm2, %v9283_v23  ;;  %v9346_v22 = vld [vmem:[%s9524_s16 + $0x100] sm:$0xff]   ;;  %v9347_v23 = vld [vmem:[%s9585_s7 + $0x90] sm:$0xff]  }
 0x18f   : > { %8139 = vmatmul.mubr.msk.bf16.gmra.mrb[60].mxu1 %vm588_vm2, %v9284_v24  ;;  %8437 = vmatmul.mubr.msk.bf16.gmra.mrb[28].mxu0 %vm588_vm2, %v9285_v25  ;;  %v9348_v24 = vld [vmem:[%s9524_s16 + $0x108] sm:$0xff]   ;;  %v9349_v25 = vld [vmem:[%s9585_s7 + $0x98] sm:$0xff]  }
 0x190   : > { %8144 = vmatprep.mubr.msk.bf16.mxu1 %vm588_vm2, %v9286_v26  ;;  %8440 = vmatprep.mubr.msk.bf16.mxu0 %vm588_vm2, %v9287_v28  ;;  %v9350_v26 = vld [vmem:[%s9530_s26 + $0x90] sm:$0xff]   ;;  %v9351_v28 = vld [vmem:[%s9585_s7 + $0xa0] sm:$0xff]  }
 0x197   : > { %8145 = vmatmul.mubr.msk.bf16.vlgmr.msra.gmra.mrb[0].mxu1 %vm588_vm2, %v9288_v29  ;;  %8441 = vmatmul.mubr.msk.bf16.gmra.mrb[32].mxu0 %vm588_vm2, %v9289_v30  ;;  %v9352_v29 = vld [vmem:[%s9530_s26 + $0x98] sm:$0xff]   ;;  %v9353_v30 = vld [vmem:[%s9585_s7 + $0xa8] sm:$0xff]  }
 0x198   : > { %8539 = vmatpush3.bf16.msra.mxu1 %v9503_v8  ;;  %8148 = vmatprep.mubr.msk.bf16.mxu1 %vm588_vm2, %v9290_v31  ;;  %v9296_v8 = vld [vmem:[%s9524_s16 + $0x38] sm:$0xff]   ;;  %v9354_v31 = vld [vmem:[%s9530_s26 + $0xa0] sm:$0xff]   ;;  %s6647_s16 = sshll.u32 %s10465_s19, 7 }
 0x199   : > { %8444 = vmatprep.mubr.msk.bf16.mxu0 %vm588_vm2, %v9291_v19  ;;  %v9355_v19 = vld [vmem:[%s9585_s7 + $0xb0] sm:$0xff]   ;;  %s286_s17 = sadd.s32 %s6647_s16, %s6646_s15 }
 0x19f   : > { %8149 = vmatmul.mubr.msk.bf16.gmra.mrb[4].mxu1 %vm588_vm2, %v9292_v32  ;;  %8445 = vmatmul.mubr.msk.bf16.gmra.mrb[36].mxu0 %vm588_vm2, %v9293_v33  ;;  %v9356_v32 = vld [vmem:[%s9530_s26 + $0xa8] sm:$0xff]   ;;  %v9357_v33 = vld [vmem:[%s9585_s7 + $0xb8] sm:$0xff]  }
 0x1a0   : > { %8152 = vmatprep.mubr.msk.bf16.mxu1 %vm588_vm2, %v9294_v34  ;;  %8448 = vmatprep.mubr.msk.bf16.mxu0 %vm588_vm2, %v9295_v27  ;;  %v9358_v34 = vld [vmem:[%s9530_s26 + $0xb0] sm:$0xff]   ;;  %v9359_v27 = vld [vmem:[%s9585_s7 + $0xc0] sm:$0xff]  }
 0x1a7   : > { %8153 = vmatmul.mubr.msk.bf16.gmra.mrb[8].mxu1 %vm588_vm2, %v9296_v8  ;;  %8449 = vmatmul.mubr.msk.bf16.gmra.mrb[40].mxu0 %vm588_vm2, %v9297_v35  ;;  %v9360_v8 = vld [vmem:[%s9530_s26 + $0xb8] sm:$0xff]   ;;  %v9361_v35 = vld [vmem:[%s9585_s7 + $0xc8] sm:$0xff]  }
 0x1a8   : > { %8156 = vmatprep.mubr.msk.bf16.mxu1 %vm588_vm2, %v9298_v36  ;;  %8452 = vmatprep.mubr.msk.bf16.mxu0 %vm588_vm2, %v9299_v37  ;;  %v9362_v36 = vld [vmem:[%s9530_s26 + $0xc0] sm:$0xff]   ;;  %v9363_v37 = vld [vmem:[%s9585_s7 + $0xd0] sm:$0xff]  }
 0x1af   : > { %8157 = vmatmul.mubr.msk.bf16.gmra.mrb[12].mxu1 %vm588_vm2, %v9300_v38  ;;  %8453 = vmatmul.mubr.msk.bf16.gmra.mrb[44].mxu0 %vm588_vm2, %v9301_v39  ;;  %v9364_v38 = vld [vmem:[%s9530_s26 + $0xc8] sm:$0xff]   ;;  %v9365_v39 = vld [vmem:[%s9585_s7 + $0xd8] sm:$0xff]  }
 0x1b0   : > { %8160 = vmatprep.mubr.msk.bf16.mxu1 %vm588_vm2, %v9302_v40  ;;  %8456 = vmatprep.mubr.msk.bf16.mxu0 %vm588_vm2, %v9303_v41  ;;  %v9366_v40 = vld [vmem:[%s9530_s26 + $0xd0] sm:$0xff]   ;;  %v9367_v41 = vld [vmem:[%s9585_s7 + $0xe0] sm:$0xff]  }
 0x1b7   : > { %8161 = vmatmul.mubr.msk.bf16.gmra.mrb[16].mxu1 %vm588_vm2, %v9304_v42  ;;  %8457 = vmatmul.mubr.msk.bf16.gmra.mrb[48].mxu0 %vm588_vm2, %v9305_v43  ;;  %v9368_v42 = vld [vmem:[%s9530_s26 + $0xd8] sm:$0xff]   ;;  %v9369_v43 = vld [vmem:[%s9585_s7 + $0xe8] sm:$0xff]  }
 0x1b8   : > { %8164 = vmatprep.mubr.msk.bf16.mxu1 %vm588_vm2, %v9306_v44  ;;  %8460 = vmatprep.mubr.msk.bf16.mxu0 %vm588_vm2, %v9307_v45  ;;  %v9370_v44 = vld [vmem:[%s9530_s26 + $0xe0] sm:$0xff]   ;;  %v9371_v45 = vld [vmem:[%s9585_s7 + $0xf0] sm:$0xff]  }
 0x1bf   : > { %8165 = vmatmul.mubr.msk.bf16.gmra.mrb[20].mxu1 %vm588_vm2, %v9308_v46  ;;  %8461 = vmatmul.mubr.msk.bf16.gmra.mrb[52].mxu0 %vm588_vm2, %v9309_v47  ;;  %v9372_v46 = vld [vmem:[%s9530_s26 + $0xe8] sm:$0xff]   ;;  %v9373_v47 = vld [vmem:[%s9585_s7 + $0xf8] sm:$0xff]  }
 0x1c0   : > { %8168 = vmatprep.mubr.msk.bf16.mxu1 %vm588_vm2, %v9310_v48  ;;  %8464 = vmatprep.mubr.msk.bf16.mxu0 %vm588_vm2, %v9311_v49  ;;  %v9374_v48 = vld [vmem:[%s9530_s26 + $0xf0] sm:$0xff]   ;;  %v9375_v49 = vld [vmem:[%s9585_s7 + $0x100] sm:$0xff]  }
 0x1c7   : > { %8169 = vmatmul.mubr.msk.bf16.gmra.mrb[24].mxu1 %vm588_vm2, %v9312_v50  ;;  %8465 = vmatmul.mubr.msk.bf16.gmra.mrb[56].mxu0 %vm588_vm2, %v9313_v51  ;;  %v9376_v50 = vld [vmem:[%s9530_s26 + $0xf8] sm:$0xff]   ;;  %v9377_v51 = vld [vmem:[%s9585_s7 + $0x108] sm:$0xff]  }
 0x1c8   : > { %8172 = vmatprep.mubr.msk.bf16.mxu1 %vm588_vm2, %v9314_v52  ;;  %8468 = vmatprep.mubr.msk.bf16.mxu0 %vm588_vm2, %v9315_v53  ;;  %v9378_v52 = vld [vmem:[%s9530_s26 + $0x100] sm:$0xff]   ;;  %v9379_v53 = vld [vmem:[%s9585_s7 + $0x110] sm:$0xff]  }
 0x1cf   : > { %8173 = vmatmul.mubr.msk.bf16.gmra.mrb[28].mxu1 %vm588_vm2, %v9316_v54  ;;  %8469 = vmatmul.mubr.msk.bf16.gmra.mrb[60].mxu0 %vm588_vm2, %v9317_v55  ;;  %v9380_v54 = vld [vmem:[%s9530_s26 + $0x108] sm:$0xff]   ;;  %v9381_v55 = vld [vmem:[%s9585_s7 + $0x118] sm:$0xff]   ;;  %s6648_s26 = sshll.u32 %s286_s17, 3 }
 0x1d0   : > { %8176 = vmatprep.mubr.msk.bf16.mxu1 %vm588_vm2, %v9318_v56  ;;  %8474 = vmatprep.mubr.msk.bf16.mxu0 %vm588_vm2, %v9319_v57  ;;  %s10215_s19 = scalar_lea.vmem %s10453_s5, %s6648_s26 }
 0x1d7   : > { %8177 = vmatmul.mubr.msk.bf16.gmra.mrb[32].mxu1 %vm588_vm2, %v9320_v58  ;;  %8475 = vmatmul.mubr.msk.bf16.vlgmr.msra.gmra.mrb[0].mxu0 %vm588_vm2, %v9321_v59 }
 0x1d8   : > { %8180 = vmatprep.mubr.msk.bf16.mxu1 %vm588_vm2, %v9322_v61  ;;  %8478 = vmatprep.mubr.msk.bf16.mxu0 %vm588_vm2, %v9323_v62 }
 0x1df   : > { %8181 = vmatmul.mubr.msk.bf16.gmra.mrb[36].mxu1 %vm588_vm2, %v9324_v63  ;;  %8479 = vmatmul.mubr.msk.bf16.gmra.mrb[4].mxu0 %vm588_vm2, %v9325_v4 }
 0x1e0   : > { %8184 = vmatprep.mubr.msk.bf16.mxu1 %vm588_vm2, %v9326_v0  ;;  %8482 = vmatprep.mubr.msk.bf16.mxu0 %vm588_vm2, %v9327_v1 }
 0x1e7   : > { %8185 = vmatmul.mubr.msk.bf16.gmra.mrb[40].mxu1 %vm588_vm2, %v9328_v2  ;;  %8483 = vmatmul.mubr.msk.bf16.gmra.mrb[8].mxu0 %vm588_vm2, %v9329_v60 }
 0x1e8   : > { %8188 = vmatprep.mubr.msk.bf16.mxu1 %vm588_vm2, %v9330_v3  ;;  %8486 = vmatprep.mubr.msk.bf16.mxu0 %vm588_vm2, %v9331_v5 }
 0x1ef   : > { %8189 = vmatmul.mubr.msk.bf16.gmra.mrb[44].mxu1 %vm588_vm2, %v9332_v6  ;;  %8487 = vmatmul.mubr.msk.bf16.gmra.mrb[12].mxu0 %vm588_vm2, %v9333_v7 }
 0x1f0   : > { %8192 = vmatprep.mubr.msk.bf16.mxu1 %vm588_vm2, %v9334_v9  ;;  %8490 = vmatprep.mubr.msk.bf16.mxu0 %vm588_vm2, %v9335_v10 }
 0x1f7   : > { %8193 = vmatmul.mubr.msk.bf16.gmra.mrb[48].mxu1 %vm588_vm2, %v9336_v11  ;;  %8491 = vmatmul.mubr.msk.bf16.gmra.mrb[16].mxu0 %vm588_vm2, %v9337_v12 }
 0x1f8   : > { %8196 = vmatprep.mubr.msk.bf16.mxu1 %vm588_vm2, %v9338_v13  ;;  %8494 = vmatprep.mubr.msk.bf16.mxu0 %vm588_vm2, %v9339_v14 }
 0x1ff   : > { %8197 = vmatmul.mubr.msk.bf16.gmra.mrb[52].mxu1 %vm588_vm2, %v9340_v15  ;;  %8495 = vmatmul.mubr.msk.bf16.gmra.mrb[20].mxu0 %vm588_vm2, %v9341_v16 }
 0x200   : > { %8200 = vmatprep.mubr.msk.bf16.mxu1 %vm588_vm2, %v9342_v17  ;;  %8498 = vmatprep.mubr.msk.bf16.mxu0 %vm588_vm2, %v9343_v18 }
 0x207   : > { %8201 = vmatmul.mubr.msk.bf16.gmra.mrb[56].mxu1 %vm588_vm2, %v9344_v20  ;;  %8499 = vmatmul.mubr.msk.bf16.gmra.mrb[24].mxu0 %vm588_vm2, %v9345_v21 }
 0x208   : > { %8204 = vmatprep.mubr.msk.bf16.mxu1 %vm588_vm2, %v9346_v22  ;;  %8502 = vmatprep.mubr.msk.bf16.mxu0 %vm588_vm2, %v9347_v23 }
 0x20f   : > { %8205 = vmatmul.mubr.msk.bf16.gmra.mrb[60].mxu1 %vm588_vm2, %v9348_v24  ;;  %8503 = vmatmul.mubr.msk.bf16.gmra.mrb[28].mxu0 %vm588_vm2, %v9349_v25 }
 0x210   : > { %8242 = vmatprep.mubr.msk.bf16.mxu1 %vm588_vm2, %v9350_v26  ;;  %8506 = vmatprep.mubr.msk.bf16.mxu0 %vm588_vm2, %v9351_v28  ;;  %v10209_v28 = vld [vmem:[%s10452_s4] ss:$0 sm:$0xff] }
 0x217   : > { %8243 = vmatmul.mubr.msk.bf16.vlgmr.msra.gmra.mrb[32].mxu1 %vm588_vm2, %v9352_v29  ;;  %8507 = vmatmul.mubr.msk.bf16.gmra.mrb[32].mxu0 %vm588_vm2, %v9353_v30 }
 0x218   : > { %8246 = vmatprep.mubr.msk.bf16.mxu1 %vm588_vm2, %v9354_v31  ;;  %8510 = vmatprep.mubr.msk.bf16.mxu0 %vm588_vm2, %v9355_v19 }
 0x21f   : > { %8247 = vmatmul.mubr.msk.bf16.gmra.mrb[36].mxu1 %vm588_vm2, %v9356_v32  ;;  %8511 = vmatmul.mubr.msk.bf16.gmra.mrb[36].mxu0 %vm588_vm2, %v9357_v33 }
 0x220   : > { %8250 = vmatprep.mubr.msk.bf16.mxu1 %vm588_vm2, %v9358_v34  ;;  %8514 = vmatprep.mubr.msk.bf16.mxu0 %vm588_vm2, %v9359_v27 }
 0x227   : > { %8251 = vmatmul.mubr.msk.bf16.gmra.mrb[40].mxu1 %vm588_vm2, %v9360_v8  ;;  %8515 = vmatmul.mubr.msk.bf16.gmra.mrb[40].mxu0 %vm588_vm2, %v9361_v35 }
 0x228   : > { %8254 = vmatprep.mubr.msk.bf16.mxu1 %vm588_vm2, %v9362_v36  ;;  %8518 = vmatprep.mubr.msk.bf16.mxu0 %vm588_vm2, %v9363_v37 }
 0x22f   : > { %8255 = vmatmul.mubr.msk.bf16.gmra.mrb[44].mxu1 %vm588_vm2, %v9364_v38  ;;  %8519 = vmatmul.mubr.msk.bf16.gmra.mrb[44].mxu0 %vm588_vm2, %v9365_v39 }
 0x230   : > { %8258 = vmatprep.mubr.msk.bf16.mxu1 %vm588_vm2, %v9366_v40  ;;  %8522 = vmatprep.mubr.msk.bf16.mxu0 %vm588_vm2, %v9367_v41 }
 0x237   : > { %8259 = vmatmul.mubr.msk.bf16.gmra.mrb[48].mxu1 %vm588_vm2, %v9368_v42  ;;  %8523 = vmatmul.mubr.msk.bf16.gmra.mrb[48].mxu0 %vm588_vm2, %v9369_v43 }
 0x238   : > { %8262 = vmatprep.mubr.msk.bf16.mxu1 %vm588_vm2, %v9370_v44  ;;  %8526 = vmatprep.mubr.msk.bf16.mxu0 %vm588_vm2, %v9371_v45 }
 0x23f   : > { %8263 = vmatmul.mubr.msk.bf16.gmra.mrb[52].mxu1 %vm588_vm2, %v9372_v46  ;;  %8527 = vmatmul.mubr.msk.bf16.gmra.mrb[52].mxu0 %vm588_vm2, %v9373_v47 }
 0x240   : > { %8266 = vmatprep.mubr.msk.bf16.mxu1 %vm588_vm2, %v9374_v48  ;;  %8530 = vmatprep.mubr.msk.bf16.mxu0 %vm588_vm2, %v9375_v49 }
 0x247   : > { %8267 = vmatmul.mubr.msk.bf16.gmra.mrb[56].mxu1 %vm588_vm2, %v9376_v50  ;;  %8531 = vmatmul.mubr.msk.bf16.gmra.mrb[56].mxu0 %vm588_vm2, %v9377_v51 }
 0x248   : > { %8270 = vmatprep.mubr.msk.bf16.mxu1 %vm588_vm2, %v9378_v52  ;;  %8534 = vmatprep.mubr.msk.bf16.mxu0 %vm588_vm2, %v9379_v53 }
 0x24f   : > { %8271 = vmatmul.mubr.msk.bf16.gmra.mrb[60].mxu1 %vm588_vm2, %v9380_v54  ;;  %8535 = vmatmul.mubr.msk.bf16.gmra.mrb[60].mxu0 %vm588_vm2, %v9381_v55 }
 0x26a   : > { %v8146_v56 = vpop.f32.mrb[0].mxu1 }
 0x26b   : > { %v2572_v57 = vpop.f32.mrb[1].mxu1 }
 0x26c   : > { %v8147_v58 = vpop.f32.mrb[2].mxu1 }
 0x26d   : > { %v2575_v59 = vpop.f32.mrb[3].mxu1 }
 0x272   : > { %v8150_v61 = vpop.f32.mrb[4].mxu1 }
 0x273   : > { %v2588_v62 = vpop.f32.mrb[5].mxu1 }
 0x274   : > { %v8151_v63 = vpop.f32.mrb[6].mxu1 }
 0x275   : > { %v10154_v4 = vpop.f32.mrb[7].mxu1 }
 0x27a   : > { %v10156_v0 = vpop.f32.mrb[8].mxu1 }
 0x27b   : > { %v10158_v1 = vpop.f32.mrb[9].mxu1 }
 0x27c   : > { %v10160_v2 = vpop.f32.mrb[10].mxu1 }
 0x27d   : > { %v10162_v60 = vpop.f32.mrb[11].mxu1 }
 0x282   : > { %v10164_v3 = vpop.f32.mrb[12].mxu1 }
 0x283   : > { %v10166_v5 = vpop.f32.mrb[13].mxu1 }
 0x284   : > { %v10168_v6 = vpop.f32.mrb[14].mxu1 }
 0x285   : > { %v10170_v7 = vpop.f32.mrb[15].mxu1 }
 0x28a   : > { %v10172_v9 = vpop.f32.mrb[16].mxu1 }
 0x28b   : > { %v10174_v10 = vpop.f32.mrb[17].mxu1 }
 0x28c   : > { %v10176_v11 = vpop.f32.mrb[18].mxu1 }
 0x28d   : > { %v10178_v12 = vpop.f32.mrb[19].mxu1 }
 0x292   : > { %v10180_v13 = vpop.f32.mrb[20].mxu1 }
 0x293   : > { %v10182_v14 = vpop.f32.mrb[21].mxu1 }
 0x294   : > { %v10184_v15 = vpop.f32.mrb[22].mxu1 }
 0x295   : > { %v10186_v16 = vpop.f32.mrb[23].mxu1 }
 0x29a   : > { %v10188_v17 = vpop.f32.mrb[24].mxu1 }
 0x29b   : > { %v10190_v18 = vpop.f32.mrb[25].mxu1 }
 0x29c   : > { %v10193_v20 = vpop.f32.mrb[26].mxu1 }
 0x29d   : > { %v10195_v21 = vpop.f32.mrb[27].mxu1 }
 0x2a2   : > { %v10197_v22 = vpop.f32.mrb[28].mxu1 }
 0x2a3   : > { %v10199_v23 = vpop.f32.mrb[29].mxu1 }
 0x2a4   : > { %v10201_v24 = vpop.f32.mrb[30].mxu1 }
 0x2a5   : > { %v10203_v25 = vpop.f32.mrb[31].mxu1 }
 0x2aa   : > { %v8476_v26 = vpop.f32.mrb[0].mxu0 }
 0x2ab   : > { %v8540_v29 = vadd.f32 %v8476_v26, %v8146_v56  ;;  %v5974_v30 = vpop.f32.mrb[1].mxu0 }
 0x2ac   : > { %v8541_v31 = vadd.f32 %v5974_v30, %v2572_v57  ;;  %v8477_v19 = vpop.f32.mrb[2].mxu0 }
 0x2ad   : > { %v6302_v32 = vadd.f32 %v8540_v29, %v10209_v28  ;;  %v8542_v33 = vadd.f32 %v8477_v19, %v8147_v58  ;;  %v5977_v34 = vpop.f32.mrb[3].mxu0 }
 0x2ae   : > { %v6300_v27 = vadd.f32 %v8541_v31, %v10209_v28  ;;  %v8543_v8 = vadd.f32 %v5977_v34, %v2575_v59 }
 0x2af   : > { %v6366_v35 = vmax.f32 %v6302_v32, 0.0  ;;  %v6303_v36 = vadd.f32 %v8542_v33, %v10209_v28 }
 0x2b0   : > { %v6364_v37 = vmax.f32 %v6300_v27, 0.0  ;;  %v6301_v38 = vadd.f32 %v8543_v8, %v10209_v28 }
 0x2b1   : > { %6431 = vst.msk [vmem:[%s10215_s19 + $0x10] sm:$0xff] %vm6428_vm3, %v6366_v35  ;;  %v6367_v39 = vmax.f32 %v6303_v36, 0.0 }
 0x2b2   : > { %6429 = vst.msk [vmem:[%s10215_s19] sm:$0xff] %vm6428_vm3, %v6364_v37  ;;  %v6365_v40 = vmax.f32 %v6301_v38, 0.0  ;;  %v8480_v41 = vpop.f32.mrb[4].mxu0 }
 0x2b3   : > { %6432 = vst.msk [vmem:[%s10215_s19 + $0x18] sm:$0xff] %vm6428_vm3, %v6367_v39  ;;  %v8544_v42 = vadd.f32 %v8480_v41, %v8150_v61  ;;  %v5990_v43 = vpop.f32.mrb[5].mxu0 }
 0x2b4   : > { %6430 = vst.msk [vmem:[%s10215_s19 + $0x8] sm:$0xff] %vm6428_vm3, %v6365_v40  ;;  %v8545_v44 = vadd.f32 %v5990_v43, %v2588_v62  ;;  %v8481_v45 = vpop.f32.mrb[6].mxu0 }
 0x2b5   : > { %v6306_v46 = vadd.f32 %v8544_v42, %v10209_v28  ;;  %v8546_v47 = vadd.f32 %v8481_v45, %v8151_v63  ;;  %v5993_v48 = vpop.f32.mrb[7].mxu0 }
 0x2b6   : > { %v6304_v49 = vadd.f32 %v8545_v44, %v10209_v28  ;;  %v8547_v50 = vadd.f32 %v5993_v48, %v10154_v4 }
 0x2b7   : > { %v6370_v51 = vmax.f32 %v6306_v46, 0.0  ;;  %v6307_v52 = vadd.f32 %v8546_v47, %v10209_v28 }
 0x2b8   : > { %v6368_v53 = vmax.f32 %v6304_v49, 0.0  ;;  %v6305_v54 = vadd.f32 %v8547_v50, %v10209_v28 }
 0x2b9   : > { %6435 = vst.msk [vmem:[%s10215_s19 + $0x30] sm:$0xff] %vm6428_vm3, %v6370_v51  ;;  %v6371_v55 = vmax.f32 %v6307_v52, 0.0 }
 0x2ba   : > { %6433 = vst.msk [vmem:[%s10215_s19 + $0x20] sm:$0xff] %vm6428_vm3, %v6368_v53  ;;  %v6369_v56 = vmax.f32 %v6305_v54, 0.0  ;;  %v8484_v57 = vpop.f32.mrb[8].mxu0 }
 0x2bb   : > { %6436 = vst.msk [vmem:[%s10215_s19 + $0x38] sm:$0xff] %vm6428_vm3, %v6371_v55  ;;  %v8548_v58 = vadd.f32 %v8484_v57, %v10156_v0  ;;  %v6006_v59 = vpop.f32.mrb[9].mxu0 }
 0x2bc   : > { %6434 = vst.msk [vmem:[%s10215_s19 + $0x28] sm:$0xff] %vm6428_vm3, %v6369_v56  ;;  %v8549_v61 = vadd.f32 %v6006_v59, %v10158_v1  ;;  %v8485_v62 = vpop.f32.mrb[10].mxu0 }
 0x2bd   : > { %v6310_v63 = vadd.f32 %v8548_v58, %v10209_v28  ;;  %v8550_v4 = vadd.f32 %v8485_v62, %v10160_v2  ;;  %v6009_v26 = vpop.f32.mrb[11].mxu0 }
 0x2be   : > { %v6308_v29 = vadd.f32 %v8549_v61, %v10209_v28  ;;  %v8551_v30 = vadd.f32 %v6009_v26, %v10162_v60 }
 0x2bf   : > { %v6374_v31 = vmax.f32 %v6310_v63, 0.0  ;;  %v6311_v0 = vadd.f32 %v8550_v4, %v10209_v28 }
 0x2c0   : > { %v6372_v19 = vmax.f32 %v6308_v29, 0.0  ;;  %v6309_v32 = vadd.f32 %v8551_v30, %v10209_v28 }
 0x2c1   : > { %6439 = vst.msk [vmem:[%s10215_s19 + $0x50] sm:$0xff] %vm6428_vm3, %v6374_v31  ;;  %v6375_v1 = vmax.f32 %v6311_v0, 0.0 }
 0x2c2   : > { %6437 = vst.msk [vmem:[%s10215_s19 + $0x40] sm:$0xff] %vm6428_vm3, %v6372_v19  ;;  %v6373_v33 = vmax.f32 %v6309_v32, 0.0  ;;  %v8488_v34 = vpop.f32.mrb[12].mxu0 }
 0x2c3   : > { %6440 = vst.msk [vmem:[%s10215_s19 + $0x58] sm:$0xff] %vm6428_vm3, %v6375_v1  ;;  %v8552_v2 = vadd.f32 %v8488_v34, %v10164_v3  ;;  %v6022_v60 = vpop.f32.mrb[13].mxu0 }
 0x2c4   : > { %6438 = vst.msk [vmem:[%s10215_s19 + $0x48] sm:$0xff] %vm6428_vm3, %v6373_v33  ;;  %v8553_v27 = vadd.f32 %v6022_v60, %v10166_v5  ;;  %v8489_v8 = vpop.f32.mrb[14].mxu0 }
 0x2c5   : > { %v6314_v35 = vadd.f32 %v8552_v2, %v10209_v28  ;;  %v8554_v36 = vadd.f32 %v8489_v8, %v10168_v6  ;;  %v6025_v37 = vpop.f32.mrb[15].mxu0 }
 0x2c6   : > { %v6312_v38 = vadd.f32 %v8553_v27, %v10209_v28  ;;  %v8555_v39 = vadd.f32 %v6025_v37, %v10170_v7 }
 0x2c7   : > { %v6378_v40 = vmax.f32 %v6314_v35, 0.0  ;;  %v6315_v3 = vadd.f32 %v8554_v36, %v10209_v28 }
 0x2c8   : > { %v6376_v41 = vmax.f32 %v6312_v38, 0.0  ;;  %v6313_v42 = vadd.f32 %v8555_v39, %v10209_v28 }
 0x2c9   : > { %6443 = vst.msk [vmem:[%s10215_s19 + $0x70] sm:$0xff] %vm6428_vm3, %v6378_v40  ;;  %v6379_v5 = vmax.f32 %v6315_v3, 0.0 }
 0x2ca   : > { %6441 = vst.msk [vmem:[%s10215_s19 + $0x60] sm:$0xff] %vm6428_vm3, %v6376_v41  ;;  %v6377_v43 = vmax.f32 %v6313_v42, 0.0  ;;  %v8492_v44 = vpop.f32.mrb[16].mxu0 }
 0x2cb   : > { %6444 = vst.msk [vmem:[%s10215_s19 + $0x78] sm:$0xff] %vm6428_vm3, %v6379_v5  ;;  %v8556_v6 = vadd.f32 %v8492_v44, %v10172_v9  ;;  %v6038_v7 = vpop.f32.mrb[17].mxu0 }
 0x2cc   : > { %6442 = vst.msk [vmem:[%s10215_s19 + $0x68] sm:$0xff] %vm6428_vm3, %v6377_v43  ;;  %v8557_v45 = vadd.f32 %v6038_v7, %v10174_v10  ;;  %v8493_v46 = vpop.f32.mrb[18].mxu0 }
 0x2cd   : > { %v6318_v47 = vadd.f32 %v8556_v6, %v10209_v28  ;;  %v8558_v48 = vadd.f32 %v8493_v46, %v10176_v11  ;;  %v6041_v49 = vpop.f32.mrb[19].mxu0 }
 0x2ce   : > { %v6316_v50 = vadd.f32 %v8557_v45, %v10209_v28  ;;  %v8559_v51 = vadd.f32 %v6041_v49, %v10178_v12 }
 0x2cf   : > { %v6382_v52 = vmax.f32 %v6318_v47, 0.0  ;;  %v6319_v9 = vadd.f32 %v8558_v48, %v10209_v28 }
 0x2d0   : > { %v6380_v53 = vmax.f32 %v6316_v50, 0.0  ;;  %v6317_v54 = vadd.f32 %v8559_v51, %v10209_v28 }
 0x2d1   : > { %6447 = vst.msk [vmem:[%s10215_s19 + $0x90] sm:$0xff] %vm6428_vm3, %v6382_v52  ;;  %v6383_v10 = vmax.f32 %v6319_v9, 0.0 }
 0x2d2   : > { %6445 = vst.msk [vmem:[%s10215_s19 + $0x80] sm:$0xff] %vm6428_vm3, %v6380_v53  ;;  %v6381_v55 = vmax.f32 %v6317_v54, 0.0  ;;  %v8496_v56 = vpop.f32.mrb[20].mxu0 }
 0x2d3   : > { %6448 = vst.msk [vmem:[%s10215_s19 + $0x98] sm:$0xff] %vm6428_vm3, %v6383_v10  ;;  %v8560_v11 = vadd.f32 %v8496_v56, %v10180_v13  ;;  %v6054_v12 = vpop.f32.mrb[21].mxu0 }
 0x2d4   : > { %6446 = vst.msk [vmem:[%s10215_s19 + $0x88] sm:$0xff] %vm6428_vm3, %v6381_v55  ;;  %v8561_v57 = vadd.f32 %v6054_v12, %v10182_v14  ;;  %v8497_v58 = vpop.f32.mrb[22].mxu0 }
 0x2d5   : > { %v6322_v59 = vadd.f32 %v8560_v11, %v10209_v28  ;;  %v8562_v61 = vadd.f32 %v8497_v58, %v10184_v15  ;;  %v6057_v62 = vpop.f32.mrb[23].mxu0 }
 0x2d6   : > { %v6320_v63 = vadd.f32 %v8561_v57, %v10209_v28  ;;  %v8563_v4 = vadd.f32 %v6057_v62, %v10186_v16 }
 0x2d7   : > { %v6386_v26 = vmax.f32 %v6322_v59, 0.0  ;;  %v6323_v13 = vadd.f32 %v8562_v61, %v10209_v28 }
 0x2d8   : > { %v6384_v29 = vmax.f32 %v6320_v63, 0.0  ;;  %v6321_v30 = vadd.f32 %v8563_v4, %v10209_v28 }
 0x2d9   : > { %6451 = vst.msk [vmem:[%s10215_s19 + $0xb0] sm:$0xff] %vm6428_vm3, %v6386_v26  ;;  %v6387_v14 = vmax.f32 %v6323_v13, 0.0 }
 0x2da   : > { %6449 = vst.msk [vmem:[%s10215_s19 + $0xa0] sm:$0xff] %vm6428_vm3, %v6384_v29  ;;  %v6385_v31 = vmax.f32 %v6321_v30, 0.0  ;;  %v8500_v0 = vpop.f32.mrb[24].mxu0 }
 0x2db   : > { %6452 = vst.msk [vmem:[%s10215_s19 + $0xb8] sm:$0xff] %vm6428_vm3, %v6387_v14  ;;  %v8564_v15 = vadd.f32 %v8500_v0, %v10188_v17  ;;  %v6070_v16 = vpop.f32.mrb[25].mxu0 }
 0x2dc   : > { %6450 = vst.msk [vmem:[%s10215_s19 + $0xa8] sm:$0xff] %vm6428_vm3, %v6385_v31  ;;  %v8565_v19 = vadd.f32 %v6070_v16, %v10190_v18  ;;  %v8501_v32 = vpop.f32.mrb[26].mxu0 }
 0x2dd   : > { %v6326_v1 = vadd.f32 %v8564_v15, %v10209_v28  ;;  %v8566_v33 = vadd.f32 %v8501_v32, %v10193_v20  ;;  %v6073_v34 = vpop.f32.mrb[27].mxu0 }
 0x2de   : > { %v6324_v2 = vadd.f32 %v8565_v19, %v10209_v28  ;;  %v8567_v60 = vadd.f32 %v6073_v34, %v10195_v21 }
 0x2df   : > { %v6390_v27 = vmax.f32 %v6326_v1, 0.0  ;;  %v6327_v17 = vadd.f32 %v8566_v33, %v10209_v28 }
 0x2e0   : > { %v6388_v8 = vmax.f32 %v6324_v2, 0.0  ;;  %v6325_v35 = vadd.f32 %v8567_v60, %v10209_v28 }
 0x2e1   : > { %6455 = vst.msk [vmem:[%s10215_s19 + $0xd0] sm:$0xff] %vm6428_vm3, %v6390_v27  ;;  %v6391_v18 = vmax.f32 %v6327_v17, 0.0 }
 0x2e2   : > { %6453 = vst.msk [vmem:[%s10215_s19 + $0xc0] sm:$0xff] %vm6428_vm3, %v6388_v8  ;;  %v6389_v36 = vmax.f32 %v6325_v35, 0.0  ;;  %v8504_v37 = vpop.f32.mrb[28].mxu0 }
 0x2e3   : > { %6456 = vst.msk [vmem:[%s10215_s19 + $0xd8] sm:$0xff] %vm6428_vm3, %v6391_v18  ;;  %v8568_v20 = vadd.f32 %v8504_v37, %v10197_v22  ;;  %v6086_v38 = vpop.f32.mrb[29].mxu0 }
 0x2e4   : > { %6454 = vst.msk [vmem:[%s10215_s19 + $0xc8] sm:$0xff] %vm6428_vm3, %v6389_v36  ;;  %v8569_v21 = vadd.f32 %v6086_v38, %v10199_v23  ;;  %v8505_v39 = vpop.f32.mrb[30].mxu0 }
 0x2e5   : > { %v6330_v40 = vadd.f32 %v8568_v20, %v10209_v28  ;;  %v8570_v3 = vadd.f32 %v8505_v39, %v10201_v24  ;;  %v6089_v41 = vpop.f32.mrb[31].mxu0 }
 0x2e6   : > { %v6328_v42 = vadd.f32 %v8569_v21, %v10209_v28  ;;  %v8571_v5 = vadd.f32 %v6089_v41, %v10203_v25 }
 0x2e7   : > { %v6394_v43 = vmax.f32 %v6330_v40, 0.0  ;;  %v6331_v22 = vadd.f32 %v8570_v3, %v10209_v28 }
 0x2e8   : > { %v6392_v44 = vmax.f32 %v6328_v42, 0.0  ;;  %v6329_v6 = vadd.f32 %v8571_v5, %v10209_v28 }
 0x2e9   : > { %6459 = vst.msk [vmem:[%s10215_s19 + $0xf0] sm:$0xff] %vm6428_vm3, %v6394_v43  ;;  %v6395_v23 = vmax.f32 %v6331_v22, 0.0 }
 0x2ea   : > { %v8244_v7 = vpop.f32.mrb[32].mxu1  ;;  %6457 = vst.msk [vmem:[%s10215_s19 + $0xe0] sm:$0xff] %vm6428_vm3, %v6392_v44  ;;  %v6393_v45 = vmax.f32 %v6329_v6, 0.0  ;;  %v8508_v24 = vpop.f32.mrb[32].mxu0 }
 0x2eb   : > { %v3380_v46 = vpop.f32.mrb[33].mxu1  ;;  %6460 = vst.msk [vmem:[%s10215_s19 + $0xf8] sm:$0xff] %vm6428_vm3, %v6395_v23  ;;  %v8572_v47 = vadd.f32 %v8508_v24, %v8244_v7  ;;  %v6102_v25 = vpop.f32.mrb[33].mxu0 }
 0x2ec   : > { %v8245_v48 = vpop.f32.mrb[34].mxu1  ;;  %6458 = vst.msk [vmem:[%s10215_s19 + $0xe8] sm:$0xff] %vm6428_vm3, %v6393_v45  ;;  %v8573_v49 = vadd.f32 %v6102_v25, %v3380_v46  ;;  %v8509_v50 = vpop.f32.mrb[34].mxu0 }
 0x2ed   : > { %v3383_v51 = vpop.f32.mrb[35].mxu1  ;;  %v6334_v52 = vadd.f32 %v8572_v47, %v10209_v28  ;;  %v8574_v9 = vadd.f32 %v8509_v50, %v8245_v48  ;;  %v6105_v53 = vpop.f32.mrb[35].mxu0 }
 0x2ee   : > { %v6332_v54 = vadd.f32 %v8573_v49, %v10209_v28  ;;  %v8575_v10 = vadd.f32 %v6105_v53, %v3383_v51 }
 0x2ef   : > { %v6398_v55 = vmax.f32 %v6334_v52, 0.0  ;;  %v6335_v56 = vadd.f32 %v8574_v9, %v10209_v28 }
 0x2f0   : > { %v6396_v11 = vmax.f32 %v6332_v54, 0.0  ;;  %v6333_v12 = vadd.f32 %v8575_v10, %v10209_v28 }
 0x2f1   : > { %6463 = vst.msk [vmem:[%s10215_s19 + $0x110] sm:$0xff] %vm6428_vm3, %v6398_v55  ;;  %v6399_v57 = vmax.f32 %v6335_v56, 0.0 }
 0x2f2   : > { %v8248_v58 = vpop.f32.mrb[36].mxu1  ;;  %6461 = vst.msk [vmem:[%s10215_s19 + $0x100] sm:$0xff] %vm6428_vm3, %v6396_v11  ;;  %v6397_v59 = vmax.f32 %v6333_v12, 0.0  ;;  %v8512_v61 = vpop.f32.mrb[36].mxu0 }
 0x2f3   : > { %v3396_v62 = vpop.f32.mrb[37].mxu1  ;;  %6464 = vst.msk [vmem:[%s10215_s19 + $0x118] sm:$0xff] %vm6428_vm3, %v6399_v57  ;;  %v8576_v63 = vadd.f32 %v8512_v61, %v8248_v58  ;;  %v6118_v4 = vpop.f32.mrb[37].mxu0 }
 0x2f4   : > { %v8249_v26 = vpop.f32.mrb[38].mxu1  ;;  %6462 = vst.msk [vmem:[%s10215_s19 + $0x108] sm:$0xff] %vm6428_vm3, %v6397_v59  ;;  %v8577_v13 = vadd.f32 %v6118_v4, %v3396_v62  ;;  %v8513_v29 = vpop.f32.mrb[38].mxu0 }
 0x2f5   : > { %v3399_v30 = vpop.f32.mrb[39].mxu1  ;;  %v6338_v14 = vadd.f32 %v8576_v63, %v10209_v28  ;;  %v8578_v31 = vadd.f32 %v8513_v29, %v8249_v26  ;;  %v6121_v0 = vpop.f32.mrb[39].mxu0 }
 0x2f6   : > { %v6336_v15 = vadd.f32 %v8577_v13, %v10209_v28  ;;  %v8579_v16 = vadd.f32 %v6121_v0, %v3399_v30 }
 0x2f7   : > { %v6402_v19 = vmax.f32 %v6338_v14, 0.0  ;;  %v6339_v32 = vadd.f32 %v8578_v31, %v10209_v28 }
 0x2f8   : > { %v6400_v1 = vmax.f32 %v6336_v15, 0.0  ;;  %v6337_v33 = vadd.f32 %v8579_v16, %v10209_v28 }
 0x2f9   : > { %6467 = vst.msk [vmem:[%s10215_s19 + $0x130] sm:$0xff] %vm6428_vm3, %v6402_v19  ;;  %v6403_v34 = vmax.f32 %v6339_v32, 0.0 }
 0x2fa   : > { %v8252_v2 = vpop.f32.mrb[40].mxu1  ;;  %6465 = vst.msk [vmem:[%s10215_s19 + $0x120] sm:$0xff] %vm6428_vm3, %v6400_v1  ;;  %v6401_v60 = vmax.f32 %v6337_v33, 0.0  ;;  %v8516_v27 = vpop.f32.mrb[40].mxu0 }
 0x2fb   : > { %v3412_v17 = vpop.f32.mrb[41].mxu1  ;;  %6468 = vst.msk [vmem:[%s10215_s19 + $0x138] sm:$0xff] %vm6428_vm3, %v6403_v34  ;;  %v8580_v8 = vadd.f32 %v8516_v27, %v8252_v2  ;;  %v6134_v35 = vpop.f32.mrb[41].mxu0 }
 0x2fc   : > { %v8253_v18 = vpop.f32.mrb[42].mxu1  ;;  %6466 = vst.msk [vmem:[%s10215_s19 + $0x128] sm:$0xff] %vm6428_vm3, %v6401_v60  ;;  %v8581_v36 = vadd.f32 %v6134_v35, %v3412_v17  ;;  %v8517_v37 = vpop.f32.mrb[42].mxu0 }
 0x2fd   : > { %v3415_v20 = vpop.f32.mrb[43].mxu1  ;;  %v6342_v38 = vadd.f32 %v8580_v8, %v10209_v28  ;;  %v8582_v21 = vadd.f32 %v8517_v37, %v8253_v18  ;;  %v6137_v39 = vpop.f32.mrb[43].mxu0 }
 0x2fe   : > { %v6340_v40 = vadd.f32 %v8581_v36, %v10209_v28  ;;  %v8583_v3 = vadd.f32 %v6137_v39, %v3415_v20 }
 0x2ff   : > { %v6406_v41 = vmax.f32 %v6342_v38, 0.0  ;;  %v6343_v42 = vadd.f32 %v8582_v21, %v10209_v28 }
 0x300   : > { %v6404_v5 = vmax.f32 %v6340_v40, 0.0  ;;  %v6341_v43 = vadd.f32 %v8583_v3, %v10209_v28 }
 0x301   : > { %6471 = vst.msk [vmem:[%s10215_s19 + $0x150] sm:$0xff] %vm6428_vm3, %v6406_v41  ;;  %v6407_v22 = vmax.f32 %v6343_v42, 0.0 }
 0x302   : > { %v8256_v44 = vpop.f32.mrb[44].mxu1  ;;  %6469 = vst.msk [vmem:[%s10215_s19 + $0x140] sm:$0xff] %vm6428_vm3, %v6404_v5  ;;  %v6405_v6 = vmax.f32 %v6341_v43, 0.0  ;;  %v8520_v23 = vpop.f32.mrb[44].mxu0 }
 0x303   : > { %v3428_v7 = vpop.f32.mrb[45].mxu1  ;;  %6472 = vst.msk [vmem:[%s10215_s19 + $0x158] sm:$0xff] %vm6428_vm3, %v6407_v22  ;;  %v8584_v45 = vadd.f32 %v8520_v23, %v8256_v44  ;;  %v6150_v24 = vpop.f32.mrb[45].mxu0 }
 0x304   : > { %v8257_v46 = vpop.f32.mrb[46].mxu1  ;;  %6470 = vst.msk [vmem:[%s10215_s19 + $0x148] sm:$0xff] %vm6428_vm3, %v6405_v6  ;;  %v8585_v47 = vadd.f32 %v6150_v24, %v3428_v7  ;;  %v8521_v25 = vpop.f32.mrb[46].mxu0 }
 0x305   : > { %v3431_v48 = vpop.f32.mrb[47].mxu1  ;;  %v6346_v49 = vadd.f32 %v8584_v45, %v10209_v28  ;;  %v8586_v50 = vadd.f32 %v8521_v25, %v8257_v46  ;;  %v6153_v51 = vpop.f32.mrb[47].mxu0 }
 0x306   : > { %v6344_v52 = vadd.f32 %v8585_v47, %v10209_v28  ;;  %v8587_v9 = vadd.f32 %v6153_v51, %v3431_v48 }
 0x307   : > { %v6410_v53 = vmax.f32 %v6346_v49, 0.0  ;;  %v6347_v54 = vadd.f32 %v8586_v50, %v10209_v28 }
 0x308   : > { %v6408_v10 = vmax.f32 %v6344_v52, 0.0  ;;  %v6345_v55 = vadd.f32 %v8587_v9, %v10209_v28 }
 0x309   : > { %6475 = vst.msk [vmem:[%s10215_s19 + $0x170] sm:$0xff] %vm6428_vm3, %v6410_v53  ;;  %v6411_v56 = vmax.f32 %v6347_v54, 0.0 }
 0x30a   : > { %v8260_v11 = vpop.f32.mrb[48].mxu1  ;;  %6473 = vst.msk [vmem:[%s10215_s19 + $0x160] sm:$0xff] %vm6428_vm3, %v6408_v10  ;;  %v6409_v12 = vmax.f32 %v6345_v55, 0.0  ;;  %v8524_v57 = vpop.f32.mrb[48].mxu0 }
 0x30b   : > { %v3444_v58 = vpop.f32.mrb[49].mxu1  ;;  %6476 = vst.msk [vmem:[%s10215_s19 + $0x178] sm:$0xff] %vm6428_vm3, %v6411_v56  ;;  %v8588_v59 = vadd.f32 %v8524_v57, %v8260_v11  ;;  %v6166_v61 = vpop.f32.mrb[49].mxu0 }
 0x30c   : > { %v8261_v62 = vpop.f32.mrb[50].mxu1  ;;  %6474 = vst.msk [vmem:[%s10215_s19 + $0x168] sm:$0xff] %vm6428_vm3, %v6409_v12  ;;  %v8589_v63 = vadd.f32 %v6166_v61, %v3444_v58  ;;  %v8525_v4 = vpop.f32.mrb[50].mxu0 }
 0x30d   : > { %v3447_v26 = vpop.f32.mrb[51].mxu1  ;;  %v6350_v13 = vadd.f32 %v8588_v59, %v10209_v28  ;;  %v8590_v29 = vadd.f32 %v8525_v4, %v8261_v62  ;;  %v6169_v30 = vpop.f32.mrb[51].mxu0 }
 0x30e   : > { %v6348_v14 = vadd.f32 %v8589_v63, %v10209_v28  ;;  %v8591_v31 = vadd.f32 %v6169_v30, %v3447_v26 }
 0x30f   : > { %v6414_v0 = vmax.f32 %v6350_v13, 0.0  ;;  %v6351_v15 = vadd.f32 %v8590_v29, %v10209_v28 }
 0x310   : > { %v6412_v16 = vmax.f32 %v6348_v14, 0.0  ;;  %v6349_v19 = vadd.f32 %v8591_v31, %v10209_v28 }
 0x311   : > { %6479 = vst.msk [vmem:[%s10215_s19 + $0x190] sm:$0xff] %vm6428_vm3, %v6414_v0  ;;  %v6415_v32 = vmax.f32 %v6351_v15, 0.0 }
 0x312   : > { %v8264_v1 = vpop.f32.mrb[52].mxu1  ;;  %6477 = vst.msk [vmem:[%s10215_s19 + $0x180] sm:$0xff] %vm6428_vm3, %v6412_v16  ;;  %v6413_v33 = vmax.f32 %v6349_v19, 0.0  ;;  %v8528_v34 = vpop.f32.mrb[52].mxu0 }
 0x313   : > { %v3460_v2 = vpop.f32.mrb[53].mxu1  ;;  %6480 = vst.msk [vmem:[%s10215_s19 + $0x198] sm:$0xff] %vm6428_vm3, %v6415_v32  ;;  %v8592_v60 = vadd.f32 %v8528_v34, %v8264_v1  ;;  %v6182_v27 = vpop.f32.mrb[53].mxu0 }
 0x314   : > { %v8265_v17 = vpop.f32.mrb[54].mxu1  ;;  %6478 = vst.msk [vmem:[%s10215_s19 + $0x188] sm:$0xff] %vm6428_vm3, %v6413_v33  ;;  %v8593_v8 = vadd.f32 %v6182_v27, %v3460_v2  ;;  %v8529_v35 = vpop.f32.mrb[54].mxu0 }
 0x315   : > { %v3463_v18 = vpop.f32.mrb[55].mxu1  ;;  %v6354_v36 = vadd.f32 %v8592_v60, %v10209_v28  ;;  %v8594_v37 = vadd.f32 %v8529_v35, %v8265_v17  ;;  %v6185_v20 = vpop.f32.mrb[55].mxu0 }
 0x316   : > { %v6352_v38 = vadd.f32 %v8593_v8, %v10209_v28  ;;  %v8595_v21 = vadd.f32 %v6185_v20, %v3463_v18 }
 0x317   : > { %v6418_v39 = vmax.f32 %v6354_v36, 0.0  ;;  %v6355_v40 = vadd.f32 %v8594_v37, %v10209_v28 }
 0x318   : > { %v6416_v3 = vmax.f32 %v6352_v38, 0.0  ;;  %v6353_v41 = vadd.f32 %v8595_v21, %v10209_v28 }
 0x319   : > { %6483 = vst.msk [vmem:[%s10215_s19 + $0x1b0] sm:$0xff] %vm6428_vm3, %v6418_v39  ;;  %v6419_v42 = vmax.f32 %v6355_v40, 0.0 }
 0x31a   : > { %v8268_v5 = vpop.f32.mrb[56].mxu1  ;;  %6481 = vst.msk [vmem:[%s10215_s19 + $0x1a0] sm:$0xff] %vm6428_vm3, %v6416_v3  ;;  %v6417_v43 = vmax.f32 %v6353_v41, 0.0  ;;  %v8532_v22 = vpop.f32.mrb[56].mxu0 }
 0x31b   : > { %v3476_v44 = vpop.f32.mrb[57].mxu1  ;;  %6484 = vst.msk [vmem:[%s10215_s19 + $0x1b8] sm:$0xff] %vm6428_vm3, %v6419_v42  ;;  %v8596_v6 = vadd.f32 %v8532_v22, %v8268_v5  ;;  %v6198_v23 = vpop.f32.mrb[57].mxu0 }
 0x31c   : > { %v8269_v7 = vpop.f32.mrb[58].mxu1  ;;  %6482 = vst.msk [vmem:[%s10215_s19 + $0x1a8] sm:$0xff] %vm6428_vm3, %v6417_v43  ;;  %v8597_v45 = vadd.f32 %v6198_v23, %v3476_v44  ;;  %v8533_v24 = vpop.f32.mrb[58].mxu0 }
 0x31d   : > { %v3479_v46 = vpop.f32.mrb[59].mxu1  ;;  %v6358_v47 = vadd.f32 %v8596_v6, %v10209_v28  ;;  %v8598_v25 = vadd.f32 %v8533_v24, %v8269_v7  ;;  %v6201_v48 = vpop.f32.mrb[59].mxu0 }
 0x31e   : > { %v6356_v49 = vadd.f32 %v8597_v45, %v10209_v28  ;;  %v8599_v50 = vadd.f32 %v6201_v48, %v3479_v46 }
 0x31f   : > { %v6422_v51 = vmax.f32 %v6358_v47, 0.0  ;;  %v6359_v52 = vadd.f32 %v8598_v25, %v10209_v28 }
 0x320   : > { %v6420_v9 = vmax.f32 %v6356_v49, 0.0  ;;  %v6357_v53 = vadd.f32 %v8599_v50, %v10209_v28 }
 0x321   : > { %6487 = vst.msk [vmem:[%s10215_s19 + $0x1d0] sm:$0xff] %vm6428_vm3, %v6422_v51  ;;  %v6423_v54 = vmax.f32 %v6359_v52, 0.0 }
 0x322   : > { %v8272_v10 = vpop.f32.mrb[60].mxu1  ;;  %6485 = vst.msk [vmem:[%s10215_s19 + $0x1c0] sm:$0xff] %vm6428_vm3, %v6420_v9  ;;  %v6421_v55 = vmax.f32 %v6357_v53, 0.0  ;;  %v8536_v56 = vpop.f32.mrb[60].mxu0 }
 0x323   : > { %v3492_v11 = vpop.f32.mrb[61].mxu1  ;;  %6488 = vst.msk [vmem:[%s10215_s19 + $0x1d8] sm:$0xff] %vm6428_vm3, %v6423_v54  ;;  %v8600_v12 = vadd.f32 %v8536_v56, %v8272_v10  ;;  %v6214_v57 = vpop.f32.mrb[61].mxu0 }
 0x324   : > { %v8273_v58 = vpop.f32.mrb[62].mxu1  ;;  %6486 = vst.msk [vmem:[%s10215_s19 + $0x1c8] sm:$0xff] %vm6428_vm3, %v6421_v55  ;;  %v8601_v59 = vadd.f32 %v6214_v57, %v3492_v11  ;;  %v8537_v61 = vpop.f32.mrb[62].mxu0 }
 0x325   : > { %v3495_v62 = vpop.f32.mrb[63].mxu1  ;;  %v6362_v63 = vadd.f32 %v8600_v12, %v10209_v28  ;;  %v8602_v4 = vadd.f32 %v8537_v61, %v8273_v58  ;;  %v6217_v26 = vpop.f32.mrb[63].mxu0 }
 0x326   : > { %v6360_v13 = vadd.f32 %v8601_v59, %v10209_v28  ;;  %v8603_v29 = vadd.f32 %v6217_v26, %v3495_v62 }
 0x327   : > { %v6426_v30 = vmax.f32 %v6362_v63, 0.0  ;;  %v6363_v14 = vadd.f32 %v8602_v4, %v10209_v28 }
 0x328   : > { %v6424_v31 = vmax.f32 %v6360_v13, 0.0  ;;  %v6361_v0 = vadd.f32 %v8603_v29, %v10209_v28 }
 0x329   : > { %6491 = vst.msk [vmem:[%s10215_s19 + $0x1f0] sm:$0xff] %vm6428_vm3, %v6426_v30  ;;  %v6427_v15 = vmax.f32 %v6363_v14, 0.0 }
 0x32a   : > { %6489 = vst.msk [vmem:[%s10215_s19 + $0x1e0] sm:$0xff] %vm6428_vm3, %v6424_v31  ;;  %v6425_v16 = vmax.f32 %v6361_v0, 0.0 }
 0x32b   : > { %6492 = vst.msk [vmem:[%s10215_s19 + $0x1f8] sm:$0xff] %vm6428_vm3, %v6427_v15 }
 0x32c   : > { %6490 = vst.msk [vmem:[%s10215_s19 + $0x1e8] sm:$0xff] %vm6428_vm3, %v6425_v16 }
 0x32d PF: > { %s15_s22 = sadd.s32 1, %s9420_s22   ;;  %s10454_s18 = smov %s9412_s20 }
 0x32e   : > { %p12_p7 = scmp.ge.s32.totalorder %s15_s22, 6   ;;  %s10455_s19 = smov %s9416_s21 }
 0x32f   : > { %s10456_s20 = smov %s10459_s23  ;;  %s10457_s21 = smov %s10463_s24 }
 0x330   :  { %14 = sbr.rel (!%p12_p7) target bundleno = 3 (0x3), region = 93 }

// kernel: feature_matching_forward.10
= control target key start
LH: loop header
LB: loop body
LE: loop exit
PB: predicated region body
PF: predicated region fallthrough
CT: control target
= control target key end

     0   :  { %s9917_s18 = smov 0   ;;  %s9919_s19 = smov 0   ;;  %s10988_s0 = inlined_call_operand.vmem [shape: bf16[2,34,32,64], index: 0, kind: input, shape index: {}]   ;;  %s10989_s1 = inlined_call_operand.vmem [shape: bf16[2,34,32,64], index: 1, kind: input, shape index: {}]   ;;  %s10990_s2 = inlined_call_operand.vmem [shape: bf16[2,34,32,64], index: 2, kind: input, shape index: {}]   ;;  %s10991_s3 = inlined_call_operand.vmem [shape: bf16[3,3,64,64], index: 3, kind: input, shape index: {}]   ;;  %s10992_s4 = inlined_call_operand.vmem [shape: f32[1,64], index: 4, kind: input, shape index: {}]   ;;  %s10993_s5 = inlined_call_operand.vmem [shape: f32[2,32,32,64], index: 5, kind: output, shape index: {}]  }
   0x1   :  { %s9921_s20 = smov 0   ;;  %s9923_s21 = smov 0  }
   0x2   :  { %s9925_s22 = smov 0  }
   0x3 LB: > { %s24_s23 = sadd.s32 1, %s9877_s20  ;;  %s27_s24 = sadd.s32 1, %s9881_s21  ;;  %s9885_s22 = sphi %s9925_s22, %s15_s22   ;;  %s9881_s21 = sphi %s9923_s21, %s10997_s21   ;;  %s9877_s20 = sphi %s9921_s20, %s10996_s20   ;;  %s9873_s19 = sphi %s9919_s19, %s10995_s19   ;;  %s9869_s18 = sphi %s9917_s18, %s10994_s18  }
   0x4   : > { %p25_p0 = scmp.ge.s32.totalorder %s24_s23, 2  ;;  %p6888_p1 = scmp.ge.s32.totalorder %s9885_s22, 1 }
   0x5   : > { %p221_p2 = scmp.lt.s32.totalorder %s9885_s22, 5 }
   0x6   : > { %s10999_s23 = smov (%p25_p0, %s24_s23), 0  ;;  %s11001_s24 = smov (!%p25_p0, %s27_s24), %s9881_s21 }
   0x7   : > { %p222_p3 = pnand %p6888_p1, %p221_p2  ;;  %p29_p4 = scmp.ge.s32.totalorder %s11001_s24, 2 }
   0x8   : > { %v9519_v0 = vld [vmem:[%s10991_s3 + $0x20] sm:$0xff] (!%p222_p3)   ;;  %p264_p5 = scmp.lt.s32.totalorder (!%p222_p3), %s9873_s19, 1  ;;  %v9521_v2 = vld [vmem:[%s10991_s3 + $0x28] sm:$0xff] (!%p222_p3)   ;;  %v9523_v4 = vld [vmem:[%s10991_s3 + $0x30] sm:$0xff] (!%p222_p3)   ;;  %s9973_s13 = sshll.u32 (!%p222_p3), %s9869_s18, 8  ;;  %vm626_vm0 = vcmask (!%p222_p3), 523264  }
   0x9   : > { %s11003_s24 = smov (%p29_p4, %s11001_s24), 0  ;;  %225 = sbr.rel (%p222_p3) target bundleno = 817 (0x331), region = 40 }
   0xa   : > { %v9520_v1 = vld [vmem:[%s10991_s3 + $0x80] sm:$0xff] (!%p222_p3)   ;;  %8310 = vmatprep.subr.bf16.mxu1 (!%p222_p3), %v9519_v0  ;;  %v9522_v3 = vld [vmem:[%s10991_s3 + $0x88] sm:$0xff] (!%p222_p3)   ;;  %v9524_v5 = vld [vmem:[%s10991_s3 + $0x90] sm:$0xff] (!%p222_p3)  }
   0xb   : > { %8598 = vmatprep.subr.bf16.mxu0 (!%p222_p3), %v9520_v1  ;;  %8311 = vmatpush3.bf16.msra.mxu1 (!%p222_p3), %v9519_v0  ;;  %v9525_v6 = vld [vmem:[%s10991_s3 + $0x38] sm:$0xff] (!%p222_p3)   ;;  %v9530_v10 = vld [vmem:[%s10991_s3] sm:$0xff] (!%p222_p3)   ;;  %v9541_v18 = vld [vmem:[%s10991_s3 + $0xa8] sm:$0xff] (!%p222_p3)  }
   0xc   : > { %8599 = vmatpush3.bf16.msra.mxu0 (!%p222_p3), %v9520_v1  ;;  %8312 = vmatprep.subr.bf16.mxu1 (!%p222_p3), %v9521_v2  ;;  %v9526_v7 = vld [vmem:[%s10991_s3 + $0x98] sm:$0xff] (!%p222_p3)   ;;  %v9532_v11 = vld [vmem:[%s10991_s3 + $0xa0] sm:$0xff] (!%p222_p3)   ;;  %v9549_v24 = vld [vmem:[%s10991_s3 + $0x8] sm:$0xff] (!%p222_p3)  }
   0xd   : > { %8600 = vmatprep.subr.bf16.mxu0 (!%p222_p3), %v9522_v3  ;;  %v9551_v26 = vld [vmem:[%s10991_s3 + $0xb0] sm:$0xff] (!%p222_p3)   ;;  %v9560_v31 = vld [vmem:[%s10991_s3 + $0xb8] sm:$0xff] (!%p222_p3)   ;;  %v9570_v37 = vld [vmem:[%s10991_s3 + $0xc0] sm:$0xff] (!%p222_p3)  }
   0xe   : > { %v9568_v36 = vld [vmem:[%s10991_s3 + $0x10] sm:$0xff] (!%p222_p3)   ;;  %v9586_v46 = vld [vmem:[%s10991_s3 + $0x18] sm:$0xff] (!%p222_p3)   ;;  %v9588_v55 = vld [vmem:[%s10991_s3 + $0xc8] sm:$0xff] (!%p222_p3)  }
   0xf   : > { %8313 = vmatpush3.bf16.msra.mxu1 (!%p222_p3), %v9521_v2  ;;  %v10113_v58 = vld [vmem:[%s10991_s3 + $0x40] sm:$0xff] (!%p222_p3)   ;;  %v9606_v60 = vld [vmem:[%s10991_s3 + $0xd0] sm:$0xff] (!%p222_p3)  }
  0x10   : > { %s11005_s19 = smov (!%p264_p5, %s9873_s19), 1  ;;  %8601 = vmatpush3.bf16.msra.mxu0 %v9522_v3  ;;  %8314 = vmatprep.subr.bf16.mxu1 %v9523_v4 }
  0x11   : > { %s9967_s10 = smul.u32 544, %s11005_s19  ;;  %8602 = vmatprep.subr.bf16.mxu0 %v9524_v5 }
  0x13   : > { %s268_s16 = scalar_lea.vmem %s10988_s0, %s9967_s10  ;;  %s273_s26 = scalar_lea.vmem %s10989_s1, %s9967_s10  ;;  %8315 = vmatpush3.bf16.msra.mxu1 %v9523_v4 }
  0x14   : > { %s9987_s29 = scalar_lea.vmem %s268_s16, %s9973_s13  ;;  %s9993_s7 = scalar_lea.vmem %s273_s26, %s9973_s13  ;;  %8603 = vmatpush3.bf16.msra.mxu0 %v9524_v5  ;;  %8316 = vmatprep.subr.bf16.mxu1 %v9525_v6 }
  0x15   : > { %v9527_v8 = vld [vmem:[%s9993_s7] sm:$0xff]   ;;  %v9528_v9 = vld [vmem:[%s9993_s7 + $0x10] sm:$0xff]   ;;  %8604 = vmatprep.subr.bf16.mxu0 %v9526_v7  ;;  %v9529_v12 = vld [vmem:[%s9993_s7 + $0x8] sm:$0xff]   ;;  %s278_s8 = scalar_lea.vmem %s10990_s2, %s9967_s10 }
  0x16   : > { %8318 = vmatprep.mubr.msk.bf16.mxu1 %vm626_vm0, %v9527_v8  ;;  %8606 = vmatprep.mubr.msk.bf16.mxu0 %vm626_vm0, %v9528_v9  ;;  %v9531_v13 = vld [vmem:[%s9993_s7 + $0x18] sm:$0xff]   ;;  %v9533_v14 = vld [vmem:[%s9993_s7 + $0x10] sm:$0xff]   ;;  %v9534_v15 = vld [vmem:[%s9993_s7 + $0x20] sm:$0xff]   ;;  %s10055_s9 = scalar_lea.vmem %s278_s8, %s9973_s13 }
  0x17   : > { %8317 = vmatpush3.bf16.msra.mxu1 %v9525_v6  ;;  %v9535_v16 = vld [vmem:[%s9993_s7 + $0x18] sm:$0xff]   ;;  %v9536_v17 = vld [vmem:[%s9993_s7 + $0x28] sm:$0xff]   ;;  %v9537_v19 = vld [vmem:[%s9993_s7 + $0x20] sm:$0xff]  }
  0x18   : > { %8605 = vmatpush3.bf16.msra.mxu0 %v9526_v7  ;;  %8382 = vmatprep.subr.bf16.mxu1 %v9530_v10  ;;  %v9538_v20 = vld [vmem:[%s9993_s7 + $0x30] sm:$0xff]   ;;  %v9539_v21 = vld [vmem:[%s9993_s7 + $0x28] sm:$0xff]   ;;  %v9540_v22 = vld [vmem:[%s9993_s7 + $0x38] sm:$0xff]  }
  0x19   : > { %8670 = vmatprep.subr.bf16.mxu0 %v9532_v11  ;;  %v9542_v23 = vld [vmem:[%s9993_s7 + $0x30] sm:$0xff]   ;;  %v9543_v25 = vld [vmem:[%s9993_s7 + $0x40] sm:$0xff]   ;;  %v9544_v27 = vld [vmem:[%s9993_s7 + $0x38] sm:$0xff]  }
  0x1a   : > { %8319 = vmatmul.mubr.msk.bf16.vlgmr.msra.gmra.mrb[0].mxu1 %vm626_vm0, %v9529_v12  ;;  %v9545_v28 = vld [vmem:[%s9993_s7 + $0x48] sm:$0xff]   ;;  %v9546_v29 = vld [vmem:[%s9993_s7 + $0x40] sm:$0xff]   ;;  %v9547_v30 = vld [vmem:[%s9993_s7 + $0x50] sm:$0xff]  }
  0x1b   : > { %8607 = vmatmul.mubr.msk.bf16.vlgmr.msra.gmra.mrb[0].mxu0 %vm626_vm0, %v9531_v13  ;;  %8383 = vmatpush3.bf16.msra.mxu1 %v9530_v10  ;;  %v9548_v32 = vld [vmem:[%s9993_s7 + $0x48] sm:$0xff]   ;;  %v9550_v33 = vld [vmem:[%s9993_s7 + $0x58] sm:$0xff]   ;;  %v9552_v34 = vld [vmem:[%s9993_s7 + $0x50] sm:$0xff]  }
  0x1c   : > { %8671 = vmatpush3.bf16.msra.mxu0 %v9532_v11  ;;  %8322 = vmatprep.mubr.msk.bf16.mxu1 %vm626_vm0, %v9533_v14  ;;  %v9553_v35 = vld [vmem:[%s9993_s7 + $0x60] sm:$0xff]   ;;  %v9554_v38 = vld [vmem:[%s9993_s7 + $0x58] sm:$0xff]   ;;  %v9555_v39 = vld [vmem:[%s9993_s7 + $0x68] sm:$0xff]  }
  0x1d   : > { %8610 = vmatprep.mubr.msk.bf16.mxu0 %vm626_vm0, %v9534_v15  ;;  %8672 = vmatprep.subr.bf16.mxu0 %v9541_v18  ;;  %v9556_v40 = vld [vmem:[%s9993_s7 + $0x60] sm:$0xff]   ;;  %v9557_v41 = vld [vmem:[%s9993_s7 + $0x70] sm:$0xff]   ;;  %v9558_v42 = vld [vmem:[%s9993_s7 + $0x68] sm:$0xff]  }
  0x1e   : > { %8384 = vmatprep.subr.bf16.mxu1 %v9549_v24  ;;  %v9559_v43 = vld [vmem:[%s9993_s7 + $0x78] sm:$0xff]   ;;  %v9561_v44 = vld [vmem:[%s9993_s7 + $0x70] sm:$0xff]   ;;  %v9562_v45 = vld [vmem:[%s9993_s7 + $0x80] sm:$0xff]  }
  0x1f   : > { %8385 = vmatpush3.bf16.msra.mxu1 %v9549_v24  ;;  %v9563_v47 = vld [vmem:[%s9993_s7 + $0x78] sm:$0xff]   ;;  %v9564_v48 = vld [vmem:[%s9993_s7 + $0x88] sm:$0xff]   ;;  %v9565_v49 = vld [vmem:[%s9993_s7 + $0x80] sm:$0xff]  }
  0x20   : > { %8673 = vmatpush3.bf16.msra.mxu0 %v9541_v18  ;;  %8386 = vmatprep.subr.bf16.mxu1 %v9568_v36  ;;  %v9566_v50 = vld [vmem:[%s10055_s9 + $0x10] sm:$0xff]   ;;  %v9567_v51 = vld [vmem:[%s9993_s7 + $0x88] sm:$0xff]   ;;  %v9569_v52 = vld [vmem:[%s10055_s9 + $0x18] sm:$0xff]  }
  0x21   : > { %8674 = vmatprep.subr.bf16.mxu0 %v9551_v26  ;;  %v9571_v53 = vld [vmem:[%s9993_s7 + $0x90] sm:$0xff]   ;;  %v9572_v54 = vld [vmem:[%s10055_s9 + $0x20] sm:$0xff]   ;;  %v9573_v56 = vld [vmem:[%s9993_s7 + $0x98] sm:$0xff]  }
  0x22   : > { %8323 = vmatmul.mubr.msk.bf16.gmra.mrb[4].mxu1 %vm626_vm0, %v9535_v16  ;;  %v9574_v57 = vld [vmem:[%s10055_s9 + $0x28] sm:$0xff]   ;;  %v9575_v59 = vld [vmem:[%s9993_s7 + $0xa0] sm:$0xff]   ;;  %v9576_v61 = vld [vmem:[%s10055_s9 + $0x30] sm:$0xff]  }
  0x23   : > { %8611 = vmatmul.mubr.msk.bf16.gmra.mrb[4].mxu0 %vm626_vm0, %v9536_v17  ;;  %8326 = vmatprep.mubr.msk.bf16.mxu1 %vm626_vm0, %v9537_v19  ;;  %v9577_v62 = vld [vmem:[%s9993_s7 + $0xa8] sm:$0xff]   ;;  %v9578_v63 = vld [vmem:[%s10055_s9 + $0x38] sm:$0xff]   ;;  %v9579_v0 = vld [vmem:[%s9993_s7 + $0xb0] sm:$0xff]  }
  0x24   : > { %8614 = vmatprep.mubr.msk.bf16.mxu0 %vm626_vm0, %v9538_v20  ;;  %8675 = vmatpush3.bf16.msra.mxu0 %v9551_v26  ;;  %v9580_v1 = vld [vmem:[%s10055_s9 + $0x40] sm:$0xff]   ;;  %v9581_v2 = vld [vmem:[%s9993_s7 + $0xb8] sm:$0xff]   ;;  %v9582_v3 = vld [vmem:[%s10055_s9 + $0x48] sm:$0xff]  }
  0x25   : > { %8676 = vmatprep.subr.bf16.mxu0 %v9560_v31  ;;  %8387 = vmatpush3.bf16.msra.mxu1 %v9568_v36  ;;  %v9583_v4 = vld [vmem:[%s9993_s7 + $0xc0] sm:$0xff]   ;;  %v9584_v5 = vld [vmem:[%s10055_s9 + $0x50] sm:$0xff]   ;;  %v9624_v6 = vld [vmem:[%s10991_s3 + $0xd8] sm:$0xff]  }
  0x26   : > { %8388 = vmatprep.subr.bf16.mxu1 %v9586_v46  ;;  %v9585_v7 = vld [vmem:[%s9993_s7 + $0xc8] sm:$0xff]   ;;  %v9587_v8 = vld [vmem:[%s10055_s9 + $0x58] sm:$0xff]   ;;  %v9589_v9 = vld [vmem:[%s9993_s7 + $0xd0] sm:$0xff]  }
  0x27   : > { %v9590_v10 = vld [vmem:[%s10055_s9 + $0x60] sm:$0xff]   ;;  %v9591_v11 = vld [vmem:[%s9993_s7 + $0xd8] sm:$0xff]   ;;  %v9592_v12 = vld [vmem:[%s10055_s9 + $0x68] sm:$0xff]  }
  0x28   : > { %8677 = vmatpush3.bf16.msra.mxu0 %v9560_v31  ;;  %v9593_v13 = vld [vmem:[%s9993_s7 + $0xe0] sm:$0xff]   ;;  %v9594_v14 = vld [vmem:[%s10055_s9 + $0x70] sm:$0xff]   ;;  %v9595_v16 = vld [vmem:[%s9993_s7 + $0xe8] sm:$0xff]  }
  0x29   : > { %8742 = vmatprep.subr.bf16.mxu0 %v9570_v37  ;;  %8389 = vmatpush3.bf16.msra.mxu1 %v9586_v46  ;;  %v10162_v15 = vld [vmem:[%s10991_s3 + $0xe0] sm:$0xff]   ;;  %v9596_v17 = vld [vmem:[%s10055_s9 + $0x78] sm:$0xff]   ;;  %v9597_v18 = vld [vmem:[%s9993_s7 + $0xf0] sm:$0xff]  }
  0x2a   : > { %8327 = vmatmul.mubr.msk.bf16.gmra.mrb[8].mxu1 %vm626_vm0, %v9539_v21  ;;  %8454 = vmatprep.subr.bf16.mxu1 %v10113_v58  ;;  %v9598_v19 = vld [vmem:[%s10055_s9 + $0x80] sm:$0xff]   ;;  %v9599_v20 = vld [vmem:[%s9993_s7 + $0xf8] sm:$0xff]   ;;  %v9600_v21 = vld [vmem:[%s10055_s9 + $0x88] sm:$0xff]  }
  0x2b   : > { %8615 = vmatmul.mubr.msk.bf16.gmra.mrb[8].mxu0 %vm626_vm0, %v9540_v22  ;;  %8330 = vmatprep.mubr.msk.bf16.mxu1 %vm626_vm0, %v9542_v23  ;;  %v9601_v22 = vld [vmem:[%s9987_s29] sm:$0xff]   ;;  %v9602_v23 = vld [vmem:[%s10055_s9 + $0x90] sm:$0xff]   ;;  %v9603_v24 = vld [vmem:[%s9987_s29 + $0x8] sm:$0xff]  }
  0x2c   : > { %8618 = vmatprep.mubr.msk.bf16.mxu0 %vm626_vm0, %v9543_v25  ;;  %v9605_v25 = vld [vmem:[%s10055_s9 + $0x98] sm:$0xff]   ;;  %v9607_v26 = vld [vmem:[%s9987_s29 + $0x10] sm:$0xff]   ;;  %v9610_v31 = vld [vmem:[%s10055_s9 + $0xa8] sm:$0xff]  }
  0x2d   : > { %v10212_v36 = vld [vmem:[%s10991_s3 + $0x60] sm:$0xff]   ;;  %v9625_v46 = vld [vmem:[%s9987_s29 + $0x50] sm:$0xff]  }
  0x32   : > { %8331 = vmatmul.mubr.msk.bf16.gmra.mrb[12].mxu1 %vm626_vm0, %v9544_v27  ;;  %v9608_v27 = vld [vmem:[%s10055_s9 + $0xa0] sm:$0xff]  }
  0x33   : > { %8619 = vmatmul.mubr.msk.bf16.gmra.mrb[12].mxu0 %vm626_vm0, %v9545_v28  ;;  %8334 = vmatprep.mubr.msk.bf16.mxu1 %vm626_vm0, %v9546_v29  ;;  %v9622_v28 = vld [vmem:[%s10991_s3 + $0x48] sm:$0xff]   ;;  %v9640_v29 = vld [vmem:[%s10991_s3 + $0x50] sm:$0xff]  }
  0x34   : > { %8622 = vmatprep.mubr.msk.bf16.mxu0 %vm626_vm0, %v9547_v30  ;;  %v9609_v30 = vld [vmem:[%s9987_s29 + $0x18] sm:$0xff]  }
  0x3a   : > { %8335 = vmatmul.mubr.msk.bf16.gmra.mrb[16].mxu1 %vm626_vm0, %v9548_v32  ;;  %v9611_v32 = vld [vmem:[%s9987_s29 + $0x20] sm:$0xff]  }
  0x3b   : > { %8623 = vmatmul.mubr.msk.bf16.gmra.mrb[16].mxu0 %vm626_vm0, %v9550_v33  ;;  %8338 = vmatprep.mubr.msk.bf16.mxu1 %vm626_vm0, %v9552_v34  ;;  %v9612_v33 = vld [vmem:[%s10055_s9 + $0xb0] sm:$0xff]   ;;  %v9658_v34 = vld [vmem:[%s10991_s3 + $0x58] sm:$0xff]  }
  0x3c   : > { %8626 = vmatprep.mubr.msk.bf16.mxu0 %vm626_vm0, %v9553_v35  ;;  %v9613_v35 = vld [vmem:[%s9987_s29 + $0x28] sm:$0xff]  }
  0x42   : > { %8339 = vmatmul.mubr.msk.bf16.gmra.mrb[20].mxu1 %vm626_vm0, %v9554_v38  ;;  %v9615_v38 = vld [vmem:[%s9987_s29 + $0x30] sm:$0xff]  }
  0x43   : > { %8627 = vmatmul.mubr.msk.bf16.gmra.mrb[20].mxu0 %vm626_vm0, %v9555_v39  ;;  %8342 = vmatprep.mubr.msk.bf16.mxu1 %vm626_vm0, %v9556_v40  ;;  %v9616_v39 = vld [vmem:[%s10055_s9 + $0xc0] sm:$0xff]   ;;  %v9617_v40 = vld [vmem:[%s9987_s29 + $0x38] sm:$0xff]  }
  0x44   : > { %8630 = vmatprep.mubr.msk.bf16.mxu0 %vm626_vm0, %v9557_v41  ;;  %v9618_v41 = vld [vmem:[%s10055_s9 + $0xc8] sm:$0xff]  }
  0x4a   : > { %8343 = vmatmul.mubr.msk.bf16.gmra.mrb[24].mxu1 %vm626_vm0, %v9558_v42  ;;  %v9619_v42 = vld [vmem:[%s9987_s29 + $0x40] sm:$0xff]  }
  0x4b   : > { %8631 = vmatmul.mubr.msk.bf16.gmra.mrb[24].mxu0 %vm626_vm0, %v9559_v43  ;;  %8346 = vmatprep.mubr.msk.bf16.mxu1 %vm626_vm0, %v9561_v44  ;;  %v9620_v43 = vld [vmem:[%s10055_s9 + $0xd0] sm:$0xff]   ;;  %v9621_v44 = vld [vmem:[%s9987_s29 + $0x48] sm:$0xff]  }
  0x4c   : > { %8634 = vmatprep.mubr.msk.bf16.mxu0 %vm626_vm0, %v9562_v45  ;;  %v9623_v45 = vld [vmem:[%s10055_s9 + $0xd8] sm:$0xff]  }
  0x52   : > { %8347 = vmatmul.mubr.msk.bf16.gmra.mrb[28].mxu1 %vm626_vm0, %v9563_v47  ;;  %v9626_v47 = vld [vmem:[%s10055_s9 + $0xe0] sm:$0xff]  }
  0x53   : > { %8635 = vmatmul.mubr.msk.bf16.gmra.mrb[28].mxu0 %vm626_vm0, %v9564_v48  ;;  %8350 = vmatprep.mubr.msk.bf16.mxu1 %vm626_vm0, %v9565_v49  ;;  %v9627_v48 = vld [vmem:[%s9987_s29 + $0x58] sm:$0xff]   ;;  %v9628_v49 = vld [vmem:[%s10055_s9 + $0xe8] sm:$0xff]  }
  0x54   : > { %8678 = vmatprep.mubr.msk.bf16.mxu0 %vm626_vm0, %v9566_v50  ;;  %v9629_v50 = vld [vmem:[%s9987_s29 + $0x60] sm:$0xff]  }
  0x5a   : > { %8351 = vmatmul.mubr.msk.bf16.gmra.mrb[32].mxu1 %vm626_vm0, %v9567_v51  ;;  %v9630_v51 = vld [vmem:[%s10055_s9 + $0xf0] sm:$0xff]  }
  0x5b   : > { %8679 = vmatmul.mubr.msk.bf16.vlgmr.msra.gmra.mrb[0].mxu0 %vm626_vm0, %v9569_v52  ;;  %8354 = vmatprep.mubr.msk.bf16.mxu1 %vm626_vm0, %v9571_v53  ;;  %v9631_v52 = vld [vmem:[%s9987_s29 + $0x68] sm:$0xff]   ;;  %v9632_v53 = vld [vmem:[%s10055_s9 + $0xf8] sm:$0xff]  }
  0x5c   : > { %8743 = vmatpush3.bf16.msra.mxu0 %v9570_v37  ;;  %8682 = vmatprep.mubr.msk.bf16.mxu0 %vm626_vm0, %v9572_v54  ;;  %v9614_v37 = vld [vmem:[%s10055_s9 + $0xb8] sm:$0xff]   ;;  %v9633_v54 = vld [vmem:[%s9987_s29 + $0x70] sm:$0xff]  }
  0x5d   : > { %8744 = vmatprep.subr.bf16.mxu0 %v9588_v55 }
  0x60   : > { %8745 = vmatpush3.bf16.msra.mxu0 %v9588_v55  ;;  %v9634_v55 = vld [vmem:[%s10055_s9 + $0x100] sm:$0xff]  }
  0x61   : > { %8746 = vmatprep.subr.bf16.mxu0 %v9606_v60 }
  0x62   : > { %8355 = vmatmul.mubr.msk.bf16.gmra.mrb[36].mxu1 %vm626_vm0, %v9573_v56  ;;  %v9635_v56 = vld [vmem:[%s9987_s29 + $0x78] sm:$0xff]  }
  0x63   : > { %8683 = vmatmul.mubr.msk.bf16.gmra.mrb[4].mxu0 %vm626_vm0, %v9574_v57  ;;  %8358 = vmatprep.mubr.msk.bf16.mxu1 %vm626_vm0, %v9575_v59  ;;  %v9636_v57 = vld [vmem:[%s10055_s9 + $0x108] sm:$0xff]   ;;  %v9638_v59 = vld [vmem:[%s9987_s29 + $0x20] sm:$0xff]  }
  0x64   : > { %8686 = vmatprep.mubr.msk.bf16.mxu0 %vm626_vm0, %v9576_v61  ;;  %8747 = vmatpush3.bf16.msra.mxu0 %v9606_v60  ;;  %v9639_v60 = vld [vmem:[%s9987_s29 + $0x88] sm:$0xff]  }
  0x65   : > { %8748 = vmatprep.subr.bf16.mxu0 %v9624_v6  ;;  %v9641_v61 = vld [vmem:[%s9987_s29 + $0x28] sm:$0xff]  }
  0x68   : > { %8749 = vmatpush3.bf16.msra.mxu0 %v9624_v6  ;;  %v9696_v6 = vld [vmem:[%s10991_s3 + $0xf8] sm:$0xff]  }
  0x69   : > { %8814 = vmatprep.subr.bf16.mxu0 %v10162_v15 }
  0x6a   : > { %8359 = vmatmul.mubr.msk.bf16.gmra.mrb[40].mxu1 %vm626_vm0, %v9577_v62  ;;  %v9643_v62 = vld [vmem:[%s9987_s29 + $0x90] sm:$0xff]  }
  0x6b   : > { %8687 = vmatmul.mubr.msk.bf16.gmra.mrb[8].mxu0 %vm626_vm0, %v9578_v63  ;;  %8362 = vmatprep.mubr.msk.bf16.mxu1 %vm626_vm0, %v9579_v0  ;;  %v9644_v63 = vld [vmem:[%s9987_s29 + $0x30] sm:$0xff]   ;;  %v9660_v0 = vld [vmem:[%s10991_s3 + $0xe8] sm:$0xff]  }
  0x6c   : > { %8690 = vmatprep.mubr.msk.bf16.mxu0 %vm626_vm0, %v9580_v1  ;;  %v9645_v1 = vld [vmem:[%s9987_s29 + $0x98] sm:$0xff]  }
  0x72   : > { %8363 = vmatmul.mubr.msk.bf16.gmra.mrb[44].mxu1 %vm626_vm0, %v9581_v2  ;;  %v9678_v2 = vld [vmem:[%s10991_s3 + $0xf0] sm:$0xff]  }
  0x73   : > { %8691 = vmatmul.mubr.msk.bf16.gmra.mrb[12].mxu0 %vm626_vm0, %v9582_v3  ;;  %8366 = vmatprep.mubr.msk.bf16.mxu1 %vm626_vm0, %v9583_v4  ;;  %v9646_v3 = vld [vmem:[%s9987_s29 + $0x38] sm:$0xff]   ;;  %v9647_v4 = vld [vmem:[%s9987_s29 + $0xa0] sm:$0xff]  }
  0x74   : > { %8694 = vmatprep.mubr.msk.bf16.mxu0 %vm626_vm0, %v9584_v5  ;;  %v9648_v5 = vld [vmem:[%s9987_s29 + $0x40] sm:$0xff]  }
  0x7a   : > { %8367 = vmatmul.mubr.msk.bf16.gmra.mrb[48].mxu1 %vm626_vm0, %v9585_v7  ;;  %v9649_v7 = vld [vmem:[%s9987_s29 + $0xa8] sm:$0xff]  }
  0x7b   : > { %8695 = vmatmul.mubr.msk.bf16.gmra.mrb[16].mxu0 %vm626_vm0, %v9587_v8  ;;  %8370 = vmatprep.mubr.msk.bf16.mxu1 %vm626_vm0, %v9589_v9  ;;  %v10292_v8 = vld [vmem:[%s10991_s3 + $0x100] sm:$0xff]   ;;  %v9650_v9 = vld [vmem:[%s9987_s29 + $0x48] sm:$0xff]  }
  0x7c   : > { %8698 = vmatprep.mubr.msk.bf16.mxu0 %vm626_vm0, %v9590_v10  ;;  %v9651_v10 = vld [vmem:[%s9987_s29 + $0xb0] sm:$0xff]  }
  0x82   : > { %8371 = vmatmul.mubr.msk.bf16.gmra.mrb[52].mxu1 %vm626_vm0, %v9591_v11  ;;  %v9652_v11 = vld [vmem:[%s9987_s29 + $0x50] sm:$0xff]  }
  0x83   : > { %8699 = vmatmul.mubr.msk.bf16.gmra.mrb[20].mxu0 %vm626_vm0, %v9592_v12  ;;  %8374 = vmatprep.mubr.msk.bf16.mxu1 %vm626_vm0, %v9593_v13  ;;  %v9653_v12 = vld [vmem:[%s9987_s29 + $0xb8] sm:$0xff]  }
  0x84   : > { %8702 = vmatprep.mubr.msk.bf16.mxu0 %vm626_vm0, %v9594_v14  ;;  %v9654_v13 = vld [vmem:[%s9987_s29 + $0x58] sm:$0xff]   ;;  %v9655_v14 = vld [vmem:[%s9987_s29 + $0xc0] sm:$0xff]  }
  0x8a   : > { %8375 = vmatmul.mubr.msk.bf16.gmra.mrb[56].mxu1 %vm626_vm0, %v9595_v16  ;;  %v9657_v16 = vld [vmem:[%s9987_s29 + $0xc8] sm:$0xff]  }
  0x8b   : > { %8703 = vmatmul.mubr.msk.bf16.gmra.mrb[24].mxu0 %vm626_vm0, %v9596_v17  ;;  %8378 = vmatprep.mubr.msk.bf16.mxu1 %vm626_vm0, %v9597_v18  ;;  %v9659_v17 = vld [vmem:[%s9987_s29 + $0x68] sm:$0xff]   ;;  %v9661_v18 = vld [vmem:[%s9987_s29 + $0xd0] sm:$0xff]  }
  0x8c   : > { %8706 = vmatprep.mubr.msk.bf16.mxu0 %vm626_vm0, %v9598_v19  ;;  %v9662_v19 = vld [vmem:[%s9987_s29 + $0x70] sm:$0xff]  }
  0x92   : > { %8379 = vmatmul.mubr.msk.bf16.gmra.mrb[60].mxu1 %vm626_vm0, %v9599_v20  ;;  %v9663_v20 = vld [vmem:[%s9987_s29 + $0xd8] sm:$0xff]  }
  0x93   : > { %8707 = vmatmul.mubr.msk.bf16.gmra.mrb[28].mxu0 %vm626_vm0, %v9600_v21  ;;  %8390 = vmatprep.mubr.msk.bf16.mxu1 %vm626_vm0, %v9601_v22  ;;  %v9664_v21 = vld [vmem:[%s9987_s29 + $0x78] sm:$0xff]   ;;  %v9665_v22 = vld [vmem:[%s9987_s29 + $0xe0] sm:$0xff]  }
  0x94   : > { %8710 = vmatprep.mubr.msk.bf16.mxu0 %vm626_vm0, %v9602_v23  ;;  %v9666_v23 = vld [vmem:[%s9987_s29 + $0x80] sm:$0xff]  }
  0x9a   : > { %8391 = vmatmul.mubr.msk.bf16.vlgmr.msra.gmra.mrb[0].mxu1 %vm626_vm0, %v9603_v24  ;;  %v9667_v24 = vld [vmem:[%s9987_s29 + $0xe8] sm:$0xff]  }
  0x9b   : > { %8711 = vmatmul.mubr.msk.bf16.gmra.mrb[32].mxu0 %vm626_vm0, %v9605_v25  ;;  %8455 = vmatpush3.bf16.msra.mxu1 %v10113_v58  ;;  %v9637_v58 = vld [vmem:[%s9987_s29 + $0x80] sm:$0xff]   ;;  %v9668_v25 = vld [vmem:[%s9987_s29 + $0x88] sm:$0xff]  }
  0x9c   : > { %8394 = vmatprep.mubr.msk.bf16.mxu1 %vm626_vm0, %v9607_v26  ;;  %8714 = vmatprep.mubr.msk.bf16.mxu0 %vm626_vm0, %v9608_v27  ;;  %v9669_v26 = vld [vmem:[%s9987_s29 + $0xf0] sm:$0xff]  }
  0x9d   : > { %8456 = vmatprep.subr.bf16.mxu1 %v9622_v28  ;;  %v9670_v27 = vld [vmem:[%s9987_s29 + $0x90] sm:$0xff]  }
  0x9f   : > { %8457 = vmatpush3.bf16.msra.mxu1 %v9622_v28  ;;  %v9671_v28 = vld [vmem:[%s9987_s29 + $0xf8] sm:$0xff]  }
  0xa0   : > { %8458 = vmatprep.subr.bf16.mxu1 %v9640_v29 }
  0xa2   : > { %8395 = vmatmul.mubr.msk.bf16.gmra.mrb[4].mxu1 %vm626_vm0, %v9609_v30  ;;  %v9673_v30 = vld [vmem:[%s10055_s9] sm:$0xff]  }
  0xa3   : > { %8715 = vmatmul.mubr.msk.bf16.gmra.mrb[36].mxu0 %vm626_vm0, %v9610_v31  ;;  %8398 = vmatprep.mubr.msk.bf16.mxu1 %vm626_vm0, %v9611_v32  ;;  %v9674_v31 = vld [vmem:[%s9987_s29 + $0xa0] sm:$0xff]   ;;  %v9675_v32 = vld [vmem:[%s10055_s9 + $0x8] sm:$0xff]  }
  0xa4   : > { %8718 = vmatprep.mubr.msk.bf16.mxu0 %vm626_vm0, %v9612_v33  ;;  %8459 = vmatpush3.bf16.msra.mxu1 %v9640_v29  ;;  %v9672_v29 = vld [vmem:[%s9987_s29 + $0x98] sm:$0xff]   ;;  %v9677_v33 = vld [vmem:[%s9987_s29 + $0xa8] sm:$0xff]  }
  0xa5   : > { %8460 = vmatprep.subr.bf16.mxu1 %v9658_v34 }
  0xa8   : > { %8461 = vmatpush3.bf16.msra.mxu1 %v9658_v34  ;;  %v9679_v34 = vld [vmem:[%s10055_s9 + $0x10] sm:$0xff]  }
  0xa9   : > { %8526 = vmatprep.subr.bf16.mxu1 %v10212_v36 }
  0xaa   : > { %8399 = vmatmul.mubr.msk.bf16.gmra.mrb[8].mxu1 %vm626_vm0, %v9613_v35  ;;  %v9680_v35 = vld [vmem:[%s9987_s29 + $0xb0] sm:$0xff]  }
  0xab   : > { %8719 = vmatmul.mubr.msk.bf16.gmra.mrb[40].mxu0 %vm626_vm0, %v9614_v37  ;;  %8402 = vmatprep.mubr.msk.bf16.mxu1 %vm626_vm0, %v9615_v38  ;;  %v9694_v37 = vld [vmem:[%s10991_s3 + $0x68] sm:$0xff]   ;;  %v9681_v38 = vld [vmem:[%s10055_s9 + $0x18] sm:$0xff]  }
  0xac   : > { %8722 = vmatprep.mubr.msk.bf16.mxu0 %vm626_vm0, %v9616_v39  ;;  %v9712_v39 = vld [vmem:[%s10991_s3 + $0x70] sm:$0xff]  }
  0xb2   : > { %8403 = vmatmul.mubr.msk.bf16.gmra.mrb[12].mxu1 %vm626_vm0, %v9617_v40  ;;  %v9682_v40 = vld [vmem:[%s9987_s29 + $0xb8] sm:$0xff]  }
  0xb3   : > { %8723 = vmatmul.mubr.msk.bf16.gmra.mrb[44].mxu0 %vm626_vm0, %v9618_v41  ;;  %8406 = vmatprep.mubr.msk.bf16.mxu1 %vm626_vm0, %v9619_v42  ;;  %v9683_v41 = vld [vmem:[%s10055_s9 + $0x20] sm:$0xff]  }
  0xb4   : > { %8726 = vmatprep.mubr.msk.bf16.mxu0 %vm626_vm0, %v9620_v43  ;;  %v9684_v42 = vld [vmem:[%s9987_s29 + $0xc0] sm:$0xff]   ;;  %v9685_v43 = vld [vmem:[%s10055_s9 + $0x28] sm:$0xff]  }
  0xba   : > { %8407 = vmatmul.mubr.msk.bf16.gmra.mrb[16].mxu1 %vm626_vm0, %v9621_v44  ;;  %v9686_v44 = vld [vmem:[%s9987_s29 + $0xc8] sm:$0xff]  }
  0xbb   : > { %8727 = vmatmul.mubr.msk.bf16.gmra.mrb[48].mxu0 %vm626_vm0, %v9623_v45  ;;  %8410 = vmatprep.mubr.msk.bf16.mxu1 %vm626_vm0, %v9625_v46  ;;  %v9687_v45 = vld [vmem:[%s10055_s9 + $0x30] sm:$0xff]  }
  0xbc   : > { %8730 = vmatprep.mubr.msk.bf16.mxu0 %vm626_vm0, %v9626_v47  ;;  %v9688_v46 = vld [vmem:[%s9987_s29 + $0xd0] sm:$0xff]   ;;  %v10375_v47 = vld [vmem:[%s10991_s3 + $0x80] sm:$0xff]  }
  0xc2   : > { %8411 = vmatmul.mubr.msk.bf16.gmra.mrb[20].mxu1 %vm626_vm0, %v9627_v48  ;;  %v9689_v48 = vld [vmem:[%s10055_s9 + $0x38] sm:$0xff]  }
  0xc3   : > { %8731 = vmatmul.mubr.msk.bf16.gmra.mrb[52].mxu0 %vm626_vm0, %v9628_v49  ;;  %8414 = vmatprep.mubr.msk.bf16.mxu1 %vm626_vm0, %v9629_v50  ;;  %v9690_v49 = vld [vmem:[%s9987_s29 + $0xd8] sm:$0xff]   ;;  %v9691_v50 = vld [vmem:[%s10055_s9 + $0x40] sm:$0xff]  }
  0xc4   : > { %8734 = vmatprep.mubr.msk.bf16.mxu0 %vm626_vm0, %v9630_v51  ;;  %v9692_v51 = vld [vmem:[%s9987_s29 + $0xe0] sm:$0xff]  }
  0xca   : > { %8415 = vmatmul.mubr.msk.bf16.gmra.mrb[24].mxu1 %vm626_vm0, %v9631_v52  ;;  %v9693_v52 = vld [vmem:[%s10055_s9 + $0x48] sm:$0xff]  }
  0xcb   : > { %8735 = vmatmul.mubr.msk.bf16.gmra.mrb[56].mxu0 %vm626_vm0, %v9632_v53  ;;  %8418 = vmatprep.mubr.msk.bf16.mxu1 %vm626_vm0, %v9633_v54  ;;  %v9695_v53 = vld [vmem:[%s9987_s29 + $0xe8] sm:$0xff]   ;;  %v9697_v54 = vld [vmem:[%s10055_s9 + $0x50] sm:$0xff]  }
  0xcc   : > { %8738 = vmatprep.mubr.msk.bf16.mxu0 %vm626_vm0, %v9634_v55  ;;  %v9698_v55 = vld [vmem:[%s9987_s29 + $0xf0] sm:$0xff]  }
  0xd2   : > { %8419 = vmatmul.mubr.msk.bf16.gmra.mrb[28].mxu1 %vm626_vm0, %v9635_v56  ;;  %v9699_v56 = vld [vmem:[%s10055_s9 + $0x58] sm:$0xff]  }
  0xd3   : > { %8739 = vmatmul.mubr.msk.bf16.gmra.mrb[60].mxu0 %vm626_vm0, %v9636_v57  ;;  %8422 = vmatprep.mubr.msk.bf16.mxu1 %vm626_vm0, %v9637_v58  ;;  %v9700_v57 = vld [vmem:[%s9987_s29 + $0xf8] sm:$0xff]   ;;  %v9701_v58 = vld [vmem:[%s10055_s9 + $0x60] sm:$0xff]  }
  0xd4   : > { %8750 = vmatprep.mubr.msk.bf16.mxu0 %vm626_vm0, %v9638_v59  ;;  %v9702_v59 = vld [vmem:[%s9987_s29 + $0x100] sm:$0xff]  }
  0xda   : > { %8423 = vmatmul.mubr.msk.bf16.gmra.mrb[32].mxu1 %vm626_vm0, %v9639_v60  ;;  %v9703_v60 = vld [vmem:[%s10055_s9 + $0x68] sm:$0xff]  }
  0xdb   : > { %8751 = vmatmul.mubr.msk.bf16.vlgmr.msra.gmra.mrb[0].mxu0 %vm626_vm0, %v9641_v61  ;;  %8426 = vmatprep.mubr.msk.bf16.mxu1 %vm626_vm0, %v9643_v62  ;;  %v9704_v61 = vld [vmem:[%s9987_s29 + $0x108] sm:$0xff]   ;;  %v9705_v62 = vld [vmem:[%s10055_s9 + $0x70] sm:$0xff]  }
  0xdc   : > { %8815 = vmatpush3.bf16.msra.mxu0 %v10162_v15  ;;  %8754 = vmatprep.mubr.msk.bf16.mxu0 %vm626_vm0, %v9644_v63  ;;  %v9656_v15 = vld [vmem:[%s9987_s29 + $0x60] sm:$0xff]   ;;  %v9706_v63 = vld [vmem:[%s9987_s29 + $0x110] sm:$0xff]  }
  0xdd   : > { %8816 = vmatprep.subr.bf16.mxu0 %v9660_v0 }
  0xe0   : > { %8817 = vmatpush3.bf16.msra.mxu0 %v9660_v0  ;;  %v9707_v0 = vld [vmem:[%s10055_s9 + $0x78] sm:$0xff]  }
  0xe1   : > { %8818 = vmatprep.subr.bf16.mxu0 %v9678_v2 }
  0xe2   : > { %8427 = vmatmul.mubr.msk.bf16.gmra.mrb[36].mxu1 %vm626_vm0, %v9645_v1  ;;  %v9708_v1 = vld [vmem:[%s9987_s29 + $0x118] sm:$0xff]  }
  0xe3   : > { %8755 = vmatmul.mubr.msk.bf16.gmra.mrb[4].mxu0 %vm626_vm0, %v9646_v3  ;;  %8430 = vmatprep.mubr.msk.bf16.mxu1 %vm626_vm0, %v9647_v4  ;;  %v9710_v3 = vld [vmem:[%s9993_s7 + $0x20] sm:$0xff]   ;;  %v9711_v4 = vld [vmem:[%s10055_s9 + $0x88] sm:$0xff]  }
  0xe4   : > { %8758 = vmatprep.mubr.msk.bf16.mxu0 %vm626_vm0, %v9648_v5  ;;  %8819 = vmatpush3.bf16.msra.mxu0 %v9678_v2  ;;  %v9709_v2 = vld [vmem:[%s10055_s9 + $0x80] sm:$0xff]   ;;  %v9713_v5 = vld [vmem:[%s9993_s7 + $0x28] sm:$0xff]  }
  0xe5   : > { %8820 = vmatprep.subr.bf16.mxu0 %v9696_v6 }
  0xe8   : > { %8821 = vmatpush3.bf16.msra.mxu0 %v9696_v6  ;;  %v9715_v6 = vld [vmem:[%s10055_s9 + $0x90] sm:$0xff]  }
  0xe9   : > { %8886 = vmatprep.subr.bf16.mxu0 %v10292_v8 }
  0xea   : > { %8431 = vmatmul.mubr.msk.bf16.gmra.mrb[40].mxu1 %vm626_vm0, %v9649_v7  ;;  %v9716_v7 = vld [vmem:[%s9993_s7 + $0x30] sm:$0xff]  }
  0xeb   : > { %8759 = vmatmul.mubr.msk.bf16.gmra.mrb[8].mxu0 %vm626_vm0, %v9650_v9  ;;  %8434 = vmatprep.mubr.msk.bf16.mxu1 %vm626_vm0, %v9651_v10  ;;  %v9732_v9 = vld [vmem:[%s10991_s3 + $0x108] sm:$0xff]   ;;  %v9749_v10 = vld [vmem:[%s10991_s3 + $0x110] sm:$0xff]  }
  0xec   : > { %8762 = vmatprep.mubr.msk.bf16.mxu0 %vm626_vm0, %v9652_v11  ;;  %v9717_v11 = vld [vmem:[%s10055_s9 + $0x98] sm:$0xff]  }
  0xf2   : > { %8435 = vmatmul.mubr.msk.bf16.gmra.mrb[44].mxu1 %vm626_vm0, %v9653_v12  ;;  %v9718_v12 = vld [vmem:[%s9993_s7 + $0x38] sm:$0xff]  }
  0xf3   : > { %8763 = vmatmul.mubr.msk.bf16.gmra.mrb[12].mxu0 %vm626_vm0, %v9654_v13  ;;  %8438 = vmatprep.mubr.msk.bf16.mxu1 %vm626_vm0, %v9655_v14  ;;  %v9719_v13 = vld [vmem:[%s10055_s9 + $0xa0] sm:$0xff]  }
  0xf4   : > { %8766 = vmatprep.mubr.msk.bf16.mxu0 %vm626_vm0, %v9656_v15  ;;  %v9720_v14 = vld [vmem:[%s9993_s7 + $0x40] sm:$0xff]   ;;  %v9721_v15 = vld [vmem:[%s10055_s9 + $0xa8] sm:$0xff]  }
  0xfa   : > { %8439 = vmatmul.mubr.msk.bf16.gmra.mrb[48].mxu1 %vm626_vm0, %v9657_v16  ;;  %v9722_v16 = vld [vmem:[%s9993_s7 + $0x48] sm:$0xff]  }
  0xfb   : > { %8767 = vmatmul.mubr.msk.bf16.gmra.mrb[16].mxu0 %vm626_vm0, %v9659_v17  ;;  %8442 = vmatprep.mubr.msk.bf16.mxu1 %vm626_vm0, %v9661_v18  ;;  %v9723_v17 = vld [vmem:[%s10055_s9 + $0xb0] sm:$0xff]  }
  0xfc   : > { %8770 = vmatprep.mubr.msk.bf16.mxu0 %vm626_vm0, %v9662_v19  ;;  %v9724_v18 = vld [vmem:[%s9993_s7 + $0x50] sm:$0xff]   ;;  %v9725_v19 = vld [vmem:[%s10055_s9 + $0xb8] sm:$0xff]  }
 0x102   : > { %8443 = vmatmul.mubr.msk.bf16.gmra.mrb[52].mxu1 %vm626_vm0, %v9663_v20  ;;  %v9726_v20 = vld [vmem:[%s9993_s7 + $0x58] sm:$0xff]  }
 0x103   : > { %8771 = vmatmul.mubr.msk.bf16.gmra.mrb[20].mxu0 %vm626_vm0, %v9664_v21  ;;  %8446 = vmatprep.mubr.msk.bf16.mxu1 %vm626_vm0, %v9665_v22  ;;  %v9727_v21 = vld [vmem:[%s10055_s9 + $0xc0] sm:$0xff]  }
 0x104   : > { %8774 = vmatprep.mubr.msk.bf16.mxu0 %vm626_vm0, %v9666_v23  ;;  %v9728_v22 = vld [vmem:[%s9993_s7 + $0x60] sm:$0xff]   ;;  %v9729_v23 = vld [vmem:[%s10055_s9 + $0xc8] sm:$0xff]  }
 0x10a   : > { %8447 = vmatmul.mubr.msk.bf16.gmra.mrb[56].mxu1 %vm626_vm0, %v9667_v24  ;;  %v9731_v24 = vld [vmem:[%s9993_s7 + $0x68] sm:$0xff]  }
 0x10b   : > { %8775 = vmatmul.mubr.msk.bf16.gmra.mrb[24].mxu0 %vm626_vm0, %v9668_v25  ;;  %8450 = vmatprep.mubr.msk.bf16.mxu1 %vm626_vm0, %v9669_v26  ;;  %v9733_v25 = vld [vmem:[%s10055_s9 + $0xd0] sm:$0xff]  }
 0x10c   : > { %8778 = vmatprep.mubr.msk.bf16.mxu0 %vm626_vm0, %v9670_v27  ;;  %v9734_v26 = vld [vmem:[%s9993_s7 + $0x70] sm:$0xff]   ;;  %v9735_v27 = vld [vmem:[%s10055_s9 + $0xd8] sm:$0xff]  }
 0x112   : > { %8451 = vmatmul.mubr.msk.bf16.gmra.mrb[60].mxu1 %vm626_vm0, %v9671_v28  ;;  %v9736_v28 = vld [vmem:[%s9993_s7 + $0x78] sm:$0xff]  }
 0x113   : > { %8779 = vmatmul.mubr.msk.bf16.gmra.mrb[28].mxu0 %vm626_vm0, %v9672_v29  ;;  %8462 = vmatprep.mubr.msk.bf16.mxu1 %vm626_vm0, %v9673_v30  ;;  %v9737_v29 = vld [vmem:[%s10055_s9 + $0xe0] sm:$0xff]  }
 0x114   : > { %8782 = vmatprep.mubr.msk.bf16.mxu0 %vm626_vm0, %v9674_v31  ;;  %v9738_v30 = vld [vmem:[%s9993_s7 + $0x80] sm:$0xff]   ;;  %v9739_v31 = vld [vmem:[%s10055_s9 + $0xe8] sm:$0xff]  }
 0x11a   : > { %8463 = vmatmul.mubr.msk.bf16.vlgmr.msra.gmra.mrb[0].mxu1 %vm626_vm0, %v9675_v32  ;;  %v9740_v32 = vld [vmem:[%s9993_s7 + $0x88] sm:$0xff]  }
 0x11b   : > { %8783 = vmatmul.mubr.msk.bf16.gmra.mrb[32].mxu0 %vm626_vm0, %v9677_v33  ;;  %8527 = vmatpush3.bf16.msra.mxu1 %v10212_v36  ;;  %v9730_v36 = vld [vmem:[%s10991_s3 + $0x78] sm:$0xff]   ;;  %v9741_v33 = vld [vmem:[%s10055_s9 + $0xf0] sm:$0xff]  }
 0x11c   : > { %8466 = vmatprep.mubr.msk.bf16.mxu1 %vm626_vm0, %v9679_v34  ;;  %8786 = vmatprep.mubr.msk.bf16.mxu0 %vm626_vm0, %v9680_v35  ;;  %v9742_v34 = vld [vmem:[%s9993_s7 + $0x90] sm:$0xff]   ;;  %v9743_v35 = vld [vmem:[%s10055_s9 + $0xf8] sm:$0xff]  }
 0x11d   : > { %8528 = vmatprep.subr.bf16.mxu1 %v9694_v37 }
 0x11f   : > { %8529 = vmatpush3.bf16.msra.mxu1 %v9694_v37  ;;  %v9744_v37 = vld [vmem:[%s9993_s7 + $0x98] sm:$0xff]  }
 0x120   : > { %8530 = vmatprep.subr.bf16.mxu1 %v9712_v39 }
 0x122   : > { %8467 = vmatmul.mubr.msk.bf16.gmra.mrb[4].mxu1 %vm626_vm0, %v9681_v38  ;;  %v9745_v38 = vld [vmem:[%s9987_s29 + $0x10] sm:$0xff]  }
 0x123   : > { %8787 = vmatmul.mubr.msk.bf16.gmra.mrb[36].mxu0 %vm626_vm0, %v9682_v40  ;;  %8470 = vmatprep.mubr.msk.bf16.mxu1 %vm626_vm0, %v9683_v41  ;;  %v9747_v40 = vld [vmem:[%s9987_s29 + $0x18] sm:$0xff]   ;;  %v9748_v41 = vld [vmem:[%s9993_s7 + $0xa8] sm:$0xff]  }
 0x124   : > { %8790 = vmatprep.mubr.msk.bf16.mxu0 %vm626_vm0, %v9684_v42  ;;  %8531 = vmatpush3.bf16.msra.mxu1 %v9712_v39  ;;  %v9746_v39 = vld [vmem:[%s9993_s7 + $0xa0] sm:$0xff]  }
 0x125   : > { %8532 = vmatprep.subr.bf16.mxu1 %v9730_v36  ;;  %v9750_v42 = vld [vmem:[%s9987_s29 + $0x20] sm:$0xff]  }
 0x128   : > { %8533 = vmatpush3.bf16.msra.mxu1 %v9730_v36  ;;  %v9751_v36 = vld [vmem:[%s9993_s7 + $0xb0] sm:$0xff]  }
 0x129   : > { %8958 = vmatprep.subr.bf16.mxu1 %v10375_v47 }
 0x12a   : > { %8471 = vmatmul.mubr.msk.bf16.gmra.mrb[8].mxu1 %vm626_vm0, %v9685_v43  ;;  %v9844_v43 = vld [vmem:[%s10991_s3 + $0x88] sm:$0xff]  }
 0x12b   : > { %8791 = vmatmul.mubr.msk.bf16.gmra.mrb[40].mxu0 %vm626_vm0, %v9686_v44  ;;  %8474 = vmatprep.mubr.msk.bf16.mxu1 %vm626_vm0, %v9687_v45  ;;  %v9752_v44 = vld [vmem:[%s9987_s29 + $0x28] sm:$0xff]   ;;  %v9753_v45 = vld [vmem:[%s9993_s7 + $0xb8] sm:$0xff]  }
 0x12c   : > { %8794 = vmatprep.mubr.msk.bf16.mxu0 %vm626_vm0, %v9688_v46  ;;  %v9754_v46 = vld [vmem:[%s9987_s29 + $0x30] sm:$0xff]  }
 0x132   : > { %8475 = vmatmul.mubr.msk.bf16.gmra.mrb[12].mxu1 %vm626_vm0, %v9689_v48  ;;  %v9755_v48 = vld [vmem:[%s9993_s7 + $0xc0] sm:$0xff]  }
 0x133   : > { %8795 = vmatmul.mubr.msk.bf16.gmra.mrb[44].mxu0 %vm626_vm0, %v9690_v49  ;;  %8478 = vmatprep.mubr.msk.bf16.mxu1 %vm626_vm0, %v9691_v50  ;;  %v9846_v49 = vld [vmem:[%s10991_s3 + $0x98] sm:$0xff]  }
 0x134   : > { %8798 = vmatprep.mubr.msk.bf16.mxu0 %vm626_vm0, %v9692_v51  ;;  %v9756_v50 = vld [vmem:[%s9987_s29 + $0x38] sm:$0xff]   ;;  %v9757_v51 = vld [vmem:[%s9993_s7 + $0xc8] sm:$0xff]  }
 0x13a   : > { %8479 = vmatmul.mubr.msk.bf16.gmra.mrb[16].mxu1 %vm626_vm0, %v9693_v52  ;;  %v9758_v52 = vld [vmem:[%s9987_s29 + $0x40] sm:$0xff]  }
 0x13b   : > { %8799 = vmatmul.mubr.msk.bf16.gmra.mrb[48].mxu0 %vm626_vm0, %v9695_v53  ;;  %8482 = vmatprep.mubr.msk.bf16.mxu1 %vm626_vm0, %v9697_v54  ;;  %v9759_v53 = vld [vmem:[%s9993_s7 + $0xd0] sm:$0xff]   ;;  %v9760_v54 = vld [vmem:[%s9987_s29 + $0x48] sm:$0xff]  }
 0x13c   : > { %8802 = vmatprep.mubr.msk.bf16.mxu0 %vm626_vm0, %v9698_v55  ;;  %v9761_v55 = vld [vmem:[%s9993_s7 + $0xd8] sm:$0xff]  }
 0x142   : > { %8483 = vmatmul.mubr.msk.bf16.gmra.mrb[20].mxu1 %vm626_vm0, %v9699_v56  ;;  %v9762_v56 = vld [vmem:[%s9987_s29 + $0x50] sm:$0xff]  }
 0x143   : > { %8803 = vmatmul.mubr.msk.bf16.gmra.mrb[52].mxu0 %vm626_vm0, %v9700_v57  ;;  %8486 = vmatprep.mubr.msk.bf16.mxu1 %vm626_vm0, %v9701_v58  ;;  %v9763_v57 = vld [vmem:[%s9993_s7 + $0xe0] sm:$0xff]   ;;  %v9764_v58 = vld [vmem:[%s9987_s29 + $0x58] sm:$0xff]  }
 0x144   : > { %8806 = vmatprep.mubr.msk.bf16.mxu0 %vm626_vm0, %v9702_v59  ;;  %v9765_v59 = vld [vmem:[%s9993_s7 + $0xe8] sm:$0xff]  }
 0x14a   : > { %8487 = vmatmul.mubr.msk.bf16.gmra.mrb[24].mxu1 %vm626_vm0, %v9703_v60  ;;  %v9767_v60 = vld [vmem:[%s9987_s29 + $0x60] sm:$0xff]  }
 0x14b   : > { %8807 = vmatmul.mubr.msk.bf16.gmra.mrb[56].mxu0 %vm626_vm0, %v9704_v61  ;;  %8490 = vmatprep.mubr.msk.bf16.mxu1 %vm626_vm0, %v9705_v62  ;;  %v9768_v61 = vld [vmem:[%s9993_s7 + $0xf0] sm:$0xff]   ;;  %v9769_v62 = vld [vmem:[%s9987_s29 + $0x68] sm:$0xff]  }
 0x14c   : > { %8810 = vmatprep.mubr.msk.bf16.mxu0 %vm626_vm0, %v9706_v63  ;;  %v9770_v63 = vld [vmem:[%s9993_s7 + $0xf8] sm:$0xff]  }
 0x152   : > { %8491 = vmatmul.mubr.msk.bf16.gmra.mrb[28].mxu1 %vm626_vm0, %v9707_v0  ;;  %v9771_v0 = vld [vmem:[%s9987_s29 + $0x70] sm:$0xff]  }
 0x153   : > { %8811 = vmatmul.mubr.msk.bf16.gmra.mrb[60].mxu0 %vm626_vm0, %v9708_v1  ;;  %8494 = vmatprep.mubr.msk.bf16.mxu1 %vm626_vm0, %v9709_v2  ;;  %v9772_v1 = vld [vmem:[%s9993_s7 + $0x100] sm:$0xff]   ;;  %v9773_v2 = vld [vmem:[%s9987_s29 + $0x78] sm:$0xff]  }
 0x154   : > { %8822 = vmatprep.mubr.msk.bf16.mxu0 %vm626_vm0, %v9710_v3  ;;  %v9774_v3 = vld [vmem:[%s9993_s7 + $0x108] sm:$0xff]  }
 0x15a   : > { %8495 = vmatmul.mubr.msk.bf16.gmra.mrb[32].mxu1 %vm626_vm0, %v9711_v4  ;;  %v9775_v4 = vld [vmem:[%s9987_s29 + $0x80] sm:$0xff]  }
 0x15b   : > { %8823 = vmatmul.mubr.msk.bf16.vlgmr.msra.gmra.mrb[0].mxu0 %vm626_vm0, %v9713_v5  ;;  %8498 = vmatprep.mubr.msk.bf16.mxu1 %vm626_vm0, %v9715_v6  ;;  %v9776_v5 = vld [vmem:[%s9993_s7 + $0x110] sm:$0xff]   ;;  %v9777_v6 = vld [vmem:[%s9987_s29 + $0x88] sm:$0xff]  }
 0x15c   : > { %8887 = vmatpush3.bf16.msra.mxu0 %v10292_v8  ;;  %8826 = vmatprep.mubr.msk.bf16.mxu0 %vm626_vm0, %v9716_v7  ;;  %v9766_v8 = vld [vmem:[%s10991_s3 + $0x118] sm:$0xff]  }
 0x15d   : > { %8888 = vmatprep.subr.bf16.mxu0 %v9732_v9  ;;  %v9778_v7 = vld [vmem:[%s9993_s7 + $0x118] sm:$0xff]  }
 0x160   : > { %8889 = vmatpush3.bf16.msra.mxu0 %v9732_v9  ;;  %v9779_v9 = vld [vmem:[%s9987_s29 + $0x90] sm:$0xff]  }
 0x161   : > { %8890 = vmatprep.subr.bf16.mxu0 %v9749_v10 }
 0x162   : > { %8499 = vmatmul.mubr.msk.bf16.gmra.mrb[36].mxu1 %vm626_vm0, %v9717_v11  ;;  %v9781_v11 = vld [vmem:[%s9987_s29 + $0x98] sm:$0xff]  }
 0x163   : > { %8827 = vmatmul.mubr.msk.bf16.gmra.mrb[4].mxu0 %vm626_vm0, %v9718_v12  ;;  %8502 = vmatprep.mubr.msk.bf16.mxu1 %vm626_vm0, %v9719_v13  ;;  %v9782_v12 = vld [vmem:[%s10055_s9 + $0x28] sm:$0xff]   ;;  %v9783_v13 = vld [vmem:[%s9987_s29 + $0xa0] sm:$0xff]  }
 0x164   : > { %8830 = vmatprep.mubr.msk.bf16.mxu0 %vm626_vm0, %v9720_v14  ;;  %8891 = vmatpush3.bf16.msra.mxu0 %v9749_v10  ;;  %v9780_v10 = vld [vmem:[%s10055_s9 + $0x20] sm:$0xff]   ;;  %v9784_v14 = vld [vmem:[%s10055_s9 + $0x30] sm:$0xff]  }
 0x165   : > { %8892 = vmatprep.subr.bf16.mxu0 %v9766_v8 }
 0x168   : > { %8893 = vmatpush3.bf16.msra.mxu0 %v9766_v8  ;;  %v9785_v8 = vld [vmem:[%s9987_s29 + $0xa8] sm:$0xff]  }
 0x16a   : > { %8503 = vmatmul.mubr.msk.bf16.gmra.mrb[40].mxu1 %vm626_vm0, %v9721_v15  ;;  %v9786_v15 = vld [vmem:[%s10055_s9 + $0x38] sm:$0xff]  }
 0x16b   : > { %8831 = vmatmul.mubr.msk.bf16.gmra.mrb[8].mxu0 %vm626_vm0, %v9722_v16  ;;  %8506 = vmatprep.mubr.msk.bf16.mxu1 %vm626_vm0, %v9723_v17  ;;  %v9787_v16 = vld [vmem:[%s9987_s29 + $0xb0] sm:$0xff]   ;;  %v9788_v17 = vld [vmem:[%s10055_s9 + $0x40] sm:$0xff]  }
 0x16c   : > { %8834 = vmatprep.mubr.msk.bf16.mxu0 %vm626_vm0, %v9724_v18  ;;  %v9789_v18 = vld [vmem:[%s9987_s29 + $0xb8] sm:$0xff]  }
 0x172   : > { %8507 = vmatmul.mubr.msk.bf16.gmra.mrb[44].mxu1 %vm626_vm0, %v9725_v19  ;;  %v9790_v19 = vld [vmem:[%s10055_s9 + $0x48] sm:$0xff]  }
 0x173   : > { %8835 = vmatmul.mubr.msk.bf16.gmra.mrb[12].mxu0 %vm626_vm0, %v9726_v20  ;;  %8510 = vmatprep.mubr.msk.bf16.mxu1 %vm626_vm0, %v9727_v21  ;;  %v9791_v20 = vld [vmem:[%s9987_s29 + $0xc0] sm:$0xff]   ;;  %v9792_v21 = vld [vmem:[%s10055_s9 + $0x50] sm:$0xff]  }
 0x174   : > { %8838 = vmatprep.mubr.msk.bf16.mxu0 %vm626_vm0, %v9728_v22  ;;  %v9793_v22 = vld [vmem:[%s9987_s29 + $0xc8] sm:$0xff]  }
 0x17a   : > { %8511 = vmatmul.mubr.msk.bf16.gmra.mrb[48].mxu1 %vm626_vm0, %v9729_v23  ;;  %v9794_v23 = vld [vmem:[%s10055_s9 + $0x58] sm:$0xff]  }
 0x17b   : > { %8839 = vmatmul.mubr.msk.bf16.gmra.mrb[16].mxu0 %vm626_vm0, %v9731_v24  ;;  %8514 = vmatprep.mubr.msk.bf16.mxu1 %vm626_vm0, %v9733_v25  ;;  %v9795_v24 = vld [vmem:[%s9987_s29 + $0xd0] sm:$0xff]   ;;  %v9796_v25 = vld [vmem:[%s10055_s9 + $0x60] sm:$0xff]  }
 0x17c   : > { %8842 = vmatprep.mubr.msk.bf16.mxu0 %vm626_vm0, %v9734_v26  ;;  %v9797_v26 = vld [vmem:[%s9987_s29 + $0xd8] sm:$0xff]  }
 0x182   : > { %8515 = vmatmul.mubr.msk.bf16.gmra.mrb[52].mxu1 %vm626_vm0, %v9735_v27  ;;  %v9798_v27 = vld [vmem:[%s10055_s9 + $0x68] sm:$0xff]  }
 0x183   : > { %8843 = vmatmul.mubr.msk.bf16.gmra.mrb[20].mxu0 %vm626_vm0, %v9736_v28  ;;  %8518 = vmatprep.mubr.msk.bf16.mxu1 %vm626_vm0, %v9737_v29  ;;  %v9799_v28 = vld [vmem:[%s9987_s29 + $0xe0] sm:$0xff]   ;;  %v9800_v29 = vld [vmem:[%s10055_s9 + $0x70] sm:$0xff]  }
 0x184   : > { %8846 = vmatprep.mubr.msk.bf16.mxu0 %vm626_vm0, %v9738_v30  ;;  %v9801_v30 = vld [vmem:[%s9987_s29 + $0xe8] sm:$0xff]  }
 0x18a   : > { %8519 = vmatmul.mubr.msk.bf16.gmra.mrb[56].mxu1 %vm626_vm0, %v9739_v31  ;;  %v9802_v31 = vld [vmem:[%s10055_s9 + $0x78] sm:$0xff]  }
 0x18b   : > { %8847 = vmatmul.mubr.msk.bf16.gmra.mrb[24].mxu0 %vm626_vm0, %v9740_v32  ;;  %8522 = vmatprep.mubr.msk.bf16.mxu1 %vm626_vm0, %v9741_v33  ;;  %v9803_v32 = vld [vmem:[%s9987_s29 + $0xf0] sm:$0xff]   ;;  %v9804_v33 = vld [vmem:[%s10055_s9 + $0x80] sm:$0xff]  }
 0x18c   : > { %8850 = vmatprep.mubr.msk.bf16.mxu0 %vm626_vm0, %v9742_v34  ;;  %v9805_v34 = vld [vmem:[%s9987_s29 + $0xf8] sm:$0xff]  }
 0x192   : > { %8523 = vmatmul.mubr.msk.bf16.gmra.mrb[60].mxu1 %vm626_vm0, %v9743_v35  ;;  %v9806_v35 = vld [vmem:[%s10055_s9 + $0x88] sm:$0xff]  }
 0x193   : > { %8851 = vmatmul.mubr.msk.bf16.gmra.mrb[28].mxu0 %vm626_vm0, %v9744_v37  ;;  %8534 = vmatprep.mubr.msk.bf16.mxu1 %vm626_vm0, %v9745_v38  ;;  %v9807_v37 = vld [vmem:[%s9987_s29 + $0x100] sm:$0xff]   ;;  %v9808_v38 = vld [vmem:[%s10055_s9 + $0x90] sm:$0xff]  }
 0x194   : > { %8854 = vmatprep.mubr.msk.bf16.mxu0 %vm626_vm0, %v9746_v39  ;;  %v9809_v39 = vld [vmem:[%s9987_s29 + $0x108] sm:$0xff]   ;;  %s6892_s29 = sshll.u32 %s9869_s18, 4 }
 0x195   : > { %p282_p6 = scmp.lt.s32.totalorder %s6892_s29, 31 }
 0x197   : > { %s11007_s29 = smov (!%p282_p6, %s6892_s29), 31 }
 0x19a   : > { %8535 = vmatmul.mubr.msk.bf16.vlgmr.msra.gmra.mrb[0].mxu1 %vm626_vm0, %v9747_v40  ;;  %v9810_v40 = vld [vmem:[%s10055_s9 + $0x98] sm:$0xff]  }
 0x19b   : > { %8855 = vmatmul.mubr.msk.bf16.gmra.mrb[32].mxu0 %vm626_vm0, %v9748_v41  ;;  %8962 = vmatpush3.bf16.msra.mxu1 %v10375_v47  ;;  %v9845_v47 = vld [vmem:[%s10991_s3 + $0x90] sm:$0xff]  }
 0x19c   : > { %8538 = vmatprep.mubr.msk.bf16.mxu1 %vm626_vm0, %v9750_v42  ;;  %8858 = vmatprep.mubr.msk.bf16.mxu0 %vm626_vm0, %v9751_v36  ;;  %v9811_v41 = vld [vmem:[%s9993_s7 + $0x90] sm:$0xff]   ;;  %v9812_v42 = vld [vmem:[%s10055_s9 + $0xa0] sm:$0xff]   ;;  %v9813_v36 = vld [vmem:[%s9993_s7 + $0x98] sm:$0xff]  }
 0x19d   : > { %8959 = vmatprep.subr.bf16.mxu1 %v9844_v43 }
 0x19f   : > { %8963 = vmatpush3.bf16.msra.mxu1 %v9844_v43  ;;  %v9814_v43 = vld [vmem:[%s10055_s9 + $0xa8] sm:$0xff]  }
 0x1a0   : > { %8960 = vmatprep.subr.bf16.mxu1 %v9845_v47 }
 0x1a2   : > { %8539 = vmatmul.mubr.msk.bf16.gmra.mrb[4].mxu1 %vm626_vm0, %v9752_v44  ;;  %v9815_v44 = vld [vmem:[%s9993_s7 + $0xa0] sm:$0xff]  }
 0x1a3   : > { %8859 = vmatmul.mubr.msk.bf16.gmra.mrb[36].mxu0 %vm626_vm0, %v9753_v45  ;;  %8542 = vmatprep.mubr.msk.bf16.mxu1 %vm626_vm0, %v9754_v46  ;;  %v9816_v45 = vld [vmem:[%s10055_s9 + $0xb0] sm:$0xff]   ;;  %v9817_v46 = vld [vmem:[%s9993_s7 + $0xa8] sm:$0xff]  }
 0x1a4   : > { %8862 = vmatprep.mubr.msk.bf16.mxu0 %vm626_vm0, %v9755_v48  ;;  %8964 = vmatpush3.bf16.msra.mxu1 %v9845_v47  ;;  %v9818_v48 = vld [vmem:[%s10055_s9 + $0xb8] sm:$0xff]   ;;  %v9819_v47 = vld [vmem:[%s9993_s7 + $0xb0] sm:$0xff]  }
 0x1a5   : > { %8961 = vmatprep.subr.bf16.mxu1 %v9846_v49 }
 0x1a8   : > { %8965 = vmatpush3.bf16.msra.mxu1 %v9846_v49  ;;  %v9820_v49 = vld [vmem:[%s10055_s9 + $0xc0] sm:$0xff]  }
 0x1aa   : > { %8543 = vmatmul.mubr.msk.bf16.gmra.mrb[8].mxu1 %vm626_vm0, %v9756_v50  ;;  %v9821_v50 = vld [vmem:[%s9993_s7 + $0xb8] sm:$0xff]  }
 0x1ab   : > { %8863 = vmatmul.mubr.msk.bf16.gmra.mrb[40].mxu0 %vm626_vm0, %v9757_v51  ;;  %8546 = vmatprep.mubr.msk.bf16.mxu1 %vm626_vm0, %v9758_v52  ;;  %v9822_v51 = vld [vmem:[%s10055_s9 + $0xc8] sm:$0xff]   ;;  %v9823_v52 = vld [vmem:[%s9993_s7 + $0xc0] sm:$0xff]  }
 0x1ac   : > { %8866 = vmatprep.mubr.msk.bf16.mxu0 %vm626_vm0, %v9759_v53  ;;  %v9824_v53 = vld [vmem:[%s10055_s9 + $0xd0] sm:$0xff]  }
 0x1b2   : > { %8547 = vmatmul.mubr.msk.bf16.gmra.mrb[12].mxu1 %vm626_vm0, %v9760_v54  ;;  %v9825_v54 = vld [vmem:[%s9993_s7 + $0xc8] sm:$0xff]  }
 0x1b3   : > { %8867 = vmatmul.mubr.msk.bf16.gmra.mrb[44].mxu0 %vm626_vm0, %v9761_v55  ;;  %8550 = vmatprep.mubr.msk.bf16.mxu1 %vm626_vm0, %v9762_v56  ;;  %v9826_v55 = vld [vmem:[%s10055_s9 + $0xd8] sm:$0xff]   ;;  %v9827_v56 = vld [vmem:[%s9993_s7 + $0xd0] sm:$0xff]  }
 0x1b4   : > { %8870 = vmatprep.mubr.msk.bf16.mxu0 %vm626_vm0, %v9763_v57  ;;  %v9828_v57 = vld [vmem:[%s10055_s9 + $0xe0] sm:$0xff]  }
 0x1ba   : > { %8551 = vmatmul.mubr.msk.bf16.gmra.mrb[16].mxu1 %vm626_vm0, %v9764_v58  ;;  %v9829_v58 = vld [vmem:[%s9993_s7 + $0xd8] sm:$0xff]  }
 0x1bb   : > { %8871 = vmatmul.mubr.msk.bf16.gmra.mrb[48].mxu0 %vm626_vm0, %v9765_v59  ;;  %8554 = vmatprep.mubr.msk.bf16.mxu1 %vm626_vm0, %v9767_v60  ;;  %v9830_v59 = vld [vmem:[%s10055_s9 + $0xe8] sm:$0xff]   ;;  %v9831_v60 = vld [vmem:[%s9993_s7 + $0xe0] sm:$0xff]  }
 0x1bc   : > { %8874 = vmatprep.mubr.msk.bf16.mxu0 %vm626_vm0, %v9768_v61  ;;  %v9832_v61 = vld [vmem:[%s10055_s9 + $0xf0] sm:$0xff]  }
 0x1c2   : > { %8555 = vmatmul.mubr.msk.bf16.gmra.mrb[20].mxu1 %vm626_vm0, %v9769_v62  ;;  %v9833_v62 = vld [vmem:[%s9993_s7 + $0xe8] sm:$0xff]  }
 0x1c3   : > { %8875 = vmatmul.mubr.msk.bf16.gmra.mrb[52].mxu0 %vm626_vm0, %v9770_v63  ;;  %8558 = vmatprep.mubr.msk.bf16.mxu1 %vm626_vm0, %v9771_v0  ;;  %v9834_v63 = vld [vmem:[%s10055_s9 + $0xf8] sm:$0xff]   ;;  %v9835_v0 = vld [vmem:[%s9993_s7 + $0xf0] sm:$0xff]  }
 0x1c4   : > { %8878 = vmatprep.mubr.msk.bf16.mxu0 %vm626_vm0, %v9772_v1  ;;  %v9836_v1 = vld [vmem:[%s10055_s9 + $0x100] sm:$0xff]  }
 0x1ca   : > { %8559 = vmatmul.mubr.msk.bf16.gmra.mrb[24].mxu1 %vm626_vm0, %v9773_v2  ;;  %v9837_v2 = vld [vmem:[%s9993_s7 + $0xf8] sm:$0xff]  }
 0x1cb   : > { %8879 = vmatmul.mubr.msk.bf16.gmra.mrb[56].mxu0 %vm626_vm0, %v9774_v3  ;;  %8562 = vmatprep.mubr.msk.bf16.mxu1 %vm626_vm0, %v9775_v4  ;;  %v9838_v3 = vld [vmem:[%s10055_s9 + $0x108] sm:$0xff]   ;;  %v9839_v4 = vld [vmem:[%s9993_s7 + $0x100] sm:$0xff]  }
 0x1cc   : > { %8882 = vmatprep.mubr.msk.bf16.mxu0 %vm626_vm0, %v9776_v5  ;;  %v9840_v5 = vld [vmem:[%s10055_s9 + $0x110] sm:$0xff]  }
 0x1d2   : > { %8563 = vmatmul.mubr.msk.bf16.gmra.mrb[28].mxu1 %vm626_vm0, %v9777_v6  ;;  %v9841_v6 = vld [vmem:[%s9993_s7 + $0x108] sm:$0xff]   ;;  %s6893_s7 = sshll.u32 %s11007_s29, 2 }
 0x1d3   : > { %8883 = vmatmul.mubr.msk.bf16.gmra.mrb[60].mxu0 %vm626_vm0, %v9778_v7  ;;  %8566 = vmatprep.mubr.msk.bf16.mxu1 %vm626_vm0, %v9779_v9  ;;  %v9842_v7 = vld [vmem:[%s10055_s9 + $0x118] sm:$0xff]   ;;  %s6894_s9 = sshll.u32 %s11005_s19, 7 }
 0x1d4   : > { %8894 = vmatprep.mubr.msk.bf16.mxu0 %vm626_vm0, %v9780_v10  ;;  %s286_s17 = sadd.s32 %s6894_s9, %s6893_s7 }
 0x1d5   : > { %s6895_s26 = sshll.u32 %s286_s17, 3 }
 0x1d6   : > { %s10755_s19 = scalar_lea.vmem %s10993_s5, %s6895_s26 }
 0x1da   : > { %8567 = vmatmul.mubr.msk.bf16.gmra.mrb[32].mxu1 %vm626_vm0, %v9781_v11 }
 0x1db   : > { %8895 = vmatmul.mubr.msk.bf16.vlgmr.msra.gmra.mrb[0].mxu0 %vm626_vm0, %v9782_v12  ;;  %8570 = vmatprep.mubr.msk.bf16.mxu1 %vm626_vm0, %v9783_v13 }
 0x1dc   : > { %8898 = vmatprep.mubr.msk.bf16.mxu0 %vm626_vm0, %v9784_v14 }
 0x1e2   : > { %8571 = vmatmul.mubr.msk.bf16.gmra.mrb[36].mxu1 %vm626_vm0, %v9785_v8 }
 0x1e3   : > { %8899 = vmatmul.mubr.msk.bf16.gmra.mrb[4].mxu0 %vm626_vm0, %v9786_v15  ;;  %8574 = vmatprep.mubr.msk.bf16.mxu1 %vm626_vm0, %v9787_v16 }
 0x1e4   : > { %8902 = vmatprep.mubr.msk.bf16.mxu0 %vm626_vm0, %v9788_v17 }
 0x1ea   : > { %8575 = vmatmul.mubr.msk.bf16.gmra.mrb[40].mxu1 %vm626_vm0, %v9789_v18 }
 0x1eb   : > { %8903 = vmatmul.mubr.msk.bf16.gmra.mrb[8].mxu0 %vm626_vm0, %v9790_v19  ;;  %8578 = vmatprep.mubr.msk.bf16.mxu1 %vm626_vm0, %v9791_v20 }
 0x1ec   : > { %8906 = vmatprep.mubr.msk.bf16.mxu0 %vm626_vm0, %v9792_v21 }
 0x1f2   : > { %8579 = vmatmul.mubr.msk.bf16.gmra.mrb[44].mxu1 %vm626_vm0, %v9793_v22 }
 0x1f3   : > { %8907 = vmatmul.mubr.msk.bf16.gmra.mrb[12].mxu0 %vm626_vm0, %v9794_v23  ;;  %8582 = vmatprep.mubr.msk.bf16.mxu1 %vm626_vm0, %v9795_v24 }
 0x1f4   : > { %8910 = vmatprep.mubr.msk.bf16.mxu0 %vm626_vm0, %v9796_v25 }
 0x1fa   : > { %8583 = vmatmul.mubr.msk.bf16.gmra.mrb[48].mxu1 %vm626_vm0, %v9797_v26 }
 0x1fb   : > { %8911 = vmatmul.mubr.msk.bf16.gmra.mrb[16].mxu0 %vm626_vm0, %v9798_v27  ;;  %8586 = vmatprep.mubr.msk.bf16.mxu1 %vm626_vm0, %v9799_v28 }
 0x1fc   : > { %8914 = vmatprep.mubr.msk.bf16.mxu0 %vm626_vm0, %v9800_v29 }
 0x202   : > { %8587 = vmatmul.mubr.msk.bf16.gmra.mrb[52].mxu1 %vm626_vm0, %v9801_v30 }
 0x203   : > { %8915 = vmatmul.mubr.msk.bf16.gmra.mrb[20].mxu0 %vm626_vm0, %v9802_v31  ;;  %8590 = vmatprep.mubr.msk.bf16.mxu1 %vm626_vm0, %v9803_v32 }
 0x204   : > { %8918 = vmatprep.mubr.msk.bf16.mxu0 %vm626_vm0, %v9804_v33 }
 0x20a   : > { %8591 = vmatmul.mubr.msk.bf16.gmra.mrb[56].mxu1 %vm626_vm0, %v9805_v34 }
 0x20b   : > { %8919 = vmatmul.mubr.msk.bf16.gmra.mrb[24].mxu0 %vm626_vm0, %v9806_v35  ;;  %8594 = vmatprep.mubr.msk.bf16.mxu1 %vm626_vm0, %v9807_v37 }
 0x20c   : > { %8922 = vmatprep.mubr.msk.bf16.mxu0 %vm626_vm0, %v9808_v38 }
 0x212   : > { %8595 = vmatmul.mubr.msk.bf16.gmra.mrb[60].mxu1 %vm626_vm0, %v9809_v39 }
 0x213   : > { %8923 = vmatmul.mubr.msk.bf16.gmra.mrb[28].mxu0 %vm626_vm0, %v9810_v40  ;;  %8638 = vmatprep.mubr.msk.bf16.mxu1 %vm626_vm0, %v9811_v41 }
 0x214   : > { %8926 = vmatprep.mubr.msk.bf16.mxu0 %vm626_vm0, %v9812_v42  ;;  %v10749_v42 = vld [vmem:[%s10992_s4] ss:$0 sm:$0xff] }
 0x21a   : > { %8639 = vmatmul.mubr.msk.bf16.vlgmr.msra.gmra.mrb[32].mxu1 %vm626_vm0, %v9813_v36 }
 0x21b   : > { %8927 = vmatmul.mubr.msk.bf16.gmra.mrb[32].mxu0 %vm626_vm0, %v9814_v43  ;;  %8642 = vmatprep.mubr.msk.bf16.mxu1 %vm626_vm0, %v9815_v44 }
 0x21c   : > { %8930 = vmatprep.mubr.msk.bf16.mxu0 %vm626_vm0, %v9816_v45 }
 0x222   : > { %8643 = vmatmul.mubr.msk.bf16.gmra.mrb[36].mxu1 %vm626_vm0, %v9817_v46 }
 0x223   : > { %8931 = vmatmul.mubr.msk.bf16.gmra.mrb[36].mxu0 %vm626_vm0, %v9818_v48  ;;  %8646 = vmatprep.mubr.msk.bf16.mxu1 %vm626_vm0, %v9819_v47 }
 0x224   : > { %8934 = vmatprep.mubr.msk.bf16.mxu0 %vm626_vm0, %v9820_v49 }
 0x22a   : > { %8647 = vmatmul.mubr.msk.bf16.gmra.mrb[40].mxu1 %vm626_vm0, %v9821_v50 }
 0x22b   : > { %8935 = vmatmul.mubr.msk.bf16.gmra.mrb[40].mxu0 %vm626_vm0, %v9822_v51  ;;  %8650 = vmatprep.mubr.msk.bf16.mxu1 %vm626_vm0, %v9823_v52 }
 0x22c   : > { %8938 = vmatprep.mubr.msk.bf16.mxu0 %vm626_vm0, %v9824_v53 }
 0x232   : > { %8651 = vmatmul.mubr.msk.bf16.gmra.mrb[44].mxu1 %vm626_vm0, %v9825_v54 }
 0x233   : > { %8939 = vmatmul.mubr.msk.bf16.gmra.mrb[44].mxu0 %vm626_vm0, %v9826_v55  ;;  %8654 = vmatprep.mubr.msk.bf16.mxu1 %vm626_vm0, %v9827_v56 }
 0x234   : > { %8942 = vmatprep.mubr.msk.bf16.mxu0 %vm626_vm0, %v9828_v57 }
 0x23a   : > { %8655 = vmatmul.mubr.msk.bf16.gmra.mrb[48].mxu1 %vm626_vm0, %v9829_v58 }
 0x23b   : > { %8943 = vmatmul.mubr.msk.bf16.gmra.mrb[48].mxu0 %vm626_vm0, %v9830_v59  ;;  %8658 = vmatprep.mubr.msk.bf16.mxu1 %vm626_vm0, %v9831_v60 }
 0x23c   : > { %8946 = vmatprep.mubr.msk.bf16.mxu0 %vm626_vm0, %v9832_v61 }
 0x242   : > { %8659 = vmatmul.mubr.msk.bf16.gmra.mrb[52].mxu1 %vm626_vm0, %v9833_v62 }
 0x243   : > { %8947 = vmatmul.mubr.msk.bf16.gmra.mrb[52].mxu0 %vm626_vm0, %v9834_v63  ;;  %8662 = vmatprep.mubr.msk.bf16.mxu1 %vm626_vm0, %v9835_v0 }
 0x244   : > { %8950 = vmatprep.mubr.msk.bf16.mxu0 %vm626_vm0, %v9836_v1 }
 0x24a   : > { %8663 = vmatmul.mubr.msk.bf16.gmra.mrb[56].mxu1 %vm626_vm0, %v9837_v2 }
 0x24b   : > { %8951 = vmatmul.mubr.msk.bf16.gmra.mrb[56].mxu0 %vm626_vm0, %v9838_v3  ;;  %8666 = vmatprep.mubr.msk.bf16.mxu1 %vm626_vm0, %v9839_v4 }
 0x24c   : > { %8954 = vmatprep.mubr.msk.bf16.mxu0 %vm626_vm0, %v9840_v5 }
 0x252   : > { %8667 = vmatmul.mubr.msk.bf16.gmra.mrb[60].mxu1 %vm626_vm0, %v9841_v6 }
 0x253   : > { %8955 = vmatmul.mubr.msk.bf16.gmra.mrb[60].mxu0 %vm626_vm0, %v9842_v7 }
 0x26d   : > { %v8536_v9 = vpop.f32.mrb[0].mxu1 }
 0x26e   : > { %v2680_v10 = vpop.f32.mrb[1].mxu1 }
 0x26f   : > { %v8537_v11 = vpop.f32.mrb[2].mxu1 }
 0x270   : > { %v2683_v12 = vpop.f32.mrb[3].mxu1 }
 0x275   : > { %v8540_v13 = vpop.f32.mrb[4].mxu1 }
 0x276   : > { %v2696_v14 = vpop.f32.mrb[5].mxu1 }
 0x277   : > { %v8541_v8 = vpop.f32.mrb[6].mxu1 }
 0x278   : > { %v10694_v15 = vpop.f32.mrb[7].mxu1 }
 0x27d   : > { %v10696_v16 = vpop.f32.mrb[8].mxu1 }
 0x27e   : > { %v10698_v17 = vpop.f32.mrb[9].mxu1 }
 0x27f   : > { %v10700_v18 = vpop.f32.mrb[10].mxu1 }
 0x280   : > { %v10702_v19 = vpop.f32.mrb[11].mxu1 }
 0x285   : > { %v10704_v20 = vpop.f32.mrb[12].mxu1 }
 0x286   : > { %v10706_v21 = vpop.f32.mrb[13].mxu1 }
 0x287   : > { %v10708_v22 = vpop.f32.mrb[14].mxu1 }
 0x288   : > { %v10710_v23 = vpop.f32.mrb[15].mxu1 }
 0x28d   : > { %v10712_v24 = vpop.f32.mrb[16].mxu1 }
 0x28e   : > { %v10714_v25 = vpop.f32.mrb[17].mxu1 }
 0x28f   : > { %v10716_v26 = vpop.f32.mrb[18].mxu1 }
 0x290   : > { %v10718_v27 = vpop.f32.mrb[19].mxu1 }
 0x295   : > { %v10720_v28 = vpop.f32.mrb[20].mxu1 }
 0x296   : > { %v10722_v29 = vpop.f32.mrb[21].mxu1 }
 0x297   : > { %v10724_v30 = vpop.f32.mrb[22].mxu1 }
 0x298   : > { %v10726_v31 = vpop.f32.mrb[23].mxu1 }
 0x29d   : > { %v10728_v32 = vpop.f32.mrb[24].mxu1 }
 0x29e   : > { %v10730_v33 = vpop.f32.mrb[25].mxu1 }
 0x29f   : > { %v10733_v34 = vpop.f32.mrb[26].mxu1 }
 0x2a0   : > { %v10735_v35 = vpop.f32.mrb[27].mxu1 }
 0x2a5   : > { %v10737_v37 = vpop.f32.mrb[28].mxu1 }
 0x2a6   : > { %v10739_v38 = vpop.f32.mrb[29].mxu1 }
 0x2a7   : > { %v10741_v39 = vpop.f32.mrb[30].mxu1 }
 0x2a8   : > { %v10743_v40 = vpop.f32.mrb[31].mxu1 }
 0x2ae   : > { %v8896_v41 = vpop.f32.mrb[0].mxu0 }
 0x2af   : > { %v8966_v36 = vadd.f32 %v8896_v41, %v8536_v9  ;;  %v6222_v43 = vpop.f32.mrb[1].mxu0 }
 0x2b0   : > { %v8967_v44 = vadd.f32 %v6222_v43, %v2680_v10  ;;  %v8897_v45 = vpop.f32.mrb[2].mxu0 }
 0x2b1   : > { %v6550_v46 = vadd.f32 %v8966_v36, %v10749_v42  ;;  %v8968_v48 = vadd.f32 %v8897_v45, %v8537_v11  ;;  %v6225_v47 = vpop.f32.mrb[3].mxu0 }
 0x2b2   : > { %v6548_v49 = vadd.f32 %v8967_v44, %v10749_v42  ;;  %v8969_v50 = vadd.f32 %v6225_v47, %v2683_v12 }
 0x2b3   : > { %v6614_v51 = vmax.f32 %v6550_v46, 0.0  ;;  %v6551_v52 = vadd.f32 %v8968_v48, %v10749_v42 }
 0x2b4   : > { %v6612_v53 = vmax.f32 %v6548_v49, 0.0  ;;  %v6549_v54 = vadd.f32 %v8969_v50, %v10749_v42 }
 0x2b5   : > { %6678 = vst.msk [vmem:[%s10755_s19 + $0x10] sm:$0xff] %vm626_vm0, %v6614_v51  ;;  %v6615_v55 = vmax.f32 %v6551_v52, 0.0 }
 0x2b6   : > { %6676 = vst.msk [vmem:[%s10755_s19] sm:$0xff] %vm626_vm0, %v6612_v53  ;;  %v6613_v56 = vmax.f32 %v6549_v54, 0.0  ;;  %v8900_v57 = vpop.f32.mrb[4].mxu0 }
 0x2b7   : > { %6679 = vst.msk [vmem:[%s10755_s19 + $0x18] sm:$0xff] %vm626_vm0, %v6615_v55  ;;  %v8970_v58 = vadd.f32 %v8900_v57, %v8540_v13  ;;  %v6238_v59 = vpop.f32.mrb[5].mxu0 }
 0x2b8   : > { %6677 = vst.msk [vmem:[%s10755_s19 + $0x8] sm:$0xff] %vm626_vm0, %v6613_v56  ;;  %v8971_v60 = vadd.f32 %v6238_v59, %v2696_v14  ;;  %v8901_v61 = vpop.f32.mrb[6].mxu0 }
 0x2b9   : > { %v6554_v62 = vadd.f32 %v8970_v58, %v10749_v42  ;;  %v8972_v63 = vadd.f32 %v8901_v61, %v8541_v8  ;;  %v6241_v0 = vpop.f32.mrb[7].mxu0 }
 0x2ba   : > { %v6552_v1 = vadd.f32 %v8971_v60, %v10749_v42  ;;  %v8973_v2 = vadd.f32 %v6241_v0, %v10694_v15 }
 0x2bb   : > { %v6618_v3 = vmax.f32 %v6554_v62, 0.0  ;;  %v6555_v4 = vadd.f32 %v8972_v63, %v10749_v42 }
 0x2bc   : > { %v6616_v5 = vmax.f32 %v6552_v1, 0.0  ;;  %v6553_v6 = vadd.f32 %v8973_v2, %v10749_v42 }
 0x2bd   : > { %6682 = vst.msk [vmem:[%s10755_s19 + $0x30] sm:$0xff] %vm626_vm0, %v6618_v3  ;;  %v6619_v7 = vmax.f32 %v6555_v4, 0.0 }
 0x2be   : > { %6680 = vst.msk [vmem:[%s10755_s19 + $0x20] sm:$0xff] %vm626_vm0, %v6616_v5  ;;  %v6617_v9 = vmax.f32 %v6553_v6, 0.0  ;;  %v8904_v10 = vpop.f32.mrb[8].mxu0 }
 0x2bf   : > { %6683 = vst.msk [vmem:[%s10755_s19 + $0x38] sm:$0xff] %vm626_vm0, %v6619_v7  ;;  %v8974_v11 = vadd.f32 %v8904_v10, %v10696_v16  ;;  %v6254_v12 = vpop.f32.mrb[9].mxu0 }
 0x2c0   : > { %6681 = vst.msk [vmem:[%s10755_s19 + $0x28] sm:$0xff] %vm626_vm0, %v6617_v9  ;;  %v8975_v13 = vadd.f32 %v6254_v12, %v10698_v17  ;;  %v8905_v14 = vpop.f32.mrb[10].mxu0 }
 0x2c1   : > { %v6558_v8 = vadd.f32 %v8974_v11, %v10749_v42  ;;  %v8976_v15 = vadd.f32 %v8905_v14, %v10700_v18  ;;  %v6257_v41 = vpop.f32.mrb[11].mxu0 }
 0x2c2   : > { %v6556_v36 = vadd.f32 %v8975_v13, %v10749_v42  ;;  %v8977_v43 = vadd.f32 %v6257_v41, %v10702_v19 }
 0x2c3   : > { %v6622_v44 = vmax.f32 %v6558_v8, 0.0  ;;  %v6559_v16 = vadd.f32 %v8976_v15, %v10749_v42 }
 0x2c4   : > { %v6620_v45 = vmax.f32 %v6556_v36, 0.0  ;;  %v6557_v46 = vadd.f32 %v8977_v43, %v10749_v42 }
 0x2c5   : > { %6686 = vst.msk [vmem:[%s10755_s19 + $0x50] sm:$0xff] %vm626_vm0, %v6622_v44  ;;  %v6623_v17 = vmax.f32 %v6559_v16, 0.0 }
 0x2c6   : > { %6684 = vst.msk [vmem:[%s10755_s19 + $0x40] sm:$0xff] %vm626_vm0, %v6620_v45  ;;  %v6621_v48 = vmax.f32 %v6557_v46, 0.0  ;;  %v8908_v47 = vpop.f32.mrb[12].mxu0 }
 0x2c7   : > { %6687 = vst.msk [vmem:[%s10755_s19 + $0x58] sm:$0xff] %vm626_vm0, %v6623_v17  ;;  %v8978_v18 = vadd.f32 %v8908_v47, %v10704_v20  ;;  %v6270_v19 = vpop.f32.mrb[13].mxu0 }
 0x2c8   : > { %6685 = vst.msk [vmem:[%s10755_s19 + $0x48] sm:$0xff] %vm626_vm0, %v6621_v48  ;;  %v8979_v49 = vadd.f32 %v6270_v19, %v10706_v21  ;;  %v8909_v50 = vpop.f32.mrb[14].mxu0 }
 0x2c9   : > { %v6562_v51 = vadd.f32 %v8978_v18, %v10749_v42  ;;  %v8980_v52 = vadd.f32 %v8909_v50, %v10708_v22  ;;  %v6273_v53 = vpop.f32.mrb[15].mxu0 }
 0x2ca   : > { %v6560_v54 = vadd.f32 %v8979_v49, %v10749_v42  ;;  %v8981_v55 = vadd.f32 %v6273_v53, %v10710_v23 }
 0x2cb   : > { %v6626_v56 = vmax.f32 %v6562_v51, 0.0  ;;  %v6563_v20 = vadd.f32 %v8980_v52, %v10749_v42 }
 0x2cc   : > { %v6624_v57 = vmax.f32 %v6560_v54, 0.0  ;;  %v6561_v58 = vadd.f32 %v8981_v55, %v10749_v42 }
 0x2cd   : > { %6690 = vst.msk [vmem:[%s10755_s19 + $0x70] sm:$0xff] %vm626_vm0, %v6626_v56  ;;  %v6627_v21 = vmax.f32 %v6563_v20, 0.0 }
 0x2ce   : > { %6688 = vst.msk [vmem:[%s10755_s19 + $0x60] sm:$0xff] %vm626_vm0, %v6624_v57  ;;  %v6625_v59 = vmax.f32 %v6561_v58, 0.0  ;;  %v8912_v60 = vpop.f32.mrb[16].mxu0 }
 0x2cf   : > { %6691 = vst.msk [vmem:[%s10755_s19 + $0x78] sm:$0xff] %vm626_vm0, %v6627_v21  ;;  %v8982_v22 = vadd.f32 %v8912_v60, %v10712_v24  ;;  %v6286_v23 = vpop.f32.mrb[17].mxu0 }
 0x2d0   : > { %6689 = vst.msk [vmem:[%s10755_s19 + $0x68] sm:$0xff] %vm626_vm0, %v6625_v59  ;;  %v8983_v61 = vadd.f32 %v6286_v23, %v10714_v25  ;;  %v8913_v62 = vpop.f32.mrb[18].mxu0 }
 0x2d1   : > { %v6566_v63 = vadd.f32 %v8982_v22, %v10749_v42  ;;  %v8984_v0 = vadd.f32 %v8913_v62, %v10716_v26  ;;  %v6289_v1 = vpop.f32.mrb[19].mxu0 }
 0x2d2   : > { %v6564_v2 = vadd.f32 %v8983_v61, %v10749_v42  ;;  %v8985_v3 = vadd.f32 %v6289_v1, %v10718_v27 }
 0x2d3   : > { %v6630_v4 = vmax.f32 %v6566_v63, 0.0  ;;  %v6567_v24 = vadd.f32 %v8984_v0, %v10749_v42 }
 0x2d4   : > { %v6628_v5 = vmax.f32 %v6564_v2, 0.0  ;;  %v6565_v6 = vadd.f32 %v8985_v3, %v10749_v42 }
 0x2d5   : > { %6694 = vst.msk [vmem:[%s10755_s19 + $0x90] sm:$0xff] %vm626_vm0, %v6630_v4  ;;  %v6631_v25 = vmax.f32 %v6567_v24, 0.0 }
 0x2d6   : > { %6692 = vst.msk [vmem:[%s10755_s19 + $0x80] sm:$0xff] %vm626_vm0, %v6628_v5  ;;  %v6629_v7 = vmax.f32 %v6565_v6, 0.0  ;;  %v8916_v9 = vpop.f32.mrb[20].mxu0 }
 0x2d7   : > { %6695 = vst.msk [vmem:[%s10755_s19 + $0x98] sm:$0xff] %vm626_vm0, %v6631_v25  ;;  %v8986_v26 = vadd.f32 %v8916_v9, %v10720_v28  ;;  %v6302_v27 = vpop.f32.mrb[21].mxu0 }
 0x2d8   : > { %6693 = vst.msk [vmem:[%s10755_s19 + $0x88] sm:$0xff] %vm626_vm0, %v6629_v7  ;;  %v8987_v10 = vadd.f32 %v6302_v27, %v10722_v29  ;;  %v8917_v11 = vpop.f32.mrb[22].mxu0 }
 0x2d9   : > { %v6570_v12 = vadd.f32 %v8986_v26, %v10749_v42  ;;  %v8988_v13 = vadd.f32 %v8917_v11, %v10724_v30  ;;  %v6305_v14 = vpop.f32.mrb[23].mxu0 }
 0x2da   : > { %v6568_v8 = vadd.f32 %v8987_v10, %v10749_v42  ;;  %v8989_v15 = vadd.f32 %v6305_v14, %v10726_v31 }
 0x2db   : > { %v6634_v41 = vmax.f32 %v6570_v12, 0.0  ;;  %v6571_v28 = vadd.f32 %v8988_v13, %v10749_v42 }
 0x2dc   : > { %v6632_v36 = vmax.f32 %v6568_v8, 0.0  ;;  %v6569_v43 = vadd.f32 %v8989_v15, %v10749_v42 }
 0x2dd   : > { %6698 = vst.msk [vmem:[%s10755_s19 + $0xb0] sm:$0xff] %vm626_vm0, %v6634_v41  ;;  %v6635_v29 = vmax.f32 %v6571_v28, 0.0 }
 0x2de   : > { %6696 = vst.msk [vmem:[%s10755_s19 + $0xa0] sm:$0xff] %vm626_vm0, %v6632_v36  ;;  %v6633_v44 = vmax.f32 %v6569_v43, 0.0  ;;  %v8920_v16 = vpop.f32.mrb[24].mxu0 }
 0x2df   : > { %6699 = vst.msk [vmem:[%s10755_s19 + $0xb8] sm:$0xff] %vm626_vm0, %v6635_v29  ;;  %v8990_v30 = vadd.f32 %v8920_v16, %v10728_v32  ;;  %v6318_v31 = vpop.f32.mrb[25].mxu0 }
 0x2e0   : > { %6697 = vst.msk [vmem:[%s10755_s19 + $0xa8] sm:$0xff] %vm626_vm0, %v6633_v44  ;;  %v8991_v45 = vadd.f32 %v6318_v31, %v10730_v33  ;;  %v8921_v46 = vpop.f32.mrb[26].mxu0 }
 0x2e1   : > { %v6574_v17 = vadd.f32 %v8990_v30, %v10749_v42  ;;  %v8992_v48 = vadd.f32 %v8921_v46, %v10733_v34  ;;  %v6321_v47 = vpop.f32.mrb[27].mxu0 }
 0x2e2   : > { %v6572_v18 = vadd.f32 %v8991_v45, %v10749_v42  ;;  %v8993_v19 = vadd.f32 %v6321_v47, %v10735_v35 }
 0x2e3   : > { %v6638_v49 = vmax.f32 %v6574_v17, 0.0  ;;  %v6575_v32 = vadd.f32 %v8992_v48, %v10749_v42 }
 0x2e4   : > { %v6636_v50 = vmax.f32 %v6572_v18, 0.0  ;;  %v6573_v51 = vadd.f32 %v8993_v19, %v10749_v42 }
 0x2e5   : > { %6702 = vst.msk [vmem:[%s10755_s19 + $0xd0] sm:$0xff] %vm626_vm0, %v6638_v49  ;;  %v6639_v33 = vmax.f32 %v6575_v32, 0.0 }
 0x2e6   : > { %6700 = vst.msk [vmem:[%s10755_s19 + $0xc0] sm:$0xff] %vm626_vm0, %v6636_v50  ;;  %v6637_v52 = vmax.f32 %v6573_v51, 0.0  ;;  %v8924_v53 = vpop.f32.mrb[28].mxu0 }
 0x2e7   : > { %6703 = vst.msk [vmem:[%s10755_s19 + $0xd8] sm:$0xff] %vm626_vm0, %v6639_v33  ;;  %v8994_v34 = vadd.f32 %v8924_v53, %v10737_v37  ;;  %v6334_v54 = vpop.f32.mrb[29].mxu0 }
 0x2e8   : > { %6701 = vst.msk [vmem:[%s10755_s19 + $0xc8] sm:$0xff] %vm626_vm0, %v6637_v52  ;;  %v8995_v35 = vadd.f32 %v6334_v54, %v10739_v38  ;;  %v8925_v55 = vpop.f32.mrb[30].mxu0 }
 0x2e9   : > { %v6578_v56 = vadd.f32 %v8994_v34, %v10749_v42  ;;  %v8996_v20 = vadd.f32 %v8925_v55, %v10741_v39  ;;  %v6337_v57 = vpop.f32.mrb[31].mxu0 }
 0x2ea   : > { %v6576_v58 = vadd.f32 %v8995_v35, %v10749_v42  ;;  %v8997_v21 = vadd.f32 %v6337_v57, %v10743_v40 }
 0x2eb   : > { %v6642_v59 = vmax.f32 %v6578_v56, 0.0  ;;  %v6579_v37 = vadd.f32 %v8996_v20, %v10749_v42 }
 0x2ec   : > { %v6640_v60 = vmax.f32 %v6576_v58, 0.0  ;;  %v6577_v22 = vadd.f32 %v8997_v21, %v10749_v42 }
 0x2ed   : > { %6706 = vst.msk [vmem:[%s10755_s19 + $0xf0] sm:$0xff] %vm626_vm0, %v6642_v59  ;;  %v6643_v38 = vmax.f32 %v6579_v37, 0.0  ;;  %v8640_v23 = vpop.f32.mrb[32].mxu1 }
 0x2ee   : > { %6704 = vst.msk [vmem:[%s10755_s19 + $0xe0] sm:$0xff] %vm626_vm0, %v6640_v60  ;;  %v6641_v61 = vmax.f32 %v6577_v22, 0.0  ;;  %v8928_v39 = vpop.f32.mrb[32].mxu0  ;;  %v3516_v62 = vpop.f32.mrb[33].mxu1 }
 0x2ef   : > { %6707 = vst.msk [vmem:[%s10755_s19 + $0xf8] sm:$0xff] %vm626_vm0, %v6643_v38  ;;  %v8998_v63 = vadd.f32 %v8928_v39, %v8640_v23  ;;  %v6350_v40 = vpop.f32.mrb[33].mxu0  ;;  %v8641_v0 = vpop.f32.mrb[34].mxu1 }
 0x2f0   : > { %6705 = vst.msk [vmem:[%s10755_s19 + $0xe8] sm:$0xff] %vm626_vm0, %v6641_v61  ;;  %v8999_v1 = vadd.f32 %v6350_v40, %v3516_v62  ;;  %v8929_v2 = vpop.f32.mrb[34].mxu0  ;;  %v3519_v3 = vpop.f32.mrb[35].mxu1 }
 0x2f1   : > { %v6582_v4 = vadd.f32 %v8998_v63, %v10749_v42  ;;  %v9000_v24 = vadd.f32 %v8929_v2, %v8641_v0  ;;  %v6353_v5 = vpop.f32.mrb[35].mxu0 }
 0x2f2   : > { %v6580_v6 = vadd.f32 %v8999_v1, %v10749_v42  ;;  %v9001_v25 = vadd.f32 %v6353_v5, %v3519_v3 }
 0x2f3   : > { %v6646_v7 = vmax.f32 %v6582_v4, 0.0  ;;  %v6583_v9 = vadd.f32 %v9000_v24, %v10749_v42 }
 0x2f4   : > { %v6644_v26 = vmax.f32 %v6580_v6, 0.0  ;;  %v6581_v27 = vadd.f32 %v9001_v25, %v10749_v42 }
 0x2f5   : > { %6710 = vst.msk [vmem:[%s10755_s19 + $0x110] sm:$0xff] %vm626_vm0, %v6646_v7  ;;  %v6647_v10 = vmax.f32 %v6583_v9, 0.0  ;;  %v8644_v11 = vpop.f32.mrb[36].mxu1 }
 0x2f6   : > { %6708 = vst.msk [vmem:[%s10755_s19 + $0x100] sm:$0xff] %vm626_vm0, %v6644_v26  ;;  %v6645_v12 = vmax.f32 %v6581_v27, 0.0  ;;  %v8932_v13 = vpop.f32.mrb[36].mxu0  ;;  %v3532_v14 = vpop.f32.mrb[37].mxu1 }
 0x2f7   : > { %6711 = vst.msk [vmem:[%s10755_s19 + $0x118] sm:$0xff] %vm626_vm0, %v6647_v10  ;;  %v9002_v8 = vadd.f32 %v8932_v13, %v8644_v11  ;;  %v6366_v15 = vpop.f32.mrb[37].mxu0  ;;  %v8645_v41 = vpop.f32.mrb[38].mxu1 }
 0x2f8   : > { %6709 = vst.msk [vmem:[%s10755_s19 + $0x108] sm:$0xff] %vm626_vm0, %v6645_v12  ;;  %v9003_v28 = vadd.f32 %v6366_v15, %v3532_v14  ;;  %v8933_v36 = vpop.f32.mrb[38].mxu0  ;;  %v3535_v43 = vpop.f32.mrb[39].mxu1 }
 0x2f9   : > { %v6586_v29 = vadd.f32 %v9002_v8, %v10749_v42  ;;  %v9004_v44 = vadd.f32 %v8933_v36, %v8645_v41  ;;  %v6369_v16 = vpop.f32.mrb[39].mxu0 }
 0x2fa   : > { %v6584_v30 = vadd.f32 %v9003_v28, %v10749_v42  ;;  %v9005_v31 = vadd.f32 %v6369_v16, %v3535_v43 }
 0x2fb   : > { %v6650_v45 = vmax.f32 %v6586_v29, 0.0  ;;  %v6587_v46 = vadd.f32 %v9004_v44, %v10749_v42 }
 0x2fc   : > { %v6648_v17 = vmax.f32 %v6584_v30, 0.0  ;;  %v6585_v48 = vadd.f32 %v9005_v31, %v10749_v42 }
 0x2fd   : > { %6714 = vst.msk [vmem:[%s10755_s19 + $0x130] sm:$0xff] %vm626_vm0, %v6650_v45  ;;  %v6651_v47 = vmax.f32 %v6587_v46, 0.0  ;;  %v8648_v18 = vpop.f32.mrb[40].mxu1 }
 0x2fe   : > { %6712 = vst.msk [vmem:[%s10755_s19 + $0x120] sm:$0xff] %vm626_vm0, %v6648_v17  ;;  %v6649_v19 = vmax.f32 %v6585_v48, 0.0  ;;  %v8936_v49 = vpop.f32.mrb[40].mxu0  ;;  %v3548_v32 = vpop.f32.mrb[41].mxu1 }
 0x2ff   : > { %6715 = vst.msk [vmem:[%s10755_s19 + $0x138] sm:$0xff] %vm626_vm0, %v6651_v47  ;;  %v9006_v50 = vadd.f32 %v8936_v49, %v8648_v18  ;;  %v6382_v51 = vpop.f32.mrb[41].mxu0  ;;  %v8649_v33 = vpop.f32.mrb[42].mxu1 }
 0x300   : > { %6713 = vst.msk [vmem:[%s10755_s19 + $0x128] sm:$0xff] %vm626_vm0, %v6649_v19  ;;  %v9007_v52 = vadd.f32 %v6382_v51, %v3548_v32  ;;  %v8937_v53 = vpop.f32.mrb[42].mxu0  ;;  %v3551_v34 = vpop.f32.mrb[43].mxu1 }
 0x301   : > { %v6590_v54 = vadd.f32 %v9006_v50, %v10749_v42  ;;  %v9008_v35 = vadd.f32 %v8937_v53, %v8649_v33  ;;  %v6385_v55 = vpop.f32.mrb[43].mxu0 }
 0x302   : > { %v6588_v56 = vadd.f32 %v9007_v52, %v10749_v42  ;;  %v9009_v20 = vadd.f32 %v6385_v55, %v3551_v34 }
 0x303   : > { %v6654_v57 = vmax.f32 %v6590_v54, 0.0  ;;  %v6591_v58 = vadd.f32 %v9008_v35, %v10749_v42 }
 0x304   : > { %v6652_v21 = vmax.f32 %v6588_v56, 0.0  ;;  %v6589_v59 = vadd.f32 %v9009_v20, %v10749_v42 }
 0x305   : > { %6718 = vst.msk [vmem:[%s10755_s19 + $0x150] sm:$0xff] %vm626_vm0, %v6654_v57  ;;  %v6655_v37 = vmax.f32 %v6591_v58, 0.0  ;;  %v8652_v60 = vpop.f32.mrb[44].mxu1 }
 0x306   : > { %6716 = vst.msk [vmem:[%s10755_s19 + $0x140] sm:$0xff] %vm626_vm0, %v6652_v21  ;;  %v6653_v22 = vmax.f32 %v6589_v59, 0.0  ;;  %v8940_v38 = vpop.f32.mrb[44].mxu0  ;;  %v3564_v23 = vpop.f32.mrb[45].mxu1 }
 0x307   : > { %6719 = vst.msk [vmem:[%s10755_s19 + $0x158] sm:$0xff] %vm626_vm0, %v6655_v37  ;;  %v9010_v61 = vadd.f32 %v8940_v38, %v8652_v60  ;;  %v6398_v39 = vpop.f32.mrb[45].mxu0  ;;  %v8653_v62 = vpop.f32.mrb[46].mxu1 }
 0x308   : > { %6717 = vst.msk [vmem:[%s10755_s19 + $0x148] sm:$0xff] %vm626_vm0, %v6653_v22  ;;  %v9011_v63 = vadd.f32 %v6398_v39, %v3564_v23  ;;  %v8941_v40 = vpop.f32.mrb[46].mxu0  ;;  %v3567_v0 = vpop.f32.mrb[47].mxu1 }
 0x309   : > { %v6594_v1 = vadd.f32 %v9010_v61, %v10749_v42  ;;  %v9012_v2 = vadd.f32 %v8941_v40, %v8653_v62  ;;  %v6401_v3 = vpop.f32.mrb[47].mxu0 }
 0x30a   : > { %v6592_v4 = vadd.f32 %v9011_v63, %v10749_v42  ;;  %v9013_v24 = vadd.f32 %v6401_v3, %v3567_v0 }
 0x30b   : > { %v6658_v5 = vmax.f32 %v6594_v1, 0.0  ;;  %v6595_v6 = vadd.f32 %v9012_v2, %v10749_v42 }
 0x30c   : > { %v6656_v25 = vmax.f32 %v6592_v4, 0.0  ;;  %v6593_v7 = vadd.f32 %v9013_v24, %v10749_v42 }
 0x30d   : > { %6722 = vst.msk [vmem:[%s10755_s19 + $0x170] sm:$0xff] %vm626_vm0, %v6658_v5  ;;  %v6659_v9 = vmax.f32 %v6595_v6, 0.0  ;;  %v8656_v26 = vpop.f32.mrb[48].mxu1 }
 0x30e   : > { %6720 = vst.msk [vmem:[%s10755_s19 + $0x160] sm:$0xff] %vm626_vm0, %v6656_v25  ;;  %v6657_v27 = vmax.f32 %v6593_v7, 0.0  ;;  %v8944_v10 = vpop.f32.mrb[48].mxu0  ;;  %v3580_v11 = vpop.f32.mrb[49].mxu1 }
 0x30f   : > { %6723 = vst.msk [vmem:[%s10755_s19 + $0x178] sm:$0xff] %vm626_vm0, %v6659_v9  ;;  %v9014_v12 = vadd.f32 %v8944_v10, %v8656_v26  ;;  %v6414_v13 = vpop.f32.mrb[49].mxu0  ;;  %v8657_v14 = vpop.f32.mrb[50].mxu1 }
 0x310   : > { %6721 = vst.msk [vmem:[%s10755_s19 + $0x168] sm:$0xff] %vm626_vm0, %v6657_v27  ;;  %v9015_v8 = vadd.f32 %v6414_v13, %v3580_v11  ;;  %v8945_v15 = vpop.f32.mrb[50].mxu0  ;;  %v3583_v41 = vpop.f32.mrb[51].mxu1 }
 0x311   : > { %v6598_v28 = vadd.f32 %v9014_v12, %v10749_v42  ;;  %v9016_v36 = vadd.f32 %v8945_v15, %v8657_v14  ;;  %v6417_v43 = vpop.f32.mrb[51].mxu0 }
 0x312   : > { %v6596_v29 = vadd.f32 %v9015_v8, %v10749_v42  ;;  %v9017_v44 = vadd.f32 %v6417_v43, %v3583_v41 }
 0x313   : > { %v6662_v16 = vmax.f32 %v6598_v28, 0.0  ;;  %v6599_v30 = vadd.f32 %v9016_v36, %v10749_v42 }
 0x314   : > { %v6660_v31 = vmax.f32 %v6596_v29, 0.0  ;;  %v6597_v45 = vadd.f32 %v9017_v44, %v10749_v42 }
 0x315   : > { %6726 = vst.msk [vmem:[%s10755_s19 + $0x190] sm:$0xff] %vm626_vm0, %v6662_v16  ;;  %v6663_v46 = vmax.f32 %v6599_v30, 0.0  ;;  %v8660_v17 = vpop.f32.mrb[52].mxu1 }
 0x316   : > { %6724 = vst.msk [vmem:[%s10755_s19 + $0x180] sm:$0xff] %vm626_vm0, %v6660_v31  ;;  %v6661_v48 = vmax.f32 %v6597_v45, 0.0  ;;  %v8948_v47 = vpop.f32.mrb[52].mxu0  ;;  %v3596_v18 = vpop.f32.mrb[53].mxu1 }
 0x317   : > { %6727 = vst.msk [vmem:[%s10755_s19 + $0x198] sm:$0xff] %vm626_vm0, %v6663_v46  ;;  %v9018_v19 = vadd.f32 %v8948_v47, %v8660_v17  ;;  %v6430_v49 = vpop.f32.mrb[53].mxu0  ;;  %v8661_v32 = vpop.f32.mrb[54].mxu1 }
 0x318   : > { %6725 = vst.msk [vmem:[%s10755_s19 + $0x188] sm:$0xff] %vm626_vm0, %v6661_v48  ;;  %v9019_v50 = vadd.f32 %v6430_v49, %v3596_v18  ;;  %v8949_v51 = vpop.f32.mrb[54].mxu0  ;;  %v3599_v33 = vpop.f32.mrb[55].mxu1 }
 0x319   : > { %v6602_v52 = vadd.f32 %v9018_v19, %v10749_v42  ;;  %v9020_v53 = vadd.f32 %v8949_v51, %v8661_v32  ;;  %v6433_v34 = vpop.f32.mrb[55].mxu0 }
 0x31a   : > { %v6600_v54 = vadd.f32 %v9019_v50, %v10749_v42  ;;  %v9021_v35 = vadd.f32 %v6433_v34, %v3599_v33 }
 0x31b   : > { %v6666_v55 = vmax.f32 %v6602_v52, 0.0  ;;  %v6603_v56 = vadd.f32 %v9020_v53, %v10749_v42 }
 0x31c   : > { %v6664_v20 = vmax.f32 %v6600_v54, 0.0  ;;  %v6601_v57 = vadd.f32 %v9021_v35, %v10749_v42 }
 0x31d   : > { %6730 = vst.msk [vmem:[%s10755_s19 + $0x1b0] sm:$0xff] %vm626_vm0, %v6666_v55  ;;  %v6667_v58 = vmax.f32 %v6603_v56, 0.0  ;;  %v8664_v21 = vpop.f32.mrb[56].mxu1 }
 0x31e   : > { %6728 = vst.msk [vmem:[%s10755_s19 + $0x1a0] sm:$0xff] %vm626_vm0, %v6664_v20  ;;  %v6665_v59 = vmax.f32 %v6601_v57, 0.0  ;;  %v8952_v37 = vpop.f32.mrb[56].mxu0  ;;  %v3612_v60 = vpop.f32.mrb[57].mxu1 }
 0x31f   : > { %6731 = vst.msk [vmem:[%s10755_s19 + $0x1b8] sm:$0xff] %vm626_vm0, %v6667_v58  ;;  %v9022_v22 = vadd.f32 %v8952_v37, %v8664_v21  ;;  %v6446_v38 = vpop.f32.mrb[57].mxu0  ;;  %v8665_v23 = vpop.f32.mrb[58].mxu1 }
 0x320   : > { %6729 = vst.msk [vmem:[%s10755_s19 + $0x1a8] sm:$0xff] %vm626_vm0, %v6665_v59  ;;  %v9023_v61 = vadd.f32 %v6446_v38, %v3612_v60  ;;  %v8953_v39 = vpop.f32.mrb[58].mxu0  ;;  %v3615_v62 = vpop.f32.mrb[59].mxu1 }
 0x321   : > { %v6606_v63 = vadd.f32 %v9022_v22, %v10749_v42  ;;  %v9024_v40 = vadd.f32 %v8953_v39, %v8665_v23  ;;  %v6449_v0 = vpop.f32.mrb[59].mxu0 }
 0x322   : > { %v6604_v1 = vadd.f32 %v9023_v61, %v10749_v42  ;;  %v9025_v2 = vadd.f32 %v6449_v0, %v3615_v62 }
 0x323   : > { %v6670_v3 = vmax.f32 %v6606_v63, 0.0  ;;  %v6607_v4 = vadd.f32 %v9024_v40, %v10749_v42 }
 0x324   : > { %v6668_v24 = vmax.f32 %v6604_v1, 0.0  ;;  %v6605_v5 = vadd.f32 %v9025_v2, %v10749_v42 }
 0x325   : > { %6734 = vst.msk [vmem:[%s10755_s19 + $0x1d0] sm:$0xff] %vm626_vm0, %v6670_v3  ;;  %v6671_v6 = vmax.f32 %v6607_v4, 0.0  ;;  %v8668_v25 = vpop.f32.mrb[60].mxu1 }
 0x326   : > { %6732 = vst.msk [vmem:[%s10755_s19 + $0x1c0] sm:$0xff] %vm626_vm0, %v6668_v24  ;;  %v6669_v7 = vmax.f32 %v6605_v5, 0.0  ;;  %v8956_v9 = vpop.f32.mrb[60].mxu0  ;;  %v3628_v26 = vpop.f32.mrb[61].mxu1 }
 0x327   : > { %6735 = vst.msk [vmem:[%s10755_s19 + $0x1d8] sm:$0xff] %vm626_vm0, %v6671_v6  ;;  %v9026_v27 = vadd.f32 %v8956_v9, %v8668_v25  ;;  %v6462_v10 = vpop.f32.mrb[61].mxu0  ;;  %v8669_v11 = vpop.f32.mrb[62].mxu1 }
 0x328   : > { %6733 = vst.msk [vmem:[%s10755_s19 + $0x1c8] sm:$0xff] %vm626_vm0, %v6669_v7  ;;  %v9027_v12 = vadd.f32 %v6462_v10, %v3628_v26  ;;  %v8957_v13 = vpop.f32.mrb[62].mxu0  ;;  %v3631_v14 = vpop.f32.mrb[63].mxu1 }
 0x329   : > { %v6610_v8 = vadd.f32 %v9026_v27, %v10749_v42  ;;  %v9028_v15 = vadd.f32 %v8957_v13, %v8669_v11  ;;  %v6465_v41 = vpop.f32.mrb[63].mxu0 }
 0x32a   : > { %v6608_v28 = vadd.f32 %v9027_v12, %v10749_v42  ;;  %v9029_v36 = vadd.f32 %v6465_v41, %v3631_v14 }
 0x32b   : > { %v6674_v43 = vmax.f32 %v6610_v8, 0.0  ;;  %v6611_v29 = vadd.f32 %v9028_v15, %v10749_v42 }
 0x32c   : > { %v6672_v44 = vmax.f32 %v6608_v28, 0.0  ;;  %v6609_v16 = vadd.f32 %v9029_v36, %v10749_v42 }
 0x32d   : > { %6738 = vst.msk [vmem:[%s10755_s19 + $0x1f0] sm:$0xff] %vm626_vm0, %v6674_v43  ;;  %v6675_v30 = vmax.f32 %v6611_v29, 0.0 }
 0x32e   : > { %6736 = vst.msk [vmem:[%s10755_s19 + $0x1e0] sm:$0xff] %vm626_vm0, %v6672_v44  ;;  %v6673_v31 = vmax.f32 %v6609_v16, 0.0 }
 0x32f   : > { %6739 = vst.msk [vmem:[%s10755_s19 + $0x1f8] sm:$0xff] %vm626_vm0, %v6675_v30 }
 0x330   : > { %6737 = vst.msk [vmem:[%s10755_s19 + $0x1e8] sm:$0xff] %vm626_vm0, %v6673_v31 }
 0x331 PF: > { %s15_s22 = sadd.s32 1, %s9885_s22   ;;  %s10994_s18 = smov %s9877_s20 }
 0x332   : > { %p12_p7 = scmp.ge.s32.totalorder %s15_s22, 6   ;;  %s10995_s19 = smov %s9881_s21 }
 0x333   : > { %s10996_s20 = smov %s10999_s23  ;;  %s10997_s21 = smov %s11003_s24 }
 0x334   :  { %14 = sbr.rel (!%p12_p7) target bundleno = 3 (0x3), region = 93 }

// kernel: feature_matching_forward.12
= control target key start
LH: loop header
LB: loop body
LE: loop exit
PB: predicated region body
PF: predicated region fallthrough
CT: control target
= control target key end

     0   :  { %vm823_vm0 = vcmask 130048   ;;  %s1574_s1 = inlined_call_operand.vmem [shape: bf16[128,16], index: 1, kind: input, shape index: {}]   ;;  %s1575_s0 = inlined_call_operand.vmem [shape: bf16[512,128], index: 0, kind: input, shape index: {}]   ;;  %s1576_s2 = inlined_call_operand.vmem [shape: f32[1,16], index: 2, kind: input, shape index: {}]   ;;  %s1577_s3 = inlined_call_operand.vmem [shape: f32[512,16], index: 3, kind: output, shape index: {}]  }
   0x1   :  { %v1069_v0 = vld [vmem:[%s1574_s1] sm:$0xff]   ;;  %v1070_v1 = vld [vmem:[%s1574_s1 + $0x8] sm:$0xff]   ;;  %v1071_v2 = vld [vmem:[%s1574_s1 + $0x10] sm:$0xff]  }
   0x2   :  { %973 = vmatprep.subr.bf16.mxu0 %v1069_v0  ;;  %1053 = vmatprep.subr.bf16.mxu1 %v1069_v0  ;;  %v1072_v3 = vld [vmem:[%s1574_s1 + $0x18] sm:$0xff]   ;;  %v1077_v4 = vld [vmem:[%s1575_s0] sm:$0xff]   ;;  %v1074_v7 = vld [vmem:[%s1574_s1 + $0x28] sm:$0xff]  }
   0x3   :  { %974 = vmatpush3.bf16.msra.mxu0 %v1069_v0  ;;  %1061 = vmatpush3.bf16.msra.mxu1 %v1069_v0  ;;  %v1078_v5 = vld [vmem:[%s1575_s0 + $0x80] sm:$0xff]   ;;  %v1075_v8 = vld [vmem:[%s1574_s1 + $0x30] sm:$0xff]   ;;  %v1076_v9 = vld [vmem:[%s1574_s1 + $0x38] sm:$0xff]  }
   0x4   :  { %975 = vmatprep.subr.bf16.mxu0 %v1070_v1  ;;  %1054 = vmatprep.subr.bf16.mxu1 %v1070_v1  ;;  %v1073_v6 = vld [vmem:[%s1574_s1 + $0x20] sm:$0xff]   ;;  %v1079_v10 = vld [vmem:[%s1575_s0 + $0x8] sm:$0xff]   ;;  %v1081_v12 = vld [vmem:[%s1575_s0 + $0x10] sm:$0xff]  }
   0x5   :  { %989 = vmatprep.mubr.bf16.mxu0 %v1077_v4  ;;  %1021 = vmatprep.mubr.bf16.mxu1 %v1078_v5  ;;  %v1080_v11 = vld [vmem:[%s1575_s0 + $0x88] sm:$0xff]   ;;  %v1082_v13 = vld [vmem:[%s1575_s0 + $0x90] sm:$0xff]   ;;  %v1083_v14 = vld [vmem:[%s1575_s0 + $0x18] sm:$0xff]  }
   0x6   :  { %v1084_v15 = vld [vmem:[%s1575_s0 + $0x98] sm:$0xff]   ;;  %v1085_v16 = vld [vmem:[%s1575_s0 + $0x20] sm:$0xff]   ;;  %v1087_v18 = vld [vmem:[%s1575_s0 + $0x28] sm:$0xff]  }
   0x7   :  { %976 = vmatpush3.bf16.msra.mxu0 %v1070_v1  ;;  %1062 = vmatpush3.bf16.msra.mxu1 %v1070_v1  ;;  %v1086_v17 = vld [vmem:[%s1575_s0 + $0xa0] sm:$0xff]   ;;  %v1088_v19 = vld [vmem:[%s1575_s0 + $0xa8] sm:$0xff]   ;;  %v1089_v20 = vld [vmem:[%s1575_s0 + $0x30] sm:$0xff]  }
   0x8   :  { %977 = vmatprep.subr.bf16.mxu0 %v1071_v2  ;;  %1055 = vmatprep.subr.bf16.mxu1 %v1071_v2  ;;  %v1090_v21 = vld [vmem:[%s1575_s0 + $0xb0] sm:$0xff]   ;;  %v1091_v22 = vld [vmem:[%s1575_s0 + $0x38] sm:$0xff]   ;;  %v1093_v24 = vld [vmem:[%s1575_s0 + $0x40] sm:$0xff]  }
   0x9   :  { %v1092_v23 = vld [vmem:[%s1575_s0 + $0xb8] sm:$0xff]   ;;  %v1094_v25 = vld [vmem:[%s1575_s0 + $0xc0] sm:$0xff]   ;;  %v1095_v26 = vld [vmem:[%s1575_s0 + $0x48] sm:$0xff]  }
   0xa   :  { %v1096_v27 = vld [vmem:[%s1575_s0 + $0xc8] sm:$0xff]   ;;  %v1097_v28 = vld [vmem:[%s1575_s0 + $0x50] sm:$0xff]   ;;  %v1099_v30 = vld [vmem:[%s1575_s0 + $0x58] sm:$0xff]  }
   0xb   :  { %978 = vmatpush3.bf16.msra.mxu0 %v1071_v2  ;;  %1063 = vmatpush3.bf16.msra.mxu1 %v1071_v2  ;;  %v1098_v29 = vld [vmem:[%s1575_s0 + $0xd0] sm:$0xff]   ;;  %v1100_v31 = vld [vmem:[%s1575_s0 + $0xd8] sm:$0xff]   ;;  %v1101_v32 = vld [vmem:[%s1575_s0 + $0x60] sm:$0xff]  }
   0xc   :  { %979 = vmatprep.subr.bf16.mxu0 %v1072_v3  ;;  %1056 = vmatprep.subr.bf16.mxu1 %v1072_v3  ;;  %v1102_v33 = vld [vmem:[%s1575_s0 + $0xe0] sm:$0xff]   ;;  %v1103_v34 = vld [vmem:[%s1575_s0 + $0x68] sm:$0xff]   ;;  %v1105_v36 = vld [vmem:[%s1575_s0 + $0x70] sm:$0xff]  }
   0xd   :  { %v1104_v35 = vld [vmem:[%s1575_s0 + $0xe8] sm:$0xff]   ;;  %v1106_v37 = vld [vmem:[%s1575_s0 + $0xf0] sm:$0xff]   ;;  %v1107_v38 = vld [vmem:[%s1575_s0 + $0x78] sm:$0xff]  }
   0xe   :  { %v1108_v39 = vld [vmem:[%s1575_s0 + $0xf8] sm:$0xff]   ;;  %v1252_v40 = vld [vmem:[%s1576_s2] ss:$0 sm:$0xff] }
   0xf   :  { %980 = vmatpush3.bf16.msra.mxu0 %v1072_v3  ;;  %1064 = vmatpush3.bf16.msra.mxu1 %v1072_v3 }
  0x10   :  { %981 = vmatprep.subr.bf16.mxu0 %v1073_v6  ;;  %1057 = vmatprep.subr.bf16.mxu1 %v1073_v6 }
  0x13   :  { %982 = vmatpush3.bf16.msra.mxu0 %v1073_v6  ;;  %1065 = vmatpush3.bf16.msra.mxu1 %v1073_v6 }
  0x14   :  { %983 = vmatprep.subr.bf16.mxu0 %v1074_v7  ;;  %1058 = vmatprep.subr.bf16.mxu1 %v1074_v7 }
  0x17   :  { %984 = vmatpush3.bf16.msra.mxu0 %v1074_v7  ;;  %1066 = vmatpush3.bf16.msra.mxu1 %v1074_v7 }
  0x18   :  { %985 = vmatprep.subr.bf16.mxu0 %v1075_v8  ;;  %1059 = vmatprep.subr.bf16.mxu1 %v1075_v8 }
  0x1b   :  { %986 = vmatpush3.bf16.msra.mxu0 %v1075_v8  ;;  %1067 = vmatpush3.bf16.msra.mxu1 %v1075_v8 }
  0x1c   :  { %987 = vmatprep.subr.bf16.mxu0 %v1076_v9  ;;  %1060 = vmatprep.subr.bf16.mxu1 %v1076_v9 }
  0x1f   :  { %988 = vmatpush3.bf16.msra.mxu0 %v1076_v9  ;;  %1068 = vmatpush3.bf16.msra.mxu1 %v1076_v9 }
  0x22   :  { %990 = vmatmul.mubr.bf16.vlgmr.msra.gmra.mrb[0].mxu0 %v1079_v10  ;;  %1022 = vmatmul.mubr.bf16.vlgmr.msra.gmra.mrb[0].mxu1 %v1080_v11 }
  0x23   :  { %993 = vmatprep.mubr.bf16.mxu0 %v1081_v12  ;;  %1025 = vmatprep.mubr.bf16.mxu1 %v1082_v13 }
  0x2a   :  { %994 = vmatmul.mubr.bf16.gmra.mrb[4].mxu0 %v1083_v14  ;;  %1026 = vmatmul.mubr.bf16.gmra.mrb[4].mxu1 %v1084_v15 }
  0x2b   :  { %997 = vmatprep.mubr.bf16.mxu0 %v1085_v16  ;;  %1029 = vmatprep.mubr.bf16.mxu1 %v1086_v17 }
  0x32   :  { %998 = vmatmul.mubr.bf16.gmra.mrb[8].mxu0 %v1087_v18  ;;  %1030 = vmatmul.mubr.bf16.gmra.mrb[8].mxu1 %v1088_v19 }
  0x33   :  { %1001 = vmatprep.mubr.bf16.mxu0 %v1089_v20  ;;  %1033 = vmatprep.mubr.bf16.mxu1 %v1090_v21 }
  0x3a   :  { %1002 = vmatmul.mubr.bf16.gmra.mrb[12].mxu0 %v1091_v22  ;;  %1034 = vmatmul.mubr.bf16.gmra.mrb[12].mxu1 %v1092_v23 }
  0x3b   :  { %1005 = vmatprep.mubr.bf16.mxu0 %v1093_v24  ;;  %1037 = vmatprep.mubr.bf16.mxu1 %v1094_v25 }
  0x42   :  { %1006 = vmatmul.mubr.bf16.gmra.mrb[16].mxu0 %v1095_v26  ;;  %1038 = vmatmul.mubr.bf16.gmra.mrb[16].mxu1 %v1096_v27 }
  0x43   :  { %1009 = vmatprep.mubr.bf16.mxu0 %v1097_v28  ;;  %1041 = vmatprep.mubr.bf16.mxu1 %v1098_v29 }
  0x4a   :  { %1010 = vmatmul.mubr.bf16.gmra.mrb[20].mxu0 %v1099_v30  ;;  %1042 = vmatmul.mubr.bf16.gmra.mrb[20].mxu1 %v1100_v31 }
  0x4b   :  { %1013 = vmatprep.mubr.bf16.mxu0 %v1101_v32  ;;  %1045 = vmatprep.mubr.bf16.mxu1 %v1102_v33 }
  0x52   :  { %1014 = vmatmul.mubr.bf16.gmra.mrb[24].mxu0 %v1103_v34  ;;  %1046 = vmatmul.mubr.bf16.gmra.mrb[24].mxu1 %v1104_v35 }
  0x53   :  { %1017 = vmatprep.mubr.bf16.mxu0 %v1105_v36  ;;  %1049 = vmatprep.mubr.bf16.mxu1 %v1106_v37 }
  0x5a   :  { %1018 = vmatmul.mubr.bf16.gmra.mrb[28].mxu0 %v1107_v38  ;;  %1050 = vmatmul.mubr.bf16.gmra.mrb[28].mxu1 %v1108_v39 }
  0xf5   :  { %v991_v41 = vpop.f32.mrb[0].mxu0  ;;  %v1023_v42 = vpop.f32.mrb[0].mxu1 }
  0xf6   :  { %v385_v43 = vadd.f32 %v991_v41, %v1252_v40  ;;  %v513_v44 = vadd.f32 %v1023_v42, %v1252_v40  ;;  %v376_v45 = vpop.f32.mrb[1].mxu0  ;;  %v504_v46 = vpop.f32.mrb[1].mxu1 }
  0xf7   :  { %v377_v47 = vadd.f32 %v1252_v40, %v376_v45  ;;  %v505_v48 = vadd.f32 %v1252_v40, %v504_v46  ;;  %v992_v49 = vpop.f32.mrb[2].mxu0  ;;  %v1024_v50 = vpop.f32.mrb[2].mxu1 }
  0xf8   :  { %vm633_vm1 = vcmp.ge.f32.partialorder %v385_v43, 0.0  ;;  %v697_v51 = vmul.f32 0.2, %v385_v43  ;;  %vm665_vm2 = vcmp.ge.f32.partialorder %v513_v44, 0.0  ;;  %v729_v52 = vmul.f32 0.2, %v513_v44 }
  0xf9   :  { %vm631_vm3 = vcmp.ge.f32.partialorder %v377_v47, 0.0  ;;  %v695_v53 = vmul.f32 0.2, %v377_v47  ;;  %vm663_vm4 = vcmp.ge.f32.partialorder %v505_v48, 0.0  ;;  %v727_v54 = vmul.f32 0.2, %v505_v48 }
  0xfa   :  { %v761_v55 = vsel %vm633_vm1, %v385_v43, %v697_v51  ;;  %v793_v56 = vsel %vm665_vm2, %v513_v44, %v729_v52  ;;  %v388_v57 = vadd.f32 %v992_v49, %v1252_v40  ;;  %v516_v58 = vadd.f32 %v1024_v50, %v1252_v40  ;;  %v379_v59 = vpop.f32.mrb[3].mxu0  ;;  %v507_v60 = vpop.f32.mrb[3].mxu1 }
  0xfb   :  { %826 = vst.msk [vmem:[%s1577_s3 + $0x10] sm:$0xff] %vm823_vm0, %v761_v55  ;;  %858 = vst.msk [vmem:[%s1577_s3 + $0x110] sm:$0xff] %vm823_vm0, %v793_v56  ;;  %v759_v61 = vsel %vm631_vm3, %v377_v47, %v695_v53  ;;  %v791_v62 = vsel %vm663_vm4, %v505_v48, %v727_v54  ;;  %v380_v63 = vadd.f32 %v1252_v40, %v379_v59 }
  0xfc   :  { %v508_v0 = vadd.f32 %v1252_v40, %v507_v60  ;;  %824 = vst.msk [vmem:[%s1577_s3] sm:$0xff] %vm823_vm0, %v759_v61  ;;  %856 = vst.msk [vmem:[%s1577_s3 + $0x100] sm:$0xff] %vm823_vm0, %v791_v62  ;;  %vm634_vm5 = vcmp.ge.f32.partialorder %v388_v57, 0.0  ;;  %v698_v1 = vmul.f32 0.2, %v388_v57  ;;  %vm666_vm6 = vcmp.ge.f32.partialorder %v516_v58, 0.0 }
  0xfd   :  { %v730_v2 = vmul.f32 0.2, %v516_v58  ;;  %vm632_vm7 = vcmp.ge.f32.partialorder %v380_v63, 0.0  ;;  %v696_v3 = vmul.f32 0.2, %v380_v63  ;;  %v995_v7 = vpop.f32.mrb[4].mxu0 }
  0xfe   :  { %vm664_vm8 = vcmp.ge.f32.partialorder %v508_v0, 0.0  ;;  %v728_v4 = vmul.f32 0.2, %v508_v0  ;;  %v762_v5 = vsel %vm634_vm5, %v388_v57, %v698_v1  ;;  %v1027_v8 = vpop.f32.mrb[4].mxu1  ;;  %v401_v11 = vadd.f32 %v995_v7, %v1252_v40  ;;  %v392_v13 = vpop.f32.mrb[5].mxu0 }
  0xff   :  { %v794_v6 = vsel %vm666_vm6, %v516_v58, %v730_v2  ;;  %827 = vst.msk [vmem:[%s1577_s3 + $0x18] sm:$0xff] %vm823_vm0, %v762_v5  ;;  %v760_v9 = vsel %vm632_vm7, %v380_v63, %v696_v3  ;;  %v529_v12 = vadd.f32 %v1027_v8, %v1252_v40  ;;  %v520_v14 = vpop.f32.mrb[5].mxu1  ;;  %v393_v15 = vadd.f32 %v1252_v40, %v392_v13  ;;  %v996_v17 = vpop.f32.mrb[6].mxu0 }
 0x100   :  { %859 = vst.msk [vmem:[%s1577_s3 + $0x118] sm:$0xff] %vm823_vm0, %v794_v6  ;;  %v792_v10 = vsel %vm664_vm8, %v508_v0, %v728_v4  ;;  %825 = vst.msk [vmem:[%s1577_s3 + $0x8] sm:$0xff] %vm823_vm0, %v760_v9  ;;  %v521_v16 = vadd.f32 %v1252_v40, %v520_v14  ;;  %v1028_v18 = vpop.f32.mrb[6].mxu1  ;;  %vm637_vm9 = vcmp.ge.f32.partialorder %v401_v11, 0.0  ;;  %v701_v19 = vmul.f32 0.2, %v401_v11 }
 0x101   :  { %857 = vst.msk [vmem:[%s1577_s3 + $0x108] sm:$0xff] %vm823_vm0, %v792_v10  ;;  %vm669_vm10 = vcmp.ge.f32.partialorder %v529_v12, 0.0  ;;  %v733_v20 = vmul.f32 0.2, %v529_v12  ;;  %vm635_vm11 = vcmp.ge.f32.partialorder %v393_v15, 0.0  ;;  %v404_v25 = vadd.f32 %v996_v17, %v1252_v40  ;;  %v395_v27 = vpop.f32.mrb[7].mxu0 }
 0x102   :  { %v699_v21 = vmul.f32 0.2, %v393_v15  ;;  %vm667_vm12 = vcmp.ge.f32.partialorder %v521_v16, 0.0  ;;  %v731_v22 = vmul.f32 0.2, %v521_v16  ;;  %v765_v23 = vsel %vm637_vm9, %v401_v11, %v701_v19  ;;  %v523_v28 = vpop.f32.mrb[7].mxu1 }
 0x103   :  { %v797_v24 = vsel %vm669_vm10, %v529_v12, %v733_v20  ;;  %v532_v26 = vadd.f32 %v1028_v18, %v1252_v40  ;;  %830 = vst.msk [vmem:[%s1577_s3 + $0x30] sm:$0xff] %vm823_vm0, %v765_v23  ;;  %v396_v31 = vadd.f32 %v1252_v40, %v395_v27  ;;  %v524_v32 = vadd.f32 %v1252_v40, %v523_v28 }
 0x104   :  { %862 = vst.msk [vmem:[%s1577_s3 + $0x130] sm:$0xff] %vm823_vm0, %v797_v24  ;;  %v763_v29 = vsel %vm635_vm11, %v393_v15, %v699_v21  ;;  %v795_v30 = vsel %vm667_vm12, %v521_v16, %v731_v22  ;;  %vm638_vm13 = vcmp.ge.f32.partialorder %v404_v25, 0.0  ;;  %v702_v33 = vmul.f32 0.2, %v404_v25 }
 0x105   :  { %828 = vst.msk [vmem:[%s1577_s3 + $0x20] sm:$0xff] %vm823_vm0, %v763_v29  ;;  %860 = vst.msk [vmem:[%s1577_s3 + $0x120] sm:$0xff] %vm823_vm0, %v795_v30  ;;  %vm670_vm14 = vcmp.ge.f32.partialorder %v532_v26, 0.0  ;;  %v734_v34 = vmul.f32 0.2, %v532_v26  ;;  %vm636_vm15 = vcmp.ge.f32.partialorder %v396_v31, 0.0 }
 0x106   :  { %v700_v35 = vmul.f32 0.2, %v396_v31  ;;  %vm668_vm1 = vcmp.ge.f32.partialorder %v524_v32, 0.0  ;;  %v732_v36 = vmul.f32 0.2, %v524_v32  ;;  %v766_v37 = vsel %vm638_vm13, %v404_v25, %v702_v33  ;;  %v999_v39 = vpop.f32.mrb[8].mxu0 }
 0x107   :  { %v798_v38 = vsel %vm670_vm14, %v532_v26, %v734_v34  ;;  %v1031_v41 = vpop.f32.mrb[8].mxu1  ;;  %831 = vst.msk [vmem:[%s1577_s3 + $0x38] sm:$0xff] %vm823_vm0, %v766_v37  ;;  %v417_v44 = vadd.f32 %v999_v39, %v1252_v40  ;;  %v408_v46 = vpop.f32.mrb[9].mxu0 }
 0x108   :  { %863 = vst.msk [vmem:[%s1577_s3 + $0x138] sm:$0xff] %vm823_vm0, %v798_v38  ;;  %v764_v42 = vsel %vm636_vm15, %v396_v31, %v700_v35  ;;  %v796_v43 = vsel %vm668_vm1, %v524_v32, %v732_v36  ;;  %v545_v45 = vadd.f32 %v1031_v41, %v1252_v40  ;;  %v536_v47 = vpop.f32.mrb[9].mxu1  ;;  %v409_v48 = vadd.f32 %v1252_v40, %v408_v46  ;;  %v1000_v50 = vpop.f32.mrb[10].mxu0 }
 0x109   :  { %829 = vst.msk [vmem:[%s1577_s3 + $0x28] sm:$0xff] %vm823_vm0, %v764_v42  ;;  %861 = vst.msk [vmem:[%s1577_s3 + $0x128] sm:$0xff] %vm823_vm0, %v796_v43  ;;  %v537_v49 = vadd.f32 %v1252_v40, %v536_v47  ;;  %v1032_v51 = vpop.f32.mrb[10].mxu1  ;;  %vm641_vm2 = vcmp.ge.f32.partialorder %v417_v44, 0.0  ;;  %v705_v52 = vmul.f32 0.2, %v417_v44  ;;  %v420_v58 = vadd.f32 %v1000_v50, %v1252_v40 }
 0x10a   :  { %vm673_vm3 = vcmp.ge.f32.partialorder %v545_v45, 0.0  ;;  %v737_v53 = vmul.f32 0.2, %v545_v45  ;;  %vm639_vm4 = vcmp.ge.f32.partialorder %v409_v48, 0.0  ;;  %v703_v54 = vmul.f32 0.2, %v409_v48 }
 0x10b   :  { %vm671_vm5 = vcmp.ge.f32.partialorder %v537_v49, 0.0  ;;  %v735_v55 = vmul.f32 0.2, %v537_v49  ;;  %v769_v56 = vsel %vm641_vm2, %v417_v44, %v705_v52  ;;  %v548_v59 = vadd.f32 %v1032_v51, %v1252_v40  ;;  %v411_v60 = vpop.f32.mrb[11].mxu0  ;;  %v539_v61 = vpop.f32.mrb[11].mxu1 }
 0x10c   :  { %v801_v57 = vsel %vm673_vm3, %v545_v45, %v737_v53  ;;  %834 = vst.msk [vmem:[%s1577_s3 + $0x50] sm:$0xff] %vm823_vm0, %v769_v56  ;;  %v767_v62 = vsel %vm639_vm4, %v409_v48, %v703_v54  ;;  %v412_v0 = vadd.f32 %v1252_v40, %v411_v60  ;;  %v540_v1 = vadd.f32 %v1252_v40, %v539_v61 }
 0x10d   :  { %866 = vst.msk [vmem:[%s1577_s3 + $0x150] sm:$0xff] %vm823_vm0, %v801_v57  ;;  %v799_v63 = vsel %vm671_vm5, %v537_v49, %v735_v55  ;;  %v1003_v2 = vpop.f32.mrb[12].mxu0  ;;  %v1035_v3 = vpop.f32.mrb[12].mxu1  ;;  %832 = vst.msk [vmem:[%s1577_s3 + $0x40] sm:$0xff] %vm823_vm0, %v767_v62  ;;  %vm642_vm6 = vcmp.ge.f32.partialorder %v420_v58, 0.0  ;;  %vm674_vm7 = vcmp.ge.f32.partialorder %v548_v59, 0.0 }
 0x10e   :  { %864 = vst.msk [vmem:[%s1577_s3 + $0x140] sm:$0xff] %vm823_vm0, %v799_v63  ;;  %v706_v4 = vmul.f32 0.2, %v420_v58  ;;  %v738_v5 = vmul.f32 0.2, %v548_v59  ;;  %vm640_vm8 = vcmp.ge.f32.partialorder %v412_v0, 0.0  ;;  %v433_v10 = vadd.f32 %v1003_v2, %v1252_v40 }
 0x10f   :  { %v704_v6 = vmul.f32 0.2, %v412_v0  ;;  %vm672_vm9 = vcmp.ge.f32.partialorder %v540_v1, 0.0  ;;  %v736_v7 = vmul.f32 0.2, %v540_v1  ;;  %v561_v11 = vadd.f32 %v1035_v3, %v1252_v40  ;;  %v424_v12 = vpop.f32.mrb[13].mxu0 }
 0x110   :  { %v770_v8 = vsel %vm642_vm6, %v420_v58, %v706_v4  ;;  %v802_v9 = vsel %vm674_vm7, %v548_v59, %v738_v5  ;;  %v552_v13 = vpop.f32.mrb[13].mxu1  ;;  %v425_v16 = vadd.f32 %v1252_v40, %v424_v12  ;;  %v1004_v18 = vpop.f32.mrb[14].mxu0  ;;  %vm645_vm10 = vcmp.ge.f32.partialorder %v433_v10, 0.0 }
 0x111   :  { %835 = vst.msk [vmem:[%s1577_s3 + $0x58] sm:$0xff] %vm823_vm0, %v770_v8  ;;  %867 = vst.msk [vmem:[%s1577_s3 + $0x158] sm:$0xff] %vm823_vm0, %v802_v9  ;;  %v768_v14 = vsel %vm640_vm8, %v412_v0, %v704_v6  ;;  %v800_v15 = vsel %vm672_vm9, %v540_v1, %v736_v7  ;;  %v553_v17 = vadd.f32 %v1252_v40, %v552_v13  ;;  %v1036_v19 = vpop.f32.mrb[14].mxu1  ;;  %v709_v20 = vmul.f32 0.2, %v433_v10  ;;  %v427_v28 = vpop.f32.mrb[15].mxu0 }
 0x112   :  { %833 = vst.msk [vmem:[%s1577_s3 + $0x48] sm:$0xff] %vm823_vm0, %v768_v14  ;;  %865 = vst.msk [vmem:[%s1577_s3 + $0x148] sm:$0xff] %vm823_vm0, %v800_v15  ;;  %vm677_vm11 = vcmp.ge.f32.partialorder %v561_v11, 0.0  ;;  %v741_v21 = vmul.f32 0.2, %v561_v11  ;;  %vm643_vm12 = vcmp.ge.f32.partialorder %v425_v16, 0.0  ;;  %v436_v26 = vadd.f32 %v1004_v18, %v1252_v40 }
 0x113   :  { %v707_v22 = vmul.f32 0.2, %v425_v16  ;;  %vm675_vm13 = vcmp.ge.f32.partialorder %v553_v17, 0.0  ;;  %v739_v23 = vmul.f32 0.2, %v553_v17  ;;  %v773_v24 = vsel %vm645_vm10, %v433_v10, %v709_v20  ;;  %v555_v29 = vpop.f32.mrb[15].mxu1 }
 0x114   :  { %v805_v25 = vsel %vm677_vm11, %v561_v11, %v741_v21  ;;  %v564_v27 = vadd.f32 %v1036_v19, %v1252_v40  ;;  %838 = vst.msk [vmem:[%s1577_s3 + $0x70] sm:$0xff] %vm823_vm0, %v773_v24  ;;  %v428_v32 = vadd.f32 %v1252_v40, %v427_v28  ;;  %v556_v33 = vadd.f32 %v1252_v40, %v555_v29 }
 0x115   :  { %870 = vst.msk [vmem:[%s1577_s3 + $0x170] sm:$0xff] %vm823_vm0, %v805_v25  ;;  %v771_v30 = vsel %vm643_vm12, %v425_v16, %v707_v22  ;;  %v803_v31 = vsel %vm675_vm13, %v553_v17, %v739_v23  ;;  %v1007_v34 = vpop.f32.mrb[16].mxu0  ;;  %v1039_v35 = vpop.f32.mrb[16].mxu1  ;;  %vm646_vm14 = vcmp.ge.f32.partialorder %v436_v26, 0.0  ;;  %v710_v36 = vmul.f32 0.2, %v436_v26 }
 0x116   :  { %836 = vst.msk [vmem:[%s1577_s3 + $0x60] sm:$0xff] %vm823_vm0, %v771_v30  ;;  %868 = vst.msk [vmem:[%s1577_s3 + $0x160] sm:$0xff] %vm823_vm0, %v803_v31  ;;  %vm678_vm15 = vcmp.ge.f32.partialorder %v564_v27, 0.0  ;;  %v742_v37 = vmul.f32 0.2, %v564_v27  ;;  %vm644_vm1 = vcmp.ge.f32.partialorder %v428_v32, 0.0  ;;  %v449_v43 = vadd.f32 %v1007_v34, %v1252_v40 }
 0x117   :  { %v708_v38 = vmul.f32 0.2, %v428_v32  ;;  %vm676_vm2 = vcmp.ge.f32.partialorder %v556_v33, 0.0  ;;  %v740_v39 = vmul.f32 0.2, %v556_v33  ;;  %v774_v41 = vsel %vm646_vm14, %v436_v26, %v710_v36  ;;  %v440_v45 = vpop.f32.mrb[17].mxu0 }
 0x118   :  { %v806_v42 = vsel %vm678_vm15, %v564_v27, %v742_v37  ;;  %v577_v44 = vadd.f32 %v1039_v35, %v1252_v40  ;;  %v568_v46 = vpop.f32.mrb[17].mxu1  ;;  %839 = vst.msk [vmem:[%s1577_s3 + $0x78] sm:$0xff] %vm823_vm0, %v774_v41  ;;  %v441_v49 = vadd.f32 %v1252_v40, %v440_v45  ;;  %v1008_v51 = vpop.f32.mrb[18].mxu0  ;;  %vm649_vm3 = vcmp.ge.f32.partialorder %v449_v43, 0.0 }
 0x119   :  { %871 = vst.msk [vmem:[%s1577_s3 + $0x178] sm:$0xff] %vm823_vm0, %v806_v42  ;;  %v772_v47 = vsel %vm644_vm1, %v428_v32, %v708_v38  ;;  %v804_v48 = vsel %vm676_vm2, %v556_v33, %v740_v39  ;;  %v569_v50 = vadd.f32 %v1252_v40, %v568_v46  ;;  %v1040_v52 = vpop.f32.mrb[18].mxu1  ;;  %v713_v53 = vmul.f32 0.2, %v449_v43  ;;  %v443_v61 = vpop.f32.mrb[19].mxu0 }
 0x11a   :  { %837 = vst.msk [vmem:[%s1577_s3 + $0x68] sm:$0xff] %vm823_vm0, %v772_v47  ;;  %869 = vst.msk [vmem:[%s1577_s3 + $0x168] sm:$0xff] %vm823_vm0, %v804_v48  ;;  %vm681_vm4 = vcmp.ge.f32.partialorder %v577_v44, 0.0  ;;  %v745_v54 = vmul.f32 0.2, %v577_v44  ;;  %vm647_vm5 = vcmp.ge.f32.partialorder %v441_v49, 0.0  ;;  %v452_v59 = vadd.f32 %v1008_v51, %v1252_v40 }
 0x11b   :  { %v711_v55 = vmul.f32 0.2, %v441_v49  ;;  %vm679_vm6 = vcmp.ge.f32.partialorder %v569_v50, 0.0  ;;  %v743_v56 = vmul.f32 0.2, %v569_v50  ;;  %v777_v57 = vsel %vm649_vm3, %v449_v43, %v713_v53  ;;  %v571_v62 = vpop.f32.mrb[19].mxu1 }
 0x11c   :  { %v809_v58 = vsel %vm681_vm4, %v577_v44, %v745_v54  ;;  %v580_v60 = vadd.f32 %v1040_v52, %v1252_v40  ;;  %842 = vst.msk [vmem:[%s1577_s3 + $0x90] sm:$0xff] %vm823_vm0, %v777_v57  ;;  %v444_v1 = vadd.f32 %v1252_v40, %v443_v61  ;;  %v572_v2 = vadd.f32 %v1252_v40, %v571_v62 }
 0x11d   :  { %874 = vst.msk [vmem:[%s1577_s3 + $0x190] sm:$0xff] %vm823_vm0, %v809_v58  ;;  %v775_v63 = vsel %vm647_vm5, %v441_v49, %v711_v55  ;;  %v807_v0 = vsel %vm679_vm6, %v569_v50, %v743_v56  ;;  %v1011_v3 = vpop.f32.mrb[20].mxu0  ;;  %v1043_v4 = vpop.f32.mrb[20].mxu1  ;;  %vm650_vm7 = vcmp.ge.f32.partialorder %v452_v59, 0.0  ;;  %v714_v5 = vmul.f32 0.2, %v452_v59 }
 0x11e   :  { %840 = vst.msk [vmem:[%s1577_s3 + $0x80] sm:$0xff] %vm823_vm0, %v775_v63  ;;  %872 = vst.msk [vmem:[%s1577_s3 + $0x180] sm:$0xff] %vm823_vm0, %v807_v0  ;;  %vm682_vm8 = vcmp.ge.f32.partialorder %v580_v60, 0.0  ;;  %v746_v6 = vmul.f32 0.2, %v580_v60  ;;  %vm648_vm9 = vcmp.ge.f32.partialorder %v444_v1, 0.0  ;;  %v465_v11 = vadd.f32 %v1011_v3, %v1252_v40 }
 0x11f   :  { %v712_v7 = vmul.f32 0.2, %v444_v1  ;;  %vm680_vm10 = vcmp.ge.f32.partialorder %v572_v2, 0.0  ;;  %v744_v8 = vmul.f32 0.2, %v572_v2  ;;  %v778_v9 = vsel %vm650_vm7, %v452_v59, %v714_v5  ;;  %v456_v13 = vpop.f32.mrb[21].mxu0 }
 0x120   :  { %v810_v10 = vsel %vm682_vm8, %v580_v60, %v746_v6  ;;  %v593_v12 = vadd.f32 %v1043_v4, %v1252_v40  ;;  %v584_v14 = vpop.f32.mrb[21].mxu1  ;;  %843 = vst.msk [vmem:[%s1577_s3 + $0x98] sm:$0xff] %vm823_vm0, %v778_v9  ;;  %v457_v17 = vadd.f32 %v1252_v40, %v456_v13  ;;  %v1012_v19 = vpop.f32.mrb[22].mxu0  ;;  %vm653_vm11 = vcmp.ge.f32.partialorder %v465_v11, 0.0 }
 0x121   :  { %875 = vst.msk [vmem:[%s1577_s3 + $0x198] sm:$0xff] %vm823_vm0, %v810_v10  ;;  %v776_v15 = vsel %vm648_vm9, %v444_v1, %v712_v7  ;;  %v808_v16 = vsel %vm680_vm10, %v572_v2, %v744_v8  ;;  %v585_v18 = vadd.f32 %v1252_v40, %v584_v14  ;;  %v1044_v20 = vpop.f32.mrb[22].mxu1  ;;  %v717_v21 = vmul.f32 0.2, %v465_v11  ;;  %v459_v29 = vpop.f32.mrb[23].mxu0 }
 0x122   :  { %841 = vst.msk [vmem:[%s1577_s3 + $0x88] sm:$0xff] %vm823_vm0, %v776_v15  ;;  %873 = vst.msk [vmem:[%s1577_s3 + $0x188] sm:$0xff] %vm823_vm0, %v808_v16  ;;  %vm685_vm12 = vcmp.ge.f32.partialorder %v593_v12, 0.0  ;;  %v749_v22 = vmul.f32 0.2, %v593_v12  ;;  %vm651_vm13 = vcmp.ge.f32.partialorder %v457_v17, 0.0  ;;  %v468_v27 = vadd.f32 %v1012_v19, %v1252_v40 }
 0x123   :  { %v715_v23 = vmul.f32 0.2, %v457_v17  ;;  %vm683_vm14 = vcmp.ge.f32.partialorder %v585_v18, 0.0  ;;  %v747_v24 = vmul.f32 0.2, %v585_v18  ;;  %v781_v25 = vsel %vm653_vm11, %v465_v11, %v717_v21  ;;  %v587_v30 = vpop.f32.mrb[23].mxu1 }
 0x124   :  { %v813_v26 = vsel %vm685_vm12, %v593_v12, %v749_v22  ;;  %v596_v28 = vadd.f32 %v1044_v20, %v1252_v40  ;;  %846 = vst.msk [vmem:[%s1577_s3 + $0xb0] sm:$0xff] %vm823_vm0, %v781_v25  ;;  %v460_v33 = vadd.f32 %v1252_v40, %v459_v29  ;;  %v588_v34 = vadd.f32 %v1252_v40, %v587_v30 }
 0x125   :  { %878 = vst.msk [vmem:[%s1577_s3 + $0x1b0] sm:$0xff] %vm823_vm0, %v813_v26  ;;  %v779_v31 = vsel %vm651_vm13, %v457_v17, %v715_v23  ;;  %v811_v32 = vsel %vm683_vm14, %v585_v18, %v747_v24  ;;  %v1015_v35 = vpop.f32.mrb[24].mxu0  ;;  %v1047_v36 = vpop.f32.mrb[24].mxu1  ;;  %vm654_vm15 = vcmp.ge.f32.partialorder %v468_v27, 0.0  ;;  %v718_v37 = vmul.f32 0.2, %v468_v27 }
 0x126   :  { %844 = vst.msk [vmem:[%s1577_s3 + $0xa0] sm:$0xff] %vm823_vm0, %v779_v31  ;;  %876 = vst.msk [vmem:[%s1577_s3 + $0x1a0] sm:$0xff] %vm823_vm0, %v811_v32  ;;  %vm686_vm1 = vcmp.ge.f32.partialorder %v596_v28, 0.0  ;;  %v750_v38 = vmul.f32 0.2, %v596_v28  ;;  %vm652_vm2 = vcmp.ge.f32.partialorder %v460_v33, 0.0  ;;  %v481_v44 = vadd.f32 %v1015_v35, %v1252_v40 }
 0x127   :  { %v716_v39 = vmul.f32 0.2, %v460_v33  ;;  %vm684_vm3 = vcmp.ge.f32.partialorder %v588_v34, 0.0  ;;  %v748_v41 = vmul.f32 0.2, %v588_v34  ;;  %v782_v42 = vsel %vm654_vm15, %v468_v27, %v718_v37  ;;  %v472_v46 = vpop.f32.mrb[25].mxu0 }
 0x128   :  { %v814_v43 = vsel %vm686_vm1, %v596_v28, %v750_v38  ;;  %v609_v45 = vadd.f32 %v1047_v36, %v1252_v40  ;;  %v600_v47 = vpop.f32.mrb[25].mxu1  ;;  %847 = vst.msk [vmem:[%s1577_s3 + $0xb8] sm:$0xff] %vm823_vm0, %v782_v42  ;;  %v473_v50 = vadd.f32 %v1252_v40, %v472_v46  ;;  %v1016_v52 = vpop.f32.mrb[26].mxu0  ;;  %vm657_vm4 = vcmp.ge.f32.partialorder %v481_v44, 0.0 }
 0x129   :  { %879 = vst.msk [vmem:[%s1577_s3 + $0x1b8] sm:$0xff] %vm823_vm0, %v814_v43  ;;  %v780_v48 = vsel %vm652_vm2, %v460_v33, %v716_v39  ;;  %v812_v49 = vsel %vm684_vm3, %v588_v34, %v748_v41  ;;  %v601_v51 = vadd.f32 %v1252_v40, %v600_v47  ;;  %v1048_v53 = vpop.f32.mrb[26].mxu1  ;;  %v721_v54 = vmul.f32 0.2, %v481_v44  ;;  %v475_v62 = vpop.f32.mrb[27].mxu0 }
 0x12a   :  { %845 = vst.msk [vmem:[%s1577_s3 + $0xa8] sm:$0xff] %vm823_vm0, %v780_v48  ;;  %877 = vst.msk [vmem:[%s1577_s3 + $0x1a8] sm:$0xff] %vm823_vm0, %v812_v49  ;;  %vm689_vm5 = vcmp.ge.f32.partialorder %v609_v45, 0.0  ;;  %v753_v55 = vmul.f32 0.2, %v609_v45  ;;  %vm655_vm6 = vcmp.ge.f32.partialorder %v473_v50, 0.0  ;;  %v484_v60 = vadd.f32 %v1016_v52, %v1252_v40 }
 0x12b   :  { %v719_v56 = vmul.f32 0.2, %v473_v50  ;;  %vm687_vm7 = vcmp.ge.f32.partialorder %v601_v51, 0.0  ;;  %v751_v57 = vmul.f32 0.2, %v601_v51  ;;  %v785_v58 = vsel %vm657_vm4, %v481_v44, %v721_v54  ;;  %v603_v63 = vpop.f32.mrb[27].mxu1 }
 0x12c   :  { %v817_v59 = vsel %vm689_vm5, %v609_v45, %v753_v55  ;;  %v612_v61 = vadd.f32 %v1048_v53, %v1252_v40  ;;  %850 = vst.msk [vmem:[%s1577_s3 + $0xd0] sm:$0xff] %vm823_vm0, %v785_v58  ;;  %v476_v2 = vadd.f32 %v1252_v40, %v475_v62  ;;  %v604_v3 = vadd.f32 %v1252_v40, %v603_v63 }
 0x12d   :  { %882 = vst.msk [vmem:[%s1577_s3 + $0x1d0] sm:$0xff] %vm823_vm0, %v817_v59  ;;  %v783_v0 = vsel %vm655_vm6, %v473_v50, %v719_v56  ;;  %v815_v1 = vsel %vm687_vm7, %v601_v51, %v751_v57  ;;  %v1019_v4 = vpop.f32.mrb[28].mxu0  ;;  %v1051_v5 = vpop.f32.mrb[28].mxu1  ;;  %vm658_vm8 = vcmp.ge.f32.partialorder %v484_v60, 0.0  ;;  %v722_v6 = vmul.f32 0.2, %v484_v60 }
 0x12e   :  { %848 = vst.msk [vmem:[%s1577_s3 + $0xc0] sm:$0xff] %vm823_vm0, %v783_v0  ;;  %880 = vst.msk [vmem:[%s1577_s3 + $0x1c0] sm:$0xff] %vm823_vm0, %v815_v1  ;;  %vm690_vm9 = vcmp.ge.f32.partialorder %v612_v61, 0.0  ;;  %v754_v7 = vmul.f32 0.2, %v612_v61  ;;  %vm656_vm10 = vcmp.ge.f32.partialorder %v476_v2, 0.0  ;;  %v497_v12 = vadd.f32 %v1019_v4, %v1252_v40 }
 0x12f   :  { %v720_v8 = vmul.f32 0.2, %v476_v2  ;;  %vm688_vm11 = vcmp.ge.f32.partialorder %v604_v3, 0.0  ;;  %v752_v9 = vmul.f32 0.2, %v604_v3  ;;  %v786_v10 = vsel %vm658_vm8, %v484_v60, %v722_v6  ;;  %v488_v14 = vpop.f32.mrb[29].mxu0 }
 0x130   :  { %v818_v11 = vsel %vm690_vm9, %v612_v61, %v754_v7  ;;  %v625_v13 = vadd.f32 %v1051_v5, %v1252_v40  ;;  %v616_v15 = vpop.f32.mrb[29].mxu1  ;;  %851 = vst.msk [vmem:[%s1577_s3 + $0xd8] sm:$0xff] %vm823_vm0, %v786_v10  ;;  %v489_v18 = vadd.f32 %v1252_v40, %v488_v14  ;;  %v1020_v20 = vpop.f32.mrb[30].mxu0  ;;  %vm661_vm12 = vcmp.ge.f32.partialorder %v497_v12, 0.0 }
 0x131   :  { %883 = vst.msk [vmem:[%s1577_s3 + $0x1d8] sm:$0xff] %vm823_vm0, %v818_v11  ;;  %v784_v16 = vsel %vm656_vm10, %v476_v2, %v720_v8  ;;  %v816_v17 = vsel %vm688_vm11, %v604_v3, %v752_v9  ;;  %v617_v19 = vadd.f32 %v1252_v40, %v616_v15  ;;  %v1052_v21 = vpop.f32.mrb[30].mxu1  ;;  %v725_v22 = vmul.f32 0.2, %v497_v12  ;;  %v491_v30 = vpop.f32.mrb[31].mxu0 }
 0x132   :  { %849 = vst.msk [vmem:[%s1577_s3 + $0xc8] sm:$0xff] %vm823_vm0, %v784_v16  ;;  %881 = vst.msk [vmem:[%s1577_s3 + $0x1c8] sm:$0xff] %vm823_vm0, %v816_v17  ;;  %vm693_vm13 = vcmp.ge.f32.partialorder %v625_v13, 0.0  ;;  %v757_v23 = vmul.f32 0.2, %v625_v13  ;;  %vm659_vm14 = vcmp.ge.f32.partialorder %v489_v18, 0.0  ;;  %v500_v28 = vadd.f32 %v1020_v20, %v1252_v40 }
 0x133   :  { %v723_v24 = vmul.f32 0.2, %v489_v18  ;;  %vm691_vm15 = vcmp.ge.f32.partialorder %v617_v19, 0.0  ;;  %v755_v25 = vmul.f32 0.2, %v617_v19  ;;  %v789_v26 = vsel %vm661_vm12, %v497_v12, %v725_v22  ;;  %v619_v31 = vpop.f32.mrb[31].mxu1 }
 0x134   :  { %v821_v27 = vsel %vm693_vm13, %v625_v13, %v757_v23  ;;  %v628_v29 = vadd.f32 %v1052_v21, %v1252_v40  ;;  %854 = vst.msk [vmem:[%s1577_s3 + $0xf0] sm:$0xff] %vm823_vm0, %v789_v26  ;;  %v492_v34 = vadd.f32 %v1252_v40, %v491_v30  ;;  %v620_v35 = vadd.f32 %v1252_v40, %v619_v31 }
 0x135   :  { %886 = vst.msk [vmem:[%s1577_s3 + $0x1f0] sm:$0xff] %vm823_vm0, %v821_v27  ;;  %v787_v32 = vsel %vm659_vm14, %v489_v18, %v723_v24  ;;  %v819_v33 = vsel %vm691_vm15, %v617_v19, %v755_v25  ;;  %vm662_vm1 = vcmp.ge.f32.partialorder %v500_v28, 0.0  ;;  %v726_v36 = vmul.f32 0.2, %v500_v28 }
 0x136   :  { %852 = vst.msk [vmem:[%s1577_s3 + $0xe0] sm:$0xff] %vm823_vm0, %v787_v32  ;;  %884 = vst.msk [vmem:[%s1577_s3 + $0x1e0] sm:$0xff] %vm823_vm0, %v819_v33  ;;  %vm694_vm2 = vcmp.ge.f32.partialorder %v628_v29, 0.0  ;;  %v758_v37 = vmul.f32 0.2, %v628_v29  ;;  %vm660_vm3 = vcmp.ge.f32.partialorder %v492_v34, 0.0 }
 0x137   :  { %v724_v38 = vmul.f32 0.2, %v492_v34  ;;  %vm692_vm4 = vcmp.ge.f32.partialorder %v620_v35, 0.0  ;;  %v756_v39 = vmul.f32 0.2, %v620_v35  ;;  %v790_v41 = vsel %vm662_vm1, %v500_v28, %v726_v36 }
 0x138   :  { %v822_v40 = vsel %vm694_vm2, %v628_v29, %v758_v37  ;;  %855 = vst.msk [vmem:[%s1577_s3 + $0xf8] sm:$0xff] %vm823_vm0, %v790_v41 }
 0x139   :  { %887 = vst.msk [vmem:[%s1577_s3 + $0x1f8] sm:$0xff] %vm823_vm0, %v822_v40  ;;  %v788_v42 = vsel %vm660_vm3, %v492_v34, %v724_v38  ;;  %v820_v43 = vsel %vm692_vm4, %v620_v35, %v756_v39 }
 0x13a   :  { %853 = vst.msk [vmem:[%s1577_s3 + $0xe8] sm:$0xff] %vm823_vm0, %v788_v42  ;;  %885 = vst.msk [vmem:[%s1577_s3 + $0x1e8] sm:$0xff] %vm823_vm0, %v820_v43 }

// kernel: feature_matching_forward.11
= control target key start
LH: loop header
LB: loop body
LE: loop exit
PB: predicated region body
PF: predicated region fallthrough
CT: control target
= control target key end

     0   :  { %s5630_s18 = smov 0   ;;  %s5632_s19 = smov 0   ;;  %s6183_s0 = inlined_call_operand.vmem [shape: bf16[2,18,16,64], index: 0, kind: input, shape index: {}]   ;;  %s6184_s1 = inlined_call_operand.vmem [shape: bf16[2,18,16,64], index: 1, kind: input, shape index: {}]   ;;  %s6185_s2 = inlined_call_operand.vmem [shape: bf16[2,18,16,64], index: 2, kind: input, shape index: {}]   ;;  %s6186_s3 = inlined_call_operand.vmem [shape: bf16[3,3,64,128], index: 3, kind: input, shape index: {}]   ;;  %s6187_s4 = inlined_call_operand.vmem [shape: f32[1,128], index: 4, kind: input, shape index: {}]   ;;  %s6188_s5 = inlined_call_operand.vmem [shape: f32[2,16,16,128], index: 5, kind: output, shape index: {}]  }
   0x1   :  { %s5634_s20 = smov 0  }
   0x2 LB: > { %s27_s21 = sadd.s32 1, %s5594_s19  ;;  %p3973_p0 = scmp.ge.s32.totalorder %s5598_s20, 1  ;;  %s5598_s20 = sphi %s5634_s20, %s15_s20   ;;  %s5594_s19 = sphi %s5632_s19, %s6190_s19   ;;  %s5590_s18 = sphi %s5630_s18, %s6189_s18  }
   0x3   : > { %p29_p1 = scmp.ge.s32.totalorder %s27_s21, 2  ;;  %p221_p2 = scmp.lt.s32.totalorder %s5598_s20, 3 }
   0x5   : > { %s6192_s21 = smov (%p29_p1, %s27_s21), 0  ;;  %p222_p3 = pnand %p3973_p0, %p221_p2 }
   0x6   : > { %v5392_v0 = vld [vmem:[%s6186_s3 + $0x20] sm:$0xff] (!%p222_p3)   ;;  %p264_p4 = scmp.lt.s32.totalorder (!%p222_p3), %s5590_s18, 1  ;;  %v5394_v2 = vld [vmem:[%s6186_s3 + $0x28] sm:$0xff] (!%p222_p3)   ;;  %v5396_v4 = vld [vmem:[%s6186_s3 + $0x30] sm:$0xff] (!%p222_p3)   ;;  %vm482_vm0 = vcmask (!%p222_p3), 523264  }
   0x7   : > { %225 = sbr.rel (%p222_p3) target bundleno = 526 (0x20e), region = 40  ;;  %v5393_v1 = vld [vmem:[%s6186_s3 + $0x80] sm:$0xff] (!%p222_p3)   ;;  %4743 = vmatprep.subr.bf16.mxu1 (!%p222_p3), %v5392_v0  ;;  %v5395_v3 = vld [vmem:[%s6186_s3 + $0x88] sm:$0xff] (!%p222_p3)   ;;  %v5397_v5 = vld [vmem:[%s6186_s3 + $0x90] sm:$0xff] (!%p222_p3)  }
   0x8   : > { %4903 = vmatprep.subr.bf16.mxu0 (!%p222_p3), %v5393_v1  ;;  %4744 = vmatpush3.bf16.msra.mxu1 (!%p222_p3), %v5392_v0  ;;  %v5398_v6 = vld [vmem:[%s6186_s3 + $0x38] sm:$0xff] (!%p222_p3)   ;;  %v5403_v10 = vld [vmem:[%s6186_s3] sm:$0xff] (!%p222_p3)   ;;  %v5410_v16 = vld [vmem:[%s6186_s3 + $0xa8] sm:$0xff] (!%p222_p3)  }
   0x9   : > { %4904 = vmatpush3.bf16.msra.mxu0 (!%p222_p3), %v5393_v1  ;;  %4745 = vmatprep.subr.bf16.mxu1 (!%p222_p3), %v5394_v2  ;;  %v5399_v7 = vld [vmem:[%s6186_s3 + $0x98] sm:$0xff] (!%p222_p3)   ;;  %v5405_v11 = vld [vmem:[%s6186_s3 + $0xa0] sm:$0xff] (!%p222_p3)   ;;  %v5414_v20 = vld [vmem:[%s6186_s3 + $0x8] sm:$0xff] (!%p222_p3)  }
   0xa   : > { %4905 = vmatprep.subr.bf16.mxu0 (!%p222_p3), %v5395_v3  ;;  %v5416_v22 = vld [vmem:[%s6186_s3 + $0xb0] sm:$0xff] (!%p222_p3)   ;;  %v5421_v24 = vld [vmem:[%s6186_s3 + $0xb8] sm:$0xff] (!%p222_p3)   ;;  %v5427_v29 = vld [vmem:[%s6186_s3 + $0xc0] sm:$0xff] (!%p222_p3)  }
   0xb   : > { %v5425_v28 = vld [vmem:[%s6186_s3 + $0x10] sm:$0xff] (!%p222_p3)   ;;  %v5435_v34 = vld [vmem:[%s6186_s3 + $0x18] sm:$0xff] (!%p222_p3)   ;;  %v5437_v39 = vld [vmem:[%s6186_s3 + $0xc8] sm:$0xff] (!%p222_p3)  }
   0xc   : > { %4746 = vmatpush3.bf16.msra.mxu1 (!%p222_p3), %v5394_v2  ;;  %v5445_v42 = vld [vmem:[%s6186_s3 + $0x40] sm:$0xff] (!%p222_p3)   ;;  %v5447_v44 = vld [vmem:[%s6186_s3 + $0xd0] sm:$0xff] (!%p222_p3)   ;;  %v5457_v50 = vld [vmem:[%s6186_s3 + $0xd8] sm:$0xff] (!%p222_p3)  }
   0xd   : > { %4906 = vmatpush3.bf16.msra.mxu0 (!%p222_p3), %v5395_v3  ;;  %4747 = vmatprep.subr.bf16.mxu1 (!%p222_p3), %v5396_v4  ;;  %v5467_v55 = vld [vmem:[%s6186_s3 + $0xe0] sm:$0xff] (!%p222_p3)   ;;  %v5455_v60 = vld [vmem:[%s6186_s3 + $0x48] sm:$0xff] (!%p222_p3)   ;;  %v5465_v61 = vld [vmem:[%s6186_s3 + $0x50] sm:$0xff] (!%p222_p3)  }
   0xe   : > { %s6194_s18 = smov (!%p264_p4, %s5590_s18), 1  ;;  %4907 = vmatprep.subr.bf16.mxu0 %v5397_v5  ;;  %v5475_v2 = vld [vmem:[%s6186_s3 + $0x58] sm:$0xff]  }
   0xf   : > { %s5666_s7 = smul.u32 144, %s6194_s18 }
  0x10   : > { %4748 = vmatpush3.bf16.msra.mxu1 %v5396_v4  ;;  %v5834_v4 = vld [vmem:[%s6186_s3 + $0x60] sm:$0xff]  }
  0x11   : > { %s5678_s14 = scalar_lea.vmem %s6184_s1, %s5666_s7  ;;  %4908 = vmatpush3.bf16.msra.mxu0 %v5397_v5  ;;  %4749 = vmatprep.subr.bf16.mxu1 %v5398_v6  ;;  %s5727_s11 = scalar_lea.vmem %s6185_s2, %s5666_s7 }
  0x12   : > { %v5400_v8 = vld [vmem:[%s5678_s14] sm:$0xff]   ;;  %v5401_v9 = vld [vmem:[%s5678_s14 + $0x8] sm:$0xff]   ;;  %4909 = vmatprep.subr.bf16.mxu0 %v5399_v7  ;;  %v5404_v13 = vld [vmem:[%s5678_s14 + $0x10] sm:$0xff]   ;;  %s5763_s27 = scalar_lea.vmem %s6183_s0, %s5666_s7 }
  0x13   : > { %4751 = vmatprep.mubr.msk.bf16.mxu1 %vm482_vm0, %v5400_v8  ;;  %4911 = vmatprep.mubr.msk.bf16.mxu0 %vm482_vm0, %v5401_v9  ;;  %v5402_v12 = vld [vmem:[%s5678_s14 + $0x8] sm:$0xff]   ;;  %v5406_v14 = vld [vmem:[%s5678_s14 + $0x10] sm:$0xff]   ;;  %v5407_v15 = vld [vmem:[%s5678_s14 + $0x18] sm:$0xff]  }
  0x14   : > { %4750 = vmatpush3.bf16.msra.mxu1 %v5398_v6  ;;  %v5408_v17 = vld [vmem:[%s5678_s14 + $0x18] sm:$0xff]   ;;  %v5409_v18 = vld [vmem:[%s5678_s14 + $0x20] sm:$0xff]   ;;  %v5412_v21 = vld [vmem:[%s5678_s14 + $0x28] sm:$0xff]  }
  0x15   : > { %4910 = vmatpush3.bf16.msra.mxu0 %v5399_v7  ;;  %4783 = vmatprep.subr.bf16.mxu1 %v5403_v10  ;;  %v5411_v19 = vld [vmem:[%s5678_s14 + $0x20] sm:$0xff]   ;;  %v5413_v23 = vld [vmem:[%s5678_s14 + $0x28] sm:$0xff]   ;;  %v5415_v25 = vld [vmem:[%s5678_s14 + $0x30] sm:$0xff]  }
  0x16   : > { %4943 = vmatprep.subr.bf16.mxu0 %v5405_v11  ;;  %v5417_v26 = vld [vmem:[%s5678_s14 + $0x30] sm:$0xff]   ;;  %v5418_v27 = vld [vmem:[%s5678_s14 + $0x38] sm:$0xff]   ;;  %v5420_v31 = vld [vmem:[%s5678_s14 + $0x40] sm:$0xff]  }
  0x17   : > { %4752 = vmatmul.mubr.msk.bf16.vlgmr.msra.gmra.mrb[0].mxu1 %vm482_vm0, %v5402_v12  ;;  %v5419_v30 = vld [vmem:[%s5678_s14 + $0x38] sm:$0xff]   ;;  %v5422_v32 = vld [vmem:[%s5678_s14 + $0x40] sm:$0xff]   ;;  %v5423_v33 = vld [vmem:[%s5727_s11 + $0x8] sm:$0xff]  }
  0x18   : > { %4912 = vmatmul.mubr.msk.bf16.vlgmr.msra.gmra.mrb[0].mxu0 %vm482_vm0, %v5404_v13  ;;  %4784 = vmatpush3.bf16.msra.mxu1 %v5403_v10  ;;  %v5424_v35 = vld [vmem:[%s5678_s14 + $0x48] sm:$0xff]   ;;  %v5426_v36 = vld [vmem:[%s5727_s11 + $0x10] sm:$0xff]   ;;  %v5429_v38 = vld [vmem:[%s5727_s11 + $0x18] sm:$0xff]  }
  0x19   : > { %4944 = vmatpush3.bf16.msra.mxu0 %v5405_v11  ;;  %4755 = vmatprep.mubr.msk.bf16.mxu1 %vm482_vm0, %v5406_v14  ;;  %v5428_v37 = vld [vmem:[%s5678_s14 + $0x50] sm:$0xff]   ;;  %v5430_v40 = vld [vmem:[%s5678_s14 + $0x58] sm:$0xff]   ;;  %v5431_v41 = vld [vmem:[%s5727_s11 + $0x20] sm:$0xff]  }
  0x1a   : > { %4915 = vmatprep.mubr.msk.bf16.mxu0 %vm482_vm0, %v5407_v15  ;;  %4945 = vmatprep.subr.bf16.mxu0 %v5410_v16  ;;  %v5432_v43 = vld [vmem:[%s5678_s14 + $0x60] sm:$0xff]   ;;  %v5433_v45 = vld [vmem:[%s5727_s11 + $0x28] sm:$0xff]   ;;  %v5436_v47 = vld [vmem:[%s5727_s11 + $0x30] sm:$0xff]  }
  0x1b   : > { %4785 = vmatprep.subr.bf16.mxu1 %v5414_v20  ;;  %v5434_v46 = vld [vmem:[%s5678_s14 + $0x68] sm:$0xff]   ;;  %v5438_v48 = vld [vmem:[%s5678_s14 + $0x70] sm:$0xff]   ;;  %v5439_v49 = vld [vmem:[%s5727_s11 + $0x38] sm:$0xff]  }
  0x1c   : > { %4786 = vmatpush3.bf16.msra.mxu1 %v5414_v20  ;;  %v5440_v51 = vld [vmem:[%s5678_s14 + $0x78] sm:$0xff]   ;;  %v5441_v52 = vld [vmem:[%s5727_s11 + $0x40] sm:$0xff]   ;;  %v5443_v54 = vld [vmem:[%s5727_s11 + $0x48] sm:$0xff]  }
  0x1d   : > { %4946 = vmatpush3.bf16.msra.mxu0 %v5410_v16  ;;  %4787 = vmatprep.subr.bf16.mxu1 %v5425_v28  ;;  %v5442_v53 = vld [vmem:[%s5763_s27] sm:$0xff]   ;;  %v5444_v56 = vld [vmem:[%s5763_s27 + $0x8] sm:$0xff]   ;;  %v5446_v57 = vld [vmem:[%s5727_s11 + $0x50] sm:$0xff]  }
  0x1e   : > { %4947 = vmatprep.subr.bf16.mxu0 %v5416_v22  ;;  %v5448_v58 = vld [vmem:[%s5763_s27 + $0x10] sm:$0xff]   ;;  %v5449_v59 = vld [vmem:[%s5727_s11 + $0x58] sm:$0xff]   ;;  %v5451_v63 = vld [vmem:[%s5727_s11 + $0x60] sm:$0xff]  }
  0x1f   : > { %4756 = vmatmul.mubr.msk.bf16.gmra.mrb[4].mxu1 %vm482_vm0, %v5408_v17  ;;  %v5450_v62 = vld [vmem:[%s5763_s27 + $0x18] sm:$0xff]   ;;  %v5452_v0 = vld [vmem:[%s5763_s27 + $0x20] sm:$0xff]   ;;  %v5453_v1 = vld [vmem:[%s5727_s11 + $0x68] sm:$0xff]  }
  0x20   : > { %4916 = vmatmul.mubr.msk.bf16.gmra.mrb[4].mxu0 %vm482_vm0, %v5409_v18  ;;  %4759 = vmatprep.mubr.msk.bf16.mxu1 %vm482_vm0, %v5411_v19  ;;  %v5454_v3 = vld [vmem:[%s5763_s27 + $0x28] sm:$0xff]   ;;  %v5456_v5 = vld [vmem:[%s5727_s11 + $0x70] sm:$0xff]   ;;  %v5459_v7 = vld [vmem:[%s5727_s11 + $0x78] sm:$0xff]  }
  0x21   : > { %4919 = vmatprep.mubr.msk.bf16.mxu0 %vm482_vm0, %v5412_v21  ;;  %4948 = vmatpush3.bf16.msra.mxu0 %v5416_v22  ;;  %v5458_v6 = vld [vmem:[%s5763_s27 + $0x30] sm:$0xff]   ;;  %v5460_v8 = vld [vmem:[%s5763_s27 + $0x38] sm:$0xff]   ;;  %v5461_v9 = vld [vmem:[%s5727_s11 + $0x80] sm:$0xff]  }
  0x22   : > { %4949 = vmatprep.subr.bf16.mxu0 %v5421_v24  ;;  %4788 = vmatpush3.bf16.msra.mxu1 %v5425_v28  ;;  %v5462_v10 = vld [vmem:[%s5763_s27 + $0x40] sm:$0xff]   ;;  %v5463_v11 = vld [vmem:[%s5763_s27 + $0x10] sm:$0xff]   ;;  %v5464_v12 = vld [vmem:[%s5763_s27 + $0x48] sm:$0xff]  }
  0x23   : > { %4789 = vmatprep.subr.bf16.mxu1 %v5435_v34  ;;  %v5466_v13 = vld [vmem:[%s5763_s27 + $0x18] sm:$0xff]   ;;  %v5468_v14 = vld [vmem:[%s5763_s27 + $0x50] sm:$0xff]   ;;  %v5469_v15 = vld [vmem:[%s5763_s27 + $0x20] sm:$0xff]  }
  0x24   : > { %v5477_v16 = vld [vmem:[%s6186_s3 + $0xe8] sm:$0xff]   ;;  %v5470_v17 = vld [vmem:[%s5763_s27 + $0x58] sm:$0xff]   ;;  %v5487_v18 = vld [vmem:[%s6186_s3 + $0xf0] sm:$0xff]  }
  0x25   : > { %4950 = vmatpush3.bf16.msra.mxu0 %v5421_v24  ;;  %v5471_v19 = vld [vmem:[%s5763_s27 + $0x28] sm:$0xff]   ;;  %v5472_v20 = vld [vmem:[%s5763_s27 + $0x60] sm:$0xff]   ;;  %v5473_v21 = vld [vmem:[%s5763_s27 + $0x30] sm:$0xff]  }
  0x26   : > { %4983 = vmatprep.subr.bf16.mxu0 %v5427_v29  ;;  %4790 = vmatpush3.bf16.msra.mxu1 %v5435_v34  ;;  %v5497_v22 = vld [vmem:[%s6186_s3 + $0xf8] sm:$0xff]   ;;  %v5881_v24 = vld [vmem:[%s6186_s3 + $0x100] sm:$0xff]   ;;  %v5488_v34 = vld [vmem:[%s5727_s11 + $0x10] sm:$0xff]  }
  0x27   : > { %4760 = vmatmul.mubr.msk.bf16.gmra.mrb[8].mxu1 %vm482_vm0, %v5413_v23  ;;  %4823 = vmatprep.subr.bf16.mxu1 %v5445_v42  ;;  %v5474_v23 = vld [vmem:[%s5763_s27 + $0x68] sm:$0xff]   ;;  %v5480_v28 = vld [vmem:[%s5763_s27 + $0x78] sm:$0xff]  }
  0x28   : > { %4920 = vmatmul.mubr.msk.bf16.gmra.mrb[8].mxu0 %vm482_vm0, %v5415_v25  ;;  %4763 = vmatprep.mubr.msk.bf16.mxu1 %vm482_vm0, %v5417_v26  ;;  %v5476_v25 = vld [vmem:[%s5763_s27 + $0x38] sm:$0xff]   ;;  %v5478_v26 = vld [vmem:[%s5763_s27 + $0x70] sm:$0xff]  }
  0x29   : > { %4923 = vmatprep.mubr.msk.bf16.mxu0 %vm482_vm0, %v5418_v27  ;;  %v5479_v27 = vld [vmem:[%s5763_s27 + $0x40] sm:$0xff]  }
  0x2f   : > { %4764 = vmatmul.mubr.msk.bf16.gmra.mrb[12].mxu1 %vm482_vm0, %v5419_v30  ;;  %v5482_v30 = vld [vmem:[%s5727_s11] sm:$0xff]  }
  0x30   : > { %4924 = vmatmul.mubr.msk.bf16.gmra.mrb[12].mxu0 %vm482_vm0, %v5420_v31  ;;  %4767 = vmatprep.mubr.msk.bf16.mxu1 %vm482_vm0, %v5422_v32  ;;  %v5483_v31 = vld [vmem:[%s5763_s27 + $0x50] sm:$0xff]   ;;  %v5484_v32 = vld [vmem:[%s5727_s11 + $0x8] sm:$0xff]  }
  0x31   : > { %4951 = vmatprep.mubr.msk.bf16.mxu0 %vm482_vm0, %v5423_v33  ;;  %v5486_v33 = vld [vmem:[%s5763_s27 + $0x58] sm:$0xff]  }
  0x37   : > { %4768 = vmatmul.mubr.msk.bf16.gmra.mrb[16].mxu1 %vm482_vm0, %v5424_v35  ;;  %v5489_v35 = vld [vmem:[%s5763_s27 + $0x60] sm:$0xff]  }
  0x38   : > { %4952 = vmatmul.mubr.msk.bf16.vlgmr.msra.gmra.mrb[0].mxu0 %vm482_vm0, %v5426_v36  ;;  %4771 = vmatprep.mubr.msk.bf16.mxu1 %vm482_vm0, %v5428_v37  ;;  %v5495_v36 = vld [vmem:[%s6186_s3 + $0x68] sm:$0xff]   ;;  %v5505_v37 = vld [vmem:[%s6186_s3 + $0x70] sm:$0xff]  }
  0x39   : > { %4984 = vmatpush3.bf16.msra.mxu0 %v5427_v29  ;;  %4955 = vmatprep.mubr.msk.bf16.mxu0 %vm482_vm0, %v5429_v38  ;;  %v5481_v29 = vld [vmem:[%s5763_s27 + $0x48] sm:$0xff]   ;;  %v5490_v38 = vld [vmem:[%s5727_s11 + $0x18] sm:$0xff]  }
  0x3a   : > { %4985 = vmatprep.subr.bf16.mxu0 %v5437_v39 }
  0x3d   : > { %4986 = vmatpush3.bf16.msra.mxu0 %v5437_v39  ;;  %v5491_v39 = vld [vmem:[%s5763_s27 + $0x68] sm:$0xff]  }
  0x3e   : > { %4987 = vmatprep.subr.bf16.mxu0 %v5447_v44 }
  0x3f   : > { %4772 = vmatmul.mubr.msk.bf16.gmra.mrb[20].mxu1 %vm482_vm0, %v5430_v40  ;;  %v5492_v40 = vld [vmem:[%s5727_s11 + $0x20] sm:$0xff]  }
  0x40   : > { %4956 = vmatmul.mubr.msk.bf16.gmra.mrb[4].mxu0 %vm482_vm0, %v5431_v41  ;;  %4775 = vmatprep.mubr.msk.bf16.mxu1 %vm482_vm0, %v5432_v43  ;;  %v5493_v41 = vld [vmem:[%s5763_s27 + $0x70] sm:$0xff]   ;;  %v5494_v43 = vld [vmem:[%s5727_s11 + $0x28] sm:$0xff]  }
  0x41   : > { %4959 = vmatprep.mubr.msk.bf16.mxu0 %vm482_vm0, %v5433_v45  ;;  %4988 = vmatpush3.bf16.msra.mxu0 %v5447_v44  ;;  %v5496_v44 = vld [vmem:[%s5763_s27 + $0x78] sm:$0xff]   ;;  %v5498_v45 = vld [vmem:[%s5727_s11 + $0x30] sm:$0xff]  }
  0x42   : > { %4989 = vmatprep.subr.bf16.mxu0 %v5457_v50 }
  0x45   : > { %4990 = vmatpush3.bf16.msra.mxu0 %v5457_v50  ;;  %v5502_v50 = vld [vmem:[%s5727_s11 + $0x40] sm:$0xff]  }
  0x46   : > { %5023 = vmatprep.subr.bf16.mxu0 %v5467_v55 }
  0x47   : > { %4776 = vmatmul.mubr.msk.bf16.gmra.mrb[24].mxu1 %vm482_vm0, %v5434_v46  ;;  %v5499_v46 = vld [vmem:[%s5763_s27 + $0x80] sm:$0xff]  }
  0x48   : > { %4960 = vmatmul.mubr.msk.bf16.gmra.mrb[8].mxu0 %vm482_vm0, %v5436_v47  ;;  %4779 = vmatprep.mubr.msk.bf16.mxu1 %vm482_vm0, %v5438_v48  ;;  %v5572_v47 = vld [vmem:[%s6186_s3 + $0x80] sm:$0xff]   ;;  %v5500_v48 = vld [vmem:[%s5727_s11 + $0x38] sm:$0xff]  }
  0x49   : > { %4963 = vmatprep.mubr.msk.bf16.mxu0 %vm482_vm0, %v5439_v49  ;;  %v5501_v49 = vld [vmem:[%s5763_s27 + $0x88] sm:$0xff]  }
  0x4f   : > { %4780 = vmatmul.mubr.msk.bf16.gmra.mrb[28].mxu1 %vm482_vm0, %v5440_v51  ;;  %v5503_v51 = vld [vmem:[%s5678_s14 + $0x10] sm:$0xff]  }
  0x50   : > { %4964 = vmatmul.mubr.msk.bf16.gmra.mrb[12].mxu0 %vm482_vm0, %v5441_v52  ;;  %4791 = vmatprep.mubr.msk.bf16.mxu1 %vm482_vm0, %v5442_v53  ;;  %v5504_v52 = vld [vmem:[%s5727_s11 + $0x48] sm:$0xff]   ;;  %v5506_v53 = vld [vmem:[%s5678_s14 + $0x18] sm:$0xff]  }
  0x51   : > { %4967 = vmatprep.mubr.msk.bf16.mxu0 %vm482_vm0, %v5443_v54  ;;  %v5508_v54 = vld [vmem:[%s5727_s11 + $0x50] sm:$0xff]  }
  0x57   : > { %4792 = vmatmul.mubr.msk.bf16.vlgmr.msra.gmra.mrb[0].mxu1 %vm482_vm0, %v5444_v56  ;;  %v5517_v56 = vld [vmem:[%s6186_s3 + $0x108] sm:$0xff]  }
  0x58   : > { %4968 = vmatmul.mubr.msk.bf16.gmra.mrb[16].mxu0 %vm482_vm0, %v5446_v57  ;;  %4824 = vmatpush3.bf16.msra.mxu1 %v5445_v42  ;;  %v5515_v42 = vld [vmem:[%s6186_s3 + $0x78] sm:$0xff]   ;;  %v5526_v57 = vld [vmem:[%s6186_s3 + $0x110] sm:$0xff]  }
  0x59   : > { %4795 = vmatprep.mubr.msk.bf16.mxu1 %vm482_vm0, %v5448_v58  ;;  %4971 = vmatprep.mubr.msk.bf16.mxu0 %vm482_vm0, %v5449_v59  ;;  %v5510_v58 = vld [vmem:[%s5727_s11 + $0x58] sm:$0xff]   ;;  %v5511_v59 = vld [vmem:[%s5678_s14 + $0x28] sm:$0xff]  }
  0x5a   : > { %4825 = vmatprep.subr.bf16.mxu1 %v5455_v60 }
  0x5c   : > { %4826 = vmatpush3.bf16.msra.mxu1 %v5455_v60  ;;  %v5512_v60 = vld [vmem:[%s5727_s11 + $0x60] sm:$0xff]  }
  0x5d   : > { %4827 = vmatprep.subr.bf16.mxu1 %v5465_v61 }
  0x5f   : > { %4796 = vmatmul.mubr.msk.bf16.gmra.mrb[4].mxu1 %vm482_vm0, %v5450_v62  ;;  %v5535_v62 = vld [vmem:[%s6186_s3 + $0x118] sm:$0xff]  }
  0x60   : > { %4972 = vmatmul.mubr.msk.bf16.gmra.mrb[20].mxu0 %vm482_vm0, %v5451_v63  ;;  %4799 = vmatprep.mubr.msk.bf16.mxu1 %vm482_vm0, %v5452_v0  ;;  %v5514_v63 = vld [vmem:[%s5727_s11 + $0x68] sm:$0xff]   ;;  %v5516_v0 = vld [vmem:[%s5678_s14 + $0x38] sm:$0xff]  }
  0x61   : > { %4975 = vmatprep.mubr.msk.bf16.mxu0 %vm482_vm0, %v5453_v1  ;;  %4828 = vmatpush3.bf16.msra.mxu1 %v5465_v61  ;;  %v5513_v61 = vld [vmem:[%s5678_s14 + $0x30] sm:$0xff]  }
  0x62   : > { %4829 = vmatprep.subr.bf16.mxu1 %v5475_v2  ;;  %v5518_v1 = vld [vmem:[%s5727_s11 + $0x70] sm:$0xff]  }
  0x65   : > { %4830 = vmatpush3.bf16.msra.mxu1 %v5475_v2  ;;  %v5519_v2 = vld [vmem:[%s5678_s14 + $0x40] sm:$0xff]  }
  0x66   : > { %4863 = vmatprep.subr.bf16.mxu1 %v5834_v4 }
  0x67   : > { %4800 = vmatmul.mubr.msk.bf16.gmra.mrb[8].mxu1 %vm482_vm0, %v5454_v3  ;;  %v5520_v3 = vld [vmem:[%s5727_s11 + $0x78] sm:$0xff]  }
  0x68   : > { %4976 = vmatmul.mubr.msk.bf16.gmra.mrb[24].mxu0 %vm482_vm0, %v5456_v5  ;;  %4803 = vmatprep.mubr.msk.bf16.mxu1 %vm482_vm0, %v5458_v6  ;;  %v5522_v5 = vld [vmem:[%s5763_s27 + $0x8] sm:$0xff]   ;;  %v5523_v6 = vld [vmem:[%s5678_s14 + $0x50] sm:$0xff]  }
  0x69   : > { %4979 = vmatprep.mubr.msk.bf16.mxu0 %vm482_vm0, %v5459_v7  ;;  %v5524_v7 = vld [vmem:[%s5763_s27 + $0x10] sm:$0xff]  }
  0x6f   : > { %4804 = vmatmul.mubr.msk.bf16.gmra.mrb[12].mxu1 %vm482_vm0, %v5460_v8  ;;  %v5525_v8 = vld [vmem:[%s5678_s14 + $0x58] sm:$0xff]  }
  0x70   : > { %4980 = vmatmul.mubr.msk.bf16.gmra.mrb[28].mxu0 %vm482_vm0, %v5461_v9  ;;  %4807 = vmatprep.mubr.msk.bf16.mxu1 %vm482_vm0, %v5462_v10  ;;  %v5527_v9 = vld [vmem:[%s5763_s27 + $0x18] sm:$0xff]   ;;  %v5528_v10 = vld [vmem:[%s5678_s14 + $0x60] sm:$0xff]  }
  0x71   : > { %4991 = vmatprep.mubr.msk.bf16.mxu0 %vm482_vm0, %v5463_v11  ;;  %v5573_v11 = vld [vmem:[%s6186_s3 + $0x88] sm:$0xff]  }
  0x77   : > { %4808 = vmatmul.mubr.msk.bf16.gmra.mrb[16].mxu1 %vm482_vm0, %v5464_v12  ;;  %v5529_v12 = vld [vmem:[%s5763_s27 + $0x20] sm:$0xff]  }
  0x78   : > { %4992 = vmatmul.mubr.msk.bf16.vlgmr.msra.gmra.mrb[0].mxu0 %vm482_vm0, %v5466_v13  ;;  %4811 = vmatprep.mubr.msk.bf16.mxu1 %vm482_vm0, %v5468_v14  ;;  %v5530_v13 = vld [vmem:[%s5678_s14 + $0x68] sm:$0xff]  }
  0x79   : > { %5024 = vmatpush3.bf16.msra.mxu0 %v5467_v55  ;;  %4995 = vmatprep.mubr.msk.bf16.mxu0 %vm482_vm0, %v5469_v15  ;;  %v5509_v55 = vld [vmem:[%s5678_s14 + $0x20] sm:$0xff]   ;;  %v5531_v14 = vld [vmem:[%s5763_s27 + $0x28] sm:$0xff]   ;;  %v5532_v15 = vld [vmem:[%s5678_s14 + $0x70] sm:$0xff]  }
  0x7a   : > { %5025 = vmatprep.subr.bf16.mxu0 %v5477_v16 }
  0x7d   : > { %5026 = vmatpush3.bf16.msra.mxu0 %v5477_v16  ;;  %v5574_v16 = vld [vmem:[%s6186_s3 + $0x90] sm:$0xff]  }
  0x7e   : > { %5027 = vmatprep.subr.bf16.mxu0 %v5487_v18 }
  0x7f   : > { %4812 = vmatmul.mubr.msk.bf16.gmra.mrb[20].mxu1 %vm482_vm0, %v5470_v17  ;;  %v5575_v17 = vld [vmem:[%s6186_s3 + $0x98] sm:$0xff]  }
  0x80   : > { %4996 = vmatmul.mubr.msk.bf16.gmra.mrb[4].mxu0 %vm482_vm0, %v5471_v19  ;;  %4815 = vmatprep.mubr.msk.bf16.mxu1 %vm482_vm0, %v5472_v20  ;;  %v5534_v19 = vld [vmem:[%s5678_s14 + $0x78] sm:$0xff]  }
  0x81   : > { %4999 = vmatprep.mubr.msk.bf16.mxu0 %vm482_vm0, %v5473_v21  ;;  %5028 = vmatpush3.bf16.msra.mxu0 %v5487_v18  ;;  %v5533_v18 = vld [vmem:[%s5763_s27 + $0x30] sm:$0xff]   ;;  %v5536_v20 = vld [vmem:[%s5763_s27 + $0x38] sm:$0xff]   ;;  %v5537_v21 = vld [vmem:[%s5678_s14 + $0x80] sm:$0xff]  }
  0x82   : > { %5029 = vmatprep.subr.bf16.mxu0 %v5497_v22 }
  0x85   : > { %5030 = vmatpush3.bf16.msra.mxu0 %v5497_v22  ;;  %v5538_v22 = vld [vmem:[%s5763_s27 + $0x40] sm:$0xff]  }
  0x86   : > { %5063 = vmatprep.subr.bf16.mxu0 %v5881_v24 }
  0x87   : > { %4816 = vmatmul.mubr.msk.bf16.gmra.mrb[24].mxu1 %vm482_vm0, %v5474_v23  ;;  %v5539_v23 = vld [vmem:[%s5678_s14 + $0x88] sm:$0xff]  }
  0x88   : > { %5000 = vmatmul.mubr.msk.bf16.gmra.mrb[8].mxu0 %vm482_vm0, %v5476_v25  ;;  %4819 = vmatprep.mubr.msk.bf16.mxu1 %vm482_vm0, %v5478_v26  ;;  %v5541_v25 = vld [vmem:[%s5727_s11 + $0x10] sm:$0xff]  }
  0x89   : > { %5003 = vmatprep.mubr.msk.bf16.mxu0 %vm482_vm0, %v5479_v27  ;;  %v5542_v26 = vld [vmem:[%s5763_s27 + $0x50] sm:$0xff]   ;;  %v5543_v27 = vld [vmem:[%s5727_s11 + $0x18] sm:$0xff]  }
  0x8f   : > { %4820 = vmatmul.mubr.msk.bf16.gmra.mrb[28].mxu1 %vm482_vm0, %v5480_v28  ;;  %v5544_v28 = vld [vmem:[%s5763_s27 + $0x58] sm:$0xff]  }
  0x90   : > { %5004 = vmatmul.mubr.msk.bf16.gmra.mrb[12].mxu0 %vm482_vm0, %v5481_v29  ;;  %4831 = vmatprep.mubr.msk.bf16.mxu1 %vm482_vm0, %v5482_v30  ;;  %v5545_v29 = vld [vmem:[%s5727_s11 + $0x20] sm:$0xff]  }
  0x91   : > { %5007 = vmatprep.mubr.msk.bf16.mxu0 %vm482_vm0, %v5483_v31  ;;  %v5546_v30 = vld [vmem:[%s5763_s27 + $0x60] sm:$0xff]   ;;  %v5547_v31 = vld [vmem:[%s5727_s11 + $0x28] sm:$0xff]  }
  0x97   : > { %4832 = vmatmul.mubr.msk.bf16.vlgmr.msra.gmra.mrb[0].mxu1 %vm482_vm0, %v5484_v32  ;;  %v5548_v32 = vld [vmem:[%s5763_s27 + $0x68] sm:$0xff]  }
  0x98   : > { %5008 = vmatmul.mubr.msk.bf16.gmra.mrb[16].mxu0 %vm482_vm0, %v5486_v33  ;;  %4864 = vmatpush3.bf16.msra.mxu1 %v5834_v4  ;;  %v5521_v4 = vld [vmem:[%s5678_s14 + $0x48] sm:$0xff]   ;;  %v5549_v33 = vld [vmem:[%s5727_s11 + $0x30] sm:$0xff]  }
  0x99   : > { %4835 = vmatprep.mubr.msk.bf16.mxu1 %vm482_vm0, %v5488_v34  ;;  %5011 = vmatprep.mubr.msk.bf16.mxu0 %vm482_vm0, %v5489_v35  ;;  %v5550_v34 = vld [vmem:[%s5763_s27 + $0x70] sm:$0xff]   ;;  %v5551_v35 = vld [vmem:[%s5727_s11 + $0x38] sm:$0xff]  }
  0x9a   : > { %4865 = vmatprep.subr.bf16.mxu1 %v5495_v36 }
  0x9c   : > { %4866 = vmatpush3.bf16.msra.mxu1 %v5495_v36  ;;  %v5552_v36 = vld [vmem:[%s5763_s27 + $0x78] sm:$0xff]  }
  0x9d   : > { %4867 = vmatprep.subr.bf16.mxu1 %v5505_v37 }
  0x9f   : > { %4836 = vmatmul.mubr.msk.bf16.gmra.mrb[4].mxu1 %vm482_vm0, %v5490_v38  ;;  %v5554_v38 = vld [vmem:[%s5763_s27 + $0x80] sm:$0xff]  }
  0xa0   : > { %5012 = vmatmul.mubr.msk.bf16.gmra.mrb[20].mxu0 %vm482_vm0, %v5491_v39  ;;  %4839 = vmatprep.mubr.msk.bf16.mxu1 %vm482_vm0, %v5492_v40  ;;  %v5555_v39 = vld [vmem:[%s5727_s11 + $0x48] sm:$0xff]  }
  0xa1   : > { %5015 = vmatprep.mubr.msk.bf16.mxu0 %vm482_vm0, %v5493_v41  ;;  %4868 = vmatpush3.bf16.msra.mxu1 %v5505_v37  ;;  %v5553_v37 = vld [vmem:[%s5727_s11 + $0x40] sm:$0xff]   ;;  %v5556_v40 = vld [vmem:[%s5678_s14 + $0x48] sm:$0xff]   ;;  %v5557_v41 = vld [vmem:[%s5727_s11 + $0x50] sm:$0xff]  }
  0xa2   : > { %4869 = vmatprep.subr.bf16.mxu1 %v5515_v42 }
  0xa5   : > { %4870 = vmatpush3.bf16.msra.mxu1 %v5515_v42  ;;  %v5558_v42 = vld [vmem:[%s5678_s14 + $0x50] sm:$0xff]  }
  0xa6   : > { %5103 = vmatprep.subr.bf16.mxu1 %v5572_v47 }
  0xa7   : > { %4840 = vmatmul.mubr.msk.bf16.gmra.mrb[8].mxu1 %vm482_vm0, %v5494_v43  ;;  %v5559_v43 = vld [vmem:[%s5727_s11 + $0x58] sm:$0xff]  }
  0xa8   : > { %5016 = vmatmul.mubr.msk.bf16.gmra.mrb[24].mxu0 %vm482_vm0, %v5496_v44  ;;  %4843 = vmatprep.mubr.msk.bf16.mxu1 %vm482_vm0, %v5498_v45  ;;  %v5560_v44 = vld [vmem:[%s5678_s14 + $0x58] sm:$0xff]   ;;  %v5561_v45 = vld [vmem:[%s5727_s11 + $0x60] sm:$0xff]  }
  0xa9   : > { %5019 = vmatprep.mubr.msk.bf16.mxu0 %vm482_vm0, %v5499_v46  ;;  %v5562_v46 = vld [vmem:[%s5678_s14 + $0x60] sm:$0xff]  }
  0xaf   : > { %4844 = vmatmul.mubr.msk.bf16.gmra.mrb[12].mxu1 %vm482_vm0, %v5500_v48  ;;  %v5564_v48 = vld [vmem:[%s5678_s14 + $0x68] sm:$0xff]  }
  0xb0   : > { %5020 = vmatmul.mubr.msk.bf16.gmra.mrb[28].mxu0 %vm482_vm0, %v5501_v49  ;;  %4847 = vmatprep.mubr.msk.bf16.mxu1 %vm482_vm0, %v5502_v50  ;;  %v5565_v49 = vld [vmem:[%s5727_s11 + $0x70] sm:$0xff]  }
  0xb1   : > { %5031 = vmatprep.mubr.msk.bf16.mxu0 %vm482_vm0, %v5503_v51  ;;  %v5566_v50 = vld [vmem:[%s5678_s14 + $0x70] sm:$0xff]   ;;  %v5567_v51 = vld [vmem:[%s5727_s11 + $0x78] sm:$0xff]  }
  0xb7   : > { %4848 = vmatmul.mubr.msk.bf16.gmra.mrb[16].mxu1 %vm482_vm0, %v5504_v52  ;;  %v5568_v52 = vld [vmem:[%s5678_s14 + $0x78] sm:$0xff]  }
  0xb8   : > { %5032 = vmatmul.mubr.msk.bf16.vlgmr.msra.gmra.mrb[0].mxu0 %vm482_vm0, %v5506_v53  ;;  %4851 = vmatprep.mubr.msk.bf16.mxu1 %vm482_vm0, %v5508_v54  ;;  %v5569_v53 = vld [vmem:[%s5727_s11 + $0x80] sm:$0xff]  }
  0xb9   : > { %5064 = vmatpush3.bf16.msra.mxu0 %v5881_v24  ;;  %5035 = vmatprep.mubr.msk.bf16.mxu0 %vm482_vm0, %v5509_v55  ;;  %v5540_v24 = vld [vmem:[%s5763_s27 + $0x48] sm:$0xff]   ;;  %v5570_v54 = vld [vmem:[%s5678_s14 + $0x80] sm:$0xff]   ;;  %s4562_s27 = sshll.u32 %s6194_s18, 8 }
  0xba   : > { %5065 = vmatprep.subr.bf16.mxu0 %v5517_v56  ;;  %v5571_v55 = vld [vmem:[%s5727_s11 + $0x88] sm:$0xff]   ;;  %s6105_s15 = scalar_lea.vmem %s6188_s5, %s4562_s27 }
  0xbd   : > { %5066 = vmatpush3.bf16.msra.mxu0 %v5517_v56 }
  0xbe   : > { %5067 = vmatprep.subr.bf16.mxu0 %v5526_v57 }
  0xbf   : > { %4852 = vmatmul.mubr.msk.bf16.gmra.mrb[20].mxu1 %vm482_vm0, %v5510_v58 }
  0xc0   : > { %5036 = vmatmul.mubr.msk.bf16.gmra.mrb[4].mxu0 %vm482_vm0, %v5511_v59  ;;  %4855 = vmatprep.mubr.msk.bf16.mxu1 %vm482_vm0, %v5512_v60 }
  0xc1   : > { %5039 = vmatprep.mubr.msk.bf16.mxu0 %vm482_vm0, %v5513_v61  ;;  %5068 = vmatpush3.bf16.msra.mxu0 %v5526_v57 }
  0xc2   : > { %5069 = vmatprep.subr.bf16.mxu0 %v5535_v62 }
  0xc5   : > { %5070 = vmatpush3.bf16.msra.mxu0 %v5535_v62 }
  0xc7   : > { %4856 = vmatmul.mubr.msk.bf16.gmra.mrb[24].mxu1 %vm482_vm0, %v5514_v63 }
  0xc8   : > { %5040 = vmatmul.mubr.msk.bf16.gmra.mrb[8].mxu0 %vm482_vm0, %v5516_v0  ;;  %4859 = vmatprep.mubr.msk.bf16.mxu1 %vm482_vm0, %v5518_v1 }
  0xc9   : > { %5043 = vmatprep.mubr.msk.bf16.mxu0 %vm482_vm0, %v5519_v2 }
  0xcf   : > { %4860 = vmatmul.mubr.msk.bf16.gmra.mrb[28].mxu1 %vm482_vm0, %v5520_v3 }
  0xd0   : > { %5044 = vmatmul.mubr.msk.bf16.gmra.mrb[12].mxu0 %vm482_vm0, %v5521_v4  ;;  %4871 = vmatprep.mubr.msk.bf16.mxu1 %vm482_vm0, %v5522_v5 }
  0xd1   : > { %5047 = vmatprep.mubr.msk.bf16.mxu0 %vm482_vm0, %v5523_v6 }
  0xd7   : > { %4872 = vmatmul.mubr.msk.bf16.vlgmr.msra.gmra.mrb[0].mxu1 %vm482_vm0, %v5524_v7 }
  0xd8   : > { %5048 = vmatmul.mubr.msk.bf16.gmra.mrb[16].mxu0 %vm482_vm0, %v5525_v8  ;;  %5107 = vmatpush3.bf16.msra.mxu1 %v5572_v47  ;;  %v5563_v47 = vld [vmem:[%s5727_s11 + $0x68] sm:$0xff]  }
  0xd9   : > { %4875 = vmatprep.mubr.msk.bf16.mxu1 %vm482_vm0, %v5527_v9  ;;  %5051 = vmatprep.mubr.msk.bf16.mxu0 %vm482_vm0, %v5528_v10  ;;  %v6098_v9 = vld [vmem:[%s6187_s4] ss:$0 sm:$0xff] }
  0xda   : > { %5104 = vmatprep.subr.bf16.mxu1 %v5573_v11 }
  0xdc   : > { %5108 = vmatpush3.bf16.msra.mxu1 %v5573_v11 }
  0xdd   : > { %5105 = vmatprep.subr.bf16.mxu1 %v5574_v16 }
  0xdf   : > { %4876 = vmatmul.mubr.msk.bf16.gmra.mrb[4].mxu1 %vm482_vm0, %v5529_v12 }
  0xe0   : > { %5052 = vmatmul.mubr.msk.bf16.gmra.mrb[20].mxu0 %vm482_vm0, %v5530_v13  ;;  %4879 = vmatprep.mubr.msk.bf16.mxu1 %vm482_vm0, %v5531_v14 }
  0xe1   : > { %5055 = vmatprep.mubr.msk.bf16.mxu0 %vm482_vm0, %v5532_v15  ;;  %5109 = vmatpush3.bf16.msra.mxu1 %v5574_v16 }
  0xe2   : > { %5106 = vmatprep.subr.bf16.mxu1 %v5575_v17 }
  0xe5   : > { %5110 = vmatpush3.bf16.msra.mxu1 %v5575_v17 }
  0xe7   : > { %4880 = vmatmul.mubr.msk.bf16.gmra.mrb[8].mxu1 %vm482_vm0, %v5533_v18 }
  0xe8   : > { %5056 = vmatmul.mubr.msk.bf16.gmra.mrb[24].mxu0 %vm482_vm0, %v5534_v19  ;;  %4883 = vmatprep.mubr.msk.bf16.mxu1 %vm482_vm0, %v5536_v20 }
  0xe9   : > { %5059 = vmatprep.mubr.msk.bf16.mxu0 %vm482_vm0, %v5537_v21 }
  0xef   : > { %4884 = vmatmul.mubr.msk.bf16.gmra.mrb[12].mxu1 %vm482_vm0, %v5538_v22 }
  0xf0   : > { %5060 = vmatmul.mubr.msk.bf16.gmra.mrb[28].mxu0 %vm482_vm0, %v5539_v23  ;;  %4887 = vmatprep.mubr.msk.bf16.mxu1 %vm482_vm0, %v5540_v24 }
  0xf1   : > { %5071 = vmatprep.mubr.msk.bf16.mxu0 %vm482_vm0, %v5541_v25 }
  0xf7   : > { %4888 = vmatmul.mubr.msk.bf16.gmra.mrb[16].mxu1 %vm482_vm0, %v5542_v26 }
  0xf8   : > { %5072 = vmatmul.mubr.msk.bf16.vlgmr.msra.gmra.mrb[0].mxu0 %vm482_vm0, %v5543_v27  ;;  %4891 = vmatprep.mubr.msk.bf16.mxu1 %vm482_vm0, %v5544_v28 }
  0xf9   : > { %5075 = vmatprep.mubr.msk.bf16.mxu0 %vm482_vm0, %v5545_v29 }
  0xff   : > { %4892 = vmatmul.mubr.msk.bf16.gmra.mrb[20].mxu1 %vm482_vm0, %v5546_v30 }
 0x100   : > { %5076 = vmatmul.mubr.msk.bf16.gmra.mrb[4].mxu0 %vm482_vm0, %v5547_v31  ;;  %4895 = vmatprep.mubr.msk.bf16.mxu1 %vm482_vm0, %v5548_v32 }
 0x101   : > { %5079 = vmatprep.mubr.msk.bf16.mxu0 %vm482_vm0, %v5549_v33 }
 0x107   : > { %4896 = vmatmul.mubr.msk.bf16.gmra.mrb[24].mxu1 %vm482_vm0, %v5550_v34 }
 0x108   : > { %5080 = vmatmul.mubr.msk.bf16.gmra.mrb[8].mxu0 %vm482_vm0, %v5551_v35  ;;  %4899 = vmatprep.mubr.msk.bf16.mxu1 %vm482_vm0, %v5552_v36 }
 0x109   : > { %5083 = vmatprep.mubr.msk.bf16.mxu0 %vm482_vm0, %v5553_v37 }
 0x10f   : > { %4900 = vmatmul.mubr.msk.bf16.gmra.mrb[28].mxu1 %vm482_vm0, %v5554_v38 }
 0x110   : > { %5084 = vmatmul.mubr.msk.bf16.gmra.mrb[12].mxu0 %vm482_vm0, %v5555_v39  ;;  %4927 = vmatprep.mubr.msk.bf16.mxu1 %vm482_vm0, %v5556_v40 }
 0x111   : > { %5087 = vmatprep.mubr.msk.bf16.mxu0 %vm482_vm0, %v5557_v41 }
 0x117   : > { %4928 = vmatmul.mubr.msk.bf16.vlgmr.msra.gmra.mrb[16].mxu1 %vm482_vm0, %v5558_v42 }
 0x118   : > { %5088 = vmatmul.mubr.msk.bf16.gmra.mrb[16].mxu0 %vm482_vm0, %v5559_v43  ;;  %4931 = vmatprep.mubr.msk.bf16.mxu1 %vm482_vm0, %v5560_v44 }
 0x119   : > { %5091 = vmatprep.mubr.msk.bf16.mxu0 %vm482_vm0, %v5561_v45 }
 0x11f   : > { %4932 = vmatmul.mubr.msk.bf16.gmra.mrb[20].mxu1 %vm482_vm0, %v5562_v46 }
 0x120   : > { %5092 = vmatmul.mubr.msk.bf16.gmra.mrb[20].mxu0 %vm482_vm0, %v5563_v47  ;;  %4935 = vmatprep.mubr.msk.bf16.mxu1 %vm482_vm0, %v5564_v48 }
 0x121   : > { %5095 = vmatprep.mubr.msk.bf16.mxu0 %vm482_vm0, %v5565_v49 }
 0x127   : > { %4936 = vmatmul.mubr.msk.bf16.gmra.mrb[24].mxu1 %vm482_vm0, %v5566_v50 }
 0x128   : > { %5096 = vmatmul.mubr.msk.bf16.gmra.mrb[24].mxu0 %vm482_vm0, %v5567_v51  ;;  %4939 = vmatprep.mubr.msk.bf16.mxu1 %vm482_vm0, %v5568_v52 }
 0x129   : > { %5099 = vmatprep.mubr.msk.bf16.mxu0 %vm482_vm0, %v5569_v53 }
 0x12f   : > { %4940 = vmatmul.mubr.msk.bf16.gmra.mrb[28].mxu1 %vm482_vm0, %v5570_v54 }
 0x130   : > { %5100 = vmatmul.mubr.msk.bf16.gmra.mrb[28].mxu0 %vm482_vm0, %v5571_v55 }
 0x1aa   : > { %v4873_v56 = vpop.f32.mrb[0].mxu1 }
 0x1ab   : > { %v1624_v57 = vpop.f32.mrb[1].mxu1 }
 0x1ac   : > { %v4874_v58 = vpop.f32.mrb[2].mxu1 }
 0x1ad   : > { %v1627_v59 = vpop.f32.mrb[3].mxu1 }
 0x1b2   : > { %v4877_v60 = vpop.f32.mrb[4].mxu1 }
 0x1b3   : > { %v1640_v61 = vpop.f32.mrb[5].mxu1 }
 0x1b4   : > { %v4878_v62 = vpop.f32.mrb[6].mxu1 }
 0x1b5   : > { %v1643_v63 = vpop.f32.mrb[7].mxu1 }
 0x1ba   : > { %v4881_v0 = vpop.f32.mrb[8].mxu1 }
 0x1bb   : > { %v1656_v1 = vpop.f32.mrb[9].mxu1 }
 0x1bc   : > { %v4882_v2 = vpop.f32.mrb[10].mxu1 }
 0x1bd   : > { %v1659_v3 = vpop.f32.mrb[11].mxu1 }
 0x1c2   : > { %v6087_v4 = vpop.f32.mrb[12].mxu1 }
 0x1c3   : > { %v6089_v5 = vpop.f32.mrb[13].mxu1 }
 0x1c4   : > { %v6091_v6 = vpop.f32.mrb[14].mxu1 }
 0x1c5   : > { %v6093_v7 = vpop.f32.mrb[15].mxu1 }
 0x1cb   : > { %v5073_v8 = vpop.f32.mrb[0].mxu0 }
 0x1cc   : > { %v5111_v10 = vadd.f32 %v5073_v8, %v4873_v56  ;;  %v3566_v11 = vpop.f32.mrb[1].mxu0 }
 0x1cd   : > { %v5112_v12 = vadd.f32 %v3566_v11, %v1624_v57  ;;  %v5074_v13 = vpop.f32.mrb[2].mxu0 }
 0x1ce   : > { %v3734_v14 = vadd.f32 %v5111_v10, %v6098_v9  ;;  %v5113_v15 = vadd.f32 %v5074_v13, %v4874_v58  ;;  %v3569_v16 = vpop.f32.mrb[3].mxu0 }
 0x1cf   : > { %v3732_v17 = vadd.f32 %v5112_v12, %v6098_v9  ;;  %v5114_v18 = vadd.f32 %v3569_v16, %v1627_v59 }
 0x1d0   : > { %v3766_v19 = vmax.f32 %v3734_v14, 0.0  ;;  %v3735_v20 = vadd.f32 %v5113_v15, %v6098_v9 }
 0x1d1   : > { %v3764_v21 = vmax.f32 %v3732_v17, 0.0  ;;  %v3733_v22 = vadd.f32 %v5114_v18, %v6098_v9 }
 0x1d2   : > { %3798 = vst [vmem:[%s6105_s15 + $0x10] sm:$0xff] %v3766_v19  ;;  %v3767_v23 = vmax.f32 %v3735_v20, 0.0 }
 0x1d3   : > { %3796 = vst [vmem:[%s6105_s15] sm:$0xff] %v3764_v21  ;;  %v3765_v24 = vmax.f32 %v3733_v22, 0.0  ;;  %v5077_v25 = vpop.f32.mrb[4].mxu0 }
 0x1d4   : > { %3799 = vst [vmem:[%s6105_s15 + $0x18] sm:$0xff] %v3767_v23  ;;  %v5115_v26 = vadd.f32 %v5077_v25, %v4877_v60  ;;  %v3582_v27 = vpop.f32.mrb[5].mxu0 }
 0x1d5   : > { %3797 = vst [vmem:[%s6105_s15 + $0x8] sm:$0xff] %v3765_v24  ;;  %v5116_v28 = vadd.f32 %v3582_v27, %v1640_v61  ;;  %v5078_v29 = vpop.f32.mrb[6].mxu0 }
 0x1d6   : > { %v3738_v30 = vadd.f32 %v5115_v26, %v6098_v9  ;;  %v5117_v31 = vadd.f32 %v5078_v29, %v4878_v62  ;;  %v3585_v32 = vpop.f32.mrb[7].mxu0 }
 0x1d7   : > { %v3736_v33 = vadd.f32 %v5116_v28, %v6098_v9  ;;  %v5118_v34 = vadd.f32 %v3585_v32, %v1643_v63 }
 0x1d8   : > { %v3770_v35 = vmax.f32 %v3738_v30, 0.0  ;;  %v3739_v36 = vadd.f32 %v5117_v31, %v6098_v9 }
 0x1d9   : > { %v3768_v37 = vmax.f32 %v3736_v33, 0.0  ;;  %v3737_v38 = vadd.f32 %v5118_v34, %v6098_v9 }
 0x1da   : > { %3802 = vst [vmem:[%s6105_s15 + $0x30] sm:$0xff] %v3770_v35  ;;  %v3771_v39 = vmax.f32 %v3739_v36, 0.0 }
 0x1db   : > { %3800 = vst [vmem:[%s6105_s15 + $0x20] sm:$0xff] %v3768_v37  ;;  %v3769_v40 = vmax.f32 %v3737_v38, 0.0  ;;  %v5081_v41 = vpop.f32.mrb[8].mxu0 }
 0x1dc   : > { %3803 = vst [vmem:[%s6105_s15 + $0x38] sm:$0xff] %v3771_v39  ;;  %v5119_v42 = vadd.f32 %v5081_v41, %v4881_v0  ;;  %v3598_v43 = vpop.f32.mrb[9].mxu0 }
 0x1dd   : > { %3801 = vst [vmem:[%s6105_s15 + $0x28] sm:$0xff] %v3769_v40  ;;  %v5120_v44 = vadd.f32 %v3598_v43, %v1656_v1  ;;  %v5082_v45 = vpop.f32.mrb[10].mxu0 }
 0x1de   : > { %v3742_v46 = vadd.f32 %v5119_v42, %v6098_v9  ;;  %v5121_v47 = vadd.f32 %v5082_v45, %v4882_v2  ;;  %v3601_v48 = vpop.f32.mrb[11].mxu0 }
 0x1df   : > { %v3740_v49 = vadd.f32 %v5120_v44, %v6098_v9  ;;  %v5122_v50 = vadd.f32 %v3601_v48, %v1659_v3 }
 0x1e0   : > { %v3774_v51 = vmax.f32 %v3742_v46, 0.0  ;;  %v3743_v52 = vadd.f32 %v5121_v47, %v6098_v9 }
 0x1e1   : > { %v3772_v53 = vmax.f32 %v3740_v49, 0.0  ;;  %v3741_v54 = vadd.f32 %v5122_v50, %v6098_v9 }
 0x1e2   : > { %3806 = vst [vmem:[%s6105_s15 + $0x50] sm:$0xff] %v3774_v51  ;;  %v3775_v55 = vmax.f32 %v3743_v52, 0.0 }
 0x1e3   : > { %3804 = vst [vmem:[%s6105_s15 + $0x40] sm:$0xff] %v3772_v53  ;;  %v3773_v56 = vmax.f32 %v3741_v54, 0.0  ;;  %v5085_v57 = vpop.f32.mrb[12].mxu0 }
 0x1e4   : > { %3807 = vst [vmem:[%s6105_s15 + $0x58] sm:$0xff] %v3775_v55  ;;  %v5123_v58 = vadd.f32 %v5085_v57, %v6087_v4  ;;  %v3614_v59 = vpop.f32.mrb[13].mxu0 }
 0x1e5   : > { %3805 = vst [vmem:[%s6105_s15 + $0x48] sm:$0xff] %v3773_v56  ;;  %v5124_v60 = vadd.f32 %v3614_v59, %v6089_v5  ;;  %v5086_v61 = vpop.f32.mrb[14].mxu0 }
 0x1e6   : > { %v3746_v62 = vadd.f32 %v5123_v58, %v6098_v9  ;;  %v5125_v63 = vadd.f32 %v5086_v61, %v6091_v6  ;;  %v3617_v0 = vpop.f32.mrb[15].mxu0 }
 0x1e7   : > { %v3744_v1 = vadd.f32 %v5124_v60, %v6098_v9  ;;  %v5126_v2 = vadd.f32 %v3617_v0, %v6093_v7 }
 0x1e8   : > { %v3778_v3 = vmax.f32 %v3746_v62, 0.0  ;;  %v3747_v4 = vadd.f32 %v5125_v63, %v6098_v9 }
 0x1e9   : > { %v3776_v8 = vmax.f32 %v3744_v1, 0.0  ;;  %v3745_v10 = vadd.f32 %v5126_v2, %v6098_v9 }
 0x1ea   : > { %3810 = vst [vmem:[%s6105_s15 + $0x70] sm:$0xff] %v3778_v3  ;;  %v3779_v5 = vmax.f32 %v3747_v4, 0.0  ;;  %v4929_v11 = vpop.f32.mrb[16].mxu1 }
 0x1eb   : > { %3808 = vst [vmem:[%s6105_s15 + $0x60] sm:$0xff] %v3776_v8  ;;  %v3777_v12 = vmax.f32 %v3745_v10, 0.0  ;;  %v5089_v13 = vpop.f32.mrb[16].mxu0  ;;  %v2076_v14 = vpop.f32.mrb[17].mxu1 }
 0x1ec   : > { %3811 = vst [vmem:[%s6105_s15 + $0x78] sm:$0xff] %v3779_v5  ;;  %v5127_v6 = vadd.f32 %v5089_v13, %v4929_v11  ;;  %v3630_v15 = vpop.f32.mrb[17].mxu0  ;;  %v4930_v16 = vpop.f32.mrb[18].mxu1 }
 0x1ed   : > { %3809 = vst [vmem:[%s6105_s15 + $0x68] sm:$0xff] %v3777_v12  ;;  %v5128_v7 = vadd.f32 %v3630_v15, %v2076_v14  ;;  %v5090_v17 = vpop.f32.mrb[18].mxu0  ;;  %v2079_v18 = vpop.f32.mrb[19].mxu1 }
 0x1ee   : > { %v3750_v19 = vadd.f32 %v5127_v6, %v6098_v9  ;;  %v5129_v20 = vadd.f32 %v5090_v17, %v4930_v16  ;;  %v3633_v21 = vpop.f32.mrb[19].mxu0 }
 0x1ef   : > { %v3748_v22 = vadd.f32 %v5128_v7, %v6098_v9  ;;  %v5130_v23 = vadd.f32 %v3633_v21, %v2079_v18 }
 0x1f0   : > { %v3782_v24 = vmax.f32 %v3750_v19, 0.0  ;;  %v3751_v25 = vadd.f32 %v5129_v20, %v6098_v9 }
 0x1f1   : > { %v3780_v26 = vmax.f32 %v3748_v22, 0.0  ;;  %v3749_v27 = vadd.f32 %v5130_v23, %v6098_v9 }
 0x1f2   : > { %3814 = vst [vmem:[%s6105_s15 + $0x90] sm:$0xff] %v3782_v24  ;;  %v3783_v28 = vmax.f32 %v3751_v25, 0.0  ;;  %v4933_v29 = vpop.f32.mrb[20].mxu1 }
 0x1f3   : > { %3812 = vst [vmem:[%s6105_s15 + $0x80] sm:$0xff] %v3780_v26  ;;  %v3781_v30 = vmax.f32 %v3749_v27, 0.0  ;;  %v5093_v31 = vpop.f32.mrb[20].mxu0  ;;  %v2092_v32 = vpop.f32.mrb[21].mxu1 }
 0x1f4   : > { %3815 = vst [vmem:[%s6105_s15 + $0x98] sm:$0xff] %v3783_v28  ;;  %v5131_v33 = vadd.f32 %v5093_v31, %v4933_v29  ;;  %v3646_v34 = vpop.f32.mrb[21].mxu0  ;;  %v4934_v35 = vpop.f32.mrb[22].mxu1 }
 0x1f5   : > { %3813 = vst [vmem:[%s6105_s15 + $0x88] sm:$0xff] %v3781_v30  ;;  %v5132_v36 = vadd.f32 %v3646_v34, %v2092_v32  ;;  %v5094_v37 = vpop.f32.mrb[22].mxu0  ;;  %v2095_v38 = vpop.f32.mrb[23].mxu1 }
 0x1f6   : > { %v3754_v39 = vadd.f32 %v5131_v33, %v6098_v9  ;;  %v5133_v40 = vadd.f32 %v5094_v37, %v4934_v35  ;;  %v3649_v41 = vpop.f32.mrb[23].mxu0 }
 0x1f7   : > { %v3752_v42 = vadd.f32 %v5132_v36, %v6098_v9  ;;  %v5134_v43 = vadd.f32 %v3649_v41, %v2095_v38 }
 0x1f8   : > { %v3786_v44 = vmax.f32 %v3754_v39, 0.0  ;;  %v3755_v45 = vadd.f32 %v5133_v40, %v6098_v9 }
 0x1f9   : > { %v3784_v46 = vmax.f32 %v3752_v42, 0.0  ;;  %v3753_v47 = vadd.f32 %v5134_v43, %v6098_v9 }
 0x1fa   : > { %3818 = vst [vmem:[%s6105_s15 + $0xb0] sm:$0xff] %v3786_v44  ;;  %v3787_v48 = vmax.f32 %v3755_v45, 0.0  ;;  %v4937_v49 = vpop.f32.mrb[24].mxu1 }
 0x1fb   : > { %3816 = vst [vmem:[%s6105_s15 + $0xa0] sm:$0xff] %v3784_v46  ;;  %v3785_v50 = vmax.f32 %v3753_v47, 0.0  ;;  %v5097_v51 = vpop.f32.mrb[24].mxu0  ;;  %v2108_v52 = vpop.f32.mrb[25].mxu1 }
 0x1fc   : > { %3819 = vst [vmem:[%s6105_s15 + $0xb8] sm:$0xff] %v3787_v48  ;;  %v5135_v53 = vadd.f32 %v5097_v51, %v4937_v49  ;;  %v3662_v54 = vpop.f32.mrb[25].mxu0  ;;  %v4938_v55 = vpop.f32.mrb[26].mxu1 }
 0x1fd   : > { %3817 = vst [vmem:[%s6105_s15 + $0xa8] sm:$0xff] %v3785_v50  ;;  %v5136_v56 = vadd.f32 %v3662_v54, %v2108_v52  ;;  %v5098_v57 = vpop.f32.mrb[26].mxu0  ;;  %v2111_v58 = vpop.f32.mrb[27].mxu1 }
 0x1fe   : > { %v3758_v59 = vadd.f32 %v5135_v53, %v6098_v9  ;;  %v5137_v60 = vadd.f32 %v5098_v57, %v4938_v55  ;;  %v3665_v61 = vpop.f32.mrb[27].mxu0 }
 0x1ff   : > { %v3756_v62 = vadd.f32 %v5136_v56, %v6098_v9  ;;  %v5138_v63 = vadd.f32 %v3665_v61, %v2111_v58 }
 0x200   : > { %v3790_v0 = vmax.f32 %v3758_v59, 0.0  ;;  %v3759_v1 = vadd.f32 %v5137_v60, %v6098_v9 }
 0x201   : > { %v3788_v2 = vmax.f32 %v3756_v62, 0.0  ;;  %v3757_v3 = vadd.f32 %v5138_v63, %v6098_v9 }
 0x202   : > { %3822 = vst [vmem:[%s6105_s15 + $0xd0] sm:$0xff] %v3790_v0  ;;  %v3791_v4 = vmax.f32 %v3759_v1, 0.0  ;;  %v4941_v8 = vpop.f32.mrb[28].mxu1 }
 0x203   : > { %3820 = vst [vmem:[%s6105_s15 + $0xc0] sm:$0xff] %v3788_v2  ;;  %v3789_v10 = vmax.f32 %v3757_v3, 0.0  ;;  %v5101_v5 = vpop.f32.mrb[28].mxu0  ;;  %v2124_v11 = vpop.f32.mrb[29].mxu1 }
 0x204   : > { %3823 = vst [vmem:[%s6105_s15 + $0xd8] sm:$0xff] %v3791_v4  ;;  %v5139_v12 = vadd.f32 %v5101_v5, %v4941_v8  ;;  %v3678_v13 = vpop.f32.mrb[29].mxu0  ;;  %v4942_v14 = vpop.f32.mrb[30].mxu1 }
 0x205   : > { %3821 = vst [vmem:[%s6105_s15 + $0xc8] sm:$0xff] %v3789_v10  ;;  %v5140_v6 = vadd.f32 %v3678_v13, %v2124_v11  ;;  %v5102_v15 = vpop.f32.mrb[30].mxu0  ;;  %v2127_v16 = vpop.f32.mrb[31].mxu1 }
 0x206   : > { %v3762_v7 = vadd.f32 %v5139_v12, %v6098_v9  ;;  %v5141_v17 = vadd.f32 %v5102_v15, %v4942_v14  ;;  %v3681_v18 = vpop.f32.mrb[31].mxu0 }
 0x207   : > { %v3760_v19 = vadd.f32 %v5140_v6, %v6098_v9  ;;  %v5142_v20 = vadd.f32 %v3681_v18, %v2127_v16 }
 0x208   : > { %v3794_v21 = vmax.f32 %v3762_v7, 0.0  ;;  %v3763_v22 = vadd.f32 %v5141_v17, %v6098_v9 }
 0x209   : > { %v3792_v23 = vmax.f32 %v3760_v19, 0.0  ;;  %v3761_v24 = vadd.f32 %v5142_v20, %v6098_v9 }
 0x20a   : > { %3826 = vst [vmem:[%s6105_s15 + $0xf0] sm:$0xff] %v3794_v21  ;;  %v3795_v25 = vmax.f32 %v3763_v22, 0.0 }
 0x20b   : > { %3824 = vst [vmem:[%s6105_s15 + $0xe0] sm:$0xff] %v3792_v23  ;;  %v3793_v26 = vmax.f32 %v3761_v24, 0.0 }
 0x20c   : > { %3827 = vst [vmem:[%s6105_s15 + $0xf8] sm:$0xff] %v3795_v25 }
 0x20d   : > { %3825 = vst [vmem:[%s6105_s15 + $0xe8] sm:$0xff] %v3793_v26 }
 0x20e PF: > { %s15_s20 = sadd.s32 1, %s5598_s20   ;;  %s6189_s18 = smov %s5594_s19 }
 0x20f   : > { %p12_p5 = scmp.ge.s32.totalorder %s15_s20, 4   ;;  %s6190_s19 = smov %s6192_s21 }
 0x211   :  { %14 = sbr.rel (!%p12_p5) target bundleno = 2 (0x2), region = 93 }

// kernel: feature_matching_forward.13
= control target key start
LH: loop header
LB: loop body
LE: loop exit
PB: predicated region body
PF: predicated region fallthrough
CT: control target
= control target key end

     0   :  { %s5166_s18 = smov 0   ;;  %s5168_s19 = smov 0   ;;  %s5683_s0 = inlined_call_operand.vmem [shape: bf16[2,18,16,3], index: 0, kind: input, shape index: {}]   ;;  %s5684_s1 = inlined_call_operand.vmem [shape: bf16[2,18,16,3], index: 1, kind: input, shape index: {}]   ;;  %s5685_s2 = inlined_call_operand.vmem [shape: bf16[2,18,16,3], index: 2, kind: input, shape index: {}]   ;;  %s5686_s3 = inlined_call_operand.vmem [shape: bf16[3,3,3,64], index: 3, kind: input, shape index: {}]   ;;  %s5687_s4 = inlined_call_operand.vmem [shape: f32[1,64], index: 4, kind: input, shape index: {}]   ;;  %s5688_s5 = inlined_call_operand.vmem [shape: f32[2,16,16,64], index: 5, kind: output, shape index: {}]  }
   0x1   :  { %s5170_s20 = smov 0  }
   0x2 LB: > { %s27_s21 = sadd.s32 1, %s5129_s19  ;;  %p3726_p0 = scmp.ge.s32.totalorder %s5133_s20, 1  ;;  %s5133_s20 = sphi %s5170_s20, %s15_s20   ;;  %s5129_s19 = sphi %s5168_s19, %s5690_s19   ;;  %s5125_s18 = sphi %s5166_s18, %s5689_s18  }
   0x3   : > { %p29_p1 = scmp.ge.s32.totalorder %s27_s21, 2  ;;  %p221_p2 = scmp.lt.s32.totalorder %s5133_s20, 3 }
   0x5   : > { %s5692_s21 = smov (%p29_p1, %s27_s21), 0  ;;  %p222_p3 = pnand %p3726_p0, %p221_p2 }
   0x6   : > { %v3732_v0 = vld [vmem:[%s5686_s3 + $0x2] sm:$0x3] (!%p222_p3)  ;;  %vm493_vm0 = vcmask (!%p222_p3), 1040384   ;;  %vm494_vm1 = vcmask (!%p222_p3), 1041408   ;;  %p264_p4 = scmp.lt.s32.totalorder (!%p222_p3), %s5125_s18, 1  ;;  %v5135_v1 = vmov (!%p222_p3), 65535  }
   0x7   : > { %225 = sbr.rel (%p222_p3) target bundleno = 522 (0x20a), region = 40  ;;  %v495_v2 = vsel (!%p222_p3), %vm493_vm0, 4294967295, %v5135_v1  ;;  %v3927_v3 = vld [vmem:[%s5686_s3 + $0x8] sm:$0x3] (!%p222_p3)  ;;  %v327_v4 = vld [vmem:[%s5686_s3] sm:$0x3] (!%p222_p3) }
   0x8   : > { %v5193_v5 = vsel (!%p222_p3), %vm494_vm1, %v495_v2, 0  ;;  %v3992_v6 = vld [vmem:[%s5686_s3 + $0xa] sm:$0x3] (!%p222_p3)  ;;  %vm444_vm2 = vcmask (!%p222_p3), 23552   ;;  %v4057_v11 = vld [vmem:[%s5686_s3 + $0xc] sm:$0x3] (!%p222_p3) }
   0x9   : > { %v498_v7 = vand.u32 (!%p222_p3), %v3732_v0, %v5193_v5  ;;  %v5202_v8 = vand.u32 (!%p222_p3), %v3927_v3, %v5193_v5  ;;  %v790_v9 = vand.u32 (!%p222_p3), %v5193_v5, %v327_v4  ;;  %v2200_v10 = vand.u32 (!%p222_p3), %v3992_v6, %v5193_v5  ;;  %v3797_v12 = vld [vmem:[%s5686_s3 + $0x4] sm:$0x3] (!%p222_p3)  ;;  %v4122_v33 = vld [vmem:[%s5686_s3 + $0xe] sm:$0x3] (!%p222_p3)  ;;  %v3862_v51 = vld [vmem:[%s5686_s3 + $0x6] sm:$0x3] (!%p222_p3) }
   0xa   : > { %v2562_v17 = vand.u32 (!%p222_p3), %v4057_v11, %v5193_v5  ;;  %v5233_v19 = vand.u32 (!%p222_p3), %v3797_v12, %v5193_v5  ;;  %v5284_v38 = vand.u32 (!%p222_p3), %v4122_v33, %v5193_v5  ;;  %v5323_v56 = vand.u32 (!%p222_p3), %v3862_v51, %v5193_v5 }
   0xb   : > { %4377 = vmatprep.subr.bf16.mxu1 (!%p222_p3), %v498_v7  ;;  %4513 = vmatprep.subr.bf16.mxu0 (!%p222_p3), %v5202_v8  ;;  %vm3548_vm3 = vcmask (!%p222_p3), 523264  }
   0xc   : > { %4378 = vmatpush3.bf16.msra.mxu1 (!%p222_p3), %v498_v7  ;;  %4514 = vmatpush3.bf16.msra.mxu0 (!%p222_p3), %v5202_v8 }
   0xd   : > { %4411 = vmatprep.subr.bf16.mxu1 (!%p222_p3), %v790_v9  ;;  %4547 = vmatprep.subr.bf16.mxu0 (!%p222_p3), %v2200_v10 }
   0xe   : > { %s5694_s18 = smov (!%p264_p4, %s5125_s18), 1 }
   0xf   : > { %s5207_s30 = smul.u32 144, %s5694_s18  ;;  %s4223_s6 = sshll.u32 %s5694_s18, 8 }
  0x10   : > { %s5573_s9 = scalar_lea.vmem %s5688_s5, %s4223_s6 }
  0x11   : > { %s5215_s8 = scalar_lea.vmem %s5684_s1, %s5207_s30  ;;  %s5254_s15 = scalar_lea.vmem %s5685_s2, %s5207_s30 }
  0x12   : > { %v4967_v13 = vld [vmem:[%s5215_s8] sm:$0xff]   ;;  %v4968_v14 = vld [vmem:[%s5215_s8 + $0x8] sm:$0xff]   ;;  %v4970_v16 = vld [vmem:[%s5215_s8 + $0x10] sm:$0xff]   ;;  %s5278_s24 = scalar_lea.vmem %s5683_s0, %s5207_s30 }
  0x13   : > { %4379 = vmatprep.mubr.msk.bf16.mxu1 %vm444_vm2, %v4967_v13  ;;  %v4969_v15 = vld [vmem:[%s5215_s8 + $0x8] sm:$0xff]   ;;  %4515 = vmatprep.mubr.msk.bf16.mxu0 %vm444_vm2, %v4968_v14  ;;  %v4971_v18 = vld [vmem:[%s5215_s8 + $0x10] sm:$0xff]   ;;  %v4972_v20 = vld [vmem:[%s5215_s8 + $0x18] sm:$0xff]  }
  0x14   : > { %4380 = vmatmul.mubr.msk.bf16.vlgmr.msra.gmra.mrb[0].mxu1 %vm444_vm2, %v4969_v15  ;;  %4516 = vmatmul.mubr.msk.bf16.vlgmr.msra.gmra.mrb[0].mxu0 %vm444_vm2, %v4970_v16  ;;  %v4973_v21 = vld [vmem:[%s5215_s8 + $0x18] sm:$0xff]   ;;  %v4974_v22 = vld [vmem:[%s5215_s8 + $0x20] sm:$0xff]   ;;  %v4976_v24 = vld [vmem:[%s5215_s8 + $0x28] sm:$0xff]  }
  0x15   : > { %4412 = vmatpush3.bf16.msra.mxu1 %v790_v9  ;;  %4548 = vmatpush3.bf16.msra.mxu0 %v2200_v10  ;;  %v4975_v23 = vld [vmem:[%s5215_s8 + $0x20] sm:$0xff]   ;;  %v4977_v25 = vld [vmem:[%s5215_s8 + $0x28] sm:$0xff]   ;;  %v4978_v26 = vld [vmem:[%s5215_s8 + $0x30] sm:$0xff]  }
  0x16   : > { %4383 = vmatprep.mubr.msk.bf16.mxu1 %vm444_vm2, %v4971_v18  ;;  %4519 = vmatprep.mubr.msk.bf16.mxu0 %vm444_vm2, %v4972_v20  ;;  %v4979_v27 = vld [vmem:[%s5215_s8 + $0x30] sm:$0xff]   ;;  %v4980_v28 = vld [vmem:[%s5215_s8 + $0x38] sm:$0xff]   ;;  %v4982_v30 = vld [vmem:[%s5215_s8 + $0x40] sm:$0xff]  }
  0x17   : > { %4581 = vmatprep.subr.bf16.mxu0 %v2562_v17  ;;  %4445 = vmatprep.subr.bf16.mxu1 %v5233_v19  ;;  %v4981_v29 = vld [vmem:[%s5215_s8 + $0x38] sm:$0xff]   ;;  %v4983_v31 = vld [vmem:[%s5215_s8 + $0x40] sm:$0xff]   ;;  %v4984_v32 = vld [vmem:[%s5254_s15 + $0x8] sm:$0xff]  }
  0x18   : > { %v4985_v34 = vld [vmem:[%s5215_s8 + $0x48] sm:$0xff]   ;;  %v4986_v35 = vld [vmem:[%s5254_s15 + $0x10] sm:$0xff]   ;;  %v4988_v37 = vld [vmem:[%s5254_s15 + $0x18] sm:$0xff]  }
  0x19   : > { %v4987_v36 = vld [vmem:[%s5215_s8 + $0x50] sm:$0xff]   ;;  %v4989_v39 = vld [vmem:[%s5215_s8 + $0x58] sm:$0xff]   ;;  %v4990_v40 = vld [vmem:[%s5254_s15 + $0x20] sm:$0xff]  }
  0x1a   : > { %v4991_v41 = vld [vmem:[%s5215_s8 + $0x60] sm:$0xff]   ;;  %v4992_v42 = vld [vmem:[%s5254_s15 + $0x28] sm:$0xff]   ;;  %v4994_v44 = vld [vmem:[%s5254_s15 + $0x30] sm:$0xff]  }
  0x1b   : > { %v4993_v43 = vld [vmem:[%s5215_s8 + $0x68] sm:$0xff]   ;;  %v4995_v45 = vld [vmem:[%s5215_s8 + $0x70] sm:$0xff]   ;;  %v4996_v46 = vld [vmem:[%s5254_s15 + $0x38] sm:$0xff]  }
  0x1c   : > { %4384 = vmatmul.mubr.msk.bf16.gmra.mrb[4].mxu1 %vm444_vm2, %v4973_v21  ;;  %4520 = vmatmul.mubr.msk.bf16.gmra.mrb[4].mxu0 %vm444_vm2, %v4974_v22  ;;  %v4997_v47 = vld [vmem:[%s5215_s8 + $0x78] sm:$0xff]   ;;  %v4998_v48 = vld [vmem:[%s5254_s15 + $0x40] sm:$0xff]   ;;  %v5000_v50 = vld [vmem:[%s5254_s15 + $0x48] sm:$0xff]  }
  0x1d   : > { %4387 = vmatprep.mubr.msk.bf16.mxu1 %vm444_vm2, %v4975_v23  ;;  %4523 = vmatprep.mubr.msk.bf16.mxu0 %vm444_vm2, %v4976_v24  ;;  %v4999_v49 = vld [vmem:[%s5278_s24] sm:$0xff]   ;;  %v5001_v52 = vld [vmem:[%s5278_s24 + $0x8] sm:$0xff]   ;;  %v5002_v53 = vld [vmem:[%s5254_s15 + $0x50] sm:$0xff]  }
  0x1e   : > { %v5003_v54 = vld [vmem:[%s5278_s24 + $0x10] sm:$0xff]   ;;  %v5004_v55 = vld [vmem:[%s5254_s15 + $0x58] sm:$0xff]   ;;  %v5006_v58 = vld [vmem:[%s5254_s15 + $0x60] sm:$0xff]  }
  0x1f   : > { %v5005_v57 = vld [vmem:[%s5278_s24 + $0x18] sm:$0xff]   ;;  %v5007_v59 = vld [vmem:[%s5278_s24 + $0x20] sm:$0xff]   ;;  %v5008_v60 = vld [vmem:[%s5254_s15 + $0x68] sm:$0xff]  }
  0x20   : > { %v5009_v61 = vld [vmem:[%s5278_s24 + $0x28] sm:$0xff]   ;;  %v5010_v62 = vld [vmem:[%s5254_s15 + $0x70] sm:$0xff]   ;;  %v5012_v0 = vld [vmem:[%s5254_s15 + $0x78] sm:$0xff]  }
  0x21   : > { %v5011_v63 = vld [vmem:[%s5278_s24 + $0x30] sm:$0xff]   ;;  %v5013_v1 = vld [vmem:[%s5278_s24 + $0x38] sm:$0xff]   ;;  %v5014_v2 = vld [vmem:[%s5254_s15 + $0x80] sm:$0xff]  }
  0x22   : > { %v5015_v3 = vld [vmem:[%s5278_s24 + $0x40] sm:$0xff]   ;;  %v5016_v4 = vld [vmem:[%s5278_s24 + $0x10] sm:$0xff]   ;;  %v5017_v6 = vld [vmem:[%s5278_s24 + $0x48] sm:$0xff]  }
  0x23   : > { %v5018_v7 = vld [vmem:[%s5278_s24 + $0x18] sm:$0xff]   ;;  %v4187_v9 = vld [vmem:[%s5686_s3 + $0x10] sm:$0x3]  ;;  %v5020_v11 = vld [vmem:[%s5278_s24 + $0x20] sm:$0xff]  }
  0x24   : > { %4388 = vmatmul.mubr.msk.bf16.gmra.mrb[8].mxu1 %vm444_vm2, %v4977_v25  ;;  %4524 = vmatmul.mubr.msk.bf16.gmra.mrb[8].mxu0 %vm444_vm2, %v4978_v26  ;;  %v5019_v10 = vld [vmem:[%s5278_s24 + $0x50] sm:$0xff]   ;;  %v5363_v12 = vand.u32 %v4187_v9, %v5193_v5  ;;  %v5021_v13 = vld [vmem:[%s5278_s24 + $0x58] sm:$0xff]   ;;  %v5022_v14 = vld [vmem:[%s5278_s24 + $0x28] sm:$0xff]  }
  0x25   : > { %4391 = vmatprep.mubr.msk.bf16.mxu1 %vm444_vm2, %v4979_v27  ;;  %4527 = vmatprep.mubr.msk.bf16.mxu0 %vm444_vm2, %v4980_v28  ;;  %v5023_v5 = vld [vmem:[%s5278_s24 + $0x60] sm:$0xff]   ;;  %v5024_v15 = vld [vmem:[%s5278_s24 + $0x30] sm:$0xff]   ;;  %v5025_v16 = vld [vmem:[%s5278_s24 + $0x68] sm:$0xff]  }
  0x26   : > { %v5027_v18 = vld [vmem:[%s5278_s24 + $0x70] sm:$0xff]   ;;  %v5029_v20 = vld [vmem:[%s5278_s24 + $0x78] sm:$0xff]   ;;  %v5030_v21 = vld [vmem:[%s5278_s24 + $0x48] sm:$0xff]  }
  0x27   : > { %v5031_v22 = vld [vmem:[%s5254_s15] sm:$0xff]   ;;  %v5032_v23 = vld [vmem:[%s5278_s24 + $0x50] sm:$0xff]   ;;  %v5033_v24 = vld [vmem:[%s5254_s15 + $0x8] sm:$0xff]  }
  0x28   : > { %v5034_v25 = vld [vmem:[%s5278_s24 + $0x58] sm:$0xff]   ;;  %v5035_v26 = vld [vmem:[%s5254_s15 + $0x10] sm:$0xff]   ;;  %v5036_v27 = vld [vmem:[%s5278_s24 + $0x60] sm:$0xff]  }
  0x29   : > { %v5037_v28 = vld [vmem:[%s5254_s15 + $0x18] sm:$0xff]   ;;  %v5060_v51 = vld [vmem:[%s5215_s8 + $0x40] sm:$0xff]   ;;  %v5081_v9 = vld [vmem:[%s5278_s24 + $0x50] sm:$0xff]  }
  0x2a   : > { %v5042_v33 = vld [vmem:[%s5278_s24 + $0x78] sm:$0xff]  }
  0x2c   : > { %4392 = vmatmul.mubr.msk.bf16.gmra.mrb[12].mxu1 %vm444_vm2, %v4981_v29  ;;  %4528 = vmatmul.mubr.msk.bf16.gmra.mrb[12].mxu0 %vm444_vm2, %v4982_v30  ;;  %v5038_v29 = vld [vmem:[%s5278_s24 + $0x68] sm:$0xff]   ;;  %v5039_v30 = vld [vmem:[%s5254_s15 + $0x20] sm:$0xff]  }
  0x2d   : > { %4395 = vmatprep.mubr.msk.bf16.mxu1 %vm444_vm2, %v4983_v31  ;;  %4549 = vmatprep.mubr.msk.bf16.mxu0 %vm444_vm2, %v4984_v32  ;;  %v5040_v31 = vld [vmem:[%s5278_s24 + $0x70] sm:$0xff]   ;;  %v5041_v32 = vld [vmem:[%s5254_s15 + $0x28] sm:$0xff]  }
  0x34   : > { %4396 = vmatmul.mubr.msk.bf16.gmra.mrb[16].mxu1 %vm444_vm2, %v4985_v34  ;;  %4550 = vmatmul.mubr.msk.bf16.vlgmr.msra.gmra.mrb[0].mxu0 %vm444_vm2, %v4986_v35  ;;  %v5043_v34 = vld [vmem:[%s5254_s15 + $0x30] sm:$0xff]   ;;  %v5044_v35 = vld [vmem:[%s5278_s24 + $0x80] sm:$0xff]  }
  0x35   : > { %4399 = vmatprep.mubr.msk.bf16.mxu1 %vm444_vm2, %v4987_v36  ;;  %4582 = vmatpush3.bf16.msra.mxu0 %v2562_v17  ;;  %v5026_v17 = vld [vmem:[%s5278_s24 + $0x38] sm:$0xff]  }
  0x36   : > { %4553 = vmatprep.mubr.msk.bf16.mxu0 %vm444_vm2, %v4988_v37  ;;  %4615 = vmatprep.subr.bf16.mxu0 %v5284_v38  ;;  %v5045_v36 = vld [vmem:[%s5254_s15 + $0x38] sm:$0xff]   ;;  %v5046_v37 = vld [vmem:[%s5278_s24 + $0x88] sm:$0xff]  }
  0x3c   : > { %4400 = vmatmul.mubr.msk.bf16.gmra.mrb[20].mxu1 %vm444_vm2, %v4989_v39  ;;  %4554 = vmatmul.mubr.msk.bf16.gmra.mrb[4].mxu0 %vm444_vm2, %v4990_v40  ;;  %v5048_v39 = vld [vmem:[%s5215_s8 + $0x10] sm:$0xff]   ;;  %v5049_v40 = vld [vmem:[%s5254_s15 + $0x48] sm:$0xff]  }
  0x3d   : > { %4403 = vmatprep.mubr.msk.bf16.mxu1 %vm444_vm2, %v4991_v41  ;;  %4557 = vmatprep.mubr.msk.bf16.mxu0 %vm444_vm2, %v4992_v42  ;;  %v5050_v41 = vld [vmem:[%s5215_s8 + $0x18] sm:$0xff]   ;;  %v5051_v42 = vld [vmem:[%s5254_s15 + $0x50] sm:$0xff]  }
  0x44   : > { %4404 = vmatmul.mubr.msk.bf16.gmra.mrb[24].mxu1 %vm444_vm2, %v4993_v43  ;;  %4558 = vmatmul.mubr.msk.bf16.gmra.mrb[8].mxu0 %vm444_vm2, %v4994_v44  ;;  %v5052_v43 = vld [vmem:[%s5215_s8 + $0x20] sm:$0xff]   ;;  %v5053_v44 = vld [vmem:[%s5254_s15 + $0x58] sm:$0xff]  }
  0x45   : > { %4407 = vmatprep.mubr.msk.bf16.mxu1 %vm444_vm2, %v4995_v45  ;;  %4561 = vmatprep.mubr.msk.bf16.mxu0 %vm444_vm2, %v4996_v46  ;;  %v5054_v45 = vld [vmem:[%s5215_s8 + $0x28] sm:$0xff]   ;;  %v5055_v46 = vld [vmem:[%s5254_s15 + $0x60] sm:$0xff]  }
  0x4c   : > { %4408 = vmatmul.mubr.msk.bf16.gmra.mrb[28].mxu1 %vm444_vm2, %v4997_v47  ;;  %4562 = vmatmul.mubr.msk.bf16.gmra.mrb[12].mxu0 %vm444_vm2, %v4998_v48  ;;  %v5056_v47 = vld [vmem:[%s5215_s8 + $0x30] sm:$0xff]   ;;  %v5057_v48 = vld [vmem:[%s5254_s15 + $0x68] sm:$0xff]  }
  0x4d   : > { %4413 = vmatprep.mubr.msk.bf16.mxu1 %vm444_vm2, %v4999_v49  ;;  %4565 = vmatprep.mubr.msk.bf16.mxu0 %vm444_vm2, %v5000_v50  ;;  %v5058_v49 = vld [vmem:[%s5215_s8 + $0x38] sm:$0xff]   ;;  %v5059_v50 = vld [vmem:[%s5254_s15 + $0x70] sm:$0xff]  }
  0x54   : > { %4414 = vmatmul.mubr.msk.bf16.vlgmr.msra.gmra.mrb[0].mxu1 %vm444_vm2, %v5001_v52  ;;  %4566 = vmatmul.mubr.msk.bf16.gmra.mrb[16].mxu0 %vm444_vm2, %v5002_v53  ;;  %v5061_v52 = vld [vmem:[%s5254_s15 + $0x78] sm:$0xff]   ;;  %v5062_v53 = vld [vmem:[%s5215_s8 + $0x48] sm:$0xff]  }
  0x55   : > { %4446 = vmatpush3.bf16.msra.mxu1 %v5233_v19  ;;  %4417 = vmatprep.mubr.msk.bf16.mxu1 %vm444_vm2, %v5003_v54  ;;  %v5028_v19 = vld [vmem:[%s5278_s24 + $0x40] sm:$0xff]   ;;  %v5063_v54 = vld [vmem:[%s5278_s24 + $0x8] sm:$0xff]  }
  0x56   : > { %4569 = vmatprep.mubr.msk.bf16.mxu0 %vm444_vm2, %v5004_v55  ;;  %4479 = vmatprep.subr.bf16.mxu1 %v5323_v56  ;;  %v5064_v55 = vld [vmem:[%s5215_s8 + $0x50] sm:$0xff]  }
  0x5c   : > { %4418 = vmatmul.mubr.msk.bf16.gmra.mrb[4].mxu1 %vm444_vm2, %v5005_v57  ;;  %4570 = vmatmul.mubr.msk.bf16.gmra.mrb[20].mxu0 %vm444_vm2, %v5006_v58  ;;  %v5066_v57 = vld [vmem:[%s5215_s8 + $0x58] sm:$0xff]  }
  0x5d   : > { %4421 = vmatprep.mubr.msk.bf16.mxu1 %vm444_vm2, %v5007_v59  ;;  %4573 = vmatprep.mubr.msk.bf16.mxu0 %vm444_vm2, %v5008_v60  ;;  %v5067_v58 = vld [vmem:[%s5278_s24 + $0x18] sm:$0xff]   ;;  %v5068_v59 = vld [vmem:[%s5215_s8 + $0x60] sm:$0xff]  }
  0x5e   : > { %v5069_v60 = vld [vmem:[%s5278_s24 + $0x20] sm:$0xff]  }
  0x64   : > { %4422 = vmatmul.mubr.msk.bf16.gmra.mrb[8].mxu1 %vm444_vm2, %v5009_v61  ;;  %4574 = vmatmul.mubr.msk.bf16.gmra.mrb[24].mxu0 %vm444_vm2, %v5010_v62  ;;  %v5070_v61 = vld [vmem:[%s5215_s8 + $0x68] sm:$0xff]  }
  0x65   : > { %4425 = vmatprep.mubr.msk.bf16.mxu1 %vm444_vm2, %v5011_v63  ;;  %4577 = vmatprep.mubr.msk.bf16.mxu0 %vm444_vm2, %v5012_v0  ;;  %v5071_v62 = vld [vmem:[%s5278_s24 + $0x28] sm:$0xff]   ;;  %v5072_v63 = vld [vmem:[%s5215_s8 + $0x70] sm:$0xff]   ;;  %v5074_v0 = vld [vmem:[%s5215_s8 + $0x78] sm:$0xff]  }
  0x6c   : > { %4426 = vmatmul.mubr.msk.bf16.gmra.mrb[12].mxu1 %vm444_vm2, %v5013_v1  ;;  %4578 = vmatmul.mubr.msk.bf16.gmra.mrb[28].mxu0 %vm444_vm2, %v5014_v2  ;;  %v5075_v1 = vld [vmem:[%s5278_s24 + $0x38] sm:$0xff]   ;;  %v5076_v2 = vld [vmem:[%s5215_s8 + $0x80] sm:$0xff]  }
  0x6d   : > { %4429 = vmatprep.mubr.msk.bf16.mxu1 %vm444_vm2, %v5015_v3  ;;  %4583 = vmatprep.mubr.msk.bf16.mxu0 %vm444_vm2, %v5016_v4  ;;  %v5077_v3 = vld [vmem:[%s5278_s24 + $0x40] sm:$0xff]   ;;  %v5078_v4 = vld [vmem:[%s5215_s8 + $0x88] sm:$0xff]  }
  0x74   : > { %4430 = vmatmul.mubr.msk.bf16.gmra.mrb[16].mxu1 %vm444_vm2, %v5017_v6  ;;  %4584 = vmatmul.mubr.msk.bf16.vlgmr.msra.gmra.mrb[0].mxu0 %vm444_vm2, %v5018_v7  ;;  %v5079_v6 = vld [vmem:[%s5278_s24 + $0x48] sm:$0xff]   ;;  %v5080_v7 = vld [vmem:[%s5254_s15 + $0x10] sm:$0xff]  }
  0x75   : > { %4433 = vmatprep.mubr.msk.bf16.mxu1 %vm444_vm2, %v5019_v10  ;;  %4616 = vmatpush3.bf16.msra.mxu0 %v5284_v38  ;;  %v5047_v38 = vld [vmem:[%s5254_s15 + $0x40] sm:$0xff]   ;;  %v5082_v10 = vld [vmem:[%s5254_s15 + $0x18] sm:$0xff]  }
  0x76   : > { %4587 = vmatprep.mubr.msk.bf16.mxu0 %vm444_vm2, %v5020_v11  ;;  %4649 = vmatprep.subr.bf16.mxu0 %v5363_v12  ;;  %v5083_v11 = vld [vmem:[%s5278_s24 + $0x58] sm:$0xff]  }
  0x7c   : > { %4434 = vmatmul.mubr.msk.bf16.gmra.mrb[20].mxu1 %vm444_vm2, %v5021_v13  ;;  %4588 = vmatmul.mubr.msk.bf16.gmra.mrb[4].mxu0 %vm444_vm2, %v5022_v14  ;;  %v5085_v13 = vld [vmem:[%s5278_s24 + $0x60] sm:$0xff]   ;;  %v5086_v14 = vld [vmem:[%s5254_s15 + $0x28] sm:$0xff]  }
  0x7d   : > { %4437 = vmatprep.mubr.msk.bf16.mxu1 %vm444_vm2, %v5023_v5  ;;  %4591 = vmatprep.mubr.msk.bf16.mxu0 %vm444_vm2, %v5024_v15  ;;  %v5087_v5 = vld [vmem:[%s5278_s24 + $0x68] sm:$0xff]   ;;  %v5088_v15 = vld [vmem:[%s5254_s15 + $0x30] sm:$0xff]  }
  0x84   : > { %4438 = vmatmul.mubr.msk.bf16.gmra.mrb[24].mxu1 %vm444_vm2, %v5025_v16  ;;  %4592 = vmatmul.mubr.msk.bf16.gmra.mrb[8].mxu0 %vm444_vm2, %v5026_v17  ;;  %v5089_v16 = vld [vmem:[%s5278_s24 + $0x70] sm:$0xff]   ;;  %v5090_v17 = vld [vmem:[%s5254_s15 + $0x38] sm:$0xff]  }
  0x85   : > { %4441 = vmatprep.mubr.msk.bf16.mxu1 %vm444_vm2, %v5027_v18  ;;  %4595 = vmatprep.mubr.msk.bf16.mxu0 %vm444_vm2, %v5028_v19  ;;  %v5091_v18 = vld [vmem:[%s5278_s24 + $0x78] sm:$0xff]   ;;  %v5092_v19 = vld [vmem:[%s5254_s15 + $0x40] sm:$0xff]  }
  0x8c   : > { %4442 = vmatmul.mubr.msk.bf16.gmra.mrb[28].mxu1 %vm444_vm2, %v5029_v20  ;;  %4596 = vmatmul.mubr.msk.bf16.gmra.mrb[12].mxu0 %vm444_vm2, %v5030_v21  ;;  %v5093_v20 = vld [vmem:[%s5278_s24 + $0x80] sm:$0xff]   ;;  %v5094_v21 = vld [vmem:[%s5254_s15 + $0x48] sm:$0xff]  }
  0x8d   : > { %4447 = vmatprep.mubr.msk.bf16.mxu1 %vm444_vm2, %v5031_v22  ;;  %4599 = vmatprep.mubr.msk.bf16.mxu0 %vm444_vm2, %v5032_v23  ;;  %v5095_v22 = vld [vmem:[%s5215_s8 + $0x48] sm:$0xff]   ;;  %v5096_v23 = vld [vmem:[%s5254_s15 + $0x50] sm:$0xff]  }
  0x94   : > { %4448 = vmatmul.mubr.msk.bf16.vlgmr.msra.gmra.mrb[0].mxu1 %vm444_vm2, %v5033_v24  ;;  %4600 = vmatmul.mubr.msk.bf16.gmra.mrb[16].mxu0 %vm444_vm2, %v5034_v25  ;;  %v5097_v24 = vld [vmem:[%s5215_s8 + $0x50] sm:$0xff]   ;;  %v5098_v25 = vld [vmem:[%s5254_s15 + $0x58] sm:$0xff]  }
  0x95   : > { %4480 = vmatpush3.bf16.msra.mxu1 %v5323_v56  ;;  %4451 = vmatprep.mubr.msk.bf16.mxu1 %vm444_vm2, %v5035_v26  ;;  %v5065_v56 = vld [vmem:[%s5278_s24 + $0x10] sm:$0xff]   ;;  %v5099_v26 = vld [vmem:[%s5215_s8 + $0x58] sm:$0xff]  }
  0x96   : > { %4603 = vmatprep.mubr.msk.bf16.mxu0 %vm444_vm2, %v5036_v27  ;;  %4683 = vmatprep.subr.bf16.mxu1 %v5202_v8  ;;  %v5100_v27 = vld [vmem:[%s5254_s15 + $0x60] sm:$0xff]  }
  0x9c   : > { %4452 = vmatmul.mubr.msk.bf16.gmra.mrb[4].mxu1 %vm444_vm2, %v5037_v28  ;;  %4604 = vmatmul.mubr.msk.bf16.gmra.mrb[20].mxu0 %vm444_vm2, %v5038_v29  ;;  %v5101_v28 = vld [vmem:[%s5215_s8 + $0x60] sm:$0xff]   ;;  %v5102_v29 = vld [vmem:[%s5254_s15 + $0x68] sm:$0xff]  }
  0x9d   : > { %4455 = vmatprep.mubr.msk.bf16.mxu1 %vm444_vm2, %v5039_v30  ;;  %4607 = vmatprep.mubr.msk.bf16.mxu0 %vm444_vm2, %v5040_v31  ;;  %v5103_v30 = vld [vmem:[%s5215_s8 + $0x68] sm:$0xff]   ;;  %v5104_v31 = vld [vmem:[%s5254_s15 + $0x70] sm:$0xff]  }
  0xa4   : > { %4456 = vmatmul.mubr.msk.bf16.gmra.mrb[8].mxu1 %vm444_vm2, %v5041_v32  ;;  %4608 = vmatmul.mubr.msk.bf16.gmra.mrb[24].mxu0 %vm444_vm2, %v5042_v33  ;;  %v5105_v32 = vld [vmem:[%s5215_s8 + $0x70] sm:$0xff]   ;;  %v5106_v33 = vld [vmem:[%s5254_s15 + $0x78] sm:$0xff]  }
  0xa5   : > { %4459 = vmatprep.mubr.msk.bf16.mxu1 %vm444_vm2, %v5043_v34  ;;  %4611 = vmatprep.mubr.msk.bf16.mxu0 %vm444_vm2, %v5044_v35  ;;  %v5107_v34 = vld [vmem:[%s5215_s8 + $0x78] sm:$0xff]   ;;  %v5108_v35 = vld [vmem:[%s5254_s15 + $0x80] sm:$0xff]  }
  0xac   : > { %4460 = vmatmul.mubr.msk.bf16.gmra.mrb[12].mxu1 %vm444_vm2, %v5045_v36  ;;  %4612 = vmatmul.mubr.msk.bf16.gmra.mrb[28].mxu0 %vm444_vm2, %v5046_v37  ;;  %v5109_v36 = vld [vmem:[%s5215_s8 + $0x80] sm:$0xff]   ;;  %v5110_v37 = vld [vmem:[%s5254_s15 + $0x88] sm:$0xff]  }
  0xad   : > { %4463 = vmatprep.mubr.msk.bf16.mxu1 %vm444_vm2, %v5047_v38  ;;  %4617 = vmatprep.mubr.msk.bf16.mxu0 %vm444_vm2, %v5048_v39 }
  0xb4   : > { %4464 = vmatmul.mubr.msk.bf16.gmra.mrb[16].mxu1 %vm444_vm2, %v5049_v40  ;;  %4618 = vmatmul.mubr.msk.bf16.vlgmr.msra.gmra.mrb[0].mxu0 %vm444_vm2, %v5050_v41 }
  0xb5   : > { %4467 = vmatprep.mubr.msk.bf16.mxu1 %vm444_vm2, %v5051_v42  ;;  %4650 = vmatpush3.bf16.msra.mxu0 %v5363_v12  ;;  %v5084_v12 = vld [vmem:[%s5254_s15 + $0x20] sm:$0xff]  }
  0xb6   : > { %4621 = vmatprep.mubr.msk.bf16.mxu0 %vm444_vm2, %v5052_v43 }
  0xbc   : > { %4468 = vmatmul.mubr.msk.bf16.gmra.mrb[20].mxu1 %vm444_vm2, %v5053_v44  ;;  %4622 = vmatmul.mubr.msk.bf16.gmra.mrb[4].mxu0 %vm444_vm2, %v5054_v45 }
  0xbd   : > { %4471 = vmatprep.mubr.msk.bf16.mxu1 %vm444_vm2, %v5055_v46  ;;  %4625 = vmatprep.mubr.msk.bf16.mxu0 %vm444_vm2, %v5056_v47 }
  0xc4   : > { %4472 = vmatmul.mubr.msk.bf16.gmra.mrb[24].mxu1 %vm444_vm2, %v5057_v48  ;;  %4626 = vmatmul.mubr.msk.bf16.gmra.mrb[8].mxu0 %vm444_vm2, %v5058_v49 }
  0xc5   : > { %4475 = vmatprep.mubr.msk.bf16.mxu1 %vm444_vm2, %v5059_v50  ;;  %4629 = vmatprep.mubr.msk.bf16.mxu0 %vm444_vm2, %v5060_v51 }
  0xcc   : > { %4476 = vmatmul.mubr.msk.bf16.gmra.mrb[28].mxu1 %vm444_vm2, %v5061_v52  ;;  %4630 = vmatmul.mubr.msk.bf16.gmra.mrb[12].mxu0 %vm444_vm2, %v5062_v53 }
  0xcd   : > { %4481 = vmatprep.mubr.msk.bf16.mxu1 %vm444_vm2, %v5063_v54  ;;  %4633 = vmatprep.mubr.msk.bf16.mxu0 %vm444_vm2, %v5064_v55  ;;  %v5566_v55 = vld [vmem:[%s5687_s4] ss:$0 sm:$0xff] }
  0xd4   : > { %4482 = vmatmul.mubr.msk.bf16.vlgmr.msra.gmra.mrb[0].mxu1 %vm444_vm2, %v5065_v56  ;;  %4634 = vmatmul.mubr.msk.bf16.gmra.mrb[16].mxu0 %vm444_vm2, %v5066_v57 }
  0xd5   : > { %4684 = vmatpush3.bf16.msra.mxu1 %v5202_v8  ;;  %4485 = vmatprep.mubr.msk.bf16.mxu1 %vm444_vm2, %v5067_v58  ;;  %v5073_v8 = vld [vmem:[%s5278_s24 + $0x30] sm:$0xff]  }
  0xd6   : > { %4637 = vmatprep.mubr.msk.bf16.mxu0 %vm444_vm2, %v5068_v59 }
  0xdc   : > { %4486 = vmatmul.mubr.msk.bf16.gmra.mrb[4].mxu1 %vm444_vm2, %v5069_v60  ;;  %4638 = vmatmul.mubr.msk.bf16.gmra.mrb[20].mxu0 %vm444_vm2, %v5070_v61 }
  0xdd   : > { %4489 = vmatprep.mubr.msk.bf16.mxu1 %vm444_vm2, %v5071_v62  ;;  %4641 = vmatprep.mubr.msk.bf16.mxu0 %vm444_vm2, %v5072_v63 }
  0xe4   : > { %4490 = vmatmul.mubr.msk.bf16.gmra.mrb[8].mxu1 %vm444_vm2, %v5073_v8  ;;  %4642 = vmatmul.mubr.msk.bf16.gmra.mrb[24].mxu0 %vm444_vm2, %v5074_v0 }
  0xe5   : > { %4493 = vmatprep.mubr.msk.bf16.mxu1 %vm444_vm2, %v5075_v1  ;;  %4645 = vmatprep.mubr.msk.bf16.mxu0 %vm444_vm2, %v5076_v2 }
  0xec   : > { %4494 = vmatmul.mubr.msk.bf16.gmra.mrb[12].mxu1 %vm444_vm2, %v5077_v3  ;;  %4646 = vmatmul.mubr.msk.bf16.gmra.mrb[28].mxu0 %vm444_vm2, %v5078_v4 }
  0xed   : > { %4497 = vmatprep.mubr.msk.bf16.mxu1 %vm444_vm2, %v5079_v6  ;;  %4651 = vmatprep.mubr.msk.bf16.mxu0 %vm444_vm2, %v5080_v7 }
  0xf4   : > { %4498 = vmatmul.mubr.msk.bf16.gmra.mrb[16].mxu1 %vm444_vm2, %v5081_v9  ;;  %4652 = vmatmul.mubr.msk.bf16.vlgmr.msra.gmra.mrb[0].mxu0 %vm444_vm2, %v5082_v10 }
  0xf5   : > { %4501 = vmatprep.mubr.msk.bf16.mxu1 %vm444_vm2, %v5083_v11  ;;  %4655 = vmatprep.mubr.msk.bf16.mxu0 %vm444_vm2, %v5084_v12 }
  0xfc   : > { %4502 = vmatmul.mubr.msk.bf16.gmra.mrb[20].mxu1 %vm444_vm2, %v5085_v13  ;;  %4656 = vmatmul.mubr.msk.bf16.gmra.mrb[4].mxu0 %vm444_vm2, %v5086_v14 }
  0xfd   : > { %4505 = vmatprep.mubr.msk.bf16.mxu1 %vm444_vm2, %v5087_v5  ;;  %4659 = vmatprep.mubr.msk.bf16.mxu0 %vm444_vm2, %v5088_v15 }
 0x104   : > { %4506 = vmatmul.mubr.msk.bf16.gmra.mrb[24].mxu1 %vm444_vm2, %v5089_v16  ;;  %4660 = vmatmul.mubr.msk.bf16.gmra.mrb[8].mxu0 %vm444_vm2, %v5090_v17 }
 0x105   : > { %4509 = vmatprep.mubr.msk.bf16.mxu1 %vm444_vm2, %v5091_v18  ;;  %4663 = vmatprep.mubr.msk.bf16.mxu0 %vm444_vm2, %v5092_v19 }
 0x10c   : > { %4510 = vmatmul.mubr.msk.bf16.gmra.mrb[28].mxu1 %vm444_vm2, %v5093_v20  ;;  %4664 = vmatmul.mubr.msk.bf16.gmra.mrb[12].mxu0 %vm444_vm2, %v5094_v21 }
 0x10d   : > { %4531 = vmatprep.mubr.msk.bf16.mxu1 %vm444_vm2, %v5095_v22  ;;  %4667 = vmatprep.mubr.msk.bf16.mxu0 %vm444_vm2, %v5096_v23 }
 0x114   : > { %4532 = vmatmul.mubr.msk.bf16.vlgmr.msra.gmra.mrb[16].mxu1 %vm444_vm2, %v5097_v24  ;;  %4668 = vmatmul.mubr.msk.bf16.gmra.mrb[16].mxu0 %vm444_vm2, %v5098_v25 }
 0x115   : > { %4535 = vmatprep.mubr.msk.bf16.mxu1 %vm444_vm2, %v5099_v26  ;;  %4671 = vmatprep.mubr.msk.bf16.mxu0 %vm444_vm2, %v5100_v27 }
 0x11c   : > { %4536 = vmatmul.mubr.msk.bf16.gmra.mrb[20].mxu1 %vm444_vm2, %v5101_v28  ;;  %4672 = vmatmul.mubr.msk.bf16.gmra.mrb[20].mxu0 %vm444_vm2, %v5102_v29 }
 0x11d   : > { %4539 = vmatprep.mubr.msk.bf16.mxu1 %vm444_vm2, %v5103_v30  ;;  %4675 = vmatprep.mubr.msk.bf16.mxu0 %vm444_vm2, %v5104_v31 }
 0x124   : > { %4540 = vmatmul.mubr.msk.bf16.gmra.mrb[24].mxu1 %vm444_vm2, %v5105_v32  ;;  %4676 = vmatmul.mubr.msk.bf16.gmra.mrb[24].mxu0 %vm444_vm2, %v5106_v33 }
 0x125   : > { %4543 = vmatprep.mubr.msk.bf16.mxu1 %vm444_vm2, %v5107_v34  ;;  %4679 = vmatprep.mubr.msk.bf16.mxu0 %vm444_vm2, %v5108_v35 }
 0x12c   : > { %4544 = vmatmul.mubr.msk.bf16.gmra.mrb[28].mxu1 %vm444_vm2, %v5109_v36  ;;  %4680 = vmatmul.mubr.msk.bf16.gmra.mrb[28].mxu0 %vm444_vm2, %v5110_v37 }
 0x1a7   : > { %v4483_v38 = vpop.f32.mrb[0].mxu1 }
 0x1a8   : > { %v1516_v39 = vpop.f32.mrb[1].mxu1 }
 0x1a9   : > { %v4484_v40 = vpop.f32.mrb[2].mxu1 }
 0x1aa   : > { %v1519_v41 = vpop.f32.mrb[3].mxu1 }
 0x1af   : > { %v4487_v42 = vpop.f32.mrb[4].mxu1 }
 0x1b0   : > { %v1532_v43 = vpop.f32.mrb[5].mxu1 }
 0x1b1   : > { %v4488_v44 = vpop.f32.mrb[6].mxu1 }
 0x1b2   : > { %v1535_v45 = vpop.f32.mrb[7].mxu1 }
 0x1b7   : > { %v4491_v46 = vpop.f32.mrb[8].mxu1 }
 0x1b8   : > { %v1548_v47 = vpop.f32.mrb[9].mxu1 }
 0x1b9   : > { %v4492_v48 = vpop.f32.mrb[10].mxu1 }
 0x1ba   : > { %v1551_v49 = vpop.f32.mrb[11].mxu1 }
 0x1bf   : > { %v5555_v50 = vpop.f32.mrb[12].mxu1 }
 0x1c0   : > { %v5557_v51 = vpop.f32.mrb[13].mxu1 }
 0x1c1   : > { %v5559_v52 = vpop.f32.mrb[14].mxu1 }
 0x1c2   : > { %v5561_v53 = vpop.f32.mrb[15].mxu1 }
 0x1c7   : > { %v4653_v54 = vpop.f32.mrb[0].mxu0 }
 0x1c8   : > { %v4685_v56 = vadd.f32 %v4653_v54, %v4483_v38  ;;  %v3318_v57 = vpop.f32.mrb[1].mxu0 }
 0x1c9   : > { %v4686_v58 = vadd.f32 %v3318_v57, %v1516_v39  ;;  %v4654_v59 = vpop.f32.mrb[2].mxu0 }
 0x1ca   : > { %v3486_v60 = vadd.f32 %v4685_v56, %v5566_v55  ;;  %v4687_v61 = vadd.f32 %v4654_v59, %v4484_v40  ;;  %v3321_v62 = vpop.f32.mrb[3].mxu0 }
 0x1cb   : > { %v3484_v63 = vadd.f32 %v4686_v58, %v5566_v55  ;;  %v4688_v8 = vadd.f32 %v3321_v62, %v1519_v41 }
 0x1cc   : > { %v3518_v0 = vmax.f32 %v3486_v60, 0.0  ;;  %v3487_v1 = vadd.f32 %v4687_v61, %v5566_v55 }
 0x1cd   : > { %v3516_v2 = vmax.f32 %v3484_v63, 0.0  ;;  %v3485_v3 = vadd.f32 %v4688_v8, %v5566_v55 }
 0x1ce   : > { %3551 = vst.msk [vmem:[%s5573_s9 + $0x10] sm:$0xff] %vm3548_vm3, %v3518_v0  ;;  %v3519_v4 = vmax.f32 %v3487_v1, 0.0 }
 0x1cf   : > { %3549 = vst.msk [vmem:[%s5573_s9] sm:$0xff] %vm3548_vm3, %v3516_v2  ;;  %v3517_v6 = vmax.f32 %v3485_v3, 0.0  ;;  %v4657_v7 = vpop.f32.mrb[4].mxu0 }
 0x1d0   : > { %3552 = vst.msk [vmem:[%s5573_s9 + $0x18] sm:$0xff] %vm3548_vm3, %v3519_v4  ;;  %v4689_v9 = vadd.f32 %v4657_v7, %v4487_v42  ;;  %v3334_v10 = vpop.f32.mrb[5].mxu0 }
 0x1d1   : > { %3550 = vst.msk [vmem:[%s5573_s9 + $0x8] sm:$0xff] %vm3548_vm3, %v3517_v6  ;;  %v4690_v11 = vadd.f32 %v3334_v10, %v1532_v43  ;;  %v4658_v12 = vpop.f32.mrb[6].mxu0 }
 0x1d2   : > { %v3490_v13 = vadd.f32 %v4689_v9, %v5566_v55  ;;  %v4691_v14 = vadd.f32 %v4658_v12, %v4488_v44  ;;  %v3337_v5 = vpop.f32.mrb[7].mxu0 }
 0x1d3   : > { %v3488_v15 = vadd.f32 %v4690_v11, %v5566_v55  ;;  %v4692_v16 = vadd.f32 %v3337_v5, %v1535_v45 }
 0x1d4   : > { %v3522_v17 = vmax.f32 %v3490_v13, 0.0  ;;  %v3491_v18 = vadd.f32 %v4691_v14, %v5566_v55 }
 0x1d5   : > { %v3520_v19 = vmax.f32 %v3488_v15, 0.0  ;;  %v3489_v20 = vadd.f32 %v4692_v16, %v5566_v55 }
 0x1d6   : > { %3555 = vst.msk [vmem:[%s5573_s9 + $0x30] sm:$0xff] %vm3548_vm3, %v3522_v17  ;;  %v3523_v21 = vmax.f32 %v3491_v18, 0.0 }
 0x1d7   : > { %3553 = vst.msk [vmem:[%s5573_s9 + $0x20] sm:$0xff] %vm3548_vm3, %v3520_v19  ;;  %v3521_v22 = vmax.f32 %v3489_v20, 0.0  ;;  %v4661_v23 = vpop.f32.mrb[8].mxu0 }
 0x1d8   : > { %3556 = vst.msk [vmem:[%s5573_s9 + $0x38] sm:$0xff] %vm3548_vm3, %v3523_v21  ;;  %v4693_v24 = vadd.f32 %v4661_v23, %v4491_v46  ;;  %v3350_v25 = vpop.f32.mrb[9].mxu0 }
 0x1d9   : > { %3554 = vst.msk [vmem:[%s5573_s9 + $0x28] sm:$0xff] %vm3548_vm3, %v3521_v22  ;;  %v4694_v26 = vadd.f32 %v3350_v25, %v1548_v47  ;;  %v4662_v27 = vpop.f32.mrb[10].mxu0 }
 0x1da   : > { %v3494_v28 = vadd.f32 %v4693_v24, %v5566_v55  ;;  %v4695_v29 = vadd.f32 %v4662_v27, %v4492_v48  ;;  %v3353_v30 = vpop.f32.mrb[11].mxu0 }
 0x1db   : > { %v3492_v31 = vadd.f32 %v4694_v26, %v5566_v55  ;;  %v4696_v32 = vadd.f32 %v3353_v30, %v1551_v49 }
 0x1dc   : > { %v3526_v33 = vmax.f32 %v3494_v28, 0.0  ;;  %v3495_v34 = vadd.f32 %v4695_v29, %v5566_v55 }
 0x1dd   : > { %v3524_v35 = vmax.f32 %v3492_v31, 0.0  ;;  %v3493_v36 = vadd.f32 %v4696_v32, %v5566_v55 }
 0x1de   : > { %3559 = vst.msk [vmem:[%s5573_s9 + $0x50] sm:$0xff] %vm3548_vm3, %v3526_v33  ;;  %v3527_v37 = vmax.f32 %v3495_v34, 0.0 }
 0x1df   : > { %3557 = vst.msk [vmem:[%s5573_s9 + $0x40] sm:$0xff] %vm3548_vm3, %v3524_v35  ;;  %v3525_v38 = vmax.f32 %v3493_v36, 0.0  ;;  %v4665_v39 = vpop.f32.mrb[12].mxu0 }
 0x1e0   : > { %3560 = vst.msk [vmem:[%s5573_s9 + $0x58] sm:$0xff] %vm3548_vm3, %v3527_v37  ;;  %v4697_v40 = vadd.f32 %v4665_v39, %v5555_v50  ;;  %v3366_v41 = vpop.f32.mrb[13].mxu0 }
 0x1e1   : > { %3558 = vst.msk [vmem:[%s5573_s9 + $0x48] sm:$0xff] %vm3548_vm3, %v3525_v38  ;;  %v4698_v42 = vadd.f32 %v3366_v41, %v5557_v51  ;;  %v4666_v43 = vpop.f32.mrb[14].mxu0 }
 0x1e2   : > { %v3498_v44 = vadd.f32 %v4697_v40, %v5566_v55  ;;  %v4699_v45 = vadd.f32 %v4666_v43, %v5559_v52  ;;  %v3369_v46 = vpop.f32.mrb[15].mxu0 }
 0x1e3   : > { %v3496_v47 = vadd.f32 %v4698_v42, %v5566_v55  ;;  %v4700_v48 = vadd.f32 %v3369_v46, %v5561_v53 }
 0x1e4   : > { %v3530_v49 = vmax.f32 %v3498_v44, 0.0  ;;  %v3499_v50 = vadd.f32 %v4699_v45, %v5566_v55 }
 0x1e5   : > { %v3528_v54 = vmax.f32 %v3496_v47, 0.0  ;;  %v3497_v56 = vadd.f32 %v4700_v48, %v5566_v55 }
 0x1e6   : > { %3563 = vst.msk [vmem:[%s5573_s9 + $0x70] sm:$0xff] %vm3548_vm3, %v3530_v49  ;;  %v3531_v51 = vmax.f32 %v3499_v50, 0.0 }
 0x1e7   : > { %v4533_v57 = vpop.f32.mrb[16].mxu1  ;;  %3561 = vst.msk [vmem:[%s5573_s9 + $0x60] sm:$0xff] %vm3548_vm3, %v3528_v54  ;;  %v3529_v58 = vmax.f32 %v3497_v56, 0.0  ;;  %v4669_v52 = vpop.f32.mrb[16].mxu0 }
 0x1e8   : > { %v1940_v59 = vpop.f32.mrb[17].mxu1  ;;  %3564 = vst.msk [vmem:[%s5573_s9 + $0x78] sm:$0xff] %vm3548_vm3, %v3531_v51  ;;  %v4701_v60 = vadd.f32 %v4669_v52, %v4533_v57  ;;  %v3382_v53 = vpop.f32.mrb[17].mxu0 }
 0x1e9   : > { %v4534_v61 = vpop.f32.mrb[18].mxu1  ;;  %3562 = vst.msk [vmem:[%s5573_s9 + $0x68] sm:$0xff] %vm3548_vm3, %v3529_v58  ;;  %v4702_v62 = vadd.f32 %v3382_v53, %v1940_v59  ;;  %v4670_v63 = vpop.f32.mrb[18].mxu0 }
 0x1ea   : > { %v1943_v8 = vpop.f32.mrb[19].mxu1  ;;  %v3502_v0 = vadd.f32 %v4701_v60, %v5566_v55  ;;  %v4703_v1 = vadd.f32 %v4670_v63, %v4534_v61  ;;  %v3385_v2 = vpop.f32.mrb[19].mxu0 }
 0x1eb   : > { %v3500_v3 = vadd.f32 %v4702_v62, %v5566_v55  ;;  %v4704_v4 = vadd.f32 %v3385_v2, %v1943_v8 }
 0x1ec   : > { %v3534_v6 = vmax.f32 %v3502_v0, 0.0  ;;  %v3503_v7 = vadd.f32 %v4703_v1, %v5566_v55 }
 0x1ed   : > { %v3532_v9 = vmax.f32 %v3500_v3, 0.0  ;;  %v3501_v10 = vadd.f32 %v4704_v4, %v5566_v55 }
 0x1ee   : > { %3567 = vst.msk [vmem:[%s5573_s9 + $0x90] sm:$0xff] %vm3548_vm3, %v3534_v6  ;;  %v3535_v11 = vmax.f32 %v3503_v7, 0.0 }
 0x1ef   : > { %v4537_v12 = vpop.f32.mrb[20].mxu1  ;;  %3565 = vst.msk [vmem:[%s5573_s9 + $0x80] sm:$0xff] %vm3548_vm3, %v3532_v9  ;;  %v3533_v13 = vmax.f32 %v3501_v10, 0.0  ;;  %v4673_v14 = vpop.f32.mrb[20].mxu0 }
 0x1f0   : > { %v1956_v5 = vpop.f32.mrb[21].mxu1  ;;  %3568 = vst.msk [vmem:[%s5573_s9 + $0x98] sm:$0xff] %vm3548_vm3, %v3535_v11  ;;  %v4705_v15 = vadd.f32 %v4673_v14, %v4537_v12  ;;  %v3398_v16 = vpop.f32.mrb[21].mxu0 }
 0x1f1   : > { %v4538_v17 = vpop.f32.mrb[22].mxu1  ;;  %3566 = vst.msk [vmem:[%s5573_s9 + $0x88] sm:$0xff] %vm3548_vm3, %v3533_v13  ;;  %v4706_v18 = vadd.f32 %v3398_v16, %v1956_v5  ;;  %v4674_v19 = vpop.f32.mrb[22].mxu0 }
 0x1f2   : > { %v1959_v20 = vpop.f32.mrb[23].mxu1  ;;  %v3506_v21 = vadd.f32 %v4705_v15, %v5566_v55  ;;  %v4707_v22 = vadd.f32 %v4674_v19, %v4538_v17  ;;  %v3401_v23 = vpop.f32.mrb[23].mxu0 }
 0x1f3   : > { %v3504_v24 = vadd.f32 %v4706_v18, %v5566_v55  ;;  %v4708_v25 = vadd.f32 %v3401_v23, %v1959_v20 }
 0x1f4   : > { %v3538_v26 = vmax.f32 %v3506_v21, 0.0  ;;  %v3507_v27 = vadd.f32 %v4707_v22, %v5566_v55 }
 0x1f5   : > { %v3536_v28 = vmax.f32 %v3504_v24, 0.0  ;;  %v3505_v29 = vadd.f32 %v4708_v25, %v5566_v55 }
 0x1f6   : > { %3571 = vst.msk [vmem:[%s5573_s9 + $0xb0] sm:$0xff] %vm3548_vm3, %v3538_v26  ;;  %v3539_v30 = vmax.f32 %v3507_v27, 0.0 }
 0x1f7   : > { %v4541_v31 = vpop.f32.mrb[24].mxu1  ;;  %3569 = vst.msk [vmem:[%s5573_s9 + $0xa0] sm:$0xff] %vm3548_vm3, %v3536_v28  ;;  %v3537_v32 = vmax.f32 %v3505_v29, 0.0  ;;  %v4677_v33 = vpop.f32.mrb[24].mxu0 }
 0x1f8   : > { %v1972_v34 = vpop.f32.mrb[25].mxu1  ;;  %3572 = vst.msk [vmem:[%s5573_s9 + $0xb8] sm:$0xff] %vm3548_vm3, %v3539_v30  ;;  %v4709_v35 = vadd.f32 %v4677_v33, %v4541_v31  ;;  %v3414_v36 = vpop.f32.mrb[25].mxu0 }
 0x1f9   : > { %v4542_v37 = vpop.f32.mrb[26].mxu1  ;;  %3570 = vst.msk [vmem:[%s5573_s9 + $0xa8] sm:$0xff] %vm3548_vm3, %v3537_v32  ;;  %v4710_v38 = vadd.f32 %v3414_v36, %v1972_v34  ;;  %v4678_v39 = vpop.f32.mrb[26].mxu0 }
 0x1fa   : > { %v1975_v40 = vpop.f32.mrb[27].mxu1  ;;  %v3510_v41 = vadd.f32 %v4709_v35, %v5566_v55  ;;  %v4711_v42 = vadd.f32 %v4678_v39, %v4542_v37  ;;  %v3417_v43 = vpop.f32.mrb[27].mxu0 }
 0x1fb   : > { %v3508_v44 = vadd.f32 %v4710_v38, %v5566_v55  ;;  %v4712_v45 = vadd.f32 %v3417_v43, %v1975_v40 }
 0x1fc   : > { %v3542_v46 = vmax.f32 %v3510_v41, 0.0  ;;  %v3511_v47 = vadd.f32 %v4711_v42, %v5566_v55 }
 0x1fd   : > { %v3540_v48 = vmax.f32 %v3508_v44, 0.0  ;;  %v3509_v49 = vadd.f32 %v4712_v45, %v5566_v55 }
 0x1fe   : > { %3575 = vst.msk [vmem:[%s5573_s9 + $0xd0] sm:$0xff] %vm3548_vm3, %v3542_v46  ;;  %v3543_v50 = vmax.f32 %v3511_v47, 0.0 }
 0x1ff   : > { %v4545_v54 = vpop.f32.mrb[28].mxu1  ;;  %3573 = vst.msk [vmem:[%s5573_s9 + $0xc0] sm:$0xff] %vm3548_vm3, %v3540_v48  ;;  %v3541_v56 = vmax.f32 %v3509_v49, 0.0  ;;  %v4681_v51 = vpop.f32.mrb[28].mxu0 }
 0x200   : > { %v1988_v57 = vpop.f32.mrb[29].mxu1  ;;  %3576 = vst.msk [vmem:[%s5573_s9 + $0xd8] sm:$0xff] %vm3548_vm3, %v3543_v50  ;;  %v4713_v58 = vadd.f32 %v4681_v51, %v4545_v54  ;;  %v3430_v52 = vpop.f32.mrb[29].mxu0 }
 0x201   : > { %v4546_v59 = vpop.f32.mrb[30].mxu1  ;;  %3574 = vst.msk [vmem:[%s5573_s9 + $0xc8] sm:$0xff] %vm3548_vm3, %v3541_v56  ;;  %v4714_v60 = vadd.f32 %v3430_v52, %v1988_v57  ;;  %v4682_v53 = vpop.f32.mrb[30].mxu0 }
 0x202   : > { %v1991_v61 = vpop.f32.mrb[31].mxu1  ;;  %v3514_v62 = vadd.f32 %v4713_v58, %v5566_v55  ;;  %v4715_v63 = vadd.f32 %v4682_v53, %v4546_v59  ;;  %v3433_v8 = vpop.f32.mrb[31].mxu0 }
 0x203   : > { %v3512_v0 = vadd.f32 %v4714_v60, %v5566_v55  ;;  %v4716_v1 = vadd.f32 %v3433_v8, %v1991_v61 }
 0x204   : > { %v3546_v2 = vmax.f32 %v3514_v62, 0.0  ;;  %v3515_v3 = vadd.f32 %v4715_v63, %v5566_v55 }
 0x205   : > { %v3544_v4 = vmax.f32 %v3512_v0, 0.0  ;;  %v3513_v6 = vadd.f32 %v4716_v1, %v5566_v55 }
 0x206   : > { %3579 = vst.msk [vmem:[%s5573_s9 + $0xf0] sm:$0xff] %vm3548_vm3, %v3546_v2  ;;  %v3547_v7 = vmax.f32 %v3515_v3, 0.0 }
 0x207   : > { %3577 = vst.msk [vmem:[%s5573_s9 + $0xe0] sm:$0xff] %vm3548_vm3, %v3544_v4  ;;  %v3545_v9 = vmax.f32 %v3513_v6, 0.0 }
 0x208   : > { %3580 = vst.msk [vmem:[%s5573_s9 + $0xf8] sm:$0xff] %vm3548_vm3, %v3547_v7 }
 0x209   : > { %3578 = vst.msk [vmem:[%s5573_s9 + $0xe8] sm:$0xff] %vm3548_vm3, %v3545_v9 }
 0x20a PF: > { %s15_s20 = sadd.s32 1, %s5133_s20   ;;  %s5689_s18 = smov %s5129_s19 }
 0x20b   : > { %p12_p5 = scmp.ge.s32.totalorder %s15_s20, 4   ;;  %s5690_s19 = smov %s5692_s21 }
 0x20d   :  { %14 = sbr.rel (!%p12_p5) target bundleno = 2 (0x2), region = 93 }

// kernel: feature_matching_forward.14
= control target key start
LH: loop header
LB: loop body
LE: loop exit
PB: predicated region body
PF: predicated region fallthrough
CT: control target
= control target key end

     0   :  { %s5630_s18 = smov 0   ;;  %s5632_s19 = smov 0   ;;  %s6215_s0 = inlined_call_operand.vmem [shape: bf16[2,18,16,64], index: 0, kind: input, shape index: {}]   ;;  %s6216_s1 = inlined_call_operand.vmem [shape: bf16[2,18,16,64], index: 1, kind: input, shape index: {}]   ;;  %s6217_s2 = inlined_call_operand.vmem [shape: bf16[2,18,16,64], index: 2, kind: input, shape index: {}]   ;;  %s6218_s3 = inlined_call_operand.vmem [shape: bf16[3,3,64,64], index: 3, kind: input, shape index: {}]   ;;  %s6219_s4 = inlined_call_operand.vmem [shape: f32[1,64], index: 4, kind: input, shape index: {}]   ;;  %s6220_s5 = inlined_call_operand.vmem [shape: f32[2,16,16,64], index: 5, kind: output, shape index: {}]  }
   0x1   :  { %s5634_s20 = smov 0  }
   0x2 LB: > { %s27_s21 = sadd.s32 1, %s5594_s19  ;;  %p3973_p0 = scmp.ge.s32.totalorder %s5598_s20, 1  ;;  %s5598_s20 = sphi %s5634_s20, %s15_s20   ;;  %s5594_s19 = sphi %s5632_s19, %s6222_s19   ;;  %s5590_s18 = sphi %s5630_s18, %s6221_s18  }
   0x3   : > { %p29_p1 = scmp.ge.s32.totalorder %s27_s21, 2  ;;  %p221_p2 = scmp.lt.s32.totalorder %s5598_s20, 3 }
   0x5   : > { %s6224_s21 = smov (%p29_p1, %s27_s21), 0  ;;  %p222_p3 = pnand %p3973_p0, %p221_p2 }
   0x6   : > { %v5392_v0 = vld [vmem:[%s6218_s3 + $0x20] sm:$0xff] (!%p222_p3)   ;;  %p264_p4 = scmp.lt.s32.totalorder (!%p222_p3), %s5590_s18, 1  ;;  %v5394_v2 = vld [vmem:[%s6218_s3 + $0x28] sm:$0xff] (!%p222_p3)   ;;  %v5396_v4 = vld [vmem:[%s6218_s3 + $0x30] sm:$0xff] (!%p222_p3)   ;;  %vm482_vm0 = vcmask (!%p222_p3), 523264  }
   0x7   : > { %225 = sbr.rel (%p222_p3) target bundleno = 526 (0x20e), region = 40  ;;  %v5393_v1 = vld [vmem:[%s6218_s3 + $0x80] sm:$0xff] (!%p222_p3)   ;;  %4743 = vmatprep.subr.bf16.mxu1 (!%p222_p3), %v5392_v0  ;;  %v5395_v3 = vld [vmem:[%s6218_s3 + $0x88] sm:$0xff] (!%p222_p3)   ;;  %v5397_v5 = vld [vmem:[%s6218_s3 + $0x90] sm:$0xff] (!%p222_p3)  }
   0x8   : > { %4903 = vmatprep.subr.bf16.mxu0 (!%p222_p3), %v5393_v1  ;;  %4744 = vmatpush3.bf16.msra.mxu1 (!%p222_p3), %v5392_v0  ;;  %v5398_v6 = vld [vmem:[%s6218_s3 + $0x38] sm:$0xff] (!%p222_p3)   ;;  %v5403_v10 = vld [vmem:[%s6218_s3] sm:$0xff] (!%p222_p3)   ;;  %v5410_v16 = vld [vmem:[%s6218_s3 + $0xa8] sm:$0xff] (!%p222_p3)  }
   0x9   : > { %4904 = vmatpush3.bf16.msra.mxu0 (!%p222_p3), %v5393_v1  ;;  %4745 = vmatprep.subr.bf16.mxu1 (!%p222_p3), %v5394_v2  ;;  %v5399_v7 = vld [vmem:[%s6218_s3 + $0x98] sm:$0xff] (!%p222_p3)   ;;  %v5405_v11 = vld [vmem:[%s6218_s3 + $0xa0] sm:$0xff] (!%p222_p3)   ;;  %v5414_v20 = vld [vmem:[%s6218_s3 + $0x8] sm:$0xff] (!%p222_p3)  }
   0xa   : > { %4905 = vmatprep.subr.bf16.mxu0 (!%p222_p3), %v5395_v3  ;;  %v5416_v22 = vld [vmem:[%s6218_s3 + $0xb0] sm:$0xff] (!%p222_p3)   ;;  %v5421_v24 = vld [vmem:[%s6218_s3 + $0xb8] sm:$0xff] (!%p222_p3)   ;;  %v5427_v29 = vld [vmem:[%s6218_s3 + $0xc0] sm:$0xff] (!%p222_p3)  }
   0xb   : > { %v5425_v28 = vld [vmem:[%s6218_s3 + $0x10] sm:$0xff] (!%p222_p3)   ;;  %v5435_v34 = vld [vmem:[%s6218_s3 + $0x18] sm:$0xff] (!%p222_p3)   ;;  %v5437_v39 = vld [vmem:[%s6218_s3 + $0xc8] sm:$0xff] (!%p222_p3)  }
   0xc   : > { %4746 = vmatpush3.bf16.msra.mxu1 (!%p222_p3), %v5394_v2  ;;  %v5445_v42 = vld [vmem:[%s6218_s3 + $0x40] sm:$0xff] (!%p222_p3)   ;;  %v5447_v44 = vld [vmem:[%s6218_s3 + $0xd0] sm:$0xff] (!%p222_p3)   ;;  %v5457_v50 = vld [vmem:[%s6218_s3 + $0xd8] sm:$0xff] (!%p222_p3)  }
   0xd   : > { %4906 = vmatpush3.bf16.msra.mxu0 (!%p222_p3), %v5395_v3  ;;  %4747 = vmatprep.subr.bf16.mxu1 (!%p222_p3), %v5396_v4  ;;  %v5467_v55 = vld [vmem:[%s6218_s3 + $0xe0] sm:$0xff] (!%p222_p3)   ;;  %v5455_v60 = vld [vmem:[%s6218_s3 + $0x48] sm:$0xff] (!%p222_p3)   ;;  %v5465_v61 = vld [vmem:[%s6218_s3 + $0x50] sm:$0xff] (!%p222_p3)  }
   0xe   : > { %s6226_s18 = smov (!%p264_p4, %s5590_s18), 1  ;;  %4907 = vmatprep.subr.bf16.mxu0 %v5397_v5  ;;  %v5475_v2 = vld [vmem:[%s6218_s3 + $0x58] sm:$0xff]  }
   0xf   : > { %s5666_s7 = smul.u32 144, %s6226_s18 }
  0x10   : > { %4748 = vmatpush3.bf16.msra.mxu1 %v5396_v4  ;;  %v5834_v4 = vld [vmem:[%s6218_s3 + $0x60] sm:$0xff]  }
  0x11   : > { %s5678_s14 = scalar_lea.vmem %s6216_s1, %s5666_s7  ;;  %4908 = vmatpush3.bf16.msra.mxu0 %v5397_v5  ;;  %4749 = vmatprep.subr.bf16.mxu1 %v5398_v6  ;;  %s5727_s11 = scalar_lea.vmem %s6217_s2, %s5666_s7 }
  0x12   : > { %v5400_v8 = vld [vmem:[%s5678_s14] sm:$0xff]   ;;  %v5401_v9 = vld [vmem:[%s5678_s14 + $0x8] sm:$0xff]   ;;  %4909 = vmatprep.subr.bf16.mxu0 %v5399_v7  ;;  %v5404_v13 = vld [vmem:[%s5678_s14 + $0x10] sm:$0xff]   ;;  %s5763_s27 = scalar_lea.vmem %s6215_s0, %s5666_s7 }
  0x13   : > { %4751 = vmatprep.mubr.msk.bf16.mxu1 %vm482_vm0, %v5400_v8  ;;  %4911 = vmatprep.mubr.msk.bf16.mxu0 %vm482_vm0, %v5401_v9  ;;  %v5402_v12 = vld [vmem:[%s5678_s14 + $0x8] sm:$0xff]   ;;  %v5406_v14 = vld [vmem:[%s5678_s14 + $0x10] sm:$0xff]   ;;  %v5407_v15 = vld [vmem:[%s5678_s14 + $0x18] sm:$0xff]  }
  0x14   : > { %4750 = vmatpush3.bf16.msra.mxu1 %v5398_v6  ;;  %v5408_v17 = vld [vmem:[%s5678_s14 + $0x18] sm:$0xff]   ;;  %v5409_v18 = vld [vmem:[%s5678_s14 + $0x20] sm:$0xff]   ;;  %v5412_v21 = vld [vmem:[%s5678_s14 + $0x28] sm:$0xff]  }
  0x15   : > { %4910 = vmatpush3.bf16.msra.mxu0 %v5399_v7  ;;  %4783 = vmatprep.subr.bf16.mxu1 %v5403_v10  ;;  %v5411_v19 = vld [vmem:[%s5678_s14 + $0x20] sm:$0xff]   ;;  %v5413_v23 = vld [vmem:[%s5678_s14 + $0x28] sm:$0xff]   ;;  %v5415_v25 = vld [vmem:[%s5678_s14 + $0x30] sm:$0xff]  }
  0x16   : > { %4943 = vmatprep.subr.bf16.mxu0 %v5405_v11  ;;  %v5417_v26 = vld [vmem:[%s5678_s14 + $0x30] sm:$0xff]   ;;  %v5418_v27 = vld [vmem:[%s5678_s14 + $0x38] sm:$0xff]   ;;  %v5420_v31 = vld [vmem:[%s5678_s14 + $0x40] sm:$0xff]  }
  0x17   : > { %4752 = vmatmul.mubr.msk.bf16.vlgmr.msra.gmra.mrb[0].mxu1 %vm482_vm0, %v5402_v12  ;;  %v5419_v30 = vld [vmem:[%s5678_s14 + $0x38] sm:$0xff]   ;;  %v5422_v32 = vld [vmem:[%s5678_s14 + $0x40] sm:$0xff]   ;;  %v5423_v33 = vld [vmem:[%s5727_s11 + $0x8] sm:$0xff]  }
  0x18   : > { %4912 = vmatmul.mubr.msk.bf16.vlgmr.msra.gmra.mrb[0].mxu0 %vm482_vm0, %v5404_v13  ;;  %4784 = vmatpush3.bf16.msra.mxu1 %v5403_v10  ;;  %v5424_v35 = vld [vmem:[%s5678_s14 + $0x48] sm:$0xff]   ;;  %v5426_v36 = vld [vmem:[%s5727_s11 + $0x10] sm:$0xff]   ;;  %v5429_v38 = vld [vmem:[%s5727_s11 + $0x18] sm:$0xff]  }
  0x19   : > { %4944 = vmatpush3.bf16.msra.mxu0 %v5405_v11  ;;  %4755 = vmatprep.mubr.msk.bf16.mxu1 %vm482_vm0, %v5406_v14  ;;  %v5428_v37 = vld [vmem:[%s5678_s14 + $0x50] sm:$0xff]   ;;  %v5430_v40 = vld [vmem:[%s5678_s14 + $0x58] sm:$0xff]   ;;  %v5431_v41 = vld [vmem:[%s5727_s11 + $0x20] sm:$0xff]  }
  0x1a   : > { %4915 = vmatprep.mubr.msk.bf16.mxu0 %vm482_vm0, %v5407_v15  ;;  %4945 = vmatprep.subr.bf16.mxu0 %v5410_v16  ;;  %v5432_v43 = vld [vmem:[%s5678_s14 + $0x60] sm:$0xff]   ;;  %v5433_v45 = vld [vmem:[%s5727_s11 + $0x28] sm:$0xff]   ;;  %v5436_v47 = vld [vmem:[%s5727_s11 + $0x30] sm:$0xff]  }
  0x1b   : > { %4785 = vmatprep.subr.bf16.mxu1 %v5414_v20  ;;  %v5434_v46 = vld [vmem:[%s5678_s14 + $0x68] sm:$0xff]   ;;  %v5438_v48 = vld [vmem:[%s5678_s14 + $0x70] sm:$0xff]   ;;  %v5439_v49 = vld [vmem:[%s5727_s11 + $0x38] sm:$0xff]  }
  0x1c   : > { %4786 = vmatpush3.bf16.msra.mxu1 %v5414_v20  ;;  %v5440_v51 = vld [vmem:[%s5678_s14 + $0x78] sm:$0xff]   ;;  %v5441_v52 = vld [vmem:[%s5727_s11 + $0x40] sm:$0xff]   ;;  %v5443_v54 = vld [vmem:[%s5727_s11 + $0x48] sm:$0xff]  }
  0x1d   : > { %4946 = vmatpush3.bf16.msra.mxu0 %v5410_v16  ;;  %4787 = vmatprep.subr.bf16.mxu1 %v5425_v28  ;;  %v5442_v53 = vld [vmem:[%s5763_s27] sm:$0xff]   ;;  %v5444_v56 = vld [vmem:[%s5763_s27 + $0x8] sm:$0xff]   ;;  %v5446_v57 = vld [vmem:[%s5727_s11 + $0x50] sm:$0xff]  }
  0x1e   : > { %4947 = vmatprep.subr.bf16.mxu0 %v5416_v22  ;;  %v5448_v58 = vld [vmem:[%s5763_s27 + $0x10] sm:$0xff]   ;;  %v5449_v59 = vld [vmem:[%s5727_s11 + $0x58] sm:$0xff]   ;;  %v5451_v63 = vld [vmem:[%s5727_s11 + $0x60] sm:$0xff]  }
  0x1f   : > { %4756 = vmatmul.mubr.msk.bf16.gmra.mrb[4].mxu1 %vm482_vm0, %v5408_v17  ;;  %v5450_v62 = vld [vmem:[%s5763_s27 + $0x18] sm:$0xff]   ;;  %v5452_v0 = vld [vmem:[%s5763_s27 + $0x20] sm:$0xff]   ;;  %v5453_v1 = vld [vmem:[%s5727_s11 + $0x68] sm:$0xff]  }
  0x20   : > { %4916 = vmatmul.mubr.msk.bf16.gmra.mrb[4].mxu0 %vm482_vm0, %v5409_v18  ;;  %4759 = vmatprep.mubr.msk.bf16.mxu1 %vm482_vm0, %v5411_v19  ;;  %v5454_v3 = vld [vmem:[%s5763_s27 + $0x28] sm:$0xff]   ;;  %v5456_v5 = vld [vmem:[%s5727_s11 + $0x70] sm:$0xff]   ;;  %v5459_v7 = vld [vmem:[%s5727_s11 + $0x78] sm:$0xff]  }
  0x21   : > { %4919 = vmatprep.mubr.msk.bf16.mxu0 %vm482_vm0, %v5412_v21  ;;  %4948 = vmatpush3.bf16.msra.mxu0 %v5416_v22  ;;  %v5458_v6 = vld [vmem:[%s5763_s27 + $0x30] sm:$0xff]   ;;  %v5460_v8 = vld [vmem:[%s5763_s27 + $0x38] sm:$0xff]   ;;  %v5461_v9 = vld [vmem:[%s5727_s11 + $0x80] sm:$0xff]  }
  0x22   : > { %4949 = vmatprep.subr.bf16.mxu0 %v5421_v24  ;;  %4788 = vmatpush3.bf16.msra.mxu1 %v5425_v28  ;;  %v5462_v10 = vld [vmem:[%s5763_s27 + $0x40] sm:$0xff]   ;;  %v5463_v11 = vld [vmem:[%s5763_s27 + $0x10] sm:$0xff]   ;;  %v5464_v12 = vld [vmem:[%s5763_s27 + $0x48] sm:$0xff]  }
  0x23   : > { %4789 = vmatprep.subr.bf16.mxu1 %v5435_v34  ;;  %v5466_v13 = vld [vmem:[%s5763_s27 + $0x18] sm:$0xff]   ;;  %v5468_v14 = vld [vmem:[%s5763_s27 + $0x50] sm:$0xff]   ;;  %v5469_v15 = vld [vmem:[%s5763_s27 + $0x20] sm:$0xff]  }
  0x24   : > { %v5477_v16 = vld [vmem:[%s6218_s3 + $0xe8] sm:$0xff]   ;;  %v5470_v17 = vld [vmem:[%s5763_s27 + $0x58] sm:$0xff]   ;;  %v5487_v18 = vld [vmem:[%s6218_s3 + $0xf0] sm:$0xff]  }
  0x25   : > { %4950 = vmatpush3.bf16.msra.mxu0 %v5421_v24  ;;  %v5471_v19 = vld [vmem:[%s5763_s27 + $0x28] sm:$0xff]   ;;  %v5472_v20 = vld [vmem:[%s5763_s27 + $0x60] sm:$0xff]   ;;  %v5473_v21 = vld [vmem:[%s5763_s27 + $0x30] sm:$0xff]  }
  0x26   : > { %4983 = vmatprep.subr.bf16.mxu0 %v5427_v29  ;;  %4790 = vmatpush3.bf16.msra.mxu1 %v5435_v34  ;;  %v5497_v22 = vld [vmem:[%s6218_s3 + $0xf8] sm:$0xff]   ;;  %v5881_v24 = vld [vmem:[%s6218_s3 + $0x100] sm:$0xff]   ;;  %v5488_v34 = vld [vmem:[%s5727_s11 + $0x10] sm:$0xff]  }
  0x27   : > { %4760 = vmatmul.mubr.msk.bf16.gmra.mrb[8].mxu1 %vm482_vm0, %v5413_v23  ;;  %4823 = vmatprep.subr.bf16.mxu1 %v5445_v42  ;;  %v5474_v23 = vld [vmem:[%s5763_s27 + $0x68] sm:$0xff]   ;;  %v5480_v28 = vld [vmem:[%s5763_s27 + $0x78] sm:$0xff]  }
  0x28   : > { %4920 = vmatmul.mubr.msk.bf16.gmra.mrb[8].mxu0 %vm482_vm0, %v5415_v25  ;;  %4763 = vmatprep.mubr.msk.bf16.mxu1 %vm482_vm0, %v5417_v26  ;;  %v5476_v25 = vld [vmem:[%s5763_s27 + $0x38] sm:$0xff]   ;;  %v5478_v26 = vld [vmem:[%s5763_s27 + $0x70] sm:$0xff]  }
  0x29   : > { %4923 = vmatprep.mubr.msk.bf16.mxu0 %vm482_vm0, %v5418_v27  ;;  %v5479_v27 = vld [vmem:[%s5763_s27 + $0x40] sm:$0xff]  }
  0x2f   : > { %4764 = vmatmul.mubr.msk.bf16.gmra.mrb[12].mxu1 %vm482_vm0, %v5419_v30  ;;  %v5482_v30 = vld [vmem:[%s5727_s11] sm:$0xff]  }
  0x30   : > { %4924 = vmatmul.mubr.msk.bf16.gmra.mrb[12].mxu0 %vm482_vm0, %v5420_v31  ;;  %4767 = vmatprep.mubr.msk.bf16.mxu1 %vm482_vm0, %v5422_v32  ;;  %v5483_v31 = vld [vmem:[%s5763_s27 + $0x50] sm:$0xff]   ;;  %v5484_v32 = vld [vmem:[%s5727_s11 + $0x8] sm:$0xff]  }
  0x31   : > { %4951 = vmatprep.mubr.msk.bf16.mxu0 %vm482_vm0, %v5423_v33  ;;  %v5486_v33 = vld [vmem:[%s5763_s27 + $0x58] sm:$0xff]  }
  0x37   : > { %4768 = vmatmul.mubr.msk.bf16.gmra.mrb[16].mxu1 %vm482_vm0, %v5424_v35  ;;  %v5489_v35 = vld [vmem:[%s5763_s27 + $0x60] sm:$0xff]  }
  0x38   : > { %4952 = vmatmul.mubr.msk.bf16.vlgmr.msra.gmra.mrb[0].mxu0 %vm482_vm0, %v5426_v36  ;;  %4771 = vmatprep.mubr.msk.bf16.mxu1 %vm482_vm0, %v5428_v37  ;;  %v5495_v36 = vld [vmem:[%s6218_s3 + $0x68] sm:$0xff]   ;;  %v5505_v37 = vld [vmem:[%s6218_s3 + $0x70] sm:$0xff]  }
  0x39   : > { %4984 = vmatpush3.bf16.msra.mxu0 %v5427_v29  ;;  %4955 = vmatprep.mubr.msk.bf16.mxu0 %vm482_vm0, %v5429_v38  ;;  %v5481_v29 = vld [vmem:[%s5763_s27 + $0x48] sm:$0xff]   ;;  %v5490_v38 = vld [vmem:[%s5727_s11 + $0x18] sm:$0xff]  }
  0x3a   : > { %4985 = vmatprep.subr.bf16.mxu0 %v5437_v39 }
  0x3d   : > { %4986 = vmatpush3.bf16.msra.mxu0 %v5437_v39  ;;  %v5491_v39 = vld [vmem:[%s5763_s27 + $0x68] sm:$0xff]  }
  0x3e   : > { %4987 = vmatprep.subr.bf16.mxu0 %v5447_v44 }
  0x3f   : > { %4772 = vmatmul.mubr.msk.bf16.gmra.mrb[20].mxu1 %vm482_vm0, %v5430_v40  ;;  %v5492_v40 = vld [vmem:[%s5727_s11 + $0x20] sm:$0xff]  }
  0x40   : > { %4956 = vmatmul.mubr.msk.bf16.gmra.mrb[4].mxu0 %vm482_vm0, %v5431_v41  ;;  %4775 = vmatprep.mubr.msk.bf16.mxu1 %vm482_vm0, %v5432_v43  ;;  %v5493_v41 = vld [vmem:[%s5763_s27 + $0x70] sm:$0xff]   ;;  %v5494_v43 = vld [vmem:[%s5727_s11 + $0x28] sm:$0xff]  }
  0x41   : > { %4959 = vmatprep.mubr.msk.bf16.mxu0 %vm482_vm0, %v5433_v45  ;;  %4988 = vmatpush3.bf16.msra.mxu0 %v5447_v44  ;;  %v5496_v44 = vld [vmem:[%s5763_s27 + $0x78] sm:$0xff]   ;;  %v5498_v45 = vld [vmem:[%s5727_s11 + $0x30] sm:$0xff]  }
  0x42   : > { %4989 = vmatprep.subr.bf16.mxu0 %v5457_v50 }
  0x45   : > { %4990 = vmatpush3.bf16.msra.mxu0 %v5457_v50  ;;  %v5502_v50 = vld [vmem:[%s5727_s11 + $0x40] sm:$0xff]  }
  0x46   : > { %5023 = vmatprep.subr.bf16.mxu0 %v5467_v55 }
  0x47   : > { %4776 = vmatmul.mubr.msk.bf16.gmra.mrb[24].mxu1 %vm482_vm0, %v5434_v46  ;;  %v5499_v46 = vld [vmem:[%s5763_s27 + $0x80] sm:$0xff]  }
  0x48   : > { %4960 = vmatmul.mubr.msk.bf16.gmra.mrb[8].mxu0 %vm482_vm0, %v5436_v47  ;;  %4779 = vmatprep.mubr.msk.bf16.mxu1 %vm482_vm0, %v5438_v48  ;;  %v5572_v47 = vld [vmem:[%s6218_s3 + $0x80] sm:$0xff]   ;;  %v5500_v48 = vld [vmem:[%s5727_s11 + $0x38] sm:$0xff]  }
  0x49   : > { %4963 = vmatprep.mubr.msk.bf16.mxu0 %vm482_vm0, %v5439_v49  ;;  %v5501_v49 = vld [vmem:[%s5763_s27 + $0x88] sm:$0xff]  }
  0x4f   : > { %4780 = vmatmul.mubr.msk.bf16.gmra.mrb[28].mxu1 %vm482_vm0, %v5440_v51  ;;  %v5503_v51 = vld [vmem:[%s5678_s14 + $0x10] sm:$0xff]  }
  0x50   : > { %4964 = vmatmul.mubr.msk.bf16.gmra.mrb[12].mxu0 %vm482_vm0, %v5441_v52  ;;  %4791 = vmatprep.mubr.msk.bf16.mxu1 %vm482_vm0, %v5442_v53  ;;  %v5504_v52 = vld [vmem:[%s5727_s11 + $0x48] sm:$0xff]   ;;  %v5506_v53 = vld [vmem:[%s5678_s14 + $0x18] sm:$0xff]  }
  0x51   : > { %4967 = vmatprep.mubr.msk.bf16.mxu0 %vm482_vm0, %v5443_v54  ;;  %v5508_v54 = vld [vmem:[%s5727_s11 + $0x50] sm:$0xff]  }
  0x57   : > { %4792 = vmatmul.mubr.msk.bf16.vlgmr.msra.gmra.mrb[0].mxu1 %vm482_vm0, %v5444_v56  ;;  %v5517_v56 = vld [vmem:[%s6218_s3 + $0x108] sm:$0xff]  }
  0x58   : > { %4968 = vmatmul.mubr.msk.bf16.gmra.mrb[16].mxu0 %vm482_vm0, %v5446_v57  ;;  %4824 = vmatpush3.bf16.msra.mxu1 %v5445_v42  ;;  %v5515_v42 = vld [vmem:[%s6218_s3 + $0x78] sm:$0xff]   ;;  %v5526_v57 = vld [vmem:[%s6218_s3 + $0x110] sm:$0xff]  }
  0x59   : > { %4795 = vmatprep.mubr.msk.bf16.mxu1 %vm482_vm0, %v5448_v58  ;;  %4971 = vmatprep.mubr.msk.bf16.mxu0 %vm482_vm0, %v5449_v59  ;;  %v5510_v58 = vld [vmem:[%s5727_s11 + $0x58] sm:$0xff]   ;;  %v5511_v59 = vld [vmem:[%s5678_s14 + $0x28] sm:$0xff]  }
  0x5a   : > { %4825 = vmatprep.subr.bf16.mxu1 %v5455_v60 }
  0x5c   : > { %4826 = vmatpush3.bf16.msra.mxu1 %v5455_v60  ;;  %v5512_v60 = vld [vmem:[%s5727_s11 + $0x60] sm:$0xff]  }
  0x5d   : > { %4827 = vmatprep.subr.bf16.mxu1 %v5465_v61 }
  0x5f   : > { %4796 = vmatmul.mubr.msk.bf16.gmra.mrb[4].mxu1 %vm482_vm0, %v5450_v62  ;;  %v5535_v62 = vld [vmem:[%s6218_s3 + $0x118] sm:$0xff]  }
  0x60   : > { %4972 = vmatmul.mubr.msk.bf16.gmra.mrb[20].mxu0 %vm482_vm0, %v5451_v63  ;;  %4799 = vmatprep.mubr.msk.bf16.mxu1 %vm482_vm0, %v5452_v0  ;;  %v5514_v63 = vld [vmem:[%s5727_s11 + $0x68] sm:$0xff]   ;;  %v5516_v0 = vld [vmem:[%s5678_s14 + $0x38] sm:$0xff]  }
  0x61   : > { %4975 = vmatprep.mubr.msk.bf16.mxu0 %vm482_vm0, %v5453_v1  ;;  %4828 = vmatpush3.bf16.msra.mxu1 %v5465_v61  ;;  %v5513_v61 = vld [vmem:[%s5678_s14 + $0x30] sm:$0xff]  }
  0x62   : > { %4829 = vmatprep.subr.bf16.mxu1 %v5475_v2  ;;  %v5518_v1 = vld [vmem:[%s5727_s11 + $0x70] sm:$0xff]  }
  0x65   : > { %4830 = vmatpush3.bf16.msra.mxu1 %v5475_v2  ;;  %v5519_v2 = vld [vmem:[%s5678_s14 + $0x40] sm:$0xff]  }
  0x66   : > { %4863 = vmatprep.subr.bf16.mxu1 %v5834_v4 }
  0x67   : > { %4800 = vmatmul.mubr.msk.bf16.gmra.mrb[8].mxu1 %vm482_vm0, %v5454_v3  ;;  %v5520_v3 = vld [vmem:[%s5727_s11 + $0x78] sm:$0xff]  }
  0x68   : > { %4976 = vmatmul.mubr.msk.bf16.gmra.mrb[24].mxu0 %vm482_vm0, %v5456_v5  ;;  %4803 = vmatprep.mubr.msk.bf16.mxu1 %vm482_vm0, %v5458_v6  ;;  %v5522_v5 = vld [vmem:[%s5763_s27 + $0x8] sm:$0xff]   ;;  %v5523_v6 = vld [vmem:[%s5678_s14 + $0x50] sm:$0xff]  }
  0x69   : > { %4979 = vmatprep.mubr.msk.bf16.mxu0 %vm482_vm0, %v5459_v7  ;;  %v5524_v7 = vld [vmem:[%s5763_s27 + $0x10] sm:$0xff]  }
  0x6f   : > { %4804 = vmatmul.mubr.msk.bf16.gmra.mrb[12].mxu1 %vm482_vm0, %v5460_v8  ;;  %v5525_v8 = vld [vmem:[%s5678_s14 + $0x58] sm:$0xff]  }
  0x70   : > { %4980 = vmatmul.mubr.msk.bf16.gmra.mrb[28].mxu0 %vm482_vm0, %v5461_v9  ;;  %4807 = vmatprep.mubr.msk.bf16.mxu1 %vm482_vm0, %v5462_v10  ;;  %v5527_v9 = vld [vmem:[%s5763_s27 + $0x18] sm:$0xff]   ;;  %v5528_v10 = vld [vmem:[%s5678_s14 + $0x60] sm:$0xff]  }
  0x71   : > { %4991 = vmatprep.mubr.msk.bf16.mxu0 %vm482_vm0, %v5463_v11  ;;  %v5573_v11 = vld [vmem:[%s6218_s3 + $0x88] sm:$0xff]  }
  0x77   : > { %4808 = vmatmul.mubr.msk.bf16.gmra.mrb[16].mxu1 %vm482_vm0, %v5464_v12  ;;  %v5529_v12 = vld [vmem:[%s5763_s27 + $0x20] sm:$0xff]  }
  0x78   : > { %4992 = vmatmul.mubr.msk.bf16.vlgmr.msra.gmra.mrb[0].mxu0 %vm482_vm0, %v5466_v13  ;;  %4811 = vmatprep.mubr.msk.bf16.mxu1 %vm482_vm0, %v5468_v14  ;;  %v5530_v13 = vld [vmem:[%s5678_s14 + $0x68] sm:$0xff]  }
  0x79   : > { %5024 = vmatpush3.bf16.msra.mxu0 %v5467_v55  ;;  %4995 = vmatprep.mubr.msk.bf16.mxu0 %vm482_vm0, %v5469_v15  ;;  %v5509_v55 = vld [vmem:[%s5678_s14 + $0x20] sm:$0xff]   ;;  %v5531_v14 = vld [vmem:[%s5763_s27 + $0x28] sm:$0xff]   ;;  %v5532_v15 = vld [vmem:[%s5678_s14 + $0x70] sm:$0xff]  }
  0x7a   : > { %5025 = vmatprep.subr.bf16.mxu0 %v5477_v16 }
  0x7d   : > { %5026 = vmatpush3.bf16.msra.mxu0 %v5477_v16  ;;  %v5574_v16 = vld [vmem:[%s6218_s3 + $0x90] sm:$0xff]  }
  0x7e   : > { %5027 = vmatprep.subr.bf16.mxu0 %v5487_v18 }
  0x7f   : > { %4812 = vmatmul.mubr.msk.bf16.gmra.mrb[20].mxu1 %vm482_vm0, %v5470_v17  ;;  %v5575_v17 = vld [vmem:[%s6218_s3 + $0x98] sm:$0xff]  }
  0x80   : > { %4996 = vmatmul.mubr.msk.bf16.gmra.mrb[4].mxu0 %vm482_vm0, %v5471_v19  ;;  %4815 = vmatprep.mubr.msk.bf16.mxu1 %vm482_vm0, %v5472_v20  ;;  %v5534_v19 = vld [vmem:[%s5678_s14 + $0x78] sm:$0xff]  }
  0x81   : > { %4999 = vmatprep.mubr.msk.bf16.mxu0 %vm482_vm0, %v5473_v21  ;;  %5028 = vmatpush3.bf16.msra.mxu0 %v5487_v18  ;;  %v5533_v18 = vld [vmem:[%s5763_s27 + $0x30] sm:$0xff]   ;;  %v5536_v20 = vld [vmem:[%s5763_s27 + $0x38] sm:$0xff]   ;;  %v5537_v21 = vld [vmem:[%s5678_s14 + $0x80] sm:$0xff]  }
  0x82   : > { %5029 = vmatprep.subr.bf16.mxu0 %v5497_v22 }
  0x85   : > { %5030 = vmatpush3.bf16.msra.mxu0 %v5497_v22  ;;  %v5538_v22 = vld [vmem:[%s5763_s27 + $0x40] sm:$0xff]  }
  0x86   : > { %5063 = vmatprep.subr.bf16.mxu0 %v5881_v24 }
  0x87   : > { %4816 = vmatmul.mubr.msk.bf16.gmra.mrb[24].mxu1 %vm482_vm0, %v5474_v23  ;;  %v5539_v23 = vld [vmem:[%s5678_s14 + $0x88] sm:$0xff]  }
  0x88   : > { %5000 = vmatmul.mubr.msk.bf16.gmra.mrb[8].mxu0 %vm482_vm0, %v5476_v25  ;;  %4819 = vmatprep.mubr.msk.bf16.mxu1 %vm482_vm0, %v5478_v26  ;;  %v5541_v25 = vld [vmem:[%s5727_s11 + $0x10] sm:$0xff]  }
  0x89   : > { %5003 = vmatprep.mubr.msk.bf16.mxu0 %vm482_vm0, %v5479_v27  ;;  %v5542_v26 = vld [vmem:[%s5763_s27 + $0x50] sm:$0xff]   ;;  %v5543_v27 = vld [vmem:[%s5727_s11 + $0x18] sm:$0xff]  }
  0x8f   : > { %4820 = vmatmul.mubr.msk.bf16.gmra.mrb[28].mxu1 %vm482_vm0, %v5480_v28  ;;  %v5544_v28 = vld [vmem:[%s5763_s27 + $0x58] sm:$0xff]  }
  0x90   : > { %5004 = vmatmul.mubr.msk.bf16.gmra.mrb[12].mxu0 %vm482_vm0, %v5481_v29  ;;  %4831 = vmatprep.mubr.msk.bf16.mxu1 %vm482_vm0, %v5482_v30  ;;  %v5545_v29 = vld [vmem:[%s5727_s11 + $0x20] sm:$0xff]  }
  0x91   : > { %5007 = vmatprep.mubr.msk.bf16.mxu0 %vm482_vm0, %v5483_v31  ;;  %v5546_v30 = vld [vmem:[%s5763_s27 + $0x60] sm:$0xff]   ;;  %v5547_v31 = vld [vmem:[%s5727_s11 + $0x28] sm:$0xff]  }
  0x97   : > { %4832 = vmatmul.mubr.msk.bf16.vlgmr.msra.gmra.mrb[0].mxu1 %vm482_vm0, %v5484_v32  ;;  %v5548_v32 = vld [vmem:[%s5763_s27 + $0x68] sm:$0xff]  }
  0x98   : > { %5008 = vmatmul.mubr.msk.bf16.gmra.mrb[16].mxu0 %vm482_vm0, %v5486_v33  ;;  %4864 = vmatpush3.bf16.msra.mxu1 %v5834_v4  ;;  %v5521_v4 = vld [vmem:[%s5678_s14 + $0x48] sm:$0xff]   ;;  %v5549_v33 = vld [vmem:[%s5727_s11 + $0x30] sm:$0xff]  }
  0x99   : > { %4835 = vmatprep.mubr.msk.bf16.mxu1 %vm482_vm0, %v5488_v34  ;;  %5011 = vmatprep.mubr.msk.bf16.mxu0 %vm482_vm0, %v5489_v35  ;;  %v5550_v34 = vld [vmem:[%s5763_s27 + $0x70] sm:$0xff]   ;;  %v5551_v35 = vld [vmem:[%s5727_s11 + $0x38] sm:$0xff]  }
  0x9a   : > { %4865 = vmatprep.subr.bf16.mxu1 %v5495_v36 }
  0x9c   : > { %4866 = vmatpush3.bf16.msra.mxu1 %v5495_v36  ;;  %v5552_v36 = vld [vmem:[%s5763_s27 + $0x78] sm:$0xff]  }
  0x9d   : > { %4867 = vmatprep.subr.bf16.mxu1 %v5505_v37 }
  0x9f   : > { %4836 = vmatmul.mubr.msk.bf16.gmra.mrb[4].mxu1 %vm482_vm0, %v5490_v38  ;;  %v5554_v38 = vld [vmem:[%s5763_s27 + $0x80] sm:$0xff]  }
  0xa0   : > { %5012 = vmatmul.mubr.msk.bf16.gmra.mrb[20].mxu0 %vm482_vm0, %v5491_v39  ;;  %4839 = vmatprep.mubr.msk.bf16.mxu1 %vm482_vm0, %v5492_v40  ;;  %v5555_v39 = vld [vmem:[%s5727_s11 + $0x48] sm:$0xff]  }
  0xa1   : > { %5015 = vmatprep.mubr.msk.bf16.mxu0 %vm482_vm0, %v5493_v41  ;;  %4868 = vmatpush3.bf16.msra.mxu1 %v5505_v37  ;;  %v5553_v37 = vld [vmem:[%s5727_s11 + $0x40] sm:$0xff]   ;;  %v5556_v40 = vld [vmem:[%s5678_s14 + $0x48] sm:$0xff]   ;;  %v5557_v41 = vld [vmem:[%s5727_s11 + $0x50] sm:$0xff]  }
  0xa2   : > { %4869 = vmatprep.subr.bf16.mxu1 %v5515_v42 }
  0xa5   : > { %4870 = vmatpush3.bf16.msra.mxu1 %v5515_v42  ;;  %v5558_v42 = vld [vmem:[%s5678_s14 + $0x50] sm:$0xff]  }
  0xa6   : > { %5103 = vmatprep.subr.bf16.mxu1 %v5572_v47 }
  0xa7   : > { %4840 = vmatmul.mubr.msk.bf16.gmra.mrb[8].mxu1 %vm482_vm0, %v5494_v43  ;;  %v5559_v43 = vld [vmem:[%s5727_s11 + $0x58] sm:$0xff]  }
  0xa8   : > { %5016 = vmatmul.mubr.msk.bf16.gmra.mrb[24].mxu0 %vm482_vm0, %v5496_v44  ;;  %4843 = vmatprep.mubr.msk.bf16.mxu1 %vm482_vm0, %v5498_v45  ;;  %v5560_v44 = vld [vmem:[%s5678_s14 + $0x58] sm:$0xff]   ;;  %v5561_v45 = vld [vmem:[%s5727_s11 + $0x60] sm:$0xff]  }
  0xa9   : > { %5019 = vmatprep.mubr.msk.bf16.mxu0 %vm482_vm0, %v5499_v46  ;;  %v5562_v46 = vld [vmem:[%s5678_s14 + $0x60] sm:$0xff]  }
  0xaf   : > { %4844 = vmatmul.mubr.msk.bf16.gmra.mrb[12].mxu1 %vm482_vm0, %v5500_v48  ;;  %v5564_v48 = vld [vmem:[%s5678_s14 + $0x68] sm:$0xff]  }
  0xb0   : > { %5020 = vmatmul.mubr.msk.bf16.gmra.mrb[28].mxu0 %vm482_vm0, %v5501_v49  ;;  %4847 = vmatprep.mubr.msk.bf16.mxu1 %vm482_vm0, %v5502_v50  ;;  %v5565_v49 = vld [vmem:[%s5727_s11 + $0x70] sm:$0xff]  }
  0xb1   : > { %5031 = vmatprep.mubr.msk.bf16.mxu0 %vm482_vm0, %v5503_v51  ;;  %v5566_v50 = vld [vmem:[%s5678_s14 + $0x70] sm:$0xff]   ;;  %v5567_v51 = vld [vmem:[%s5727_s11 + $0x78] sm:$0xff]  }
  0xb7   : > { %4848 = vmatmul.mubr.msk.bf16.gmra.mrb[16].mxu1 %vm482_vm0, %v5504_v52  ;;  %v5568_v52 = vld [vmem:[%s5678_s14 + $0x78] sm:$0xff]  }
  0xb8   : > { %5032 = vmatmul.mubr.msk.bf16.vlgmr.msra.gmra.mrb[0].mxu0 %vm482_vm0, %v5506_v53  ;;  %4851 = vmatprep.mubr.msk.bf16.mxu1 %vm482_vm0, %v5508_v54  ;;  %v5569_v53 = vld [vmem:[%s5727_s11 + $0x80] sm:$0xff]  }
  0xb9   : > { %5064 = vmatpush3.bf16.msra.mxu0 %v5881_v24  ;;  %5035 = vmatprep.mubr.msk.bf16.mxu0 %vm482_vm0, %v5509_v55  ;;  %v5540_v24 = vld [vmem:[%s5763_s27 + $0x48] sm:$0xff]   ;;  %v5570_v54 = vld [vmem:[%s5678_s14 + $0x80] sm:$0xff]   ;;  %s4562_s27 = sshll.u32 %s6226_s18, 8 }
  0xba   : > { %5065 = vmatprep.subr.bf16.mxu0 %v5517_v56  ;;  %v5571_v55 = vld [vmem:[%s5727_s11 + $0x88] sm:$0xff]   ;;  %s6105_s15 = scalar_lea.vmem %s6220_s5, %s4562_s27 }
  0xbd   : > { %5066 = vmatpush3.bf16.msra.mxu0 %v5517_v56 }
  0xbe   : > { %5067 = vmatprep.subr.bf16.mxu0 %v5526_v57 }
  0xbf   : > { %4852 = vmatmul.mubr.msk.bf16.gmra.mrb[20].mxu1 %vm482_vm0, %v5510_v58 }
  0xc0   : > { %5036 = vmatmul.mubr.msk.bf16.gmra.mrb[4].mxu0 %vm482_vm0, %v5511_v59  ;;  %4855 = vmatprep.mubr.msk.bf16.mxu1 %vm482_vm0, %v5512_v60 }
  0xc1   : > { %5039 = vmatprep.mubr.msk.bf16.mxu0 %vm482_vm0, %v5513_v61  ;;  %5068 = vmatpush3.bf16.msra.mxu0 %v5526_v57 }
  0xc2   : > { %5069 = vmatprep.subr.bf16.mxu0 %v5535_v62 }
  0xc5   : > { %5070 = vmatpush3.bf16.msra.mxu0 %v5535_v62 }
  0xc7   : > { %4856 = vmatmul.mubr.msk.bf16.gmra.mrb[24].mxu1 %vm482_vm0, %v5514_v63 }
  0xc8   : > { %5040 = vmatmul.mubr.msk.bf16.gmra.mrb[8].mxu0 %vm482_vm0, %v5516_v0  ;;  %4859 = vmatprep.mubr.msk.bf16.mxu1 %vm482_vm0, %v5518_v1 }
  0xc9   : > { %5043 = vmatprep.mubr.msk.bf16.mxu0 %vm482_vm0, %v5519_v2 }
  0xcf   : > { %4860 = vmatmul.mubr.msk.bf16.gmra.mrb[28].mxu1 %vm482_vm0, %v5520_v3 }
  0xd0   : > { %5044 = vmatmul.mubr.msk.bf16.gmra.mrb[12].mxu0 %vm482_vm0, %v5521_v4  ;;  %4871 = vmatprep.mubr.msk.bf16.mxu1 %vm482_vm0, %v5522_v5 }
  0xd1   : > { %5047 = vmatprep.mubr.msk.bf16.mxu0 %vm482_vm0, %v5523_v6 }
  0xd7   : > { %4872 = vmatmul.mubr.msk.bf16.vlgmr.msra.gmra.mrb[0].mxu1 %vm482_vm0, %v5524_v7 }
  0xd8   : > { %5048 = vmatmul.mubr.msk.bf16.gmra.mrb[16].mxu0 %vm482_vm0, %v5525_v8  ;;  %5107 = vmatpush3.bf16.msra.mxu1 %v5572_v47  ;;  %v5563_v47 = vld [vmem:[%s5727_s11 + $0x68] sm:$0xff]  }
  0xd9   : > { %4875 = vmatprep.mubr.msk.bf16.mxu1 %vm482_vm0, %v5527_v9  ;;  %5051 = vmatprep.mubr.msk.bf16.mxu0 %vm482_vm0, %v5528_v10  ;;  %v6098_v9 = vld [vmem:[%s6219_s4] ss:$0 sm:$0xff] }
  0xda   : > { %5104 = vmatprep.subr.bf16.mxu1 %v5573_v11 }
  0xdc   : > { %5108 = vmatpush3.bf16.msra.mxu1 %v5573_v11 }
  0xdd   : > { %5105 = vmatprep.subr.bf16.mxu1 %v5574_v16 }
  0xdf   : > { %4876 = vmatmul.mubr.msk.bf16.gmra.mrb[4].mxu1 %vm482_vm0, %v5529_v12 }
  0xe0   : > { %5052 = vmatmul.mubr.msk.bf16.gmra.mrb[20].mxu0 %vm482_vm0, %v5530_v13  ;;  %4879 = vmatprep.mubr.msk.bf16.mxu1 %vm482_vm0, %v5531_v14 }
  0xe1   : > { %5055 = vmatprep.mubr.msk.bf16.mxu0 %vm482_vm0, %v5532_v15  ;;  %5109 = vmatpush3.bf16.msra.mxu1 %v5574_v16 }
  0xe2   : > { %5106 = vmatprep.subr.bf16.mxu1 %v5575_v17 }
  0xe5   : > { %5110 = vmatpush3.bf16.msra.mxu1 %v5575_v17 }
  0xe7   : > { %4880 = vmatmul.mubr.msk.bf16.gmra.mrb[8].mxu1 %vm482_vm0, %v5533_v18 }
  0xe8   : > { %5056 = vmatmul.mubr.msk.bf16.gmra.mrb[24].mxu0 %vm482_vm0, %v5534_v19  ;;  %4883 = vmatprep.mubr.msk.bf16.mxu1 %vm482_vm0, %v5536_v20 }
  0xe9   : > { %5059 = vmatprep.mubr.msk.bf16.mxu0 %vm482_vm0, %v5537_v21 }
  0xef   : > { %4884 = vmatmul.mubr.msk.bf16.gmra.mrb[12].mxu1 %vm482_vm0, %v5538_v22 }
  0xf0   : > { %5060 = vmatmul.mubr.msk.bf16.gmra.mrb[28].mxu0 %vm482_vm0, %v5539_v23  ;;  %4887 = vmatprep.mubr.msk.bf16.mxu1 %vm482_vm0, %v5540_v24 }
  0xf1   : > { %5071 = vmatprep.mubr.msk.bf16.mxu0 %vm482_vm0, %v5541_v25 }
  0xf7   : > { %4888 = vmatmul.mubr.msk.bf16.gmra.mrb[16].mxu1 %vm482_vm0, %v5542_v26 }
  0xf8   : > { %5072 = vmatmul.mubr.msk.bf16.vlgmr.msra.gmra.mrb[0].mxu0 %vm482_vm0, %v5543_v27  ;;  %4891 = vmatprep.mubr.msk.bf16.mxu1 %vm482_vm0, %v5544_v28 }
  0xf9   : > { %5075 = vmatprep.mubr.msk.bf16.mxu0 %vm482_vm0, %v5545_v29 }
  0xff   : > { %4892 = vmatmul.mubr.msk.bf16.gmra.mrb[20].mxu1 %vm482_vm0, %v5546_v30 }
 0x100   : > { %5076 = vmatmul.mubr.msk.bf16.gmra.mrb[4].mxu0 %vm482_vm0, %v5547_v31  ;;  %4895 = vmatprep.mubr.msk.bf16.mxu1 %vm482_vm0, %v5548_v32 }
 0x101   : > { %5079 = vmatprep.mubr.msk.bf16.mxu0 %vm482_vm0, %v5549_v33 }
 0x107   : > { %4896 = vmatmul.mubr.msk.bf16.gmra.mrb[24].mxu1 %vm482_vm0, %v5550_v34 }
 0x108   : > { %5080 = vmatmul.mubr.msk.bf16.gmra.mrb[8].mxu0 %vm482_vm0, %v5551_v35  ;;  %4899 = vmatprep.mubr.msk.bf16.mxu1 %vm482_vm0, %v5552_v36 }
 0x109   : > { %5083 = vmatprep.mubr.msk.bf16.mxu0 %vm482_vm0, %v5553_v37 }
 0x10f   : > { %4900 = vmatmul.mubr.msk.bf16.gmra.mrb[28].mxu1 %vm482_vm0, %v5554_v38 }
 0x110   : > { %5084 = vmatmul.mubr.msk.bf16.gmra.mrb[12].mxu0 %vm482_vm0, %v5555_v39  ;;  %4927 = vmatprep.mubr.msk.bf16.mxu1 %vm482_vm0, %v5556_v40 }
 0x111   : > { %5087 = vmatprep.mubr.msk.bf16.mxu0 %vm482_vm0, %v5557_v41 }
 0x117   : > { %4928 = vmatmul.mubr.msk.bf16.vlgmr.msra.gmra.mrb[16].mxu1 %vm482_vm0, %v5558_v42 }
 0x118   : > { %5088 = vmatmul.mubr.msk.bf16.gmra.mrb[16].mxu0 %vm482_vm0, %v5559_v43  ;;  %4931 = vmatprep.mubr.msk.bf16.mxu1 %vm482_vm0, %v5560_v44 }
 0x119   : > { %5091 = vmatprep.mubr.msk.bf16.mxu0 %vm482_vm0, %v5561_v45 }
 0x11f   : > { %4932 = vmatmul.mubr.msk.bf16.gmra.mrb[20].mxu1 %vm482_vm0, %v5562_v46 }
 0x120   : > { %5092 = vmatmul.mubr.msk.bf16.gmra.mrb[20].mxu0 %vm482_vm0, %v5563_v47  ;;  %4935 = vmatprep.mubr.msk.bf16.mxu1 %vm482_vm0, %v5564_v48 }
 0x121   : > { %5095 = vmatprep.mubr.msk.bf16.mxu0 %vm482_vm0, %v5565_v49 }
 0x127   : > { %4936 = vmatmul.mubr.msk.bf16.gmra.mrb[24].mxu1 %vm482_vm0, %v5566_v50 }
 0x128   : > { %5096 = vmatmul.mubr.msk.bf16.gmra.mrb[24].mxu0 %vm482_vm0, %v5567_v51  ;;  %4939 = vmatprep.mubr.msk.bf16.mxu1 %vm482_vm0, %v5568_v52 }
 0x129   : > { %5099 = vmatprep.mubr.msk.bf16.mxu0 %vm482_vm0, %v5569_v53 }
 0x12f   : > { %4940 = vmatmul.mubr.msk.bf16.gmra.mrb[28].mxu1 %vm482_vm0, %v5570_v54 }
 0x130   : > { %5100 = vmatmul.mubr.msk.bf16.gmra.mrb[28].mxu0 %vm482_vm0, %v5571_v55 }
 0x1aa   : > { %v4873_v56 = vpop.f32.mrb[0].mxu1 }
 0x1ab   : > { %v1624_v57 = vpop.f32.mrb[1].mxu1 }
 0x1ac   : > { %v4874_v58 = vpop.f32.mrb[2].mxu1 }
 0x1ad   : > { %v1627_v59 = vpop.f32.mrb[3].mxu1 }
 0x1b2   : > { %v4877_v60 = vpop.f32.mrb[4].mxu1 }
 0x1b3   : > { %v1640_v61 = vpop.f32.mrb[5].mxu1 }
 0x1b4   : > { %v4878_v62 = vpop.f32.mrb[6].mxu1 }
 0x1b5   : > { %v1643_v63 = vpop.f32.mrb[7].mxu1 }
 0x1ba   : > { %v4881_v0 = vpop.f32.mrb[8].mxu1 }
 0x1bb   : > { %v1656_v1 = vpop.f32.mrb[9].mxu1 }
 0x1bc   : > { %v4882_v2 = vpop.f32.mrb[10].mxu1 }
 0x1bd   : > { %v1659_v3 = vpop.f32.mrb[11].mxu1 }
 0x1c2   : > { %v6087_v4 = vpop.f32.mrb[12].mxu1 }
 0x1c3   : > { %v6089_v5 = vpop.f32.mrb[13].mxu1 }
 0x1c4   : > { %v6091_v6 = vpop.f32.mrb[14].mxu1 }
 0x1c5   : > { %v6093_v7 = vpop.f32.mrb[15].mxu1 }
 0x1cb   : > { %v5073_v8 = vpop.f32.mrb[0].mxu0 }
 0x1cc   : > { %v5111_v10 = vadd.f32 %v5073_v8, %v4873_v56  ;;  %v3566_v11 = vpop.f32.mrb[1].mxu0 }
 0x1cd   : > { %v5112_v12 = vadd.f32 %v3566_v11, %v1624_v57  ;;  %v5074_v13 = vpop.f32.mrb[2].mxu0 }
 0x1ce   : > { %v3734_v14 = vadd.f32 %v5111_v10, %v6098_v9  ;;  %v5113_v15 = vadd.f32 %v5074_v13, %v4874_v58  ;;  %v3569_v16 = vpop.f32.mrb[3].mxu0 }
 0x1cf   : > { %v3732_v17 = vadd.f32 %v5112_v12, %v6098_v9  ;;  %v5114_v18 = vadd.f32 %v3569_v16, %v1627_v59 }
 0x1d0   : > { %v3766_v19 = vmax.f32 %v3734_v14, 0.0  ;;  %v3735_v20 = vadd.f32 %v5113_v15, %v6098_v9 }
 0x1d1   : > { %v3764_v21 = vmax.f32 %v3732_v17, 0.0  ;;  %v3733_v22 = vadd.f32 %v5114_v18, %v6098_v9 }
 0x1d2   : > { %3798 = vst.msk [vmem:[%s6105_s15 + $0x10] sm:$0xff] %vm482_vm0, %v3766_v19  ;;  %v3767_v23 = vmax.f32 %v3735_v20, 0.0 }
 0x1d3   : > { %3796 = vst.msk [vmem:[%s6105_s15] sm:$0xff] %vm482_vm0, %v3764_v21  ;;  %v3765_v24 = vmax.f32 %v3733_v22, 0.0  ;;  %v5077_v25 = vpop.f32.mrb[4].mxu0 }
 0x1d4   : > { %3799 = vst.msk [vmem:[%s6105_s15 + $0x18] sm:$0xff] %vm482_vm0, %v3767_v23  ;;  %v5115_v26 = vadd.f32 %v5077_v25, %v4877_v60  ;;  %v3582_v27 = vpop.f32.mrb[5].mxu0 }
 0x1d5   : > { %3797 = vst.msk [vmem:[%s6105_s15 + $0x8] sm:$0xff] %vm482_vm0, %v3765_v24  ;;  %v5116_v28 = vadd.f32 %v3582_v27, %v1640_v61  ;;  %v5078_v29 = vpop.f32.mrb[6].mxu0 }
 0x1d6   : > { %v3738_v30 = vadd.f32 %v5115_v26, %v6098_v9  ;;  %v5117_v31 = vadd.f32 %v5078_v29, %v4878_v62  ;;  %v3585_v32 = vpop.f32.mrb[7].mxu0 }
 0x1d7   : > { %v3736_v33 = vadd.f32 %v5116_v28, %v6098_v9  ;;  %v5118_v34 = vadd.f32 %v3585_v32, %v1643_v63 }
 0x1d8   : > { %v3770_v35 = vmax.f32 %v3738_v30, 0.0  ;;  %v3739_v36 = vadd.f32 %v5117_v31, %v6098_v9 }
 0x1d9   : > { %v3768_v37 = vmax.f32 %v3736_v33, 0.0  ;;  %v3737_v38 = vadd.f32 %v5118_v34, %v6098_v9 }
 0x1da   : > { %3802 = vst.msk [vmem:[%s6105_s15 + $0x30] sm:$0xff] %vm482_vm0, %v3770_v35  ;;  %v3771_v39 = vmax.f32 %v3739_v36, 0.0 }
 0x1db   : > { %3800 = vst.msk [vmem:[%s6105_s15 + $0x20] sm:$0xff] %vm482_vm0, %v3768_v37  ;;  %v3769_v40 = vmax.f32 %v3737_v38, 0.0  ;;  %v5081_v41 = vpop.f32.mrb[8].mxu0 }
 0x1dc   : > { %3803 = vst.msk [vmem:[%s6105_s15 + $0x38] sm:$0xff] %vm482_vm0, %v3771_v39  ;;  %v5119_v42 = vadd.f32 %v5081_v41, %v4881_v0  ;;  %v3598_v43 = vpop.f32.mrb[9].mxu0 }
 0x1dd   : > { %3801 = vst.msk [vmem:[%s6105_s15 + $0x28] sm:$0xff] %vm482_vm0, %v3769_v40  ;;  %v5120_v44 = vadd.f32 %v3598_v43, %v1656_v1  ;;  %v5082_v45 = vpop.f32.mrb[10].mxu0 }
 0x1de   : > { %v3742_v46 = vadd.f32 %v5119_v42, %v6098_v9  ;;  %v5121_v47 = vadd.f32 %v5082_v45, %v4882_v2  ;;  %v3601_v48 = vpop.f32.mrb[11].mxu0 }
 0x1df   : > { %v3740_v49 = vadd.f32 %v5120_v44, %v6098_v9  ;;  %v5122_v50 = vadd.f32 %v3601_v48, %v1659_v3 }
 0x1e0   : > { %v3774_v51 = vmax.f32 %v3742_v46, 0.0  ;;  %v3743_v52 = vadd.f32 %v5121_v47, %v6098_v9 }
 0x1e1   : > { %v3772_v53 = vmax.f32 %v3740_v49, 0.0  ;;  %v3741_v54 = vadd.f32 %v5122_v50, %v6098_v9 }
 0x1e2   : > { %3806 = vst.msk [vmem:[%s6105_s15 + $0x50] sm:$0xff] %vm482_vm0, %v3774_v51  ;;  %v3775_v55 = vmax.f32 %v3743_v52, 0.0 }
 0x1e3   : > { %3804 = vst.msk [vmem:[%s6105_s15 + $0x40] sm:$0xff] %vm482_vm0, %v3772_v53  ;;  %v3773_v56 = vmax.f32 %v3741_v54, 0.0  ;;  %v5085_v57 = vpop.f32.mrb[12].mxu0 }
 0x1e4   : > { %3807 = vst.msk [vmem:[%s6105_s15 + $0x58] sm:$0xff] %vm482_vm0, %v3775_v55  ;;  %v5123_v58 = vadd.f32 %v5085_v57, %v6087_v4  ;;  %v3614_v59 = vpop.f32.mrb[13].mxu0 }
 0x1e5   : > { %3805 = vst.msk [vmem:[%s6105_s15 + $0x48] sm:$0xff] %vm482_vm0, %v3773_v56  ;;  %v5124_v60 = vadd.f32 %v3614_v59, %v6089_v5  ;;  %v5086_v61 = vpop.f32.mrb[14].mxu0 }
 0x1e6   : > { %v3746_v62 = vadd.f32 %v5123_v58, %v6098_v9  ;;  %v5125_v63 = vadd.f32 %v5086_v61, %v6091_v6  ;;  %v3617_v0 = vpop.f32.mrb[15].mxu0 }
 0x1e7   : > { %v3744_v1 = vadd.f32 %v5124_v60, %v6098_v9  ;;  %v5126_v2 = vadd.f32 %v3617_v0, %v6093_v7 }
 0x1e8   : > { %v3778_v3 = vmax.f32 %v3746_v62, 0.0  ;;  %v3747_v4 = vadd.f32 %v5125_v63, %v6098_v9 }
 0x1e9   : > { %v3776_v8 = vmax.f32 %v3744_v1, 0.0  ;;  %v3745_v10 = vadd.f32 %v5126_v2, %v6098_v9 }
 0x1ea   : > { %3810 = vst.msk [vmem:[%s6105_s15 + $0x70] sm:$0xff] %vm482_vm0, %v3778_v3  ;;  %v3779_v5 = vmax.f32 %v3747_v4, 0.0  ;;  %v4929_v11 = vpop.f32.mrb[16].mxu1 }
 0x1eb   : > { %3808 = vst.msk [vmem:[%s6105_s15 + $0x60] sm:$0xff] %vm482_vm0, %v3776_v8  ;;  %v3777_v12 = vmax.f32 %v3745_v10, 0.0  ;;  %v5089_v6 = vpop.f32.mrb[16].mxu0  ;;  %v2076_v13 = vpop.f32.mrb[17].mxu1 }
 0x1ec   : > { %3811 = vst.msk [vmem:[%s6105_s15 + $0x78] sm:$0xff] %vm482_vm0, %v3779_v5  ;;  %v5127_v14 = vadd.f32 %v5089_v6, %v4929_v11  ;;  %v3630_v7 = vpop.f32.mrb[17].mxu0  ;;  %v4930_v15 = vpop.f32.mrb[18].mxu1 }
 0x1ed   : > { %3809 = vst.msk [vmem:[%s6105_s15 + $0x68] sm:$0xff] %vm482_vm0, %v3777_v12  ;;  %v5128_v16 = vadd.f32 %v3630_v7, %v2076_v13  ;;  %v5090_v17 = vpop.f32.mrb[18].mxu0  ;;  %v2079_v18 = vpop.f32.mrb[19].mxu1 }
 0x1ee   : > { %v3750_v19 = vadd.f32 %v5127_v14, %v6098_v9  ;;  %v5129_v20 = vadd.f32 %v5090_v17, %v4930_v15  ;;  %v3633_v21 = vpop.f32.mrb[19].mxu0 }
 0x1ef   : > { %v3748_v22 = vadd.f32 %v5128_v16, %v6098_v9  ;;  %v5130_v23 = vadd.f32 %v3633_v21, %v2079_v18 }
 0x1f0   : > { %v3782_v24 = vmax.f32 %v3750_v19, 0.0  ;;  %v3751_v25 = vadd.f32 %v5129_v20, %v6098_v9 }
 0x1f1   : > { %v3780_v26 = vmax.f32 %v3748_v22, 0.0  ;;  %v3749_v27 = vadd.f32 %v5130_v23, %v6098_v9 }
 0x1f2   : > { %3814 = vst.msk [vmem:[%s6105_s15 + $0x90] sm:$0xff] %vm482_vm0, %v3782_v24  ;;  %v3783_v28 = vmax.f32 %v3751_v25, 0.0  ;;  %v4933_v29 = vpop.f32.mrb[20].mxu1 }
 0x1f3   : > { %3812 = vst.msk [vmem:[%s6105_s15 + $0x80] sm:$0xff] %vm482_vm0, %v3780_v26  ;;  %v3781_v30 = vmax.f32 %v3749_v27, 0.0  ;;  %v5093_v31 = vpop.f32.mrb[20].mxu0  ;;  %v2092_v32 = vpop.f32.mrb[21].mxu1 }
 0x1f4   : > { %3815 = vst.msk [vmem:[%s6105_s15 + $0x98] sm:$0xff] %vm482_vm0, %v3783_v28  ;;  %v5131_v33 = vadd.f32 %v5093_v31, %v4933_v29  ;;  %v3646_v34 = vpop.f32.mrb[21].mxu0  ;;  %v4934_v35 = vpop.f32.mrb[22].mxu1 }
 0x1f5   : > { %3813 = vst.msk [vmem:[%s6105_s15 + $0x88] sm:$0xff] %vm482_vm0, %v3781_v30  ;;  %v5132_v36 = vadd.f32 %v3646_v34, %v2092_v32  ;;  %v5094_v37 = vpop.f32.mrb[22].mxu0  ;;  %v2095_v38 = vpop.f32.mrb[23].mxu1 }
 0x1f6   : > { %v3754_v39 = vadd.f32 %v5131_v33, %v6098_v9  ;;  %v5133_v40 = vadd.f32 %v5094_v37, %v4934_v35  ;;  %v3649_v41 = vpop.f32.mrb[23].mxu0 }
 0x1f7   : > { %v3752_v42 = vadd.f32 %v5132_v36, %v6098_v9  ;;  %v5134_v43 = vadd.f32 %v3649_v41, %v2095_v38 }
 0x1f8   : > { %v3786_v44 = vmax.f32 %v3754_v39, 0.0  ;;  %v3755_v45 = vadd.f32 %v5133_v40, %v6098_v9 }
 0x1f9   : > { %v3784_v46 = vmax.f32 %v3752_v42, 0.0  ;;  %v3753_v47 = vadd.f32 %v5134_v43, %v6098_v9 }
 0x1fa   : > { %3818 = vst.msk [vmem:[%s6105_s15 + $0xb0] sm:$0xff] %vm482_vm0, %v3786_v44  ;;  %v3787_v48 = vmax.f32 %v3755_v45, 0.0  ;;  %v4937_v49 = vpop.f32.mrb[24].mxu1 }
 0x1fb   : > { %3816 = vst.msk [vmem:[%s6105_s15 + $0xa0] sm:$0xff] %vm482_vm0, %v3784_v46  ;;  %v3785_v50 = vmax.f32 %v3753_v47, 0.0  ;;  %v5097_v51 = vpop.f32.mrb[24].mxu0  ;;  %v2108_v52 = vpop.f32.mrb[25].mxu1 }
 0x1fc   : > { %3819 = vst.msk [vmem:[%s6105_s15 + $0xb8] sm:$0xff] %vm482_vm0, %v3787_v48  ;;  %v5135_v53 = vadd.f32 %v5097_v51, %v4937_v49  ;;  %v3662_v54 = vpop.f32.mrb[25].mxu0  ;;  %v4938_v55 = vpop.f32.mrb[26].mxu1 }
 0x1fd   : > { %3817 = vst.msk [vmem:[%s6105_s15 + $0xa8] sm:$0xff] %vm482_vm0, %v3785_v50  ;;  %v5136_v56 = vadd.f32 %v3662_v54, %v2108_v52  ;;  %v5098_v57 = vpop.f32.mrb[26].mxu0  ;;  %v2111_v58 = vpop.f32.mrb[27].mxu1 }
 0x1fe   : > { %v3758_v59 = vadd.f32 %v5135_v53, %v6098_v9  ;;  %v5137_v60 = vadd.f32 %v5098_v57, %v4938_v55  ;;  %v3665_v61 = vpop.f32.mrb[27].mxu0 }
 0x1ff   : > { %v3756_v62 = vadd.f32 %v5136_v56, %v6098_v9  ;;  %v5138_v63 = vadd.f32 %v3665_v61, %v2111_v58 }
 0x200   : > { %v3790_v0 = vmax.f32 %v3758_v59, 0.0  ;;  %v3759_v1 = vadd.f32 %v5137_v60, %v6098_v9 }
 0x201   : > { %v3788_v2 = vmax.f32 %v3756_v62, 0.0  ;;  %v3757_v3 = vadd.f32 %v5138_v63, %v6098_v9 }
 0x202   : > { %3822 = vst.msk [vmem:[%s6105_s15 + $0xd0] sm:$0xff] %vm482_vm0, %v3790_v0  ;;  %v3791_v4 = vmax.f32 %v3759_v1, 0.0  ;;  %v4941_v8 = vpop.f32.mrb[28].mxu1 }
 0x203   : > { %3820 = vst.msk [vmem:[%s6105_s15 + $0xc0] sm:$0xff] %vm482_vm0, %v3788_v2  ;;  %v3789_v10 = vmax.f32 %v3757_v3, 0.0  ;;  %v5101_v5 = vpop.f32.mrb[28].mxu0  ;;  %v2124_v11 = vpop.f32.mrb[29].mxu1 }
 0x204   : > { %3823 = vst.msk [vmem:[%s6105_s15 + $0xd8] sm:$0xff] %vm482_vm0, %v3791_v4  ;;  %v5139_v12 = vadd.f32 %v5101_v5, %v4941_v8  ;;  %v3678_v6 = vpop.f32.mrb[29].mxu0  ;;  %v4942_v13 = vpop.f32.mrb[30].mxu1 }
 0x205   : > { %3821 = vst.msk [vmem:[%s6105_s15 + $0xc8] sm:$0xff] %vm482_vm0, %v3789_v10  ;;  %v5140_v14 = vadd.f32 %v3678_v6, %v2124_v11  ;;  %v5102_v7 = vpop.f32.mrb[30].mxu0  ;;  %v2127_v15 = vpop.f32.mrb[31].mxu1 }
 0x206   : > { %v3762_v16 = vadd.f32 %v5139_v12, %v6098_v9  ;;  %v5141_v17 = vadd.f32 %v5102_v7, %v4942_v13  ;;  %v3681_v18 = vpop.f32.mrb[31].mxu0 }
 0x207   : > { %v3760_v19 = vadd.f32 %v5140_v14, %v6098_v9  ;;  %v5142_v20 = vadd.f32 %v3681_v18, %v2127_v15 }
 0x208   : > { %v3794_v21 = vmax.f32 %v3762_v16, 0.0  ;;  %v3763_v22 = vadd.f32 %v5141_v17, %v6098_v9 }
 0x209   : > { %v3792_v23 = vmax.f32 %v3760_v19, 0.0  ;;  %v3761_v24 = vadd.f32 %v5142_v20, %v6098_v9 }
 0x20a   : > { %3826 = vst.msk [vmem:[%s6105_s15 + $0xf0] sm:$0xff] %vm482_vm0, %v3794_v21  ;;  %v3795_v25 = vmax.f32 %v3763_v22, 0.0 }
 0x20b   : > { %3824 = vst.msk [vmem:[%s6105_s15 + $0xe0] sm:$0xff] %vm482_vm0, %v3792_v23  ;;  %v3793_v26 = vmax.f32 %v3761_v24, 0.0 }
 0x20c   : > { %3827 = vst.msk [vmem:[%s6105_s15 + $0xf8] sm:$0xff] %vm482_vm0, %v3795_v25 }
 0x20d   : > { %3825 = vst.msk [vmem:[%s6105_s15 + $0xe8] sm:$0xff] %vm482_vm0, %v3793_v26 }
 0x20e PF: > { %s15_s20 = sadd.s32 1, %s5598_s20   ;;  %s6221_s18 = smov %s5594_s19 }
 0x20f   : > { %p12_p5 = scmp.ge.s32.totalorder %s15_s20, 4   ;;  %s6222_s19 = smov %s6224_s21 }
 0x211   :  { %14 = sbr.rel (!%p12_p5) target bundleno = 2 (0x2), region = 93 }

// kernel: feature_matching_forward.15
= control target key start
LH: loop header
LB: loop body
LE: loop exit
PB: predicated region body
PF: predicated region fallthrough
CT: control target
= control target key end

     0   :  { %s2447_s18 = smov 0   ;;  %s2449_s19 = smov 0   ;;  %s2684_s0 = inlined_call_operand.vmem [shape: bf16[2,10,8,64], index: 0, kind: input, shape index: {}]   ;;  %s2685_s1 = inlined_call_operand.vmem [shape: bf16[2,10,8,64], index: 1, kind: input, shape index: {}]   ;;  %s2686_s2 = inlined_call_operand.vmem [shape: bf16[2,10,8,64], index: 2, kind: input, shape index: {}]   ;;  %s2687_s3 = inlined_call_operand.vmem [shape: bf16[3,3,64,128], index: 3, kind: input, shape index: {}]   ;;  %s2688_s4 = inlined_call_operand.vmem [shape: f32[1,128], index: 4, kind: input, shape index: {}]   ;;  %s2689_s5 = inlined_call_operand.vmem [shape: f32[2,8,8,128], index: 5, kind: output, shape index: {}]  }
   0x1   :  { %s2451_s20 = smov 0  }
   0x2 LB: > { %s27_s21 = sadd.s32 1, %s2411_s19  ;;  %p1778_p0 = scmp.ge.s32.totalorder %s2415_s20, 1  ;;  %s2415_s20 = sphi %s2451_s20, %s15_s20   ;;  %s2411_s19 = sphi %s2449_s19, %s2691_s19   ;;  %s2407_s18 = sphi %s2447_s18, %s2690_s18  }
   0x3   : > { %p29_p1 = scmp.ge.s32.totalorder %s27_s21, 2  ;;  %p221_p2 = scmp.lt.s32.totalorder %s2415_s20, 3 }
   0x5   : > { %s2693_s21 = smov (%p29_p1, %s27_s21), 0  ;;  %p222_p3 = pnand %p1778_p0, %p221_p2 }
   0x6   : > { %v2321_v0 = vld [vmem:[%s2687_s3 + $0x20] sm:$0xff] (!%p222_p3)   ;;  %p263_p4 = scmp.lt.s32.totalorder (!%p222_p3), %s2407_s18, 1  ;;  %v2323_v2 = vld [vmem:[%s2687_s3 + $0x28] sm:$0xff] (!%p222_p3)   ;;  %v2325_v4 = vld [vmem:[%s2687_s3 + $0x30] sm:$0xff] (!%p222_p3)   ;;  %vm371_vm0 = vcmask (!%p222_p3), 523264  }
   0x7   : > { %225 = sbr.rel (%p222_p3) target bundleno = 310 (0x136), region = 40  ;;  %v2322_v1 = vld [vmem:[%s2687_s3 + $0x80] sm:$0xff] (!%p222_p3)   ;;  %2080 = vmatprep.subr.bf16.mxu1 (!%p222_p3), %v2321_v0  ;;  %v2324_v3 = vld [vmem:[%s2687_s3 + $0x88] sm:$0xff] (!%p222_p3)   ;;  %v2326_v5 = vld [vmem:[%s2687_s3 + $0x90] sm:$0xff] (!%p222_p3)  }
   0x8   : > { %2144 = vmatprep.subr.bf16.mxu0 (!%p222_p3), %v2322_v1  ;;  %2081 = vmatpush3.bf16.msra.mxu1 (!%p222_p3), %v2321_v0  ;;  %v2327_v6 = vld [vmem:[%s2687_s3 + $0x38] sm:$0xff] (!%p222_p3)   ;;  %v2332_v11 = vld [vmem:[%s2687_s3] sm:$0xff] (!%p222_p3)   ;;  %v2335_v14 = vld [vmem:[%s2687_s3 + $0x8] sm:$0xff] (!%p222_p3)  }
   0x9   : > { %2145 = vmatpush3.bf16.msra.mxu0 (!%p222_p3), %v2322_v1  ;;  %2082 = vmatprep.subr.bf16.mxu1 (!%p222_p3), %v2323_v2  ;;  %v2328_v7 = vld [vmem:[%s2687_s3 + $0x98] sm:$0xff] (!%p222_p3)   ;;  %v2334_v12 = vld [vmem:[%s2687_s3 + $0xa0] sm:$0xff] (!%p222_p3)   ;;  %v2336_v15 = vld [vmem:[%s2687_s3 + $0xa8] sm:$0xff] (!%p222_p3)  }
   0xa   : > { %2146 = vmatprep.subr.bf16.mxu0 (!%p222_p3), %v2324_v3  ;;  %v2340_v19 = vld [vmem:[%s2687_s3 + $0x10] sm:$0xff] (!%p222_p3)   ;;  %v2343_v22 = vld [vmem:[%s2687_s3 + $0x18] sm:$0xff] (!%p222_p3)   ;;  %v2348_v27 = vld [vmem:[%s2687_s3 + $0x40] sm:$0xff] (!%p222_p3)  }
   0xb   : > { %v2342_v20 = vld [vmem:[%s2687_s3 + $0xb0] sm:$0xff] (!%p222_p3)   ;;  %v2344_v23 = vld [vmem:[%s2687_s3 + $0xb8] sm:$0xff] (!%p222_p3)   ;;  %v2350_v28 = vld [vmem:[%s2687_s3 + $0xc0] sm:$0xff] (!%p222_p3)  }
   0xc   : > { %2083 = vmatpush3.bf16.msra.mxu1 (!%p222_p3), %v2323_v2  ;;  %v2351_v30 = vld [vmem:[%s2687_s3 + $0x48] sm:$0xff] (!%p222_p3)   ;;  %v2356_v35 = vld [vmem:[%s2687_s3 + $0x50] sm:$0xff] (!%p222_p3)   ;;  %v2359_v38 = vld [vmem:[%s2687_s3 + $0x58] sm:$0xff] (!%p222_p3)  }
   0xd   : > { %2147 = vmatpush3.bf16.msra.mxu0 (!%p222_p3), %v2324_v3  ;;  %2084 = vmatprep.subr.bf16.mxu1 (!%p222_p3), %v2325_v4  ;;  %v2352_v31 = vld [vmem:[%s2687_s3 + $0xc8] sm:$0xff] (!%p222_p3)   ;;  %v2358_v36 = vld [vmem:[%s2687_s3 + $0xd0] sm:$0xff] (!%p222_p3)   ;;  %v2360_v39 = vld [vmem:[%s2687_s3 + $0xd8] sm:$0xff] (!%p222_p3)  }
   0xe   : > { %s2695_s18 = smov (!%p263_p4, %s2407_s18), 1  ;;  %2148 = vmatprep.subr.bf16.mxu0 %v2326_v5  ;;  %v2364_v43 = vld [vmem:[%s2687_s3 + $0x60] sm:$0xff]   ;;  %v2367_v46 = vld [vmem:[%s2687_s3 + $0x68] sm:$0xff]   ;;  %v2372_v51 = vld [vmem:[%s2687_s3 + $0x70] sm:$0xff]  }
   0xf   : > { %s2483_s7 = smul.u32 40, %s2695_s18  ;;  %v2366_v44 = vld [vmem:[%s2687_s3 + $0xe0] sm:$0xff]   ;;  %v2368_v47 = vld [vmem:[%s2687_s3 + $0xe8] sm:$0xff]   ;;  %v2374_v52 = vld [vmem:[%s2687_s3 + $0xf0] sm:$0xff]  }
  0x10   : > { %2085 = vmatpush3.bf16.msra.mxu1 %v2325_v4  ;;  %v2375_v54 = vld [vmem:[%s2687_s3 + $0x78] sm:$0xff]   ;;  %v2381_v58 = vld [vmem:[%s2687_s3 + $0x100] sm:$0xff]   ;;  %v2382_v61 = vld [vmem:[%s2687_s3 + $0x108] sm:$0xff]  }
  0x11   : > { %s2495_s14 = scalar_lea.vmem %s2685_s1, %s2483_s7  ;;  %2149 = vmatpush3.bf16.msra.mxu0 %v2326_v5  ;;  %2086 = vmatprep.subr.bf16.mxu1 %v2327_v6  ;;  %s2536_s11 = scalar_lea.vmem %s2684_s0, %s2483_s7  ;;  %v2376_v55 = vld [vmem:[%s2687_s3 + $0xf8] sm:$0xff]   ;;  %v2387_v0 = vld [vmem:[%s2687_s3 + $0x110] sm:$0xff]  }
  0x12   : > { %v2329_v8 = vld [vmem:[%s2495_s14] sm:$0xff]   ;;  %v2331_v10 = vld [vmem:[%s2495_s14 + $0x8] sm:$0xff]   ;;  %2150 = vmatprep.subr.bf16.mxu0 %v2328_v7  ;;  %v2337_v16 = vld [vmem:[%s2495_s14 + $0x10] sm:$0xff]   ;;  %s2545_s17 = scalar_lea.vmem %s2686_s2, %s2483_s7 }
  0x13   : > { %v2330_v9 = vld [vmem:[%s2495_s14 + $0x4] sm:$0xff]   ;;  %2088 = vmatprep.mubr.msk.bf16.mxu1 %vm371_vm0, %v2329_v8  ;;  %v2333_v13 = vld [vmem:[%s2495_s14 + $0xc] sm:$0xff]   ;;  %v2338_v17 = vld [vmem:[%s2495_s14 + $0x14] sm:$0xff]  }
  0x14   : > { %2152 = vmatprep.mubr.msk.bf16.mxu0 %vm371_vm0, %v2330_v9  ;;  %2087 = vmatpush3.bf16.msra.mxu1 %v2327_v6  ;;  %v2339_v18 = vld [vmem:[%s2495_s14 + $0x18] sm:$0xff]   ;;  %v2345_v24 = vld [vmem:[%s2536_s11] sm:$0xff]   ;;  %v2347_v26 = vld [vmem:[%s2536_s11 + $0x8] sm:$0xff]  }
  0x15   : > { %2151 = vmatpush3.bf16.msra.mxu0 %v2328_v7  ;;  %2096 = vmatprep.subr.bf16.mxu1 %v2332_v11  ;;  %v2341_v21 = vld [vmem:[%s2495_s14 + $0x1c] sm:$0xff]   ;;  %v2346_v25 = vld [vmem:[%s2545_s17 + $0x4] sm:$0xff]   ;;  %v2349_v29 = vld [vmem:[%s2545_s17 + $0xc] sm:$0xff]  }
  0x16   : > { %2160 = vmatprep.subr.bf16.mxu0 %v2334_v12  ;;  %v2353_v32 = vld [vmem:[%s2536_s11 + $0x10] sm:$0xff]   ;;  %v2355_v34 = vld [vmem:[%s2536_s11 + $0x18] sm:$0xff]   ;;  %v2361_v40 = vld [vmem:[%s2545_s17] sm:$0xff]  }
  0x17   : > { %2089 = vmatmul.mubr.msk.bf16.vlgmr.msra.gmra.mrb[0].mxu1 %vm371_vm0, %v2331_v10  ;;  %v2354_v33 = vld [vmem:[%s2545_s17 + $0x14] sm:$0xff]   ;;  %v2357_v37 = vld [vmem:[%s2545_s17 + $0x1c] sm:$0xff]   ;;  %v2362_v41 = vld [vmem:[%s2536_s11 + $0x8] sm:$0xff]  }
  0x18   : > { %2153 = vmatmul.mubr.msk.bf16.vlgmr.msra.gmra.mrb[0].mxu0 %vm371_vm0, %v2333_v13  ;;  %2097 = vmatpush3.bf16.msra.mxu1 %v2332_v11  ;;  %v2363_v42 = vld [vmem:[%s2545_s17 + $0x8] sm:$0xff]   ;;  %v2365_v45 = vld [vmem:[%s2536_s11 + $0x10] sm:$0xff]   ;;  %v2370_v49 = vld [vmem:[%s2536_s11 + $0x18] sm:$0xff]  }
  0x19   : > { %2161 = vmatpush3.bf16.msra.mxu0 %v2334_v12  ;;  %2098 = vmatprep.subr.bf16.mxu1 %v2335_v14  ;;  %v2369_v48 = vld [vmem:[%s2545_s17 + $0x10] sm:$0xff]   ;;  %v2371_v50 = vld [vmem:[%s2545_s17 + $0x18] sm:$0xff]   ;;  %v2373_v53 = vld [vmem:[%s2536_s11 + $0x20] sm:$0xff]  }
  0x1a   : > { %2162 = vmatprep.subr.bf16.mxu0 %v2336_v15  ;;  %2092 = vmatprep.mubr.msk.bf16.mxu1 %vm371_vm0, %v2337_v16  ;;  %v2377_v56 = vld [vmem:[%s2536_s11 + $0x4] sm:$0xff]   ;;  %v2379_v59 = vld [vmem:[%s2536_s11 + $0xc] sm:$0xff]   ;;  %v2383_v62 = vld [vmem:[%s2536_s11 + $0x14] sm:$0xff]  }
  0x1b   : > { %2156 = vmatprep.mubr.msk.bf16.mxu0 %vm371_vm0, %v2338_v17  ;;  %v2378_v57 = vld [vmem:[%s2495_s14 + $0x8] sm:$0xff]   ;;  %v2380_v60 = vld [vmem:[%s2495_s14 + $0x10] sm:$0xff]   ;;  %v2384_v63 = vld [vmem:[%s2495_s14 + $0x18] sm:$0xff]  }
  0x1c   : > { %2099 = vmatpush3.bf16.msra.mxu1 %v2335_v14  ;;  %v2385_v1 = vld [vmem:[%s2536_s11 + $0x1c] sm:$0xff]   ;;  %v2389_v4 = vld [vmem:[%s2545_s17 + $0x8] sm:$0xff]   ;;  %v2391_v7 = vld [vmem:[%s2545_s17 + $0x10] sm:$0xff]  }
  0x1d   : > { %2163 = vmatpush3.bf16.msra.mxu0 %v2336_v15  ;;  %2100 = vmatprep.subr.bf16.mxu1 %v2340_v19  ;;  %v2386_v2 = vld [vmem:[%s2495_s14 + $0x20] sm:$0xff]   ;;  %v2388_v3 = vld [vmem:[%s2687_s3 + $0x118] sm:$0xff]  }
  0x1e   : > { %2164 = vmatprep.subr.bf16.mxu0 %v2342_v20  ;;  %v2390_v5 = vld [vmem:[%s2545_s17 + $0x18] sm:$0xff]   ;;  %v2392_v6 = vld [vmem:[%s2545_s17 + $0x20] sm:$0xff]   ;;  %s2007_s17 = sshll.u32 %s2695_s18, 6 }
  0x1f   : > { %2093 = vmatmul.mubr.msk.bf16.gmra.mrb[4].mxu1 %vm371_vm0, %v2339_v18  ;;  %s286_s29 = scalar_lea.vmem %s2689_s5, %s2007_s17 }
  0x20   : > { %2157 = vmatmul.mubr.msk.bf16.gmra.mrb[4].mxu0 %vm371_vm0, %v2341_v21  ;;  %2101 = vmatpush3.bf16.msra.mxu1 %v2340_v19 }
  0x21   : > { %2165 = vmatpush3.bf16.msra.mxu0 %v2342_v20  ;;  %2102 = vmatprep.subr.bf16.mxu1 %v2343_v22 }
  0x22   : > { %2166 = vmatprep.subr.bf16.mxu0 %v2344_v23  ;;  %2104 = vmatprep.mubr.msk.bf16.mxu1 %vm371_vm0, %v2345_v24  ;;  %v2004_v24 = vld [vmem:[%s2688_s4] ss:$0 sm:$0xff] }
  0x23   : > { %2168 = vmatprep.mubr.msk.bf16.mxu0 %vm371_vm0, %v2346_v25 }
  0x24   : > { %2103 = vmatpush3.bf16.msra.mxu1 %v2343_v22 }
  0x25   : > { %2167 = vmatpush3.bf16.msra.mxu0 %v2344_v23  ;;  %2112 = vmatprep.subr.bf16.mxu1 %v2348_v27 }
  0x26   : > { %2176 = vmatprep.subr.bf16.mxu0 %v2350_v28 }
  0x27   : > { %2105 = vmatmul.mubr.msk.bf16.vlgmr.msra.gmra.mrb[0].mxu1 %vm371_vm0, %v2347_v26 }
  0x28   : > { %2169 = vmatmul.mubr.msk.bf16.vlgmr.msra.gmra.mrb[0].mxu0 %vm371_vm0, %v2349_v29  ;;  %2113 = vmatpush3.bf16.msra.mxu1 %v2348_v27 }
  0x29   : > { %2177 = vmatpush3.bf16.msra.mxu0 %v2350_v28  ;;  %2114 = vmatprep.subr.bf16.mxu1 %v2351_v30 }
  0x2a   : > { %2178 = vmatprep.subr.bf16.mxu0 %v2352_v31  ;;  %2108 = vmatprep.mubr.msk.bf16.mxu1 %vm371_vm0, %v2353_v32 }
  0x2b   : > { %2172 = vmatprep.mubr.msk.bf16.mxu0 %vm371_vm0, %v2354_v33 }
  0x2c   : > { %2115 = vmatpush3.bf16.msra.mxu1 %v2351_v30 }
  0x2d   : > { %2179 = vmatpush3.bf16.msra.mxu0 %v2352_v31  ;;  %2116 = vmatprep.subr.bf16.mxu1 %v2356_v35 }
  0x2e   : > { %2180 = vmatprep.subr.bf16.mxu0 %v2358_v36 }
  0x2f   : > { %2109 = vmatmul.mubr.msk.bf16.gmra.mrb[4].mxu1 %vm371_vm0, %v2355_v34 }
  0x30   : > { %2173 = vmatmul.mubr.msk.bf16.gmra.mrb[4].mxu0 %vm371_vm0, %v2357_v37  ;;  %2117 = vmatpush3.bf16.msra.mxu1 %v2356_v35 }
  0x31   : > { %2181 = vmatpush3.bf16.msra.mxu0 %v2358_v36  ;;  %2118 = vmatprep.subr.bf16.mxu1 %v2359_v38 }
  0x32   : > { %2182 = vmatprep.subr.bf16.mxu0 %v2360_v39  ;;  %2120 = vmatprep.mubr.msk.bf16.mxu1 %vm371_vm0, %v2361_v40 }
  0x33   : > { %2184 = vmatprep.mubr.msk.bf16.mxu0 %vm371_vm0, %v2362_v41 }
  0x34   : > { %2119 = vmatpush3.bf16.msra.mxu1 %v2359_v38 }
  0x35   : > { %2183 = vmatpush3.bf16.msra.mxu0 %v2360_v39  ;;  %2128 = vmatprep.subr.bf16.mxu1 %v2364_v43 }
  0x36   : > { %2192 = vmatprep.subr.bf16.mxu0 %v2366_v44 }
  0x37   : > { %2121 = vmatmul.mubr.msk.bf16.vlgmr.msra.gmra.mrb[0].mxu1 %vm371_vm0, %v2363_v42 }
  0x38   : > { %2185 = vmatmul.mubr.msk.bf16.vlgmr.msra.gmra.mrb[0].mxu0 %vm371_vm0, %v2365_v45  ;;  %2129 = vmatpush3.bf16.msra.mxu1 %v2364_v43 }
  0x39   : > { %2193 = vmatpush3.bf16.msra.mxu0 %v2366_v44  ;;  %2130 = vmatprep.subr.bf16.mxu1 %v2367_v46 }
  0x3a   : > { %2194 = vmatprep.subr.bf16.mxu0 %v2368_v47  ;;  %2124 = vmatprep.mubr.msk.bf16.mxu1 %vm371_vm0, %v2369_v48 }
  0x3b   : > { %2188 = vmatprep.mubr.msk.bf16.mxu0 %vm371_vm0, %v2370_v49 }
  0x3c   : > { %2131 = vmatpush3.bf16.msra.mxu1 %v2367_v46 }
  0x3d   : > { %2195 = vmatpush3.bf16.msra.mxu0 %v2368_v47  ;;  %2132 = vmatprep.subr.bf16.mxu1 %v2372_v51 }
  0x3e   : > { %2196 = vmatprep.subr.bf16.mxu0 %v2374_v52 }
  0x3f   : > { %2125 = vmatmul.mubr.msk.bf16.gmra.mrb[4].mxu1 %vm371_vm0, %v2371_v50 }
  0x40   : > { %2189 = vmatmul.mubr.msk.bf16.gmra.mrb[4].mxu0 %vm371_vm0, %v2373_v53  ;;  %2133 = vmatpush3.bf16.msra.mxu1 %v2372_v51 }
  0x41   : > { %2197 = vmatpush3.bf16.msra.mxu0 %v2374_v52  ;;  %2134 = vmatprep.subr.bf16.mxu1 %v2375_v54 }
  0x42   : > { %2198 = vmatprep.subr.bf16.mxu0 %v2376_v55  ;;  %2136 = vmatprep.mubr.msk.bf16.mxu1 %vm371_vm0, %v2377_v56 }
  0x43   : > { %2200 = vmatprep.mubr.msk.bf16.mxu0 %vm371_vm0, %v2378_v57 }
  0x44   : > { %2135 = vmatpush3.bf16.msra.mxu1 %v2375_v54 }
  0x45   : > { %2199 = vmatpush3.bf16.msra.mxu0 %v2376_v55  ;;  %2224 = vmatprep.subr.bf16.mxu1 %v2381_v58 }
  0x46   : > { %2208 = vmatprep.subr.bf16.mxu0 %v2381_v58 }
  0x47   : > { %2137 = vmatmul.mubr.msk.bf16.vlgmr.msra.gmra.mrb[0].mxu1 %vm371_vm0, %v2379_v59 }
  0x48   : > { %2201 = vmatmul.mubr.msk.bf16.vlgmr.msra.gmra.mrb[0].mxu0 %vm371_vm0, %v2380_v60  ;;  %2228 = vmatpush3.bf16.msra.mxu1 %v2381_v58 }
  0x49   : > { %2209 = vmatpush3.bf16.msra.mxu0 %v2381_v58  ;;  %2225 = vmatprep.subr.bf16.mxu1 %v2382_v61 }
  0x4a   : > { %2210 = vmatprep.subr.bf16.mxu0 %v2382_v61  ;;  %2140 = vmatprep.mubr.msk.bf16.mxu1 %vm371_vm0, %v2383_v62 }
  0x4b   : > { %2204 = vmatprep.mubr.msk.bf16.mxu0 %vm371_vm0, %v2384_v63 }
  0x4c   : > { %2229 = vmatpush3.bf16.msra.mxu1 %v2382_v61 }
  0x4d   : > { %2211 = vmatpush3.bf16.msra.mxu0 %v2382_v61  ;;  %2226 = vmatprep.subr.bf16.mxu1 %v2387_v0 }
  0x4e   : > { %2212 = vmatprep.subr.bf16.mxu0 %v2387_v0 }
  0x4f   : > { %2141 = vmatmul.mubr.msk.bf16.gmra.mrb[4].mxu1 %vm371_vm0, %v2385_v1 }
  0x50   : > { %2205 = vmatmul.mubr.msk.bf16.gmra.mrb[4].mxu0 %vm371_vm0, %v2386_v2  ;;  %2230 = vmatpush3.bf16.msra.mxu1 %v2387_v0 }
  0x51   : > { %2213 = vmatpush3.bf16.msra.mxu0 %v2387_v0  ;;  %2227 = vmatprep.subr.bf16.mxu1 %v2388_v3 }
  0x52   : > { %2214 = vmatprep.subr.bf16.mxu0 %v2388_v3  ;;  %2216 = vmatprep.mubr.msk.bf16.mxu0 %vm371_vm0, %v2389_v4 }
  0x53   : > { %2220 = vmatprep.mubr.msk.bf16.mxu1 %vm371_vm0, %v2390_v5 }
  0x54   : > { %2231 = vmatpush3.bf16.msra.mxu1 %v2388_v3 }
  0x55   : > { %2215 = vmatpush3.bf16.msra.mxu0 %v2388_v3 }
  0x57   : > { %2221 = vmatmul.mubr.msk.bf16.vlgmr.msra.gmra.mrb[8].mxu1 %vm371_vm0, %v2392_v6 }
  0x58   : > { %2217 = vmatmul.mubr.msk.bf16.vlgmr.msra.gmra.mrb[0].mxu0 %vm371_vm0, %v2391_v7 }
 0x11a   : > { %v2138_v8 = vpop.f32.mrb[0].mxu1 }
 0x11b   : > { %v828_v9 = vpop.f32.mrb[1].mxu1 }
 0x11c   : > { %v2139_v10 = vpop.f32.mrb[2].mxu1 }
 0x11d   : > { %v831_v11 = vpop.f32.mrb[3].mxu1 }
 0x122   : > { %v2142_v12 = vpop.f32.mrb[4].mxu1 }
 0x123   : > { %v2206_v13 = vpop.f32.mrb[4].mxu0  ;;  %v844_v14 = vpop.f32.mrb[5].mxu1 }
 0x124   : > { %v2236_v15 = vadd.f32 %v2206_v13, %v2142_v12  ;;  %v1437_v16 = vpop.f32.mrb[5].mxu0  ;;  %v2143_v17 = vpop.f32.mrb[6].mxu1 }
 0x125   : > { %v2238_v18 = vadd.f32 %v1437_v16, %v844_v14  ;;  %v2207_v19 = vpop.f32.mrb[6].mxu0  ;;  %v847_v20 = vpop.f32.mrb[7].mxu1 }
 0x126   : > { %v2240_v21 = vadd.f32 %v2207_v19, %v2143_v17  ;;  %v1440_v22 = vpop.f32.mrb[7].mxu0 }
 0x127   : > { %v2242_v23 = vadd.f32 %v1440_v22, %v847_v20 }
 0x12a   : > { %v2222_v25 = vpop.f32.mrb[8].mxu1 }
 0x12b   : > { %v2218_v26 = vpop.f32.mrb[0].mxu0  ;;  %v2237_v27 = vadd.f32 %v2236_v15, %v2222_v25  ;;  %v1585_v28 = vpop.f32.mrb[9].mxu1 }
 0x12c   : > { %v2232_v29 = vadd.f32 %v2218_v26, %v2138_v8  ;;  %v1569_v30 = vpop.f32.mrb[1].mxu0  ;;  %v2239_v31 = vadd.f32 %v2238_v18, %v1585_v28  ;;  %v2223_v32 = vpop.f32.mrb[10].mxu1 }
 0x12d   : > { %v1621_v33 = vadd.f32 %v2237_v27, %v2004_v24  ;;  %v2233_v34 = vadd.f32 %v1569_v30, %v828_v9  ;;  %v2219_v35 = vpop.f32.mrb[2].mxu0  ;;  %v2241_v36 = vadd.f32 %v2240_v21, %v2223_v32  ;;  %v1588_v37 = vpop.f32.mrb[11].mxu1 }
 0x12e   : > { %v1617_v38 = vadd.f32 %v2232_v29, %v2004_v24  ;;  %v1619_v39 = vadd.f32 %v2239_v31, %v2004_v24  ;;  %v2234_v40 = vadd.f32 %v2219_v35, %v2139_v10  ;;  %v1572_v41 = vpop.f32.mrb[3].mxu0  ;;  %v2243_v42 = vadd.f32 %v2242_v23, %v1588_v37 }
 0x12f   : > { %v1629_v43 = vmax.f32 %v1621_v33, 0.0  ;;  %v1615_v44 = vadd.f32 %v2233_v34, %v2004_v24  ;;  %v1622_v45 = vadd.f32 %v2241_v36, %v2004_v24  ;;  %v2235_v46 = vadd.f32 %v1572_v41, %v831_v11 }
 0x130   : > { %v1625_v47 = vmax.f32 %v1617_v38, 0.0  ;;  %v1627_v48 = vmax.f32 %v1619_v39, 0.0  ;;  %v1618_v49 = vadd.f32 %v2234_v40, %v2004_v24  ;;  %v1620_v50 = vadd.f32 %v2243_v42, %v2004_v24 }
 0x131   : > { %1637 = vst [vmem:[%s286_s29 + $0x30] sm:$0xff] %v1629_v43  ;;  %v1623_v51 = vmax.f32 %v1615_v44, 0.0  ;;  %v1630_v52 = vmax.f32 %v1622_v45, 0.0  ;;  %v1616_v53 = vadd.f32 %v2235_v46, %v2004_v24 }
 0x132   : > { %1633 = vst [vmem:[%s286_s29 + $0x10] sm:$0xff] %v1625_v47  ;;  %1635 = vst [vmem:[%s286_s29 + $0x20] sm:$0xff] %v1627_v48  ;;  %v1626_v54 = vmax.f32 %v1618_v49, 0.0  ;;  %v1628_v55 = vmax.f32 %v1620_v50, 0.0 }
 0x133   : > { %1631 = vst [vmem:[%s286_s29] sm:$0xff] %v1623_v51  ;;  %1638 = vst [vmem:[%s286_s29 + $0x38] sm:$0xff] %v1630_v52  ;;  %v1624_v56 = vmax.f32 %v1616_v53, 0.0 }
 0x134   : > { %1634 = vst [vmem:[%s286_s29 + $0x18] sm:$0xff] %v1626_v54  ;;  %1636 = vst [vmem:[%s286_s29 + $0x28] sm:$0xff] %v1628_v55 }
 0x135   : > { %1632 = vst [vmem:[%s286_s29 + $0x8] sm:$0xff] %v1624_v56 }
 0x136 PF: > { %s15_s20 = sadd.s32 1, %s2415_s20   ;;  %s2690_s18 = smov %s2411_s19 }
 0x137   : > { %p12_p5 = scmp.ge.s32.totalorder %s15_s20, 4   ;;  %s2691_s19 = smov %s2693_s21 }
 0x139   :  { %14 = sbr.rel (!%p12_p5) target bundleno = 2 (0x2), region = 93 }

// kernel: feature_matching_forward.16
= control target key start
LH: loop header
LB: loop body
LE: loop exit
PB: predicated region body
PF: predicated region fallthrough
CT: control target
= control target key end

     0   :  { %vm295_vm0 = vcmask 130048   ;;  %s566_s1 = inlined_call_operand.vmem [shape: bf16[128,16], index: 1, kind: input, shape index: {}]   ;;  %s567_s0 = inlined_call_operand.vmem [shape: bf16[128,128], index: 0, kind: input, shape index: {}]   ;;  %s568_s2 = inlined_call_operand.vmem [shape: f32[1,16], index: 2, kind: input, shape index: {}]   ;;  %s569_s3 = inlined_call_operand.vmem [shape: f32[128,16], index: 3, kind: output, shape index: {}]  }
   0x1   :  { %v397_v0 = vld [vmem:[%s566_s1] sm:$0xff]   ;;  %v398_v1 = vld [vmem:[%s566_s1 + $0x8] sm:$0xff]   ;;  %v399_v2 = vld [vmem:[%s566_s1 + $0x10] sm:$0xff]  }
   0x2   :  { %349 = vmatprep.subr.bf16.mxu0 %v397_v0  ;;  %381 = vmatprep.subr.bf16.mxu1 %v397_v0  ;;  %v400_v3 = vld [vmem:[%s566_s1 + $0x18] sm:$0xff]   ;;  %v405_v4 = vld [vmem:[%s567_s0] sm:$0xff]   ;;  %v402_v7 = vld [vmem:[%s566_s1 + $0x28] sm:$0xff]  }
   0x3   :  { %350 = vmatpush3.bf16.msra.mxu0 %v397_v0  ;;  %389 = vmatpush3.bf16.msra.mxu1 %v397_v0  ;;  %v406_v5 = vld [vmem:[%s567_s0 + $0x20] sm:$0xff]   ;;  %v403_v8 = vld [vmem:[%s566_s1 + $0x30] sm:$0xff]   ;;  %v404_v9 = vld [vmem:[%s566_s1 + $0x38] sm:$0xff]  }
   0x4   :  { %351 = vmatprep.subr.bf16.mxu0 %v398_v1  ;;  %382 = vmatprep.subr.bf16.mxu1 %v398_v1  ;;  %v401_v6 = vld [vmem:[%s566_s1 + $0x20] sm:$0xff]   ;;  %v407_v10 = vld [vmem:[%s567_s0 + $0x8] sm:$0xff]   ;;  %v409_v12 = vld [vmem:[%s567_s0 + $0x10] sm:$0xff]  }
   0x5   :  { %365 = vmatprep.mubr.bf16.mxu0 %v405_v4  ;;  %373 = vmatprep.mubr.bf16.mxu1 %v406_v5  ;;  %v408_v11 = vld [vmem:[%s567_s0 + $0x28] sm:$0xff]   ;;  %v410_v13 = vld [vmem:[%s567_s0 + $0x30] sm:$0xff]   ;;  %v411_v14 = vld [vmem:[%s567_s0 + $0x18] sm:$0xff]  }
   0x6   :  { %v412_v15 = vld [vmem:[%s567_s0 + $0x38] sm:$0xff]   ;;  %v484_v16 = vld [vmem:[%s568_s2] ss:$0 sm:$0xff] }
   0x7   :  { %352 = vmatpush3.bf16.msra.mxu0 %v398_v1  ;;  %390 = vmatpush3.bf16.msra.mxu1 %v398_v1 }
   0x8   :  { %353 = vmatprep.subr.bf16.mxu0 %v399_v2  ;;  %383 = vmatprep.subr.bf16.mxu1 %v399_v2 }
   0xb   :  { %354 = vmatpush3.bf16.msra.mxu0 %v399_v2  ;;  %391 = vmatpush3.bf16.msra.mxu1 %v399_v2 }
   0xc   :  { %355 = vmatprep.subr.bf16.mxu0 %v400_v3  ;;  %384 = vmatprep.subr.bf16.mxu1 %v400_v3 }
   0xf   :  { %356 = vmatpush3.bf16.msra.mxu0 %v400_v3  ;;  %392 = vmatpush3.bf16.msra.mxu1 %v400_v3 }
  0x10   :  { %357 = vmatprep.subr.bf16.mxu0 %v401_v6  ;;  %385 = vmatprep.subr.bf16.mxu1 %v401_v6 }
  0x13   :  { %358 = vmatpush3.bf16.msra.mxu0 %v401_v6  ;;  %393 = vmatpush3.bf16.msra.mxu1 %v401_v6 }
  0x14   :  { %359 = vmatprep.subr.bf16.mxu0 %v402_v7  ;;  %386 = vmatprep.subr.bf16.mxu1 %v402_v7 }
  0x17   :  { %360 = vmatpush3.bf16.msra.mxu0 %v402_v7  ;;  %394 = vmatpush3.bf16.msra.mxu1 %v402_v7 }
  0x18   :  { %361 = vmatprep.subr.bf16.mxu0 %v403_v8  ;;  %387 = vmatprep.subr.bf16.mxu1 %v403_v8 }
  0x1b   :  { %362 = vmatpush3.bf16.msra.mxu0 %v403_v8  ;;  %395 = vmatpush3.bf16.msra.mxu1 %v403_v8 }
  0x1c   :  { %363 = vmatprep.subr.bf16.mxu0 %v404_v9  ;;  %388 = vmatprep.subr.bf16.mxu1 %v404_v9 }
  0x1f   :  { %364 = vmatpush3.bf16.msra.mxu0 %v404_v9  ;;  %396 = vmatpush3.bf16.msra.mxu1 %v404_v9 }
  0x22   :  { %366 = vmatmul.mubr.bf16.vlgmr.msra.gmra.mrb[0].mxu0 %v407_v10  ;;  %374 = vmatmul.mubr.bf16.vlgmr.msra.gmra.mrb[0].mxu1 %v408_v11 }
  0x23   :  { %369 = vmatprep.mubr.bf16.mxu0 %v409_v12  ;;  %377 = vmatprep.mubr.bf16.mxu1 %v410_v13 }
  0x2a   :  { %370 = vmatmul.mubr.bf16.gmra.mrb[4].mxu0 %v411_v14  ;;  %378 = vmatmul.mubr.bf16.gmra.mrb[4].mxu1 %v412_v15 }
  0xf5   :  { %v367_v17 = vpop.f32.mrb[0].mxu0  ;;  %v375_v18 = vpop.f32.mrb[0].mxu1 }
  0xf6   :  { %v193_v19 = vadd.f32 %v367_v17, %v484_v16  ;;  %v225_v20 = vadd.f32 %v375_v18, %v484_v16  ;;  %v184_v21 = vpop.f32.mrb[1].mxu0  ;;  %v216_v22 = vpop.f32.mrb[1].mxu1 }
  0xf7   :  { %v185_v23 = vadd.f32 %v484_v16, %v184_v21  ;;  %v217_v24 = vadd.f32 %v484_v16, %v216_v22  ;;  %v368_v25 = vpop.f32.mrb[2].mxu0  ;;  %v376_v26 = vpop.f32.mrb[2].mxu1 }
  0xf8   :  { %vm249_vm1 = vcmp.ge.f32.partialorder %v193_v19, 0.0  ;;  %v265_v27 = vmul.f32 0.2, %v193_v19  ;;  %vm257_vm2 = vcmp.ge.f32.partialorder %v225_v20, 0.0  ;;  %v273_v28 = vmul.f32 0.2, %v225_v20 }
  0xf9   :  { %vm247_vm3 = vcmp.ge.f32.partialorder %v185_v23, 0.0  ;;  %v263_v29 = vmul.f32 0.2, %v185_v23  ;;  %vm255_vm4 = vcmp.ge.f32.partialorder %v217_v24, 0.0  ;;  %v271_v30 = vmul.f32 0.2, %v217_v24 }
  0xfa   :  { %v281_v31 = vsel %vm249_vm1, %v193_v19, %v265_v27  ;;  %v289_v32 = vsel %vm257_vm2, %v225_v20, %v273_v28  ;;  %v196_v33 = vadd.f32 %v368_v25, %v484_v16  ;;  %v228_v34 = vadd.f32 %v376_v26, %v484_v16  ;;  %v187_v35 = vpop.f32.mrb[3].mxu0  ;;  %v219_v36 = vpop.f32.mrb[3].mxu1 }
  0xfb   :  { %298 = vst.msk [vmem:[%s569_s3 + $0x10] sm:$0xff] %vm295_vm0, %v281_v31  ;;  %306 = vst.msk [vmem:[%s569_s3 + $0x50] sm:$0xff] %vm295_vm0, %v289_v32  ;;  %v279_v37 = vsel %vm247_vm3, %v185_v23, %v263_v29  ;;  %v287_v38 = vsel %vm255_vm4, %v217_v24, %v271_v30  ;;  %v188_v39 = vadd.f32 %v484_v16, %v187_v35 }
  0xfc   :  { %v220_v40 = vadd.f32 %v484_v16, %v219_v36  ;;  %296 = vst.msk [vmem:[%s569_s3] sm:$0xff] %vm295_vm0, %v279_v37  ;;  %304 = vst.msk [vmem:[%s569_s3 + $0x40] sm:$0xff] %vm295_vm0, %v287_v38  ;;  %vm250_vm5 = vcmp.ge.f32.partialorder %v196_v33, 0.0  ;;  %v266_v41 = vmul.f32 0.2, %v196_v33  ;;  %vm258_vm6 = vcmp.ge.f32.partialorder %v228_v34, 0.0 }
  0xfd   :  { %v274_v42 = vmul.f32 0.2, %v228_v34  ;;  %vm248_vm7 = vcmp.ge.f32.partialorder %v188_v39, 0.0  ;;  %v264_v43 = vmul.f32 0.2, %v188_v39  ;;  %v371_v47 = vpop.f32.mrb[4].mxu0 }
  0xfe   :  { %vm256_vm8 = vcmp.ge.f32.partialorder %v220_v40, 0.0  ;;  %v272_v44 = vmul.f32 0.2, %v220_v40  ;;  %v282_v45 = vsel %vm250_vm5, %v196_v33, %v266_v41  ;;  %v379_v48 = vpop.f32.mrb[4].mxu1  ;;  %v209_v51 = vadd.f32 %v371_v47, %v484_v16  ;;  %v200_v53 = vpop.f32.mrb[5].mxu0 }
  0xff   :  { %v290_v46 = vsel %vm258_vm6, %v228_v34, %v274_v42  ;;  %299 = vst.msk [vmem:[%s569_s3 + $0x18] sm:$0xff] %vm295_vm0, %v282_v45  ;;  %v280_v49 = vsel %vm248_vm7, %v188_v39, %v264_v43  ;;  %v241_v52 = vadd.f32 %v379_v48, %v484_v16  ;;  %v232_v54 = vpop.f32.mrb[5].mxu1  ;;  %v201_v55 = vadd.f32 %v484_v16, %v200_v53  ;;  %v372_v57 = vpop.f32.mrb[6].mxu0 }
 0x100   :  { %307 = vst.msk [vmem:[%s569_s3 + $0x58] sm:$0xff] %vm295_vm0, %v290_v46  ;;  %v288_v50 = vsel %vm256_vm8, %v220_v40, %v272_v44  ;;  %297 = vst.msk [vmem:[%s569_s3 + $0x8] sm:$0xff] %vm295_vm0, %v280_v49  ;;  %v233_v56 = vadd.f32 %v484_v16, %v232_v54  ;;  %v380_v58 = vpop.f32.mrb[6].mxu1  ;;  %vm253_vm9 = vcmp.ge.f32.partialorder %v209_v51, 0.0  ;;  %v269_v59 = vmul.f32 0.2, %v209_v51 }
 0x101   :  { %305 = vst.msk [vmem:[%s569_s3 + $0x48] sm:$0xff] %vm295_vm0, %v288_v50  ;;  %vm261_vm10 = vcmp.ge.f32.partialorder %v241_v52, 0.0  ;;  %v277_v60 = vmul.f32 0.2, %v241_v52  ;;  %vm251_vm11 = vcmp.ge.f32.partialorder %v201_v55, 0.0  ;;  %v212_v1 = vadd.f32 %v372_v57, %v484_v16  ;;  %v203_v3 = vpop.f32.mrb[7].mxu0 }
 0x102   :  { %v267_v61 = vmul.f32 0.2, %v201_v55  ;;  %vm259_vm12 = vcmp.ge.f32.partialorder %v233_v56, 0.0  ;;  %v275_v62 = vmul.f32 0.2, %v233_v56  ;;  %v285_v63 = vsel %vm253_vm9, %v209_v51, %v269_v59  ;;  %v235_v4 = vpop.f32.mrb[7].mxu1 }
 0x103   :  { %v293_v0 = vsel %vm261_vm10, %v241_v52, %v277_v60  ;;  %v244_v2 = vadd.f32 %v380_v58, %v484_v16  ;;  %302 = vst.msk [vmem:[%s569_s3 + $0x30] sm:$0xff] %vm295_vm0, %v285_v63  ;;  %v204_v7 = vadd.f32 %v484_v16, %v203_v3  ;;  %v236_v8 = vadd.f32 %v484_v16, %v235_v4 }
 0x104   :  { %310 = vst.msk [vmem:[%s569_s3 + $0x70] sm:$0xff] %vm295_vm0, %v293_v0  ;;  %v283_v5 = vsel %vm251_vm11, %v201_v55, %v267_v61  ;;  %v291_v6 = vsel %vm259_vm12, %v233_v56, %v275_v62  ;;  %vm254_vm13 = vcmp.ge.f32.partialorder %v212_v1, 0.0  ;;  %v270_v9 = vmul.f32 0.2, %v212_v1 }
 0x105   :  { %300 = vst.msk [vmem:[%s569_s3 + $0x20] sm:$0xff] %vm295_vm0, %v283_v5  ;;  %308 = vst.msk [vmem:[%s569_s3 + $0x60] sm:$0xff] %vm295_vm0, %v291_v6  ;;  %vm262_vm14 = vcmp.ge.f32.partialorder %v244_v2, 0.0  ;;  %v278_v10 = vmul.f32 0.2, %v244_v2  ;;  %vm252_vm15 = vcmp.ge.f32.partialorder %v204_v7, 0.0 }
 0x106   :  { %v268_v11 = vmul.f32 0.2, %v204_v7  ;;  %vm260_vm1 = vcmp.ge.f32.partialorder %v236_v8, 0.0  ;;  %v276_v12 = vmul.f32 0.2, %v236_v8  ;;  %v286_v13 = vsel %vm254_vm13, %v212_v1, %v270_v9 }
 0x107   :  { %v294_v14 = vsel %vm262_vm14, %v244_v2, %v278_v10  ;;  %303 = vst.msk [vmem:[%s569_s3 + $0x38] sm:$0xff] %vm295_vm0, %v286_v13 }
 0x108   :  { %311 = vst.msk [vmem:[%s569_s3 + $0x78] sm:$0xff] %vm295_vm0, %v294_v14  ;;  %v284_v15 = vsel %vm252_vm15, %v204_v7, %v268_v11  ;;  %v292_v16 = vsel %vm260_vm1, %v236_v8, %v276_v12 }
 0x109   :  { %301 = vst.msk [vmem:[%s569_s3 + $0x28] sm:$0xff] %vm295_vm0, %v284_v15  ;;  %309 = vst.msk [vmem:[%s569_s3 + $0x68] sm:$0xff] %vm295_vm0, %v292_v16 }

// kernel: squeeze.2
= control target key start
LH: loop header
LB: loop body
LE: loop exit
PB: predicated region body
PF: predicated region fallthrough
CT: control target
= control target key end

     0   :  { %s149_s0 = inlined_call_operand.vmem [shape: f32[2,256], index: 0, kind: input, shape index: {}]   ;;  %s150_s1 = inlined_call_operand.hbm [shape: f32[2,1,16,16], index: 1, kind: output, shape index: {}]  }
   0x1   :  { %v71_v0 = vld [vmem:[%s149_s0 + $0x2] sm:$0x3]  ;;  %v9_v1 = vld [vmem:[%s149_s0] sm:$0x3] }
   0x2   :  { %8 = vst [vmem:[#allocation2 + $0x8] sm:$0x3] %v71_v0  ;;  %10 = vst [vmem:[#allocation2] sm:$0x3] %v9_v1 }
   0x3   :  { %2 = vsyncpa [#allocation1], 0  ;;  %vm12_vm0 = vcmask 130048   ;;  %s104_s0 = smov 112   ;;  %s105_s10 = smov 80  }
   0x4   :  { %s106_s11 = smov 96   ;;  %s107_s12 = smov 64  }
   0x5   :  { %s108_s13 = smov 48   ;;  %s109_s14 = smov 32  }
   0x6   :  { %s110_s15 = smov 16   ;;  %s111_s16 = smov [#allocation0]  }
   0x7   :  { %s65_s17 = sshll.u32 %s111_s16, 4  ;;  %s66_s17 = int_to_ptr.vmem [resolvable:$true] %s65_s17 }
   0x8   :  { %s80_s18 = scalar_lea.vmem %s66_s17, 512  ;;  %p85_p1 = scmp.lt.s32.totalorder %s66_s17, %s66_s17 }
   0x9   :  { %v19_v2 = vld.sshfl [vmem:[#allocation2] sm:$0xff pattern:$0x99999180]   ;;  %p81_p0 = scmp.ne.s32.totalorder %s66_s17, %s80_s18  ;;  %p86_p2 = scmp.lt.s32.totalorder %s80_s18, %s80_s18 }
   0xa   :  { %v11_v3 = vld [vmem:[#allocation2] sm:$0x3]   ;;  %20 = vrot.lane.b32.xlu0 %v19_v2, %s104_s0  ;;  %32 = vrot.lane.b32.xlu1 %v19_v2, %s105_s10  ;;  %v15_v4 = vld [vmem:[#allocation2 + $0x8] sm:$0x3]  }
   0xb   :  { %13 = vst.msk [vmem:[#allocation0] ss:$16 sm:$0x3] %vm12_vm0, %v11_v3   ;;  %18 = vst.msk [vmem:[#allocation0 + $0x8] ss:$16 sm:$0x3] %vm12_vm0, %v15_v4   ;;  %p87_p3 = por %p86_p2, %p85_p1 }
   0xd   :  { %p88_p4 = pnand %p87_p3, %p81_p0 }
   0xe   :  { %26 = vrot.lane.b32.xlu0 %v19_v2, %s106_s11  ;;  %38 = vrot.lane.b32.xlu1 %v19_v2, %s107_s12 }
  0x12   :  { %44 = vrot.lane.b32.xlu0 %v19_v2, %s108_s13  ;;  %50 = vrot.lane.b32.xlu1 %v19_v2, %s109_s14 }
  0x16   :  { %56 = vrot.lane.b32.xlu0 %v19_v2, %s110_s15 }
  0x7c   :  { %v21_v5 = vpop.permute.xlu0 %20   ;;  %v33_v6 = vpop.permute.xlu1 %32  }
  0x7d   :  { %24 = vst.msk [vmem:[#allocation0 + $0x1] ss:$8 sm:$0xf] %vm12_vm0, %v21_v5   ;;  %36 = vst.msk [vmem:[#allocation0 + $0x3] ss:$8 sm:$0xf] %vm12_vm0, %v33_v6  }
  0x80   :  { %v27_v7 = vpop.permute.xlu0 %26   ;;  %v39_v8 = vpop.permute.xlu1 %38  }
  0x81   :  { %30 = vst.msk [vmem:[#allocation0 + $0x2] ss:$8 sm:$0xf] %vm12_vm0, %v27_v7   ;;  %42 = vst.msk [vmem:[#allocation0 + $0x4] ss:$8 sm:$0xf] %vm12_vm0, %v39_v8  }
  0x84   :  { %v45_v9 = vpop.permute.xlu0 %44   ;;  %v51_v10 = vpop.permute.xlu1 %50  }
  0x85   :  { %48 = vst.msk [vmem:[#allocation0 + $0x5] ss:$8 sm:$0xf] %vm12_vm0, %v45_v9   ;;  %54 = vst.msk [vmem:[#allocation0 + $0x6] ss:$8 sm:$0xf] %vm12_vm0, %v51_v10  }
  0x88   :  { %v57_v11 = vpop.permute.xlu0 %56  }
  0x89   :  { %60 = vst.msk [vmem:[#allocation0 + $0x7] ss:$8 sm:$0xf] %vm12_vm0, %v57_v11  }
  0x8a   :  { %91 = shalt.err (!%p88_p4)
}
  0x8b   :  { %s92_s21 = scalar_lea.hbm %s150_s1, 512 }
  0x8c   :  { %p93_p5 = scmp.ne.s32.totalorder %s150_s1, %s92_s21  ;;  %p96_p6 = scmp.lt.u32.totalorder %s92_s21, %s150_s1 }
  0x8e   :  { %p98_p7 = pnand %p96_p6, %p93_p5 }
  0x90   :  { %101 = shalt.err (!%p98_p7)
}
  0x91   :  { %68 = dma.vmem_to_hbm [thread:$0]  %s66_s17, 512, %s150_s1, [#allocation1]  }
  0x92   :  { %102 = dma.done.wait [#allocation1], 512  }
  0x93   :  { %103 = vsyncadd [#allocation1], 4294966784 }
  0x94   :  { %70 = vsyncpa [#allocation1], 1 }

// kernel: feature_matching_forward.17
= control target key start
LH: loop header
LB: loop body
LE: loop exit
PB: predicated region body
PF: predicated region fallthrough
CT: control target
= control target key end

     0   :  { %s907_s12 = smov 0   ;;  %s909_s13 = smov 0   ;;  %s1167_s0 = inlined_call_operand.vmem [shape: f32[2,64,144], index: 0, kind: input, shape index: {}]   ;;  %s1168_s1 = inlined_call_operand.vmem [shape: f32[2,144,256], index: 1, kind: input, shape index: {}]   ;;  %s1169_s2 = inlined_call_operand.vmem [shape: f32[2,1,256], index: 2, kind: output, shape index: {0}]   ;;  %s1170_s3 = inlined_call_operand.vmem [shape: s32[2,1,256], index: 3, kind: output, shape index: {1}]  }
   0x1   :  { %s911_s14 = smov 0  }
   0x2 LB: > { %s26_s15 = sadd.s32 1, %s878_s13  ;;  %p761_p0 = scmp.ge.s32.totalorder %s882_s14, 1  ;;  %s882_s14 = sphi %s911_s14, %s14_s14   ;;  %s878_s13 = sphi %s909_s13, %s1174_s13   ;;  %s874_s12 = sphi %s907_s12, %s1173_s12  }
   0x3   : > { %p28_p1 = scmp.ge.s32.totalorder %s26_s15, 2  ;;  %p170_p2 = scmp.lt.s32.totalorder %s882_s14, 3 }
   0x5   : > { %s1176_s15 = smov (%p28_p1, %s26_s15), 0  ;;  %p171_p3 = pnand %p761_p0, %p170_p2 }
   0x6   : > { %p208_p4 = scmp.lt.s32.totalorder (!%p171_p3), %s874_s12, 1  ;;  %vm293_vm0 = vcmask (!%p171_p3), 130048  }
   0x7   : > { %174 = sbr.rel (%p171_p3) target bundleno = 342 (0x156), region = 28 }
   0xe   : > { %s1178_s12 = smov (!%p208_p4, %s874_s12), 1 }
   0xf   : > { %s832_s16 = smul.u32 288, %s1178_s12  ;;  %s777_s17 = sshll.u32 %s1178_s12, 7 }
  0x10   : > { %s932_s20 = scalar_lea.vmem %s1167_s0, %s777_s17  ;;  %s765_s24 = sshll.u32 %s1178_s12, 1 }
  0x11   : > { %s937_s23 = scalar_lea.vmem %s1168_s1, %s832_s16  ;;  %v242_v0 = vld [vmem:[%s932_s20 + $0x8] sm:$0xff]  ;;  %v241_v56 = vld [vmem:[%s932_s20] sm:$0xff]  ;;  %v244_v58 = vld [vmem:[%s932_s20 + $0x18] sm:$0xff]  ;;  %s1003_s27 = scalar_lea.vmem %s1169_s2, %s765_s24 }
  0x12   : > { %v250_v1 = vld [vmem:[%s932_s20 + $0x48] sm:$0xff]  ;;  %v260_v3 = vld [vmem:[%s937_s23 + $0x18] sm:$0xff]  ;;  %v257_v4 = vld [vmem:[%s937_s23] sm:$0xff]  ;;  %767 = vmatprep.mubr.msk.f32.mxu0 %vm293_vm0, %v242_v0  ;;  %s1008_s30 = scalar_lea.vmem %s1170_s3, %s765_s24 }
  0x13   : > { %v258_v2 = vld [vmem:[%s937_s23 + $0x8] sm:$0xff]  ;;  %771 = vmatprep.mubr.msk.f32.mxu1 %vm293_vm0, %v250_v1  ;;  %v259_v6 = vld [vmem:[%s937_s23 + $0x10] sm:$0xff]  ;;  %v264_v8 = vld [vmem:[%s937_s23 + $0x38] sm:$0xff] }
  0x14   : > { %v778_v5 = vpack.c.bf16 %v260_v3, %v258_v2  ;;  %v262_v7 = vld [vmem:[%s937_s23 + $0x28] sm:$0xff]  ;;  %v780_v9 = vpack.c.bf16 %v259_v6, %v257_v4  ;;  %v261_v11 = vld [vmem:[%s937_s23 + $0x20] sm:$0xff]  ;;  %v263_v12 = vld [vmem:[%s937_s23 + $0x30] sm:$0xff]  ;;  %v235_v6 = vlaneseq }
  0x15   : > { %v782_v10 = vpack.c.bf16 %v264_v8, %v262_v7  ;;  %v266_v13 = vld [vmem:[%s937_s23 + $0x48] sm:$0xff]  ;;  %v268_v14 = vld [vmem:[%s937_s23 + $0x58] sm:$0xff]  ;;  %v784_v15 = vpack.c.bf16 %v263_v12, %v261_v11  ;;  %v265_v17 = vld [vmem:[%s937_s23 + $0x40] sm:$0xff]  ;;  %v884_v8 = vmov -inf  }
  0x16   : > { %779 = vmatprep.subr.bf16.mxu0 %v778_v5  ;;  %814 = vmatprep.subr.bf16.mxu1 %v778_v5  ;;  %v786_v16 = vpack.c.bf16 %v268_v14, %v266_v13  ;;  %v267_v18 = vld [vmem:[%s937_s23 + $0x50] sm:$0xff]  ;;  %v270_v19 = vld [vmem:[%s937_s23 + $0x68] sm:$0xff]  ;;  %v272_v20 = vld [vmem:[%s937_s23 + $0x78] sm:$0xff]  ;;  %vm1010_vm1 = vcmp.lt.s32.totalorder %v235_v6, 256 }
  0x17   : > { %781 = vmatpush1.bf16.msra.mxu0 %v780_v9  ;;  %823 = vmatpush1.bf16.msra.mxu1 %v780_v9  ;;  %v788_v21 = vpack.c.bf16 %v267_v18, %v265_v17  ;;  %v790_v22 = vpack.c.bf16 %v272_v20, %v270_v19  ;;  %v269_v23 = vld [vmem:[%s937_s23 + $0x60] sm:$0xff]  ;;  %v271_v24 = vld [vmem:[%s937_s23 + $0x70] sm:$0xff]  ;;  %v274_v25 = vld [vmem:[%s937_s23 + $0x88] sm:$0xff]  ;;  %239 = vst.msk [vmem:[%s1003_s27] sm:$0x3] %vm1010_vm1, %v884_v8  ;;  %v885_v9 = vmov 0  }
  0x18   : > { %783 = vmatprep.subr.bf16.mxu0 %v782_v10  ;;  %815 = vmatprep.subr.bf16.mxu1 %v782_v10  ;;  %v276_v26 = vld [vmem:[%s937_s23 + $0x98] sm:$0xff]  ;;  %v792_v27 = vpack.c.bf16 %v271_v24, %v269_v23  ;;  %v273_v29 = vld [vmem:[%s937_s23 + $0x80] sm:$0xff]  ;;  %v275_v30 = vld [vmem:[%s937_s23 + $0x90] sm:$0xff]  ;;  %240 = vst.msk [vmem:[%s1008_s30] sm:$0x3] %vm1010_vm1, %v885_v9 }
  0x19   : > { %v794_v28 = vpack.c.bf16 %v276_v26, %v274_v25  ;;  %v278_v31 = vld [vmem:[%s937_s23 + $0xa8] sm:$0xff]  ;;  %v280_v32 = vld [vmem:[%s937_s23 + $0xb8] sm:$0xff]  ;;  %v796_v33 = vpack.c.bf16 %v275_v30, %v273_v29  ;;  %v277_v35 = vld [vmem:[%s937_s23 + $0xa0] sm:$0xff] }
  0x1a   : > { %v798_v34 = vpack.c.bf16 %v280_v32, %v278_v31  ;;  %v279_v36 = vld [vmem:[%s937_s23 + $0xb0] sm:$0xff]  ;;  %v282_v37 = vld [vmem:[%s937_s23 + $0xc8] sm:$0xff]  ;;  %v284_v38 = vld [vmem:[%s937_s23 + $0xd8] sm:$0xff] }
  0x1b   : > { %785 = vmatpush1.bf16.msra.mxu0 %v784_v15  ;;  %824 = vmatpush1.bf16.msra.mxu1 %v784_v15  ;;  %v800_v39 = vpack.c.bf16 %v279_v36, %v277_v35  ;;  %v802_v40 = vpack.c.bf16 %v284_v38, %v282_v37  ;;  %v281_v41 = vld [vmem:[%s937_s23 + $0xc0] sm:$0xff]  ;;  %v283_v42 = vld [vmem:[%s937_s23 + $0xd0] sm:$0xff]  ;;  %v286_v43 = vld [vmem:[%s937_s23 + $0xe8] sm:$0xff] }
  0x1c   : > { %787 = vmatprep.subr.bf16.mxu0 %v786_v16  ;;  %816 = vmatprep.subr.bf16.mxu1 %v786_v16  ;;  %v288_v44 = vld [vmem:[%s937_s23 + $0xf8] sm:$0xff]  ;;  %v804_v45 = vpack.c.bf16 %v283_v42, %v281_v41  ;;  %v285_v47 = vld [vmem:[%s937_s23 + $0xe0] sm:$0xff]  ;;  %v287_v48 = vld [vmem:[%s937_s23 + $0xf0] sm:$0xff] }
  0x1d   : > { %v806_v46 = vpack.c.bf16 %v288_v44, %v286_v43  ;;  %v290_v49 = vld [vmem:[%s937_s23 + $0x108] sm:$0xff]  ;;  %v292_v50 = vld [vmem:[%s937_s23 + $0x118] sm:$0xff]  ;;  %v808_v51 = vpack.c.bf16 %v287_v48, %v285_v47  ;;  %v289_v53 = vld [vmem:[%s937_s23 + $0x100] sm:$0xff]  ;;  %v1059_v43 = vshrl.u32 %v235_v6, 7 }
  0x1e   : > { %v810_v52 = vpack.c.bf16 %v292_v50, %v290_v49  ;;  %v291_v54 = vld [vmem:[%s937_s23 + $0x110] sm:$0xff]  ;;  %v249_v57 = vld [vmem:[%s932_s20 + $0x40] sm:$0xff]  ;;  %v252_v59 = vld [vmem:[%s932_s20 + $0x58] sm:$0xff] }
  0x1f   : > { %789 = vmatpush1.bf16.msra.mxu0 %v788_v21  ;;  %825 = vmatpush1.bf16.msra.mxu1 %v788_v21  ;;  %v812_v55 = vpack.c.bf16 %v291_v54, %v289_v53  ;;  %v243_v60 = vld [vmem:[%s932_s20 + $0x10] sm:$0xff]  ;;  %v246_v62 = vld [vmem:[%s932_s20 + $0x28] sm:$0xff]  ;;  %v245_v0 = vld [vmem:[%s932_s20 + $0x20] sm:$0xff]  ;;  %v583_v50 = vsub.s32 0, %v1059_v43  ;;  %v433_v54 = vadd.s32 8, %v1059_v43 }
  0x20   : > { %791 = vmatprep.subr.bf16.mxu0 %v790_v22  ;;  %817 = vmatprep.subr.bf16.mxu1 %v790_v22  ;;  %v251_v61 = vld [vmem:[%s932_s20 + $0x50] sm:$0xff]  ;;  %v254_v63 = vld [vmem:[%s932_s20 + $0x68] sm:$0xff]  ;;  %v253_v1 = vld [vmem:[%s932_s20 + $0x60] sm:$0xff] }
  0x21   : > { %v248_v2 = vld [vmem:[%s932_s20 + $0x38] sm:$0xff]  ;;  %v247_v4 = vld [vmem:[%s932_s20 + $0x30] sm:$0xff] }
  0x22   : > { %v256_v3 = vld [vmem:[%s932_s20 + $0x78] sm:$0xff]  ;;  %v255_v5 = vld [vmem:[%s932_s20 + $0x70] sm:$0xff] }
  0x23   : > { %793 = vmatpush1.bf16.msra.mxu0 %v792_v27  ;;  %826 = vmatpush1.bf16.msra.mxu1 %v792_v27 }
  0x24   : > { %795 = vmatprep.subr.bf16.mxu0 %v794_v28  ;;  %818 = vmatprep.subr.bf16.mxu1 %v794_v28 }
  0x27   : > { %797 = vmatpush1.bf16.msra.mxu0 %v796_v33  ;;  %827 = vmatpush1.bf16.msra.mxu1 %v796_v33 }
  0x28   : > { %799 = vmatprep.subr.bf16.mxu0 %v798_v34  ;;  %819 = vmatprep.subr.bf16.mxu1 %v798_v34 }
  0x2b   : > { %801 = vmatpush1.bf16.msra.mxu0 %v800_v39  ;;  %828 = vmatpush1.bf16.msra.mxu1 %v800_v39 }
  0x2c   : > { %803 = vmatprep.subr.bf16.mxu0 %v802_v40  ;;  %820 = vmatprep.subr.bf16.mxu1 %v802_v40 }
  0x2f   : > { %805 = vmatpush1.bf16.msra.mxu0 %v804_v45  ;;  %829 = vmatpush1.bf16.msra.mxu1 %v804_v45  ;;  %v886_v45 = vmov 1966171168  }
  0x30   : > { %807 = vmatprep.subr.bf16.mxu0 %v806_v46  ;;  %821 = vmatprep.subr.bf16.mxu1 %v806_v46  ;;  %v599_v46 = vunpack.c.l.s4 %v886_v45 }
  0x32   : > { %v600_v53 = vunpack.c.0.s8 %v599_v46 }
  0x33   : > { %809 = vmatpush1.bf16.msra.mxu0 %v808_v51  ;;  %830 = vmatpush1.bf16.msra.mxu1 %v808_v51 }
  0x34   : > { %811 = vmatprep.subr.bf16.mxu0 %v810_v52  ;;  %822 = vmatprep.subr.bf16.mxu1 %v810_v52  ;;  %v587_v52 = vsub.s32 1, %v1059_v43 }
  0x37   : > { %813 = vmatpush1.bf16.msra.mxu0 %v812_v55  ;;  %831 = vmatpush1.bf16.msra.mxu1 %v812_v55 }
  0x3a   : > { %383 = vmatmul.mubr.f32.vlgmr.msra.gmra.mrb[0].mxu0 %v241_v56  ;;  %407 = vmatmul.mubr.f32.vlgmr.msra.gmra.mrb[0].mxu1 %v249_v57  ;;  %v578_v56 = vld [vmem:[%s1003_s27] sm:$0x3]  ;;  %v434_v57 = vadd.s32 16, %v1059_v43 }
  0x3b   : > { %768 = vmatprep.mubr.msk.f32.mxu0 %vm293_vm0, %v244_v58  ;;  %772 = vmatprep.mubr.msk.f32.mxu1 %vm293_vm0, %v252_v59  ;;  %v435_v58 = vadd.s32 24, %v1059_v43  ;;  %v436_v59 = vadd.s32 32, %v1059_v43 }
  0x3e   : > { %389 = vmatmul.mubr.f32.gmra.mrb[2].mxu0 %v243_v60  ;;  %413 = vmatmul.mubr.f32.gmra.mrb[2].mxu1 %v251_v61  ;;  %v437_v61 = vadd.s32 40, %v1059_v43 }
  0x3f   : > { %769 = vmatprep.mubr.msk.f32.mxu0 %vm293_vm0, %v246_v62  ;;  %773 = vmatprep.mubr.msk.f32.mxu1 %vm293_vm0, %v254_v63  ;;  %v438_v62 = vadd.s32 48, %v1059_v43  ;;  %v439_v63 = vadd.s32 56, %v1059_v43 }
  0x42   : > { %395 = vmatmul.mubr.f32.gmra.mrb[4].mxu0 %v245_v0  ;;  %419 = vmatmul.mubr.f32.gmra.mrb[4].mxu1 %v253_v1  ;;  %v1075_v1 = vrot.slane %v578_v56, %v583_v50 }
  0x43   : > { %770 = vmatprep.mubr.msk.f32.mxu0 %vm293_vm0, %v248_v2  ;;  %774 = vmatprep.mubr.msk.f32.mxu1 %vm293_vm0, %v256_v3  ;;  %v1081_v3 = vrot.slane %v578_v56, %v587_v52 }
  0x46   : > { %401 = vmatmul.mubr.f32.gmra.mrb[6].mxu0 %v247_v4  ;;  %425 = vmatmul.mubr.f32.gmra.mrb[6].mxu1 %v255_v5  ;;  %v1084_v4 = vsub.s32 %v600_v53, %v1059_v43 }
 0x10d   : > { %v1020_v10 = vpop.f32.mrb[0].mxu0  ;;  %v1022_v11 = vpop.f32.mrb[0].mxu1 }
 0x10e   : > { %v1024_v12 = vpop.f32.mrb[1].mxu0  ;;  %v1026_v13 = vpop.f32.mrb[1].mxu1 }
 0x111   : > { %v1028_v14 = vpop.f32.mrb[2].mxu0  ;;  %v1030_v15 = vpop.f32.mrb[2].mxu1 }
 0x112   : > { %v1032_v16 = vpop.f32.mrb[3].mxu0  ;;  %v1034_v17 = vpop.f32.mrb[3].mxu1 }
 0x115   : > { %v396_v18 = vpop.f32.mrb[4].mxu0  ;;  %v1036_v19 = vpop.f32.mrb[4].mxu1 }
 0x116   : > { %v474_v20 = vmax.f32 %v1020_v10, %v396_v18  ;;  %v1039_v21 = vpop.f32.mrb[5].mxu0  ;;  %v1041_v22 = vpop.f32.mrb[5].mxu1 }
 0x117   : > { %v487_v23 = vmax.f32 %v1024_v12, %v1039_v21 }
 0x118   : > { %v476_v24 = vmax.f32 %v474_v20, %v1022_v11 }
 0x119   : > { %v402_v25 = vpop.f32.mrb[6].mxu0  ;;  %v489_v26 = vmax.f32 %v487_v23, %v1026_v13  ;;  %v426_v27 = vpop.f32.mrb[6].mxu1 }
 0x11a   : > { %v478_v28 = vmax.f32 %v476_v24, %v1036_v19  ;;  %v475_v29 = vmax.f32 %v1028_v14, %v402_v25  ;;  %v1049_v30 = vpop.f32.mrb[7].mxu0  ;;  %v1051_v31 = vpop.f32.mrb[7].mxu1 }
 0x11b   : > { %v491_v32 = vmax.f32 %v489_v26, %v1041_v22  ;;  %v488_v33 = vmax.f32 %v1032_v16, %v1049_v30 }
 0x11c   : > { %v477_v34 = vmax.f32 %v475_v29, %v1030_v15 }
 0x11d   : > { %v490_v35 = vmax.f32 %v488_v33, %v1034_v17 }
 0x11e   : > { %v479_v36 = vmax.f32 %v477_v34, %v426_v27 }
 0x11f   : > { %v492_v37 = vmax.f32 %v490_v35, %v1051_v31 }
 0x120   : > { %v480_v38 = vmax.f32 %v478_v28, %v479_v36 }
 0x121   : > { %v493_v39 = vmax.f32 %v491_v32, %v492_v37 }
 0x122   : > { %v481_v40 = vrot.slane %v480_v38, 4 }
 0x123   : > { %v494_v41 = vrot.slane %v493_v39, 4 }
 0x124   : > { %v482_v42 = vmax.f32 %v480_v38, %v481_v40  ;;  %v579_v40 = vld [vmem:[%s1008_s30] sm:$0x3] }
 0x125   : > { %v495_v44 = vmax.f32 %v493_v39, %v494_v41 }
 0x126   : > { %v483_v47 = vrot.slane %v482_v42, 2 }
 0x127   : > { %v496_v48 = vrot.slane %v495_v44, 2 }
 0x128   : > { %v484_v49 = vmax.f32 %v482_v42, %v483_v47 }
 0x129   : > { %v497_v51 = vmax.f32 %v495_v44, %v496_v48  ;;  %v621_v48 = vrot.slane %v579_v40, %v583_v50  ;;  %v625_v50 = vrot.slane %v579_v40, %v587_v52 }
 0x12a   : > { %v485_v55 = vrot.slane %v484_v49, 1 }
 0x12b   : > { %v498_v60 = vrot.slane %v497_v51, 1 }
 0x12c   : > { %v1071_v0 = vmax.f32 %v484_v49, %v485_v55 }
 0x12d   : > { %v1077_v2 = vmax.f32 %v497_v51, %v498_v60 }
 0x12e   : > { %vm500_vm2 = vcmp.eq.f32.partialorder %v1020_v10, %v1071_v0  ;;  %vm502_vm3 = vcmp.eq.f32.partialorder %v1028_v14, %v1071_v0  ;;  %vm504_vm4 = vcmp.eq.f32.partialorder %v396_v18, %v1071_v0  ;;  %vm506_vm5 = vcmp.eq.f32.partialorder %v402_v25, %v1071_v0 }
 0x12f   : > { %vm508_vm6 = vcmp.eq.f32.partialorder %v1022_v11, %v1071_v0  ;;  %vm510_vm7 = vcmp.eq.f32.partialorder %v1030_v15, %v1071_v0  ;;  %vm512_vm8 = vcmp.eq.f32.partialorder %v1036_v19, %v1071_v0  ;;  %vm514_vm9 = vcmp.eq.f32.partialorder %v426_v27, %v1071_v0 }
 0x130   : > { %v516_v5 = vsel %vm500_vm2, %v1059_v43, 1073741824  ;;  %v518_v6 = vsel %vm502_vm3, %v433_v54, 1073741824  ;;  %v520_v8 = vsel %vm504_vm4, %v434_v57, 1073741824  ;;  %v522_v9 = vsel %vm506_vm5, %v435_v58, 1073741824 }
 0x131   : > { %v524_v10 = vsel %vm508_vm6, %v436_v59, 1073741824  ;;  %v526_v14 = vsel %vm510_vm7, %v437_v61, 1073741824  ;;  %v528_v18 = vsel %vm512_vm8, %v438_v62, 1073741824  ;;  %v530_v20 = vsel %vm514_vm9, %v439_v63, 1073741824 }
 0x132   : > { %vm532_vm10 = vcmp.lt.s32.totalorder %v516_v5, %v520_v8  ;;  %vm534_vm11 = vcmp.lt.s32.totalorder %v518_v6, %v522_v9  ;;  %vm591_vm12 = vcmp.gt.f32.partialorder %v1071_v0, %v1075_v1  ;;  %vm501_vm13 = vcmp.eq.f32.partialorder %v1024_v12, %v1077_v2 }
 0x133   : > { %v533_v11 = vsel %vm532_vm10, %v516_v5, %v520_v8  ;;  %v535_v15 = vsel %vm534_vm11, %v518_v6, %v522_v9  ;;  %v593_v19 = vsel %vm591_vm12, %v1071_v0, %v1075_v1  ;;  %vm503_vm14 = vcmp.eq.f32.partialorder %v1032_v16, %v1077_v2 }
 0x134   : > { %vm536_vm15 = vcmp.lt.s32.totalorder %v533_v11, %v524_v10  ;;  %vm538_vm0 = vcmp.lt.s32.totalorder %v535_v15, %v526_v14  ;;  %vm505_vm2 = vcmp.eq.f32.partialorder %v1039_v21, %v1077_v2  ;;  %vm507_vm3 = vcmp.eq.f32.partialorder %v1049_v30, %v1077_v2 }
 0x135   : > { %v537_v23 = vsel %vm536_vm15, %v533_v11, %v524_v10  ;;  %v539_v24 = vsel %vm538_vm0, %v535_v15, %v526_v14  ;;  %vm509_vm4 = vcmp.eq.f32.partialorder %v1026_v13, %v1077_v2  ;;  %vm511_vm5 = vcmp.eq.f32.partialorder %v1034_v17, %v1077_v2 }
 0x136   : > { %vm540_vm6 = vcmp.lt.s32.totalorder %v537_v23, %v528_v18  ;;  %vm542_vm7 = vcmp.lt.s32.totalorder %v539_v24, %v530_v20  ;;  %vm513_vm8 = vcmp.eq.f32.partialorder %v1041_v22, %v1077_v2  ;;  %vm515_vm9 = vcmp.eq.f32.partialorder %v1051_v31, %v1077_v2 }
 0x137   : > { %v541_v21 = vsel %vm540_vm6, %v537_v23, %v528_v18  ;;  %v543_v25 = vsel %vm542_vm7, %v539_v24, %v530_v20  ;;  %v517_v26 = vsel %vm501_vm13, %v1059_v43, 1073741824  ;;  %v519_v13 = vsel %vm503_vm14, %v433_v54, 1073741824 }
 0x138   : > { %vm544_vm10 = vcmp.lt.s32.totalorder %v541_v21, %v543_v25  ;;  %v521_v17 = vsel %vm505_vm2, %v434_v57, 1073741824  ;;  %v523_v27 = vsel %vm507_vm3, %v435_v58, 1073741824  ;;  %v525_v28 = vsel %vm509_vm4, %v436_v59, 1073741824 }
 0x139   : > { %v545_v29 = vsel %vm544_vm10, %v541_v21, %v543_v25  ;;  %v527_v22 = vsel %vm511_vm5, %v437_v61, 1073741824  ;;  %v529_v30 = vsel %vm513_vm8, %v438_v62, 1073741824  ;;  %v531_v32 = vsel %vm515_vm9, %v439_v63, 1073741824 }
 0x13a   : > { %v546_v31 = vrot.slane %v545_v29, 4  ;;  %vm555_vm11 = vcmp.lt.s32.totalorder %v517_v26, %v521_v17  ;;  %vm557_vm15 = vcmp.lt.s32.totalorder %v519_v13, %v523_v27  ;;  %vm592_vm0 = vcmp.gt.f32.partialorder %v1077_v2, %v1081_v3 }
 0x13b   : > { %v556_v12 = vsel %vm555_vm11, %v517_v26, %v521_v17  ;;  %v558_v33 = vsel %vm557_vm15, %v519_v13, %v523_v27  ;;  %v594_v16 = vsel %vm592_vm0, %v1077_v2, %v1081_v3 }
 0x13c   : > { %vm547_vm13 = vcmp.lt.s32.totalorder %v545_v29, %v546_v31  ;;  %vm559_vm14 = vcmp.lt.s32.totalorder %v556_v12, %v525_v28  ;;  %vm561_vm2 = vcmp.lt.s32.totalorder %v558_v33, %v527_v22  ;;  %v597_v34 = vcombine.low %v593_v19, %v594_v16 }
 0x13d   : > { %v548_v35 = vsel %vm547_vm13, %v545_v29, %v546_v31  ;;  %v560_v36 = vsel %vm559_vm14, %v556_v12, %v525_v28  ;;  %v562_v37 = vsel %vm561_vm2, %v558_v33, %v527_v22 }
 0x13e   : > { %v549_v38 = vrot.slane %v548_v35, 2  ;;  %vm563_vm3 = vcmp.lt.s32.totalorder %v560_v36, %v529_v30  ;;  %vm565_vm4 = vcmp.lt.s32.totalorder %v562_v37, %v531_v32  ;;  %v604_v39 = vrot.slane %v597_v34, %v1084_v4 }
 0x13f   : > { %v564_v41 = vsel %vm563_vm3, %v560_v36, %v529_v30  ;;  %v566_v42 = vsel %vm565_vm4, %v562_v37, %v531_v32 }
 0x140   : > { %vm550_vm5 = vcmp.lt.s32.totalorder %v548_v35, %v549_v38  ;;  %vm567_vm6 = vcmp.lt.s32.totalorder %v564_v41, %v566_v42  ;;  %v611_v44 = vrot.slane %v604_v39, %v1084_v4 }
 0x141   : > { %v551_v45 = vsel %vm550_vm5, %v548_v35, %v549_v38  ;;  %v568_v46 = vsel %vm567_vm6, %v564_v41, %v566_v42 }
 0x142   : > { %v552_v47 = vrot.slane %v551_v45, 1  ;;  %v569_v49 = vrot.slane %v568_v46, 4  ;;  %617 = vst.msk [vmem:[%s1003_s27] sm:$0x3] %vm1010_vm1, %v611_v44 }
 0x144   : > { %vm553_vm7 = vcmp.lt.s32.totalorder %v551_v45, %v552_v47  ;;  %vm570_vm8 = vcmp.lt.s32.totalorder %v568_v46, %v569_v49 }
 0x145   : > { %v554_v51 = vsel %vm553_vm7, %v551_v45, %v552_v47  ;;  %v571_v53 = vsel %vm570_vm8, %v568_v46, %v569_v49 }
 0x146   : > { %v626_v54 = vsel %vm591_vm12, %v554_v51, %v621_v48  ;;  %v572_v55 = vrot.slane %v571_v53, 2 }
 0x148   : > { %vm573_vm9 = vcmp.lt.s32.totalorder %v571_v53, %v572_v55 }
 0x149   : > { %v574_v56 = vsel %vm573_vm9, %v571_v53, %v572_v55 }
 0x14a   : > { %v575_v57 = vrot.slane %v574_v56, 1 }
 0x14c   : > { %vm576_vm10 = vcmp.lt.s32.totalorder %v574_v56, %v575_v57 }
 0x14d   : > { %v577_v58 = vsel %vm576_vm10, %v574_v56, %v575_v57 }
 0x14e   : > { %v627_v59 = vsel %vm592_vm0, %v577_v58, %v625_v50 }
 0x14f   : > { %v628_v60 = vcombine.low %v626_v54, %v627_v59 }
 0x151   : > { %v635_v61 = vrot.slane %v628_v60, %v1084_v4 }
 0x153   : > { %v642_v62 = vrot.slane %v635_v61, %v1084_v4 }
 0x155   : > { %643 = vst.msk [vmem:[%s1008_s30] sm:$0x3] %vm1010_vm1, %v642_v62 }
 0x156 PF: > { %s14_s14 = sadd.s32 1, %s882_s14   ;;  %s1173_s12 = smov %s878_s13 }
 0x157   : > { %p11_p5 = scmp.ge.s32.totalorder %s14_s14, 4   ;;  %s1174_s13 = smov %s1176_s15 }
 0x159   :  { %13 = sbr.rel (!%p11_p5) target bundleno = 2 (0x2), region = 77 }

</bundles_post_ra>
